<compile_context>
chip_gen: v7x
topology: tpu7x:2x2x1
jax: 0.10.0
libtpu: 0.0.40
codegen_flags: <defaults>
</compile_context>

<pallas_src>
import functools
import math

import jax
import jax.numpy as jnp
from jax import lax
from jax.experimental import pallas as pl
from jax.experimental.pallas import tpu as pltpu

# Tie-break epsilon added before the float->int truncation in the bucket formula.
# At exact power-of-two relative distances (n = 16, 32, 64, 128) the f32 expression lands
# exactly on an integer; the epsilon makes kernel (Mosaic log) and reference (XLA log)
# truncate identically without changing any non-boundary bucket (min gap ~0.016).
_BUCKET_EPS = 1e-4

# Planning budget for the double-buffered working set (2 in + 2 out blocks + bias scratch).
# Conservative enough for v7x's 64 MiB per-TC VMEM; v5e/v6e have more headroom.
_VMEM_PLAN_BUDGET = 40 * 1024 * 1024
_VMEM_LIMIT_BYTES = 48 * 1024 * 1024


def _relative_position_bucket_jnp(n, *, causal, num_buckets, max_distance):
    """Faithful jnp port of RelativePositionBias._relative_position_bucket (n = -rel_pos)."""
    if causal:
        nb = num_buckets
        ret = jnp.zeros_like(n)
        n = jnp.maximum(n, 0)
    else:
        nb = num_buckets // 2
        ret = (n < 0).astype(jnp.int32) * nb
        n = jnp.abs(n)
    max_exact = nb // 2
    is_small = n < max_exact
    # clamp log argument; the clamped positions are masked out by `is_small` below
    n_f = jnp.maximum(n, 1).astype(jnp.float32)
    val_f = (jnp.log(n_f / max_exact)
             / math.log(max_distance / max_exact)
             * (nb - max_exact))
    val_if_large = max_exact + (val_f + _BUCKET_EPS).astype(jnp.int32)  # trunc == torch .long()
    val_if_large = jnp.minimum(val_if_large, nb - 1)
    return ret + jnp.where(is_small, n, val_if_large)


def _relpos_bias_kernel(emb_ref, qk_ref, out_ref, bias_ref, *,
                        causal, num_buckets, max_distance):
    h = pl.program_id(0)    # head
    it = pl.program_id(1)   # query-row tile
    jt = pl.program_id(2)   # key-col tile
    b = pl.program_id(3)    # batch chunk (innermost, "arbitrary")

    tile_i, tile_j = bias_ref.shape

    # Bias tile only depends on (h, it, jt): build it once, at the first batch-chunk step,
    # and keep it resident in VMEM scratch for the rest of the batch loop.
    @pl.when(b == 0)
    def _build_bias_tile():
        shape = (tile_i, tile_j)
        q_pos = it * tile_i + lax.broadcasted_iota(jnp.int32, shape, 0)
        k_pos = jt * tile_j + lax.broadcasted_iota(jnp.int32, shape, 1)
        n = q_pos - k_pos                      # == -(rel_pos) == -(k - q)
        bucket = _relative_position_bucket_jnp(
            n, causal=causal, num_buckets=num_buckets, max_distance=max_distance)

        # Embedding lookup without a vector gather: 2-op (cmp + select) chain per bucket,
        # split into independent partial chains so all 4 VALU slots stay busy, then merged.
        # emb_ref is the transposed table (heads, num_buckets) in SMEM -> cheap scalar reads.
        n_chains = min(4, num_buckets)
        partials = []
        for c in range(n_chains):
            acc = jnp.zeros(shape, jnp.float32)
            for bk in range(c, num_buckets, n_chains):
                acc = jnp.where(bucket == bk, emb_ref[h, bk], acc)
            partials.append(acc)
        bias_ref[...] = functools.reduce(lambda a, c: a + c, partials)

    # Steady state: memory-bound, lane-dense broadcast add ((b_blk, ti, tj) + (ti, tj)).
    out_ref[...] = (qk_ref[...] + bias_ref[...]).astype(out_ref.dtype)


def _tile_candidates(dim, align):
    """Aligned divisors of `dim` (descending), always including the full extent."""
    cands = {dim}
    for t in range(align, dim, align):
        if dim % t == 0:
            cands.add(t)
    return sorted(cands, reverse=True)


def _plan_tiles(batch, i, j, itemsize, budget=_VMEM_PLAN_BUDGET):
    """Pick (b_blk, tile_i, tile_j): full-row tile_j preferred, batch folded, dtype-aware align."""
    align_i = {1: 32, 2: 16}.get(itemsize, 8)      # sublane packing per dtype width
    j_cands = _tile_candidates(j, 128)              # lane-dense or full extent, descending
    i_cands = _tile_candidates(i, align_i)
    b_cands = sorted({d for d in range(1, batch + 1) if batch % d == 0}, reverse=True)

    def fits(bb, ti, tj):
        io_block = bb * ti * tj * itemsize
        return 4 * io_block + 4 * ti * tj <= budget   # 2 in-bufs + 2 out-bufs + f32 bias scratch

    ti_min = i_cands[-1]
    tile_j = next((t for t in j_cands if fits(1, ti_min, t)), j_cands[-1])
    b_blk = next((bb for bb in b_cands if fits(bb, ti_min, tile_j)), 1)
    tile_i = next((t for t in i_cands if fits(b_blk, t, tile_j)), ti_min)
    return b_blk, tile_i, tile_j


def relative_position_bias(qk_dots, emb, *, causal=False, num_buckets=32,
                           max_distance=128, tile_i=None, tile_j=None,
                           batch_block=None, donate_qk_dots=False):
    """out = qk_dots + bias, bias[h,i,j] = emb[bucket(i,j), h].  qk_dots: (B, H, I, J)."""
    batch, heads, i, j = qk_dots.shape
    nb_tbl, heads_tbl = emb.shape
    assert nb_tbl == num_buckets and heads_tbl == heads

    auto_b, auto_i, auto_j = _plan_tiles(batch, i, j, qk_dots.dtype.itemsize)
    b_blk = batch_block if batch_block is not None else auto_b
    tile_i = tile_i if tile_i is not None else auto_i
    tile_j = tile_j if tile_j is not None else auto_j
    assert batch % b_blk == 0 and i % tile_i == 0 and j % tile_j == 0

    grid = (heads, i // tile_i, j // tile_j, batch // b_blk)

    # Transposed table (heads, num_buckets): smaller SMEM footprint, row-contiguous per head.
    emb_t = jnp.transpose(emb)

    kernel = functools.partial(
        _relpos_bias_kernel,
        causal=causal, num_buckets=num_buckets, max_distance=max_distance)

    flops = batch * heads * i * j + heads * i * j * (2 * num_buckets + 8)
    bytes_accessed = (2 * qk_dots.size * qk_dots.dtype.itemsize
                      + emb.size * emb.dtype.itemsize)

    return pl.pallas_call(
        kernel,
        out_shape=jax.ShapeDtypeStruct(qk_dots.shape, qk_dots.dtype),
        grid_spec=pltpu.PrefetchScalarGridSpec(
            num_scalar_prefetch=0,
            grid=grid,
            in_specs=[
                # tiny transposed embedding table, whole in SMEM (scalar reads in-kernel)
                pl.BlockSpec(memory_space=pltpu.MemorySpace.SMEM),
                # qk_dots: (b_blk, 1, tile_i, tile_j) blocks, head dim squeezed
                pl.BlockSpec((b_blk, None, tile_i, tile_j),
                             lambda h, it, jt, b: (b, h, it, jt)),
            ],
            out_specs=pl.BlockSpec((b_blk, None, tile_i, tile_j),
                                   lambda h, it, jt, b: (b, h, it, jt)),
            scratch_shapes=[pltpu.VMEM((tile_i, tile_j), jnp.float32)],
        ),
        compiler_params=pltpu.CompilerParams(
            dimension_semantics=("parallel", "parallel", "parallel", "arbitrary"),
            vmem_limit_bytes=_VMEM_LIMIT_BYTES,
        ),
        cost_estimate=pl.CostEstimate(
            flops=flops,
            transcendentals=heads * i * j,
            bytes_accessed=bytes_accessed,
        ),
        # Alias qk_dots (call arg index 1) to the output only when the caller donates it.
        input_output_aliases=({1: 0} if donate_qk_dots else {}),
    )(emb_t, qk_dots)


def relative_position_bias_reference(qk_dots, emb, *, causal=False,
                                     num_buckets=32, max_distance=128):
    """Pure-JAX reference mirroring the PyTorch module."""
    i, j = qk_dots.shape[-2:]
    q_pos = jnp.arange(i, dtype=jnp.int32)
    k_pos = jnp.arange(j, dtype=jnp.int32)
    rel_pos = k_pos[None, :] - q_pos[:, None]
    bucket = _relative_position_bucket_jnp(
        -rel_pos, causal=causal, num_buckets=num_buckets, max_distance=max_distance)
    values = emb[bucket]                              # (i, j, heads)  embedding gather
    bias = jnp.transpose(values, (2, 0, 1))[None]     # 'i j h -> () h i j'
    return qk_dots + bias


if __name__ == "__main__":
    # Small but layout-friendly shapes: (batch, heads, q_len, k_len) attention logits.
    batch, heads = 2, 8
    seq_q, seq_k = 256, 256
    num_buckets, max_distance = 32, 128

    key = jax.random.PRNGKey(0)
    k_qk, k_emb = jax.random.split(key)
    qk_dots = jax.random.normal(k_qk, (batch, heads, seq_q, seq_k), dtype=jnp.float32)
    emb = jax.random.normal(k_emb, (num_buckets, heads), dtype=jnp.float32) * 0.02

    # 1) Auto-planned tiles: batch fully folded, full-row tile_j, grid = (heads, 1, 1, 1).
    ref = relative_position_bias_reference(
        qk_dots, emb, causal=False, num_buckets=num_buckets, max_distance=max_distance)
    out = relative_position_bias(
        qk_dots, emb, causal=False, num_buckets=num_buckets, max_distance=max_distance)
    out = jax.block_until_ready(out)
    assert out.shape == qk_dots.shape
    assert jnp.allclose(out, ref, atol=1e-5, rtol=1e-5), "mismatch vs reference (auto tiles)"

    # 2) Explicit small tiles + batch chunking: exercises the multi-step grid and the
    #    pl.when(b == 0) bias-tile reuse path.
    out2 = relative_position_bias(
        qk_dots, emb, causal=False, num_buckets=num_buckets, max_distance=max_distance,
        tile_i=128, tile_j=128, batch_block=1)
    out2 = jax.block_until_ready(out2)
    assert jnp.allclose(out2, ref, atol=1e-5, rtol=1e-5), "mismatch vs reference (tiled)"

    # 3) Causal variant.
    ref_c = relative_position_bias_reference(
        qk_dots, emb, causal=True, num_buckets=num_buckets, max_distance=max_distance)
    out_c = relative_position_bias(
        qk_dots, emb, causal=True, num_buckets=num_buckets, max_distance=max_distance)
    out_c = jax.block_until_ready(out_c)
    assert jnp.allclose(out_c, ref_c, atol=1e-5, rtol=1e-5), "mismatch vs reference (causal)"

    print("KERNEL_OK")
</pallas_src>

<mosaic_0001>
module attributes {stable_mosaic.version = 11 : i64} {
  func.func @_relpos_bias_kernel(%arg0: i32, %arg1: i32, %arg2: i32, %arg3: i32, %arg4: memref<8x32xf32, #tpu.memory_space<smem>>, %arg5: memref<2x1x256x256xf32, #tpu.memory_space<vmem>>, %arg6: memref<2x1x256x256xf32, #tpu.memory_space<vmem>>, %arg7: memref<256x256xf32, #tpu.memory_space<vmem>>) attributes {dimension_semantics = [#tpu.dimension_semantics<parallel>, #tpu.dimension_semantics<parallel>, #tpu.dimension_semantics<parallel>, #tpu.dimension_semantics<arbitrary>], iteration_bounds = array<i64: 8, 1, 1, 1>, scalar_prefetch = 0 : i64, scratch_operands = 1 : i64, tpu.core_type = #tpu.core_type<tc>, window_params = [{transform_indices = @transform_0, window_bounds = array<i64: 8, 32>}, {transform_indices = @transform_1, window_bounds = array<i64: 2, 1, 256, 256>}, {transform_indices = @transform_2, window_bounds = array<i64: 2, 1, 256, 256>}]} {
    %c0_i32 = arith.constant 0 : i32
    %0 = arith.cmpi eq, %arg3, %c0_i32 : i32
    %1 = arith.extui %0 : i1 to i32
    %c0_i32_0 = arith.constant 0 : i32
    %2 = arith.cmpi ne, %1, %c0_i32_0 : i32
    scf.if %2 {
      %c256_i32 = arith.constant 256 : i32
      %12 = arith.muli %arg1, %c256_i32 : i32
      %13 = tpu.iota {dimensions = array<i32: 0>} : vector<256x256xi32>
      %14 = vector.broadcast %12 : i32 to vector<256x256xi32>
      %15 = arith.addi %14, %13 : vector<256x256xi32>
      %c256_i32_10 = arith.constant 256 : i32
      %16 = arith.muli %arg2, %c256_i32_10 : i32
      %17 = tpu.iota {dimensions = array<i32: 1>} : vector<256x256xi32>
      %18 = vector.broadcast %16 : i32 to vector<256x256xi32>
      %19 = arith.addi %18, %17 : vector<256x256xi32>
      %20 = arith.subi %15, %19 : vector<256x256xi32>
      %c0_i32_11 = arith.constant 0 : i32
      %21 = vector.broadcast %c0_i32_11 : i32 to vector<256x256xi32>
      %22 = arith.cmpi slt, %20, %21 : vector<256x256xi32>
      %23 = arith.extui %22 : vector<256x256xi1> to vector<256x256xi32>
      %c16_i32 = arith.constant 16 : i32
      %24 = vector.broadcast %c16_i32 : i32 to vector<256x256xi32>
      %25 = arith.muli %23, %24 : vector<256x256xi32>
      %26 = math.absi %20 : vector<256x256xi32>
      %c8_i32 = arith.constant 8 : i32
      %27 = vector.broadcast %c8_i32 : i32 to vector<256x256xi32>
      %28 = arith.cmpi slt, %26, %27 : vector<256x256xi32>
      %c1_i32 = arith.constant 1 : i32
      %29 = vector.broadcast %c1_i32 : i32 to vector<256x256xi32>
      %30 = arith.maxsi %26, %29 : vector<256x256xi32>
      %31 = arith.sitofp %30 : vector<256x256xi32> to vector<256x256xf32>
      %cst = arith.constant 8.000000e+00 : f32
      %32 = vector.broadcast %cst : f32 to vector<256x256xf32>
      %33 = arith.divf %31, %32 : vector<256x256xf32>
      %34 = math.log %33 : vector<256x256xf32>
      %cst_12 = arith.constant 2.77258873 : f32
      %35 = vector.broadcast %cst_12 : f32 to vector<256x256xf32>
      %36 = arith.divf %34, %35 : vector<256x256xf32>
      %cst_13 = arith.constant 8.000000e+00 : f32
      %37 = vector.broadcast %cst_13 : f32 to vector<256x256xf32>
      %38 = arith.mulf %36, %37 : vector<256x256xf32>
      %cst_14 = arith.constant 9.99999974E-5 : f32
      %39 = vector.broadcast %cst_14 : f32 to vector<256x256xf32>
      %40 = arith.addf %38, %39 : vector<256x256xf32>
      %41 = arith.fptosi %40 : vector<256x256xf32> to vector<256x256xi32>
      %c8_i32_15 = arith.constant 8 : i32
      %42 = vector.broadcast %c8_i32_15 : i32 to vector<256x256xi32>
      %43 = arith.addi %42, %41 : vector<256x256xi32>
      %c15_i32 = arith.constant 15 : i32
      %44 = vector.broadcast %c15_i32 : i32 to vector<256x256xi32>
      %45 = arith.minsi %43, %44 : vector<256x256xi32>
      %46 = arith.select %28, %26, %45 : vector<256x256xi1>, vector<256x256xi32>
      %47 = arith.addi %25, %46 : vector<256x256xi32>
      %cst_16 = arith.constant 0.000000e+00 : f32
      %48 = vector.broadcast %cst_16 : f32 to vector<256x256xf32>
      %c0_i32_17 = arith.constant 0 : i32
      %49 = vector.broadcast %c0_i32_17 : i32 to vector<256x256xi32>
      %50 = arith.cmpi eq, %47, %49 : vector<256x256xi32>
      %51 = arith.index_cast %arg0 : i32 to index
      %c0_18 = arith.constant 0 : index
      %52 = memref.load %arg4[%51, %c0_18] : memref<8x32xf32, #tpu.memory_space<smem>>
      %53 = vector.broadcast %52 : f32 to vector<256x256xf32>
      %54 = arith.select %50, %53, %48 : vector<256x256xi1>, vector<256x256xf32>
      %c4_i32 = arith.constant 4 : i32
      %55 = vector.broadcast %c4_i32 : i32 to vector<256x256xi32>
      %56 = arith.cmpi eq, %47, %55 : vector<256x256xi32>
      %57 = arith.index_cast %arg0 : i32 to index
      %c4 = arith.constant 4 : index
      %58 = memref.load %arg4[%57, %c4] : memref<8x32xf32, #tpu.memory_space<smem>>
      %59 = vector.broadcast %58 : f32 to vector<256x256xf32>
      %60 = arith.select %56, %59, %54 : vector<256x256xi1>, vector<256x256xf32>
      %c8_i32_19 = arith.constant 8 : i32
      %61 = vector.broadcast %c8_i32_19 : i32 to vector<256x256xi32>
      %62 = arith.cmpi eq, %47, %61 : vector<256x256xi32>
      %63 = arith.index_cast %arg0 : i32 to index
      %c8 = arith.constant 8 : index
      %64 = memref.load %arg4[%63, %c8] : memref<8x32xf32, #tpu.memory_space<smem>>
      %65 = vector.broadcast %64 : f32 to vector<256x256xf32>
      %66 = arith.select %62, %65, %60 : vector<256x256xi1>, vector<256x256xf32>
      %c12_i32 = arith.constant 12 : i32
      %67 = vector.broadcast %c12_i32 : i32 to vector<256x256xi32>
      %68 = arith.cmpi eq, %47, %67 : vector<256x256xi32>
      %69 = arith.index_cast %arg0 : i32 to index
      %c12 = arith.constant 12 : index
      %70 = memref.load %arg4[%69, %c12] : memref<8x32xf32, #tpu.memory_space<smem>>
      %71 = vector.broadcast %70 : f32 to vector<256x256xf32>
      %72 = arith.select %68, %71, %66 : vector<256x256xi1>, vector<256x256xf32>
      %c16_i32_20 = arith.constant 16 : i32
      %73 = vector.broadcast %c16_i32_20 : i32 to vector<256x256xi32>
      %74 = arith.cmpi eq, %47, %73 : vector<256x256xi32>
      %75 = arith.index_cast %arg0 : i32 to index
      %c16 = arith.constant 16 : index
      %76 = memref.load %arg4[%75, %c16] : memref<8x32xf32, #tpu.memory_space<smem>>
      %77 = vector.broadcast %76 : f32 to vector<256x256xf32>
      %78 = arith.select %74, %77, %72 : vector<256x256xi1>, vector<256x256xf32>
      %c20_i32 = arith.constant 20 : i32
      %79 = vector.broadcast %c20_i32 : i32 to vector<256x256xi32>
      %80 = arith.cmpi eq, %47, %79 : vector<256x256xi32>
      %81 = arith.index_cast %arg0 : i32 to index
      %c20 = arith.constant 20 : index
      %82 = memref.load %arg4[%81, %c20] : memref<8x32xf32, #tpu.memory_space<smem>>
      %83 = vector.broadcast %82 : f32 to vector<256x256xf32>
      %84 = arith.select %80, %83, %78 : vector<256x256xi1>, vector<256x256xf32>
      %c24_i32 = arith.constant 24 : i32
      %85 = vector.broadcast %c24_i32 : i32 to vector<256x256xi32>
      %86 = arith.cmpi eq, %47, %85 : vector<256x256xi32>
      %87 = arith.index_cast %arg0 : i32 to index
      %c24 = arith.constant 24 : index
      %88 = memref.load %arg4[%87, %c24] : memref<8x32xf32, #tpu.memory_space<smem>>
      %89 = vector.broadcast %88 : f32 to vector<256x256xf32>
      %90 = arith.select %86, %89, %84 : vector<256x256xi1>, vector<256x256xf32>
      %c28_i32 = arith.constant 28 : i32
      %91 = vector.broadcast %c28_i32 : i32 to vector<256x256xi32>
      %92 = arith.cmpi eq, %47, %91 : vector<256x256xi32>
      %93 = arith.index_cast %arg0 : i32 to index
      %c28 = arith.constant 28 : index
      %94 = memref.load %arg4[%93, %c28] : memref<8x32xf32, #tpu.memory_space<smem>>
      %95 = vector.broadcast %94 : f32 to vector<256x256xf32>
      %96 = arith.select %92, %95, %90 : vector<256x256xi1>, vector<256x256xf32>
      %cst_21 = arith.constant 0.000000e+00 : f32
      %97 = vector.broadcast %cst_21 : f32 to vector<256x256xf32>
      %c1_i32_22 = arith.constant 1 : i32
      %98 = vector.broadcast %c1_i32_22 : i32 to vector<256x256xi32>
      %99 = arith.cmpi eq, %47, %98 : vector<256x256xi32>
      %100 = arith.index_cast %arg0 : i32 to index
      %c1 = arith.constant 1 : index
      %101 = memref.load %arg4[%100, %c1] : memref<8x32xf32, #tpu.memory_space<smem>>
      %102 = vector.broadcast %101 : f32 to vector<256x256xf32>
      %103 = arith.select %99, %102, %97 : vector<256x256xi1>, vector<256x256xf32>
      %c5_i32 = arith.constant 5 : i32
      %104 = vector.broadcast %c5_i32 : i32 to vector<256x256xi32>
      %105 = arith.cmpi eq, %47, %104 : vector<256x256xi32>
      %106 = arith.index_cast %arg0 : i32 to index
      %c5 = arith.constant 5 : index
      %107 = memref.load %arg4[%106, %c5] : memref<8x32xf32, #tpu.memory_space<smem>>
      %108 = vector.broadcast %107 : f32 to vector<256x256xf32>
      %109 = arith.select %105, %108, %103 : vector<256x256xi1>, vector<256x256xf32>
      %c9_i32 = arith.constant 9 : i32
      %110 = vector.broadcast %c9_i32 : i32 to vector<256x256xi32>
      %111 = arith.cmpi eq, %47, %110 : vector<256x256xi32>
      %112 = arith.index_cast %arg0 : i32 to index
      %c9 = arith.constant 9 : index
      %113 = memref.load %arg4[%112, %c9] : memref<8x32xf32, #tpu.memory_space<smem>>
      %114 = vector.broadcast %113 : f32 to vector<256x256xf32>
      %115 = arith.select %111, %114, %109 : vector<256x256xi1>, vector<256x256xf32>
      %c13_i32 = arith.constant 13 : i32
      %116 = vector.broadcast %c13_i32 : i32 to vector<256x256xi32>
      %117 = arith.cmpi eq, %47, %116 : vector<256x256xi32>
      %118 = arith.index_cast %arg0 : i32 to index
      %c13 = arith.constant 13 : index
      %119 = memref.load %arg4[%118, %c13] : memref<8x32xf32, #tpu.memory_space<smem>>
      %120 = vector.broadcast %119 : f32 to vector<256x256xf32>
      %121 = arith.select %117, %120, %115 : vector<256x256xi1>, vector<256x256xf32>
      %c17_i32 = arith.constant 17 : i32
      %122 = vector.broadcast %c17_i32 : i32 to vector<256x256xi32>
      %123 = arith.cmpi eq, %47, %122 : vector<256x256xi32>
      %124 = arith.index_cast %arg0 : i32 to index
      %c17 = arith.constant 17 : index
      %125 = memref.load %arg4[%124, %c17] : memref<8x32xf32, #tpu.memory_space<smem>>
      %126 = vector.broadcast %125 : f32 to vector<256x256xf32>
      %127 = arith.select %123, %126, %121 : vector<256x256xi1>, vector<256x256xf32>
      %c21_i32 = arith.constant 21 : i32
      %128 = vector.broadcast %c21_i32 : i32 to vector<256x256xi32>
      %129 = arith.cmpi eq, %47, %128 : vector<256x256xi32>
      %130 = arith.index_cast %arg0 : i32 to index
      %c21 = arith.constant 21 : index
      %131 = memref.load %arg4[%130, %c21] : memref<8x32xf32, #tpu.memory_space<smem>>
      %132 = vector.broadcast %131 : f32 to vector<256x256xf32>
      %133 = arith.select %129, %132, %127 : vector<256x256xi1>, vector<256x256xf32>
      %c25_i32 = arith.constant 25 : i32
      %134 = vector.broadcast %c25_i32 : i32 to vector<256x256xi32>
      %135 = arith.cmpi eq, %47, %134 : vector<256x256xi32>
      %136 = arith.index_cast %arg0 : i32 to index
      %c25 = arith.constant 25 : index
      %137 = memref.load %arg4[%136, %c25] : memref<8x32xf32, #tpu.memory_space<smem>>
      %138 = vector.broadcast %137 : f32 to vector<256x256xf32>
      %139 = arith.select %135, %138, %133 : vector<256x256xi1>, vector<256x256xf32>
      %c29_i32 = arith.constant 29 : i32
      %140 = vector.broadcast %c29_i32 : i32 to vector<256x256xi32>
      %141 = arith.cmpi eq, %47, %140 : vector<256x256xi32>
      %142 = arith.index_cast %arg0 : i32 to index
      %c29 = arith.constant 29 : index
      %143 = memref.load %arg4[%142, %c29] : memref<8x32xf32, #tpu.memory_space<smem>>
      %144 = vector.broadcast %143 : f32 to vector<256x256xf32>
      %145 = arith.select %141, %144, %139 : vector<256x256xi1>, vector<256x256xf32>
      %cst_23 = arith.constant 0.000000e+00 : f32
      %146 = vector.broadcast %cst_23 : f32 to vector<256x256xf32>
      %c2_i32 = arith.constant 2 : i32
      %147 = vector.broadcast %c2_i32 : i32 to vector<256x256xi32>
      %148 = arith.cmpi eq, %47, %147 : vector<256x256xi32>
      %149 = arith.index_cast %arg0 : i32 to index
      %c2 = arith.constant 2 : index
      %150 = memref.load %arg4[%149, %c2] : memref<8x32xf32, #tpu.memory_space<smem>>
      %151 = vector.broadcast %150 : f32 to vector<256x256xf32>
      %152 = arith.select %148, %151, %146 : vector<256x256xi1>, vector<256x256xf32>
      %c6_i32 = arith.constant 6 : i32
      %153 = vector.broadcast %c6_i32 : i32 to vector<256x256xi32>
      %154 = arith.cmpi eq, %47, %153 : vector<256x256xi32>
      %155 = arith.index_cast %arg0 : i32 to index
      %c6 = arith.constant 6 : index
      %156 = memref.load %arg4[%155, %c6] : memref<8x32xf32, #tpu.memory_space<smem>>
      %157 = vector.broadcast %156 : f32 to vector<256x256xf32>
      %158 = arith.select %154, %157, %152 : vector<256x256xi1>, vector<256x256xf32>
      %c10_i32 = arith.constant 10 : i32
      %159 = vector.broadcast %c10_i32 : i32 to vector<256x256xi32>
      %160 = arith.cmpi eq, %47, %159 : vector<256x256xi32>
      %161 = arith.index_cast %arg0 : i32 to index
      %c10 = arith.constant 10 : index
      %162 = memref.load %arg4[%161, %c10] : memref<8x32xf32, #tpu.memory_space<smem>>
      %163 = vector.broadcast %162 : f32 to vector<256x256xf32>
      %164 = arith.select %160, %163, %158 : vector<256x256xi1>, vector<256x256xf32>
      %c14_i32 = arith.constant 14 : i32
      %165 = vector.broadcast %c14_i32 : i32 to vector<256x256xi32>
      %166 = arith.cmpi eq, %47, %165 : vector<256x256xi32>
      %167 = arith.index_cast %arg0 : i32 to index
      %c14 = arith.constant 14 : index
      %168 = memref.load %arg4[%167, %c14] : memref<8x32xf32, #tpu.memory_space<smem>>
      %169 = vector.broadcast %168 : f32 to vector<256x256xf32>
      %170 = arith.select %166, %169, %164 : vector<256x256xi1>, vector<256x256xf32>
      %c18_i32 = arith.constant 18 : i32
      %171 = vector.broadcast %c18_i32 : i32 to vector<256x256xi32>
      %172 = arith.cmpi eq, %47, %171 : vector<256x256xi32>
      %173 = arith.index_cast %arg0 : i32 to index
      %c18 = arith.constant 18 : index
      %174 = memref.load %arg4[%173, %c18] : memref<8x32xf32, #tpu.memory_space<smem>>
      %175 = vector.broadcast %174 : f32 to vector<256x256xf32>
      %176 = arith.select %172, %175, %170 : vector<256x256xi1>, vector<256x256xf32>
      %c22_i32 = arith.constant 22 : i32
      %177 = vector.broadcast %c22_i32 : i32 to vector<256x256xi32>
      %178 = arith.cmpi eq, %47, %177 : vector<256x256xi32>
      %179 = arith.index_cast %arg0 : i32 to index
      %c22 = arith.constant 22 : index
      %180 = memref.load %arg4[%179, %c22] : memref<8x32xf32, #tpu.memory_space<smem>>
      %181 = vector.broadcast %180 : f32 to vector<256x256xf32>
      %182 = arith.select %178, %181, %176 : vector<256x256xi1>, vector<256x256xf32>
      %c26_i32 = arith.constant 26 : i32
      %183 = vector.broadcast %c26_i32 : i32 to vector<256x256xi32>
      %184 = arith.cmpi eq, %47, %183 : vector<256x256xi32>
      %185 = arith.index_cast %arg0 : i32 to index
      %c26 = arith.constant 26 : index
      %186 = memref.load %arg4[%185, %c26] : memref<8x32xf32, #tpu.memory_space<smem>>
      %187 = vector.broadcast %186 : f32 to vector<256x256xf32>
      %188 = arith.select %184, %187, %182 : vector<256x256xi1>, vector<256x256xf32>
      %c30_i32 = arith.constant 30 : i32
      %189 = vector.broadcast %c30_i32 : i32 to vector<256x256xi32>
      %190 = arith.cmpi eq, %47, %189 : vector<256x256xi32>
      %191 = arith.index_cast %arg0 : i32 to index
      %c30 = arith.constant 30 : index
      %192 = memref.load %arg4[%191, %c30] : memref<8x32xf32, #tpu.memory_space<smem>>
      %193 = vector.broadcast %192 : f32 to vector<256x256xf32>
      %194 = arith.select %190, %193, %188 : vector<256x256xi1>, vector<256x256xf32>
      %cst_24 = arith.constant 0.000000e+00 : f32
      %195 = vector.broadcast %cst_24 : f32 to vector<256x256xf32>
      %c3_i32 = arith.constant 3 : i32
      %196 = vector.broadcast %c3_i32 : i32 to vector<256x256xi32>
      %197 = arith.cmpi eq, %47, %196 : vector<256x256xi32>
      %198 = arith.index_cast %arg0 : i32 to index
      %c3 = arith.constant 3 : index
      %199 = memref.load %arg4[%198, %c3] : memref<8x32xf32, #tpu.memory_space<smem>>
      %200 = vector.broadcast %199 : f32 to vector<256x256xf32>
      %201 = arith.select %197, %200, %195 : vector<256x256xi1>, vector<256x256xf32>
      %c7_i32 = arith.constant 7 : i32
      %202 = vector.broadcast %c7_i32 : i32 to vector<256x256xi32>
      %203 = arith.cmpi eq, %47, %202 : vector<256x256xi32>
      %204 = arith.index_cast %arg0 : i32 to index
      %c7 = arith.constant 7 : index
      %205 = memref.load %arg4[%204, %c7] : memref<8x32xf32, #tpu.memory_space<smem>>
      %206 = vector.broadcast %205 : f32 to vector<256x256xf32>
      %207 = arith.select %203, %206, %201 : vector<256x256xi1>, vector<256x256xf32>
      %c11_i32 = arith.constant 11 : i32
      %208 = vector.broadcast %c11_i32 : i32 to vector<256x256xi32>
      %209 = arith.cmpi eq, %47, %208 : vector<256x256xi32>
      %210 = arith.index_cast %arg0 : i32 to index
      %c11 = arith.constant 11 : index
      %211 = memref.load %arg4[%210, %c11] : memref<8x32xf32, #tpu.memory_space<smem>>
      %212 = vector.broadcast %211 : f32 to vector<256x256xf32>
      %213 = arith.select %209, %212, %207 : vector<256x256xi1>, vector<256x256xf32>
      %c15_i32_25 = arith.constant 15 : i32
      %214 = vector.broadcast %c15_i32_25 : i32 to vector<256x256xi32>
      %215 = arith.cmpi eq, %47, %214 : vector<256x256xi32>
      %216 = arith.index_cast %arg0 : i32 to index
      %c15 = arith.constant 15 : index
      %217 = memref.load %arg4[%216, %c15] : memref<8x32xf32, #tpu.memory_space<smem>>
      %218 = vector.broadcast %217 : f32 to vector<256x256xf32>
      %219 = arith.select %215, %218, %213 : vector<256x256xi1>, vector<256x256xf32>
      %c19_i32 = arith.constant 19 : i32
      %220 = vector.broadcast %c19_i32 : i32 to vector<256x256xi32>
      %221 = arith.cmpi eq, %47, %220 : vector<256x256xi32>
      %222 = arith.index_cast %arg0 : i32 to index
      %c19 = arith.constant 19 : index
      %223 = memref.load %arg4[%222, %c19] : memref<8x32xf32, #tpu.memory_space<smem>>
      %224 = vector.broadcast %223 : f32 to vector<256x256xf32>
      %225 = arith.select %221, %224, %219 : vector<256x256xi1>, vector<256x256xf32>
      %c23_i32 = arith.constant 23 : i32
      %226 = vector.broadcast %c23_i32 : i32 to vector<256x256xi32>
      %227 = arith.cmpi eq, %47, %226 : vector<256x256xi32>
      %228 = arith.index_cast %arg0 : i32 to index
      %c23 = arith.constant 23 : index
      %229 = memref.load %arg4[%228, %c23] : memref<8x32xf32, #tpu.memory_space<smem>>
      %230 = vector.broadcast %229 : f32 to vector<256x256xf32>
      %231 = arith.select %227, %230, %225 : vector<256x256xi1>, vector<256x256xf32>
      %c27_i32 = arith.constant 27 : i32
      %232 = vector.broadcast %c27_i32 : i32 to vector<256x256xi32>
      %233 = arith.cmpi eq, %47, %232 : vector<256x256xi32>
      %234 = arith.index_cast %arg0 : i32 to index
      %c27 = arith.constant 27 : index
      %235 = memref.load %arg4[%234, %c27] : memref<8x32xf32, #tpu.memory_space<smem>>
      %236 = vector.broadcast %235 : f32 to vector<256x256xf32>
      %237 = arith.select %233, %236, %231 : vector<256x256xi1>, vector<256x256xf32>
      %c31_i32 = arith.constant 31 : i32
      %238 = vector.broadcast %c31_i32 : i32 to vector<256x256xi32>
      %239 = arith.cmpi eq, %47, %238 : vector<256x256xi32>
      %240 = arith.index_cast %arg0 : i32 to index
      %c31 = arith.constant 31 : index
      %241 = memref.load %arg4[%240, %c31] : memref<8x32xf32, #tpu.memory_space<smem>>
      %242 = vector.broadcast %241 : f32 to vector<256x256xf32>
      %243 = arith.select %239, %242, %237 : vector<256x256xi1>, vector<256x256xf32>
      %244 = arith.addf %96, %145 : vector<256x256xf32>
      %245 = arith.addf %244, %194 : vector<256x256xf32>
      %246 = arith.addf %245, %243 : vector<256x256xf32>
      %c0_26 = arith.constant 0 : index
      %c0_27 = arith.constant 0 : index
      %247 = vector.load %arg7[%c0_26, %c0_27] : memref<256x256xf32, #tpu.memory_space<vmem>>, vector<256x256xf32>
      tpu.vector_store %arg7[%c0_26, %c0_27], %246 {strides = array<i32>} : memref<256x256xf32, #tpu.memory_space<vmem>>, vector<256x256xf32>,
    } else {
    }
    %c0 = arith.constant 0 : index
    %c0_1 = arith.constant 0 : index
    %c0_2 = arith.constant 0 : index
    %c0_3 = arith.constant 0 : index
    %3 = vector.load %arg5[%c0, %c0_1, %c0_2, %c0_3] : memref<2x1x256x256xf32, #tpu.memory_space<vmem>>, vector<2x1x256x256xf32>
    %4 = vector.shape_cast %3 : vector<2x1x256x256xf32> to vector<2x256x256xf32>
    %c0_4 = arith.constant 0 : index
    %c0_5 = arith.constant 0 : index
    %5 = vector.load %arg7[%c0_4, %c0_5] : memref<256x256xf32, #tpu.memory_space<vmem>>, vector<256x256xf32>
    %6 = vector.shape_cast %5 : vector<256x256xf32> to vector<1x256x256xf32>
    %7 = vector.broadcast %6 : vector<1x256x256xf32> to vector<2x256x256xf32>
    %8 = arith.addf %4, %7 : vector<2x256x256xf32>
    %c0_6 = arith.constant 0 : index
    %c0_7 = arith.constant 0 : index
    %c0_8 = arith.constant 0 : index
    %c0_9 = arith.constant 0 : index
    %9 = vector.load %arg6[%c0_6, %c0_7, %c0_8, %c0_9] : memref<2x1x256x256xf32, #tpu.memory_space<vmem>>, vector<2x1x256x256xf32>
    %10 = vector.shape_cast %9 : vector<2x1x256x256xf32> to vector<2x256x256xf32>
    %11 = vector.shape_cast %8 : vector<2x256x256xf32> to vector<2x1x256x256xf32>
    tpu.vector_store %arg6[%c0_6, %c0_7, %c0_8, %c0_9], %11 {strides = array<i32>} : memref<2x1x256x256xf32, #tpu.memory_space<vmem>>, vector<2x1x256x256xf32>,
    return
  }
  func.func @transform_0(%arg0: i32, %arg1: i32, %arg2: i32, %arg3: i32) -> (i32, i32) {
    %c0_i32 = arith.constant 0 : i32
    %c0_i32_0 = arith.constant 0 : i32
    %c0_i32_1 = arith.constant 0 : i32
    return %c0_i32, %c0_i32_0 : i32, i32
  }
  func.func @transform_1(%arg0: i32, %arg1: i32, %arg2: i32, %arg3: i32) -> (i32, i32, i32, i32) {
    %c0_i32 = arith.constant 0 : i32
    return %arg3, %arg0, %arg1, %arg2 : i32, i32, i32, i32
  }
  func.func @transform_2(%arg0: i32, %arg1: i32, %arg2: i32, %arg3: i32) -> (i32, i32, i32, i32) {
    %c0_i32 = arith.constant 0 : i32
    return %arg3, %arg0, %arg1, %arg2 : i32, i32, i32, i32
  }
}

</mosaic_0001>

<bundles_post_ra>
// kernel: tpu_custom_call.1
= control target key start
LH: loop header
LB: loop body
LE: loop exit
PB: predicated region body
PF: predicated region fallthrough
CT: control target
= control target key end

     0   :  { %s14230_s0 = inlined_call_operand.hbm [shape: f32[8,32], index: 0, kind: input, shape index: {}]   ;;  %s14231_s1 = inlined_call_operand.hbm [shape: f32[2,8,256,256], index: 1, kind: input, shape index: {}]   ;;  %s14232_s2 = inlined_call_operand.hbm [shape: f32[2,8,256,256], index: 2, kind: output, shape index: {}]  }
   0x1   :  { %14305 = sst [smem:[#allocation81_spill]] %s14230_s0 }
   0x2   :  { %14306 = sst [smem:[#allocation82_spill]] %s14231_s1 }
   0x3   :  { %7 = vsyncpa [#allocation6], 0 }
   0x4   :  { %8 = vsyncpa [#allocation4], 0 }
   0x5   :  { %10 = vsyncpa [#allocation4 + $0x1], 0 }
   0x6   :  { %11 = vsyncpa [#allocation5], 0 }
   0x7   :  { %13 = vsyncpa [#allocation5 + $0x1], 0  ;;  %s7307_s9 = smov 0   ;;  %s7309_s10 = smov 0  }
   0x8   :  { %s7311_s11 = smov 0   ;;  %s7313_s12 = smov 0  }
   0x9   :  { %s7315_s13 = smov 0   ;;  %s7317_s14 = smov 0  }
   0xa LB: > { %14307 = sst [smem:[#allocation17_spill]] %s7259_s10  ;;  %s6799_s15 = sadd.s32 4294967295, %s7275_s14   ;;  %s7275_s14 = sphi %s7317_s14, %s19_s14   ;;  %s7271_s13 = sphi %s7315_s13, %s14474_s13   ;;  %s7267_s12 = sphi %s7313_s12, %s14473_s12   ;;  %s7263_s11 = sphi %s7311_s11, %s14472_s11   ;;  %s7259_s10 = sphi %s7309_s10, %s14471_s10   ;;  %s7255_s9 = sphi %s7307_s9, %s14470_s9  }
   0xb   : > { %14308 = sst [smem:[#allocation18_spill]] %s7263_s11  ;;  %s6800_s16 = sadd.s32 4294967294, %s7275_s14  }
   0xc   : > { %14309 = sst [smem:[#allocation19_spill]] %s7271_s13  ;;  %s45_s17 = sadd.s32 1, %s7271_s13 }
   0xd   : > { %s79_s18 = sadd.s32 1, %s7263_s11  ;;  %p47_p0 = scmp.ge.s32.totalorder %s45_s17, 8 }
   0xe   : > { %p86_p1 = scmp.ne.s32.totalorder %s7263_s11, %s7259_s10  ;;  %p87_p2 = scmp.eq.s32.totalorder %s7275_s14, 0 }
   0xf   : > { %p92_p3 = scmp.ne.s32.totalorder %s7259_s10, %s7255_s9  ;;  %s14476_s17 = smov (%p47_p0, %s45_s17), 0 }
  0x10   : > { %14310 = sst [smem:[#allocation20_spill]] %s14476_s17  ;;  %p7348_p4 = por %p87_p2, %p86_p1 }
  0x11   : > { %p7352_p5 = scmp.eq.s32.totalorder %s6799_s15, 0  ;;  %s71_s21 = ssub.s32 %s7271_s13, %s14476_s17 }
  0x12   : > { %p122_p6 = scmp.eq.s32.totalorder %s6799_s15, 7  ;;  %p77_p7 = scmp.eq.s32.totalorder %s71_s21, 0 }
  0x13   : > { %p7360_p8 = por %p7352_p5, %p92_p3  ;;  %p128_p10 = scmp.eq.s32.totalorder %s6800_s16, 7 }
  0x14   : > { %p7364_p9 = por %p122_p6, %p86_p1  ;;  %p6801_p12 = scmp.ge.s32.totalorder %s7275_s14, 1 }
  0x15   : > { %s7369_s24 = scalar_select %p77_p7, %s7263_s11, %s79_s18  }
  0x16   : > { %p7371_p11 = por %p128_p10, %p92_p3  ;;  %p135_p13 = scmp.lt.s32.totalorder %s7275_s14, 9 }
  0x17   : > { %14315 = sst [smem:[#allocation21_spill]] %s7369_s24  ;;  %s14318_s0 = sld [smem:[#allocation81_spill]] }
  0x18   : > { %p7377_p0 = pnand %p6801_p12, %p135_p13 }
  0x1a   : > { %p7002_p2 = pneg %p7377_p0 }
  0x1c   : > { %p7003_p1 = pnand %p7002_p2, %p7352_p5 }
  0x1d   : > { %s7204_s29 = scalar_lea.hbm %s14318_s0, 128 }
  0x1e   : > { %p7205_p3 = scmp.ne.s32.totalorder %s14318_s0, %s7204_s29  ;;  %p7206_p6 = pneg %p7003_p1 }
  0x1f   : > { %p7211_p12 = scmp.lt.u32.totalorder %s7204_s29, %s14318_s0 }
  0x20   : > { %p7207_p7 = pnand %p7206_p6, %p7205_p3 }
  0x22   : > { %p7208_p10 = pneg %p7207_p7 }
  0x24   : > { %p7213_p13 = pnand %p7211_p12, %p7208_p10 }
  0x26   : > { %7216 = shalt.err (!%p7213_p13)
}
  0x27   : > { %s7277_s6 = smov [#allocation3]   ;;  %p6803_p2 = scmp.ge.s32.totalorder %s7275_s14, 8 }
  0x28   : > { %7005 = dma.hbm_to_smem (!%p7003_p1), %s14318_s0, 128, %s7277_s6, [#allocation6]  }
  0x29   : > { %153 = sbr.rel (%p6803_p2) target bundleno = 62 (0x3e), region = 20 }
  0x30   : > { %s157_s15 = sand.u32 1, %s7263_s11   ;;  %s6851_s16 = sshll.u32 %s7271_s13, 13 }
  0x31   : > { %s6804_s18 = sshll.u32 %s157_s15, 10  ;;  %s14319_s1 = sld [smem:[#allocation82_spill]] }
  0x32   : > { %s6983_s29 = scalar_select %p7348_p4, [#allocation0], [#allocation13] }
  0x33   : > { %s161_s30 = scalar_lea.vmem [#allocation7], %s6804_s18  ;;  %s7278_s5 = smov 65536  }
  0x34   : > { %s188_s3 = sshll.u32 %s161_s30, 4  ;;  %s180_s4 = sld [smem:[%s6983_s29]]   ;;  %s189_s3 = int_to_ptr.vmem [resolvable:$true] %s188_s3 }
  0x35   : > { %6984 = sst [smem:[#allocation10]] (%p7348_p4), %s7278_s5  ;;  %s7279_s6 = smov 8192  }
  0x36   : > { %6985 = sst [smem:[#allocation10 + $0x1]] (%p7348_p4), %s7279_s6  ;;  %s7280_s7 = smov 32  }
  0x37   : > { %s175_s28 = scalar_lea.hbm %s14319_s1, %s6851_s16  ;;  %6986 = sst [smem:[#allocation10 + $0x2]] (%p7348_p4), %s7280_s7 }
  0x38   : > { %s7281_s8 = smov 256   ;;  %s7282_s18 = smov 16  }
  0x39   : > { %6987 = sst [smem:[#allocation10 + $0x3]] (%p7348_p4), %s7281_s8  ;;  %s158_s27 = scalar_lea.sflag [#allocation4], %s157_s15 }
  0x3a   : > { %6988 = sst [smem:[#allocation10 + $0x4]] (%p7348_p4), %s7281_s8  ;;  %s6807_s16 = sshll.u32 %s180_s4, 26 }
  0x3b   : > { %6989 = sst [smem:[#allocation10 + $0x5]] (%p7348_p4), %s7282_s18  ;;  %s6808_s21 = sadd.s32 134217728, %s6807_s16 }
  0x3c   : > { %s7283_s29 = smov [#allocation9]  }
  0x3d   : > { %6990 = dma.general (%p7348_p4), %s175_s28, 16384, %s189_s3, %s158_s27, %s7283_s29, [#allocation10], %s6808_s21, 0  }
  0x3e PF: > { %213 = sbr.rel (%p7377_p0) target bundleno = 1552 (0x610), region = 28 }
  0x45   : > { %7242 = dma.done.wait (%p7352_p5), [#allocation6], 128  }
  0x46   : > { %7244 = vsyncadd (%p7352_p5), [#allocation6], 4294967168  ;;  %s7426_s30 = sand.u32 1, %s7259_s10  }
  0x47   : > { %s14233_s15 = sshll.u32 %s7426_s30, 10  ;;  %s220_s19 = scalar_lea.sflag [#allocation4], %s7426_s30 }
  0x48   : > { %s7432_s28 = scalar_lea.vmem [#allocation7], %s14233_s15 }
  0x49   : > { %7246 = dma.done.wait (%p7360_p8), %s220_s19, 16384  }
  0x4a   : > { %7248 = vsyncadd (%p7360_p8), %s220_s19, 4294950912 }
  0x4b   : > { %228 = sfence }
  0x4c   : > { %v256_v0 = vlaneseq  ;;  %s7439_s20 = sshll.u32 %s7267_s12, 7  ;;  %v14238_v27 = vmov 0  }
  0x4d   : > { %s1934_s26 = sadd.s32 4, %s7439_s20  ;;  %s7453_s22 = sld [smem:[#allocation3 + %s7439_s20]] }
  0x4e   : > { %v7441_v1 = vshrl.u32 %v256_v0, 7  ;;  %v7443_v2 = vand.u32 127, %v256_v0  ;;  %s2065_s3 = sadd.s32 8, %s7439_s20  ;;  %s7456_s4 = sld [smem:[#allocation3 + %s1934_s26]] }
  0x4f   : > { %s2196_s5 = sadd.s32 12, %s7439_s20  ;;  %s2327_s6 = sadd.s32 16, %s7439_s20 }
  0x50   : > { %14320 = vst [vmem:[#allocation22_spill] sm:$0xff] %v7443_v2  ;;  %v329_v3 = vsub.s32 %v7441_v1, %v7443_v2  ;;  %v7449_v4 = vadd.s32 128, %v7443_v2  ;;  %v258_v5 = vadd.s32 8, %v7441_v1  ;;  %s2458_s7 = sadd.s32 20, %s7439_s20  ;;  %s7469_s8 = sld [smem:[#allocation3 + %s2065_s3]]  ;;  %v259_v12 = vadd.s32 16, %v7441_v1 }
  0x51   : > { %s2589_s16 = sadd.s32 24, %s7439_s20  ;;  %s7473_s18 = sld [smem:[#allocation3 + %s2196_s5]]  ;;  %v260_v24 = vadd.s32 24, %v7441_v1 }
  0x52   : > { %v585_v6 = vsub.s32 0, %v329_v3  ;;  %v330_v7 = vsub.s32 %v7441_v1, %v7449_v4  ;;  %v7462_v8 = vsub.s32 %v258_v5, %v7443_v2  ;;  %v332_v9 = vsub.s32 %v258_v5, %v7449_v4  ;;  %s2720_s21 = sadd.s32 28, %s7439_s20  ;;  %s7478_s27 = sld [smem:[#allocation3 + %s2327_s6]] }
  0x53   : > { %s7480_s29 = sld [smem:[#allocation3 + %s2458_s7]]  ;;  %s2851_s26 = sadd.s32 1, %s7439_s20  ;;  %v333_v20 = vsub.s32 %v259_v12, %v7443_v2  ;;  %vm393_vm1 = vcmp.lt.s32.totalorder %v329_v3, 0  ;;  %v334_v32 = vsub.s32 %v259_v12, %v7449_v4  ;;  %v7523_v33 = vsub.s32 %v260_v24, %v7443_v2 }
  0x54   : > { %v7467_v10 = vmin.u32 %v585_v6, %v329_v3  ;;  %v587_v11 = vsub.s32 0, %v330_v7  ;;  %v589_v13 = vsub.s32 0, %v7462_v8  ;;  %v591_v14 = vsub.s32 0, %v332_v9  ;;  %s7483_s19 = sld [smem:[#allocation3 + %s2589_s16]]  ;;  %s2982_s5 = sadd.s32 5, %s7439_s20 }
  0x55   : > { %s7489_s3 = sld [smem:[#allocation3 + %s2720_s21]]  ;;  %s3113_s6 = sadd.s32 9, %s7439_s20  ;;  %v7506_v28 = vsel %vm393_vm1, 1, %v14238_v27  ;;  %v593_v29 = vsub.s32 0, %v333_v20  ;;  %vm395_vm3 = vcmp.lt.s32.totalorder %v7462_v8, 0  ;;  %v7527_v35 = vstv %s7453_s22 }
  0x56   : > { %vm777_vm0 = vcmp.gt.s32.totalorder %v7467_v10, 1  ;;  %v906_v15 = vcvt.s32.f32 %v587_v11  ;;  %v7487_v17 = vmin.u32 %v589_v13, %v7462_v8  ;;  %s3244_s7 = sadd.s32 13, %s7439_s20  ;;  %v908_v21 = vcvt.s32.f32 %v591_v14  ;;  %s7496_s16 = sld [smem:[#allocation3 + %s2851_s26]] }
  0x57   : > { %v778_v16 = vsel %vm777_vm0, %v7467_v10, 1  ;;  %s3375_s15 = sadd.s32 17, %s7439_s20  ;;  %s7501_s21 = sld [smem:[#allocation3 + %s2982_s5]]  ;;  %v7519_v31 = vmin.u32 %v593_v29, %v333_v20  ;;  %v521_v34 = vmul.u32 16, %v7506_v28  ;;  %v7535_v36 = vsel %vm395_vm3, 1, %v14238_v27 }
  0x58   : > { %v905_v18 = vcvt.s32.f32 %v778_v16  ;;  %v971_v19 = vmul.f32 0.125, %v906_v15  ;;  %vm781_vm2 = vcmp.gt.s32.totalorder %v7487_v17, 1  ;;  %s3506_s0 = sadd.s32 21, %s7439_s20  ;;  %v973_v26 = vmul.f32 0.125, %v908_v21  ;;  %s7508_s26 = sld [smem:[#allocation3 + %s3113_s6]] }
  0x59   : > { %v782_v23 = vsel %vm781_vm2, %v7487_v17, 1  ;;  %s7510_s1 = sld [smem:[#allocation3 + %s3244_s7]]  ;;  %s3637_s17 = sadd.s32 25, %s7439_s20  ;;  %vm397_vm4 = vcmp.lt.s32.totalorder %v333_v20, 0  ;;  %vm785_vm5 = vcmp.gt.s32.totalorder %v7519_v31, 1  ;;  %v595_v37 = vsub.s32 0, %v334_v32 }
  0x5a   : > { %v970_v22 = vmul.f32 0.125, %v905_v18  ;;  %7076 = vlog2.f32 %v971_v19  ;;  %v907_v25 = vcvt.s32.f32 %v782_v23  ;;  %s7512_s5 = sld [smem:[#allocation3 + %s3375_s15]]  ;;  %s3768_s24 = sadd.s32 29, %s7439_s20  ;;  %v7539_v38 = vstv %s7456_s4 }
  0x5b   : > { %s7516_s13 = sld [smem:[#allocation3 + %s3506_s0]]  ;;  %s3899_s15 = sadd.s32 2, %s7439_s20  ;;  %v786_v39 = vsel %vm785_vm5, %v7519_v31, 1  ;;  %v597_v40 = vsub.s32 0, %v7523_v33  ;;  %v336_v41 = vsub.s32 %v260_v24, %v7449_v4  ;;  %v7548_v42 = vstv %s7469_s8 }
  0x5c   : > { %7078 = vlog2.f32 %v970_v22  ;;  %v972_v30 = vmul.f32 0.125, %v907_v25  ;;  %s4030_s6 = sadd.s32 6, %s7439_s20  ;;  %s7531_s0 = sld [smem:[#allocation3 + %s3637_s17]]  ;;  %v7551_v43 = vstv %s7473_s18  ;;  %v909_v44 = vcvt.s32.f32 %v786_v39 }
  0x5d   : > { %7080 = vlog2.f32 %v973_v26  ;;  %s4161_s7 = sadd.s32 10, %s7439_s20  ;;  %s7541_s22 = sld [smem:[#allocation3 + %s3768_s24]]  ;;  %v910_v45 = vcvt.s32.f32 %v595_v37  ;;  %v7558_v46 = vstv %s7478_s27  ;;  %v7561_v47 = vstv %s7480_s29 }
  0x5e   : > { %7082 = vlog2.f32 %v972_v30  ;;  %s4292_s11 = sadd.s32 14, %s7439_s20  ;;  %s7553_s17 = sld [smem:[#allocation3 + %s3899_s15]]  ;;  %v523_v48 = vmul.u32 16, %v7535_v36  ;;  %v7569_v49 = vsel %vm397_vm4, 1, %v14238_v27  ;;  %v7572_v51 = vstv %s7483_s19 }
  0x5f   : > { %s7555_s10 = sld [smem:[#allocation3 + %s4030_s6]]  ;;  %s4423_s4 = sadd.s32 18, %s7439_s20  ;;  %v974_v52 = vmul.f32 0.125, %v909_v44  ;;  %v975_v53 = vmul.f32 0.125, %v910_v45  ;;  %v7578_v54 = vmin.u32 %v597_v40, %v7523_v33  ;;  %v7581_v55 = vstv %s7489_s3 }
  0x60   : > { %s7563_s24 = sld [smem:[#allocation3 + %s4161_s7]]  ;;  %s4554_s18 = sadd.s32 22, %s7439_s20  ;;  %v7584_v56 = vstv %s7496_s16  ;;  %v599_v58 = vsub.s32 0, %v336_v41  ;;  %v7589_v60 = vstv %s7501_s21  ;;  %v7592_v61 = vstv %s7508_s26 }
  0x61   : > { %s7574_s8 = sld [smem:[#allocation3 + %s4292_s11]]  ;;  %s4685_s27 = sadd.s32 26, %s7439_s20  ;;  %7084 = vlog2.f32 %v974_v52  ;;  %v7599_v3 = vstv %s7510_s1  ;;  %v7605_v6 = vstv %s7512_s5  ;;  %vm789_vm6 = vcmp.gt.s32.totalorder %v7578_v54, 1 }
  0x62   : > { %s4816_s29 = sadd.s32 30, %s7439_s20  ;;  %s7594_s11 = sld [smem:[#allocation3 + %s4423_s4]]  ;;  %7086 = vlog2.f32 %v975_v53  ;;  %v7613_v8 = vadd.s32 32, %v7441_v1  ;;  %v7616_v12 = vstv %s7516_s13  ;;  %v912_v14 = vcvt.s32.f32 %v599_v58 }
  0x63   : > { %s4947_s19 = sadd.s32 3, %s7439_s20  ;;  %s7601_s3 = sld [smem:[#allocation3 + %s4554_s18]]  ;;  %v7622_v15 = vstv %s7531_s0  ;;  %v7625_v16 = vstv %s7541_s22  ;;  %v790_v23 = vsel %vm789_vm6, %v7578_v54, 1  ;;  %vm713_vm7 = vcmp.lt.s32.totalorder %v7467_v10, 8 }
  0x64   : > { %v7077_v50 = vpop.eup %7076  ;;  %s5078_s16 = sadd.s32 7, %s7439_s20  ;;  %s7607_s21 = sld [smem:[#allocation3 + %s4685_s27]]  ;;  %v7631_v21 = vstv %s7553_s17  ;;  %v7647_v29 = vsub.s32 %v7613_v8, %v7443_v2  ;;  %v977_v39 = vmul.f32 0.125, %v912_v14  ;;  %v911_v45 = vcvt.s32.f32 %v790_v23 }
  0x65   : > { %v1037_v57 = vmul.f32 0.6931472, %v7077_v50  ;;  %s7609_s26 = sld [smem:[#allocation3 + %s4816_s29]]  ;;  %s5209_s5 = sadd.s32 11, %s7439_s20  ;;  %v7640_v24 = vstv %s7555_s10 }
  0x66   : > { %v7079_v59 = vpop.eup %7078  ;;  %s7618_s1 = sld [smem:[#allocation3 + %s4947_s19]]  ;;  %s5340_s6 = sadd.s32 15, %s7439_s20  ;;  %v7650_v32 = vstv %s7563_s24  ;;  %7088 = vlog2.f32 %v977_v39 }
  0x67   : > { %v7081_v63 = vpop.eup %7080  ;;  %v1035_v0 = vmul.f32 0.6931472, %v7079_v59  ;;  %v1164_v5 = vmul.f32 0.36067376, %v1037_v57  ;;  %s7627_s15 = sld [smem:[#allocation3 + %s5078_s16]]  ;;  %s5471_s13 = sadd.s32 19, %s7439_s20  ;;  %v7656_v40 = vstv %s7574_s8 }
  0x68   : > { %v1041_v7 = vmul.f32 0.6931472, %v7081_v63  ;;  %v7083_v9 = vpop.eup %7082  ;;  %s5602_s7 = sadd.s32 23, %s7439_s20  ;;  %s7642_s0 = sld [smem:[#allocation3 + %s5209_s5]]  ;;  %v7663_v52 = vstv %s7594_s11 }
  0x69   : > { %v1163_v11 = vmul.f32 0.36067376, %v1035_v0  ;;  %v1228_v13 = vmul.f32 8.0, %v1164_v5  ;;  %v1039_v18 = vmul.f32 0.6931472, %v7083_v9  ;;  %s5733_s22 = sadd.s32 27, %s7439_s20  ;;  %v7666_v53 = vstv %s7601_s3 }
  0x6a   : > { %v1166_v19 = vmul.f32 0.36067376, %v1041_v7  ;;  %s7652_s17 = sld [smem:[#allocation3 + %s5340_s6]]  ;;  %s5864_s4 = sadd.s32 31, %s7439_s20  ;;  %v7671_v59 = vstv %s7607_s21 }
  0x6b   : > { %v1227_v20 = vmul.f32 8.0, %v1163_v11  ;;  %v1292_v22 = vadd.f32 0.0001, %v1228_v13  ;;  %v1165_v25 = vmul.f32 0.36067376, %v1039_v18  ;;  %s7658_s10 = sld [smem:[#allocation3 + %s5471_s13]]  ;;  %v7085_v58 = vpop.eup %7084  ;;  %v7674_v63 = vstv %s7609_s26 }
  0x6c   : > { %v1230_v26 = vmul.f32 8.0, %v1166_v19  ;;  %s7660_s18 = sld [smem:[#allocation3 + %s5602_s7]]  ;;  %v7087_v7 = vpop.eup %7086  ;;  %v1043_v13 = vmul.f32 0.6931472, %v7085_v58  ;;  %v7679_v14 = vstv %s7618_s1  ;;  %s14322_s8 = sshll.u32 %s7426_s30, 10 }
  0x6d   : > { %v1291_v30 = vadd.f32 0.0001, %v1227_v20  ;;  %v6855_v37 = vtrunc.f32 %v1292_v22  ;;  %v1229_v41 = vmul.f32 8.0, %v1165_v25  ;;  %s7668_s24 = sld [smem:[#allocation3 + %s5733_s22]]  ;;  %v1045_v19 = vmul.f32 0.6931472, %v7087_v7 }
  0x6e   : > { %v1294_v44 = vadd.f32 0.0001, %v1230_v26  ;;  %s7676_s20 = sld [smem:[#allocation3 + %s5864_s4]]  ;;  %v7681_v20 = vmul.f32 0.125, %v911_v45  ;;  %v7684_v23 = vstv %s7627_s15  ;;  %v7688_v26 = vstv %s7642_s0  ;;  %s7867_s27 = scalar_lea.vmem [#allocation8], %s14322_s8 }
  0x6f   : > { %v6853_v50 = vtrunc.f32 %v1291_v30  ;;  %v6856_v57 = vcvt.f32.s32 %v6855_v37  ;;  %v1293_v0 = vadd.f32 0.0001, %v1229_v41  ;;  %v1167_v39 = vmul.f32 0.36067376, %v1043_v13 }
  0x70   : > { %v6859_v5 = vtrunc.f32 %v1294_v44  ;;  %v1168_v45 = vmul.f32 0.36067376, %v1045_v19  ;;  %v7732_v28 = vpop.eup %7088  ;;  %7090 = vlog2.f32 %v7681_v20 }
  0x71   : > { %v6854_v9 = vcvt.f32.s32 %v6853_v50  ;;  %v1420_v11 = vadd.s32 8, %v6856_v57  ;;  %v6857_v18 = vtrunc.f32 %v1293_v0  ;;  %v7693_v57 = vstv %s7652_s17 }
  0x72   : > { %v6860_v37 = vcvt.f32.s32 %v6859_v5  ;;  %v7696_v58 = vstv %s7658_s10  ;;  %v7699_v0 = vstv %s7660_s18 }
  0x73   : > { %v1419_v22 = vadd.s32 8, %v6854_v9  ;;  %vm1485_vm8 = vcmp.lt.s32.totalorder %v1420_v11, 15  ;;  %v6858_v44 = vcvt.f32.s32 %v6857_v18  ;;  %v7705_v9 = vstv %s7668_s24 }
  0x74   : > { %v1486_v30 = vsel %vm1485_vm8, %v1420_v11, 15  ;;  %v7714_v11 = vstv %s7676_s20  ;;  %v7717_v18 = vadd.s32 8, %v6860_v37 }
  0x75   : > { %vm1483_vm9 = vcmp.lt.s32.totalorder %v1419_v22, 15  ;;  %v7690_v41 = vadd.s32 16, %v1486_v30  ;;  %v7726_v30 = vmul.f32 8.0, %v1168_v45 }
  0x76   : > { %v1484_v50 = vsel %vm1483_vm9, %v1419_v22, 15  ;;  %v7724_v22 = vmul.f32 8.0, %v1167_v39 }
  0x77   : > { %v1611_v7 = vsel %vm713_vm7, %v7467_v10, %v1484_v50  ;;  %vm1740_vm10 = vcmp.eq.s32.totalorder %v7690_v41, 0  ;;  %vm1871_vm11 = vcmp.eq.s32.totalorder %v7690_v41, 4  ;;  %v7722_v10 = vadd.s32 8, %v6858_v44 }
  0x78   : > { %v7711_v5 = vadd.s32 %v1611_v7, %v521_v34  ;;  %v1807_v13 = vsel %vm1740_vm10, %v7527_v35, 0.0  ;;  %vm2002_vm10 = vcmp.eq.s32.totalorder %v7690_v41, 8  ;;  %v7927_v36 = vadd.f32 0.0001, %v7726_v30 }
  0x79   : > { %v7720_v19 = vsel %vm1871_vm11, %v7539_v38, %v1807_v13 }
  0x7a   : > { %vm1739_vm12 = vcmp.eq.s32.totalorder %v7711_v5, 0  ;;  %vm1870_vm13 = vcmp.eq.s32.totalorder %v7711_v5, 4  ;;  %vm2001_vm14 = vcmp.eq.s32.totalorder %v7711_v5, 8  ;;  %vm2132_vm15 = vcmp.eq.s32.totalorder %v7711_v5, 12 }
  0x7b   : > { %v1806_v34 = vsel %vm1739_vm12, %v7527_v35, 0.0  ;;  %vm2263_vm0 = vcmp.eq.s32.totalorder %v7711_v5, 16  ;;  %vm2394_vm1 = vcmp.eq.s32.totalorder %v7711_v5, 20  ;;  %vm2525_vm2 = vcmp.eq.s32.totalorder %v7711_v5, 24 }
  0x7c   : > { %v1937_v37 = vsel %vm1870_vm13, %v7539_v38, %v1806_v34  ;;  %vm2656_vm3 = vcmp.eq.s32.totalorder %v7711_v5, 28  ;;  %vm2787_vm4 = vcmp.eq.s32.totalorder %v7711_v5, 1  ;;  %vm2918_vm5 = vcmp.eq.s32.totalorder %v7711_v5, 5 }
  0x7d   : > { %v2068_v39 = vsel %vm2001_vm14, %v7548_v42, %v1937_v37  ;;  %v2854_v44 = vsel %vm2787_vm4, %v7584_v56, 0.0  ;;  %vm3049_vm6 = vcmp.eq.s32.totalorder %v7711_v5, 9  ;;  %vm3180_vm7 = vcmp.eq.s32.totalorder %v7711_v5, 13 }
  0x7e   : > { %v2199_v45 = vsel %vm2132_vm15, %v7551_v43, %v2068_v39  ;;  %v2985_v50 = vsel %vm2918_vm5, %v7589_v60, %v2854_v44  ;;  %vm3311_vm8 = vcmp.eq.s32.totalorder %v7711_v5, 17  ;;  %vm3442_vm9 = vcmp.eq.s32.totalorder %v7711_v5, 21 }
  0x7f   : > { %v2330_v7 = vsel %vm2263_vm0, %v7558_v46, %v2199_v45  ;;  %v3116_v13 = vsel %vm3049_vm6, %v7592_v61, %v2985_v50  ;;  %vm3573_vm11 = vcmp.eq.s32.totalorder %v7711_v5, 25  ;;  %vm3704_vm12 = vcmp.eq.s32.totalorder %v7711_v5, 29 }
  0x80   : > { %vm2133_vm13 = vcmp.eq.s32.totalorder %v7690_v41, 12  ;;  %v2461_v34 = vsel %vm2394_vm1, %v7561_v47, %v2330_v7  ;;  %v3247_v37 = vsel %vm3180_vm7, %v7599_v3, %v3116_v13  ;;  %vm3835_vm14 = vcmp.eq.s32.totalorder %v7711_v5, 2 }
  0x81   : > { %vm3966_vm15 = vcmp.eq.s32.totalorder %v7711_v5, 6  ;;  %vm2264_vm0 = vcmp.eq.s32.totalorder %v7690_v41, 16  ;;  %v2592_v39 = vsel %vm2525_vm2, %v7572_v51, %v2461_v34  ;;  %v3378_v44 = vsel %vm3311_vm8, %v7605_v6, %v3247_v37 }
  0x82   : > { %v3902_v45 = vsel %vm3835_vm14, %v7631_v21, 0.0  ;;  %vm4097_vm4 = vcmp.eq.s32.totalorder %v7711_v5, 10  ;;  %vm2395_vm1 = vcmp.eq.s32.totalorder %v7690_v41, 20  ;;  %v2723_v50 = vsel %vm2656_vm3, %v7581_v55, %v2592_v39 }
  0x83   : > { %v3509_v7 = vsel %vm3442_vm9, %v7616_v12, %v3378_v44  ;;  %v4033_v13 = vsel %vm3966_vm15, %v7640_v24, %v3902_v45  ;;  %vm4228_vm2 = vcmp.eq.s32.totalorder %v7711_v5, 14  ;;  %vm2526_vm5 = vcmp.eq.s32.totalorder %v7690_v41, 24 }
  0x84   : > { %v3640_v34 = vsel %vm3573_vm11, %v7622_v15, %v3509_v7  ;;  %v4164_v37 = vsel %vm4097_vm4, %v7650_v32, %v4033_v13  ;;  %vm4359_vm6 = vcmp.eq.s32.totalorder %v7711_v5, 18  ;;  %vm4490_vm3 = vcmp.eq.s32.totalorder %v7711_v5, 22 }
  0x85   : > { %vm2657_vm7 = vcmp.eq.s32.totalorder %v7690_v41, 28  ;;  %v3771_v39 = vsel %vm3704_vm12, %v7625_v16, %v3640_v34  ;;  %v4295_v44 = vsel %vm4228_vm2, %v7656_v40, %v4164_v37  ;;  %vm4621_vm8 = vcmp.eq.s32.totalorder %v7711_v5, 26 }
  0x86   : > { %vm4752_vm9 = vcmp.eq.s32.totalorder %v7711_v5, 30  ;;  %v4426_v45 = vsel %vm4359_vm6, %v7663_v52, %v4295_v44  ;;  %vm4883_vm11 = vcmp.eq.s32.totalorder %v7711_v5, 3  ;;  %vm5014_vm14 = vcmp.eq.s32.totalorder %v7711_v5, 7 }
  0x87   : > { %vm5145_vm15 = vcmp.eq.s32.totalorder %v7711_v5, 11  ;;  %v4557_v7 = vsel %vm4490_vm3, %v7666_v53, %v4426_v45  ;;  %v4950_v13 = vsel %vm4883_vm11, %v7679_v14, 0.0  ;;  %vm5276_vm12 = vcmp.eq.s32.totalorder %v7711_v5, 15 }
  0x88   : > { %vm5407_vm4 = vcmp.eq.s32.totalorder %v7711_v5, 19  ;;  %v4688_v34 = vsel %vm4621_vm8, %v7671_v59, %v4557_v7  ;;  %v5081_v37 = vsel %vm5014_vm14, %v7684_v23, %v4950_v13  ;;  %vm5538_vm2 = vcmp.eq.s32.totalorder %v7711_v5, 23 }
  0x89   : > { %vm5669_vm6 = vcmp.eq.s32.totalorder %v7711_v5, 27  ;;  %v4819_v44 = vsel %vm4752_vm9, %v7674_v63, %v4688_v34  ;;  %v5212_v62 = vsel %vm5145_vm15, %v7688_v26, %v5081_v37  ;;  %vm5800_vm3 = vcmp.eq.s32.totalorder %v7711_v5, 31 }
  0x8a   : > { %v5931_v45 = vadd.f32 %v3771_v39, %v2723_v50  ;;  %v5343_v27 = vsel %vm5276_vm12, %v7693_v57, %v5212_v62  ;;  %v2069_v7 = vsel %vm2002_vm10, %v7548_v42, %v7720_v19  ;;  %vm2788_vm8 = vcmp.eq.s32.totalorder %v7690_v41, 1 }
  0x8b   : > { %vm2919_vm11 = vcmp.eq.s32.totalorder %v7690_v41, 5  ;;  %v5474_v13 = vsel %vm5407_vm4, %v7696_v58, %v5343_v27  ;;  %v2200_v37 = vsel %vm2133_vm13, %v7551_v43, %v2069_v7  ;;  %v2855_v50 = vsel %vm2788_vm8, %v7584_v56, 0.0 }
  0x8c   : > { %v5995_v34 = vadd.f32 %v5931_v45, %v4819_v44  ;;  %v5605_v62 = vsel %vm5538_vm2, %v7699_v0, %v5474_v13  ;;  %v2331_v19 = vsel %vm2264_vm0, %v7558_v46, %v2200_v37  ;;  %v2986_v39 = vsel %vm2919_vm11, %v7589_v60, %v2855_v50  ;;  %v6187_v13 = vld [vmem:[%s7432_s28] sm:$0xff] }
  0x8d   : > { %vm3050_vm10 = vcmp.eq.s32.totalorder %v7690_v41, 9  ;;  %v5736_v27 = vsel %vm5669_vm6, %v7705_v9, %v5605_v62  ;;  %v2462_v44 = vsel %vm2395_vm1, %v7561_v47, %v2331_v19  ;;  %vm3181_vm13 = vcmp.eq.s32.totalorder %v7690_v41, 13 }
  0x8e   : > { %v3117_v45 = vsel %vm3050_vm10, %v7592_v61, %v2986_v39  ;;  %v5867_v7 = vsel %vm5800_vm3, %v7714_v11, %v5736_v27  ;;  %v2593_v37 = vsel %vm2526_vm5, %v7572_v51, %v2462_v44  ;;  %vm3312_vm0 = vcmp.eq.s32.totalorder %v7690_v41, 17 }
  0x8f   : > { %v3248_v50 = vsel %vm3181_vm13, %v7599_v3, %v3117_v45  ;;  %vm1489_vm9 = vcmp.lt.s32.totalorder %v7717_v18, 15  ;;  %v7845_v62 = vadd.f32 %v5995_v34, %v5867_v7  ;;  %v2724_v19 = vsel %vm2657_vm7, %v7581_v55, %v2593_v37 }
  0x90   : > { %v3379_v5 = vsel %vm3312_vm0, %v7605_v6, %v3248_v50  ;;  %vm3443_vm1 = vcmp.eq.s32.totalorder %v7690_v41, 21  ;;  %vm715_vm14 = vcmp.lt.s32.totalorder %v7487_v17, 8  ;;  %vm3574_vm5 = vcmp.eq.s32.totalorder %v7690_v41, 25 }
  0x91   : > { %14321 = vst [vmem:[#allocation23_spill] sm:$0xff] %v7845_v62  ;;  %v3510_v39 = vsel %vm3443_vm1, %v7616_v12, %v3379_v5  ;;  %vm3705_vm15 = vcmp.eq.s32.totalorder %v7690_v41, 29  ;;  %vm3836_vm12 = vcmp.eq.s32.totalorder %v7690_v41, 2  ;;  %v6379_v34 = vadd.f32 %v6187_v13, %v7845_v62 }
  0x92   : > { %v3641_v27 = vsel %vm3574_vm5, %v7622_v15, %v3510_v39  ;;  %v3903_v44 = vsel %vm3836_vm12, %v7631_v21, 0.0  ;;  %vm3967_vm7 = vcmp.eq.s32.totalorder %v7690_v41, 6  ;;  %vm4098_vm4 = vcmp.eq.s32.totalorder %v7690_v41, 10 }
  0x93   : > { %v3772_v45 = vsel %vm3705_vm15, %v7625_v16, %v3641_v27  ;;  %v4034_v7 = vsel %vm3967_vm7, %v7640_v24, %v3903_v44  ;;  %vm4229_vm2 = vcmp.eq.s32.totalorder %v7690_v41, 14  ;;  %6507 = vst [vmem:[%s7867_s27] sm:$0xff] %v6379_v34  ;;  %vm4360_vm6 = vcmp.eq.s32.totalorder %v7690_v41, 18 }
  0x94   : > { %v4165_v13 = vsel %vm4098_vm4, %v7650_v32, %v4034_v7  ;;  %vm4491_vm3 = vcmp.eq.s32.totalorder %v7690_v41, 22  ;;  %vm4622_vm8 = vcmp.eq.s32.totalorder %v7690_v41, 26  ;;  %vm4753_vm11 = vcmp.eq.s32.totalorder %v7690_v41, 30 }
  0x95   : > { %v4296_v37 = vsel %vm4229_vm2, %v7656_v40, %v4165_v13  ;;  %vm4884_vm10 = vcmp.eq.s32.totalorder %v7690_v41, 3  ;;  %vm5015_vm13 = vcmp.eq.s32.totalorder %v7690_v41, 7  ;;  %vm5146_vm0 = vcmp.eq.s32.totalorder %v7690_v41, 11 }
  0x96   : > { %v4427_v50 = vsel %vm4360_vm6, %v7663_v52, %v4296_v37  ;;  %v4951_v5 = vsel %vm4884_vm10, %v7679_v14, 0.0  ;;  %vm5277_vm1 = vcmp.eq.s32.totalorder %v7690_v41, 15  ;;  %vm5408_vm5 = vcmp.eq.s32.totalorder %v7690_v41, 19 }
  0x97   : > { %v4558_v39 = vsel %vm4491_vm3, %v7666_v53, %v4427_v50  ;;  %v5082_v34 = vsel %vm5015_vm13, %v7684_v23, %v4951_v5  ;;  %vm5539_vm15 = vcmp.eq.s32.totalorder %v7690_v41, 23  ;;  %vm5670_vm12 = vcmp.eq.s32.totalorder %v7690_v41, 27 }
  0x98   : > { %v4689_v27 = vsel %vm4622_vm8, %v7671_v59, %v4558_v39  ;;  %v5213_v44 = vsel %vm5146_vm0, %v7688_v26, %v5082_v34  ;;  %vm5801_vm7 = vcmp.eq.s32.totalorder %v7690_v41, 31  ;;  %v5932_v37 = vadd.f32 %v3772_v45, %v2724_v19 }
  0x99   : > { %v4820_v7 = vsel %vm4753_vm11, %v7674_v63, %v4689_v27  ;;  %v5344_v13 = vsel %vm5277_vm1, %v7693_v57, %v5213_v44  ;;  %vm1487_vm4 = vcmp.lt.s32.totalorder %v7722_v10, 15  ;;  %v1490_v39 = vsel %vm1489_vm9, %v7717_v18, 15 }
  0x9a   : > { %v5475_v50 = vsel %vm5408_vm5, %v7696_v58, %v5344_v13  ;;  %v1488_v5 = vsel %vm1487_vm4, %v7722_v10, 15  ;;  %v7899_v34 = vadd.f32 0.0001, %v7724_v22  ;;  %v5996_v27 = vadd.f32 %v5932_v37, %v4820_v7  ;;  %v6188_v7 = vld [vmem:[%s7432_s28 + $0x8] sm:$0xff] }
  0x9b   : > { %v5606_v25 = vsel %vm5539_vm15, %v7699_v0, %v5475_v50  ;;  %v1613_v19 = vsel %vm715_vm14, %v7487_v17, %v1488_v5  ;;  %v7912_v18 = vmul.f32 0.6931472, %v7732_v28  ;;  %v14323_v22 = vsub.s32 0, %v7647_v29 }
  0x9c   : > { %v5737_v45 = vsel %vm5670_vm12, %v7705_v9, %v5606_v25  ;;  %v7909_v10 = vadd.s32 %v1613_v19, %v523_v48  ;;  %v7923_v20 = vadd.s32 16, %v1490_v39  ;;  %v6861_v25 = vtrunc.f32 %v7899_v34  ;;  %v6190_v34 = vld [vmem:[%s7432_s28 + $0x18] sm:$0xff] }
  0x9d   : > { %v7917_v44 = vmin.u32 %v14323_v22, %v7647_v29  ;;  %v5868_v17 = vsel %vm5801_vm7, %v7714_v11, %v5737_v45  ;;  %v7966_v45 = vpop.eup %7090 }
  0x9e   : > { %v7929_v48 = vadd.f32 %v5996_v27, %v5868_v17  ;;  %vm1741_vm9 = vcmp.eq.s32.totalorder %v7909_v10, 0  ;;  %vm1872_vm14 = vcmp.eq.s32.totalorder %v7909_v10, 4  ;;  %vm2003_vm2 = vcmp.eq.s32.totalorder %v7909_v10, 8 }
  0x9f   : > { %v1808_v41 = vsel %vm1741_vm9, %v7527_v35, 0.0  ;;  %vm2134_vm6 = vcmp.eq.s32.totalorder %v7909_v10, 12  ;;  %vm2265_vm3 = vcmp.eq.s32.totalorder %v7909_v10, 16  ;;  %vm2396_vm8 = vcmp.eq.s32.totalorder %v7909_v10, 20 }
  0xa0   : > { %14324 = vst [vmem:[#allocation24_spill] sm:$0xff] %v7929_v48  ;;  %v6380_v30 = vadd.f32 %v6188_v7, %v7929_v48  ;;  %v1939_v28 = vsel %vm1872_vm14, %v7539_v38, %v1808_v41  ;;  %vm2527_vm11 = vcmp.eq.s32.totalorder %v7909_v10, 24  ;;  %vm2658_vm10 = vcmp.eq.s32.totalorder %v7909_v10, 28 }
  0xa1   : > { %v2070_v13 = vsel %vm2003_vm2, %v7548_v42, %v1939_v28  ;;  %vm2789_vm13 = vcmp.eq.s32.totalorder %v7909_v10, 1  ;;  %vm2920_vm0 = vcmp.eq.s32.totalorder %v7909_v10, 5  ;;  %vm3051_vm1 = vcmp.eq.s32.totalorder %v7909_v10, 9 }
  0xa2   : > { %6508 = vst [vmem:[%s7867_s27 + $0x8] sm:$0xff] %v6380_v30  ;;  %v2201_v37 = vsel %vm2134_vm6, %v7551_v43, %v2070_v13  ;;  %v2856_v50 = vsel %vm2789_vm13, %v7584_v56, 0.0  ;;  %vm3182_vm5 = vcmp.eq.s32.totalorder %v7909_v10, 13  ;;  %vm3313_vm15 = vcmp.eq.s32.totalorder %v7909_v10, 17 }
  0xa3   : > { %vm1742_vm12 = vcmp.eq.s32.totalorder %v7923_v20, 0  ;;  %v2332_v5 = vsel %vm2265_vm3, %v7558_v46, %v2201_v37  ;;  %v2987_v39 = vsel %vm2920_vm0, %v7589_v60, %v2856_v50  ;;  %vm3444_vm7 = vcmp.eq.s32.totalorder %v7909_v10, 21 }
  0xa4   : > { %vm3575_vm4 = vcmp.eq.s32.totalorder %v7909_v10, 25  ;;  %vm1873_vm9 = vcmp.eq.s32.totalorder %v7923_v20, 4  ;;  %v2463_v27 = vsel %vm2396_vm8, %v7561_v47, %v2332_v5  ;;  %v3118_v19 = vsel %vm3051_vm1, %v7592_v61, %v2987_v39 }
  0xa5   : > { %vm3706_vm14 = vcmp.eq.s32.totalorder %v7909_v10, 29  ;;  %vm3837_vm2 = vcmp.eq.s32.totalorder %v7909_v10, 2  ;;  %vm2004_vm6 = vcmp.eq.s32.totalorder %v7923_v20, 8  ;;  %v2594_v22 = vsel %vm2527_vm11, %v7572_v51, %v2463_v27 }
  0xa6   : > { %v3249_v17 = vsel %vm3182_vm5, %v7599_v3, %v3118_v19  ;;  %v3904_v7 = vsel %vm3837_vm2, %v7631_v21, 0.0  ;;  %vm3968_vm3 = vcmp.eq.s32.totalorder %v7909_v10, 6  ;;  %v2725_v41 = vsel %vm2658_vm10, %v7581_v55, %v2594_v22 }
  0xa7   : > { %v3380_v30 = vsel %vm3313_vm15, %v7605_v6, %v3249_v17  ;;  %v4035_v28 = vsel %vm3968_vm3, %v7640_v24, %v3904_v7  ;;  %vm4099_vm8 = vcmp.eq.s32.totalorder %v7909_v10, 10  ;;  %vm4230_vm11 = vcmp.eq.s32.totalorder %v7909_v10, 14 }
  0xa8   : > { %v3511_v13 = vsel %vm3444_vm7, %v7616_v12, %v3380_v30  ;;  %v4166_v37 = vsel %vm4099_vm8, %v7650_v32, %v4035_v28  ;;  %vm4361_vm13 = vcmp.eq.s32.totalorder %v7909_v10, 18  ;;  %vm4492_vm10 = vcmp.eq.s32.totalorder %v7909_v10, 22 }
  0xa9   : > { %v3642_v50 = vsel %vm3575_vm4, %v7622_v15, %v3511_v13  ;;  %v4297_v5 = vsel %vm4230_vm11, %v7656_v40, %v4166_v37  ;;  %vm4623_vm0 = vcmp.eq.s32.totalorder %v7909_v10, 26  ;;  %vm4754_vm1 = vcmp.eq.s32.totalorder %v7909_v10, 30 }
  0xaa   : > { %v3773_v39 = vsel %vm3706_vm14, %v7625_v16, %v3642_v50  ;;  %v4428_v27 = vsel %vm4361_vm13, %v7663_v52, %v4297_v5  ;;  %vm4885_vm5 = vcmp.eq.s32.totalorder %v7909_v10, 3  ;;  %vm5016_vm15 = vcmp.eq.s32.totalorder %v7909_v10, 7 }
  0xab   : > { %v4559_v19 = vsel %vm4492_vm10, %v7666_v53, %v4428_v27  ;;  %v4952_v22 = vsel %vm4885_vm5, %v7679_v14, 0.0  ;;  %vm5147_vm7 = vcmp.eq.s32.totalorder %v7909_v10, 11  ;;  %vm5278_vm4 = vcmp.eq.s32.totalorder %v7909_v10, 15 }
  0xac   : > { %v4690_v17 = vsel %vm4623_vm0, %v7671_v59, %v4559_v19  ;;  %v5083_v7 = vsel %vm5016_vm15, %v7684_v23, %v4952_v22  ;;  %vm5409_vm14 = vcmp.eq.s32.totalorder %v7909_v10, 19  ;;  %vm5540_vm2 = vcmp.eq.s32.totalorder %v7909_v10, 23 }
  0xad   : > { %v4821_v30 = vsel %vm4754_vm1, %v7674_v63, %v4690_v17  ;;  %v5214_v28 = vsel %vm5147_vm7, %v7688_v26, %v5083_v7  ;;  %vm5671_vm3 = vcmp.eq.s32.totalorder %v7909_v10, 27  ;;  %vm5802_vm8 = vcmp.eq.s32.totalorder %v7909_v10, 31  ;;  %v6189_v7 = vld [vmem:[%s7432_s28 + $0x10] sm:$0xff] }
  0xae   : > { %v5345_v13 = vsel %vm5278_vm4, %v7693_v57, %v5214_v28  ;;  %v5933_v37 = vadd.f32 %v3773_v39, %v2725_v41  ;;  %v1809_v50 = vsel %vm1742_vm12, %v7527_v35, 0.0  ;;  %vm2135_vm11 = vcmp.eq.s32.totalorder %v7923_v20, 12 }
  0xaf   : > { %v5476_v5 = vsel %vm5409_vm14, %v7696_v58, %v5345_v13  ;;  %v1940_v27 = vsel %vm1873_vm9, %v7539_v38, %v1809_v50  ;;  %vm2266_vm13 = vcmp.eq.s32.totalorder %v7923_v20, 16  ;;  %vm2397_vm10 = vcmp.eq.s32.totalorder %v7923_v20, 20 }
  0xb0   : > { %v5607_v19 = vsel %vm5540_vm2, %v7699_v0, %v5476_v5  ;;  %v5997_v22 = vadd.f32 %v5933_v37, %v4821_v30  ;;  %v2071_v10 = vsel %vm2004_vm6, %v7548_v42, %v1940_v27  ;;  %vm2528_vm12 = vcmp.eq.s32.totalorder %v7923_v20, 24 }
  0xb1   : > { %v5738_v41 = vsel %vm5671_vm3, %v7705_v9, %v5607_v19  ;;  %v2202_v39 = vsel %vm2135_vm11, %v7551_v43, %v2071_v10  ;;  %vm2659_vm9 = vcmp.eq.s32.totalorder %v7923_v20, 28  ;;  %vm2790_vm0 = vcmp.eq.s32.totalorder %v7923_v20, 1 }
  0xb2   : > { %v5869_v17 = vsel %vm5802_vm8, %v7714_v11, %v5738_v41  ;;  %v2333_v28 = vsel %vm2266_vm13, %v7558_v46, %v2202_v39  ;;  %vm2921_vm1 = vcmp.eq.s32.totalorder %v7923_v20, 5  ;;  %v2857_v37 = vsel %vm2790_vm0, %v7584_v56, 0.0 }
  0xb3   : > { %v8037_v30 = vadd.f32 %v5997_v22, %v5869_v17  ;;  %v2464_v13 = vsel %vm2397_vm10, %v7561_v47, %v2333_v28  ;;  %vm3052_vm6 = vcmp.eq.s32.totalorder %v7923_v20, 9  ;;  %v2988_v5 = vsel %vm2921_vm1, %v7589_v60, %v2857_v37 }
  0xb4   : > { %v2595_v50 = vsel %vm2528_vm12, %v7572_v51, %v2464_v13  ;;  %vm3183_vm5 = vcmp.eq.s32.totalorder %v7923_v20, 13  ;;  %vm3314_vm15 = vcmp.eq.s32.totalorder %v7923_v20, 17  ;;  %v3119_v22 = vsel %vm3052_vm6, %v7592_v61, %v2988_v5 }
  0xb5   : > { %14325 = vst [vmem:[#allocation25_spill] sm:$0xff] %v8037_v30  ;;  %v6381_v27 = vadd.f32 %v6189_v7, %v8037_v30  ;;  %v2726_v19 = vsel %vm2659_vm9, %v7581_v55, %v2595_v50  ;;  %vm3445_vm7 = vcmp.eq.s32.totalorder %v7923_v20, 21  ;;  %v3250_v10 = vsel %vm3183_vm5, %v7599_v3, %v3119_v22 }
  0xb6   : > { %vm3576_vm4 = vcmp.eq.s32.totalorder %v7923_v20, 25  ;;  %vm3707_vm14 = vcmp.eq.s32.totalorder %v7923_v20, 29  ;;  %vm3838_vm2 = vcmp.eq.s32.totalorder %v7923_v20, 2  ;;  %v3381_v41 = vsel %vm3314_vm15, %v7605_v6, %v3250_v10 }
  0xb7   : > { %6509 = vst [vmem:[%s7867_s27 + $0x10] sm:$0xff] %v6381_v27  ;;  %v3905_v39 = vsel %vm3838_vm2, %v7631_v21, 0.0  ;;  %vm3969_vm3 = vcmp.eq.s32.totalorder %v7923_v20, 6  ;;  %vm4100_vm8 = vcmp.eq.s32.totalorder %v7923_v20, 10  ;;  %vm793_vm11 = vcmp.gt.s32.totalorder %v7917_v44, 1 }
  0xb8   : > { %v3512_v17 = vsel %vm3445_vm7, %v7616_v12, %v3381_v41  ;;  %v4036_v7 = vsel %vm3969_vm3, %v7640_v24, %v3905_v39  ;;  %vm4231_vm13 = vcmp.eq.s32.totalorder %v7923_v20, 14  ;;  %vm4362_vm10 = vcmp.eq.s32.totalorder %v7923_v20, 18 }
  0xb9   : > { %v3643_v28 = vsel %vm3576_vm4, %v7622_v15, %v3512_v17  ;;  %v4167_v13 = vsel %vm4100_vm8, %v7650_v32, %v4036_v7  ;;  %vm4493_vm12 = vcmp.eq.s32.totalorder %v7923_v20, 22  ;;  %vm4624_vm9 = vcmp.eq.s32.totalorder %v7923_v20, 26 }
  0xba   : > { %v3774_v37 = vsel %vm3707_vm14, %v7625_v16, %v3643_v28  ;;  %v4298_v50 = vsel %vm4231_vm13, %v7656_v40, %v4167_v13  ;;  %vm4755_vm0 = vcmp.eq.s32.totalorder %v7923_v20, 30  ;;  %vm4886_vm1 = vcmp.eq.s32.totalorder %v7923_v20, 3 }
  0xbb   : > { %v4429_v5 = vsel %vm4362_vm10, %v7663_v52, %v4298_v50  ;;  %v4953_v27 = vsel %vm4886_vm1, %v7679_v14, 0.0  ;;  %vm5017_vm6 = vcmp.eq.s32.totalorder %v7923_v20, 7  ;;  %vm5148_vm5 = vcmp.eq.s32.totalorder %v7923_v20, 11 }
  0xbc   : > { %v4560_v22 = vsel %vm4493_vm12, %v7666_v53, %v4429_v5  ;;  %v5084_v10 = vsel %vm5017_vm6, %v7684_v23, %v4953_v27  ;;  %vm5279_vm15 = vcmp.eq.s32.totalorder %v7923_v20, 15  ;;  %vm5410_vm7 = vcmp.eq.s32.totalorder %v7923_v20, 19 }
  0xbd   : > { %v4691_v41 = vsel %vm4624_vm9, %v7671_v59, %v4560_v22  ;;  %v5215_v39 = vsel %vm5148_vm5, %v7688_v26, %v5084_v10  ;;  %vm5541_vm4 = vcmp.eq.s32.totalorder %v7923_v20, 23  ;;  %vm5672_vm14 = vcmp.eq.s32.totalorder %v7923_v20, 27 }
  0xbe   : > { %v4822_v17 = vsel %vm4755_vm0, %v7674_v63, %v4691_v41  ;;  %v5346_v7 = vsel %vm5279_vm15, %v7693_v57, %v5215_v39  ;;  %vm5803_vm2 = vcmp.eq.s32.totalorder %v7923_v20, 31  ;;  %v5934_v28 = vadd.f32 %v3774_v37, %v2726_v19 }
  0xbf   : > { %v5477_v13 = vsel %vm5410_vm7, %v7696_v58, %v5346_v7  ;;  %v6862_v50 = vcvt.f32.s32 %v6861_v25  ;;  %v6863_v5 = vtrunc.f32 %v7927_v36  ;;  %v1047_v27 = vmul.f32 0.6931472, %v7966_v45 }
  0xc0   : > { %v5608_v22 = vsel %vm5541_vm4, %v7699_v0, %v5477_v13  ;;  %v5998_v10 = vadd.f32 %v5934_v28, %v4822_v17  ;;  %vm399_vm3 = vcmp.lt.s32.totalorder %v7523_v33, 0  ;;  %v1170_v41 = vmul.f32 0.36067376, %v7912_v18 }
  0xc1   : > { %v5739_v39 = vsel %vm5672_vm14, %v7705_v9, %v5608_v22  ;;  %v1423_v20 = vadd.s32 8, %v6862_v50  ;;  %v6864_v19 = vcvt.f32.s32 %v6863_v5  ;;  %v1169_v37 = vmul.f32 0.36067376, %v1047_v27 }
  0xc2   : > { %v5870_v7 = vsel %vm5803_vm2, %v7714_v11, %v5739_v39  ;;  %vm717_vm8 = vcmp.lt.s32.totalorder %v7519_v31, 8  ;;  %v1234_v25 = vmul.f32 8.0, %v1170_v41  ;;  %v8104_v36 = vsel %vm793_vm11, %v7917_v44, 1 }
  0xc3   : > { %v8106_v45 = vadd.f32 %v5998_v10, %v5870_v7  ;;  %vm1491_vm13 = vcmp.lt.s32.totalorder %v1423_v20, 15  ;;  %v1424_v18 = vadd.s32 8, %v6864_v19  ;;  %v1233_v17 = vmul.f32 8.0, %v1169_v37 }
  0xc4   : > { %v1492_v28 = vsel %vm1491_vm13, %v1423_v20, 15  ;;  %v14327_v13 = vmov 0   ;;  %v8113_v5 = vadd.f32 0.0001, %v1234_v25  ;;  %v14328_v10 = vmul.u32 16, %v7569_v49 }
  0xc5   : > { %14326 = vst [vmem:[#allocation26_spill] sm:$0xff] %v8106_v45  ;;  %v8111_v50 = vsel %vm399_vm3, 1, %v14327_v13  ;;  %v6382_v27 = vadd.f32 %v6190_v34, %v8106_v45  ;;  %v1615_v22 = vsel %vm717_vm8, %v7519_v31, %v1492_v28  ;;  %vm1493_vm11 = vcmp.lt.s32.totalorder %v1424_v18, 15 }
  0xc6   : > { %v8117_v41 = vadd.f32 0.0001, %v1233_v17  ;;  %v8121_v39 = vadd.s32 %v1615_v22, %v14328_v10  ;;  %v1494_v19 = vsel %vm1493_vm11, %v1424_v18, 15  ;;  %v6867_v20 = vtrunc.f32 %v8113_v5 }
  0xc7   : > { %6510 = vst [vmem:[%s7867_s27 + $0x18] sm:$0xff] %v6382_v27  ;;  %v8126_v37 = vadd.s32 16, %v1494_v19  ;;  %v8132_v34 = vadd.s32 40, %v7441_v1  ;;  %v14331_v5 = vcvt.s32.f32 %v8104_v36 }
  0xc8   : > { %v6865_v7 = vtrunc.f32 %v8117_v41  ;;  %vm1743_vm10 = vcmp.eq.s32.totalorder %v8121_v39, 0  ;;  %vm1874_vm12 = vcmp.eq.s32.totalorder %v8121_v39, 4  ;;  %vm2005_vm9 = vcmp.eq.s32.totalorder %v8121_v39, 8 }
  0xc9   : > { %vm2136_vm0 = vcmp.eq.s32.totalorder %v8121_v39, 12  ;;  %v1810_v49 = vsel %vm1743_vm10, %v7527_v35, 0.0  ;;  %vm2267_vm1 = vcmp.eq.s32.totalorder %v8121_v39, 16  ;;  %vm2398_vm6 = vcmp.eq.s32.totalorder %v8121_v39, 20 }
  0xca   : > { %vm2529_vm5 = vcmp.eq.s32.totalorder %v8121_v39, 24  ;;  %v1941_v25 = vsel %vm1874_vm12, %v7539_v38, %v1810_v49  ;;  %vm2660_vm15 = vcmp.eq.s32.totalorder %v8121_v39, 28  ;;  %vm2791_vm7 = vcmp.eq.s32.totalorder %v8121_v39, 1 }
  0xcb   : > { %vm2922_vm4 = vcmp.eq.s32.totalorder %v8121_v39, 5  ;;  %v2072_v18 = vsel %vm2005_vm9, %v7548_v42, %v1941_v25  ;;  %v2858_v17 = vsel %vm2791_vm7, %v7584_v56, 0.0  ;;  %vm3053_vm14 = vcmp.eq.s32.totalorder %v8121_v39, 9 }
  0xcc   : > { %vm3184_vm2 = vcmp.eq.s32.totalorder %v8121_v39, 13  ;;  %v2203_v28 = vsel %vm2136_vm0, %v7551_v43, %v2072_v18  ;;  %v2989_v27 = vsel %vm2922_vm4, %v7589_v60, %v2858_v17  ;;  %vm3315_vm3 = vcmp.eq.s32.totalorder %v8121_v39, 17 }
  0xcd   : > { %vm3446_vm8 = vcmp.eq.s32.totalorder %v8121_v39, 21  ;;  %v2334_v22 = vsel %vm2267_vm1, %v7558_v46, %v2203_v28  ;;  %v3120_v10 = vsel %vm3053_vm14, %v7592_v61, %v2989_v27  ;;  %vm3577_vm13 = vcmp.eq.s32.totalorder %v8121_v39, 25 }
  0xce   : > { %vm3708_vm11 = vcmp.eq.s32.totalorder %v8121_v39, 29  ;;  %v2465_v19 = vsel %vm2398_vm6, %v7561_v47, %v2334_v22  ;;  %v3251_v49 = vsel %vm3184_vm2, %v7599_v3, %v3120_v10  ;;  %vm3839_vm10 = vcmp.eq.s32.totalorder %v8121_v39, 2 }
  0xcf   : > { %vm3970_vm12 = vcmp.eq.s32.totalorder %v8121_v39, 6  ;;  %v2596_v25 = vsel %vm2529_vm5, %v7572_v51, %v2465_v19  ;;  %v3382_v18 = vsel %vm3315_vm3, %v7605_v6, %v3251_v49  ;;  %v3906_v17 = vsel %vm3839_vm10, %v7631_v21, 0.0 }
  0xd0   : > { %vm4101_vm9 = vcmp.eq.s32.totalorder %v8121_v39, 10  ;;  %v2727_v28 = vsel %vm2660_vm15, %v7581_v55, %v2596_v25  ;;  %v3513_v27 = vsel %vm3446_vm8, %v7616_v12, %v3382_v18  ;;  %v4037_v22 = vsel %vm3970_vm12, %v7640_v24, %v3906_v17 }
  0xd1   : > { %vm4232_vm0 = vcmp.eq.s32.totalorder %v8121_v39, 14  ;;  %v3644_v10 = vsel %vm3577_vm13, %v7622_v15, %v3513_v27  ;;  %v4168_v19 = vsel %vm4101_vm9, %v7650_v32, %v4037_v22  ;;  %vm4363_vm1 = vcmp.eq.s32.totalorder %v8121_v39, 18 }
  0xd2   : > { %vm4494_vm6 = vcmp.eq.s32.totalorder %v8121_v39, 22  ;;  %v3775_v49 = vsel %vm3708_vm11, %v7625_v16, %v3644_v10  ;;  %v4299_v25 = vsel %vm4232_vm0, %v7656_v40, %v4168_v19  ;;  %vm4625_vm5 = vcmp.eq.s32.totalorder %v8121_v39, 26 }
  0xd3   : > { %vm4756_vm15 = vcmp.eq.s32.totalorder %v8121_v39, 30  ;;  %v4430_v18 = vsel %vm4363_vm1, %v7663_v52, %v4299_v25  ;;  %vm4887_vm7 = vcmp.eq.s32.totalorder %v8121_v39, 3  ;;  %vm5018_vm4 = vcmp.eq.s32.totalorder %v8121_v39, 7 }
  0xd4   : > { %vm5149_vm14 = vcmp.eq.s32.totalorder %v8121_v39, 11  ;;  %v4561_v17 = vsel %vm4494_vm6, %v7666_v53, %v4430_v18  ;;  %v4954_v27 = vsel %vm4887_vm7, %v7679_v14, 0.0  ;;  %vm5280_vm2 = vcmp.eq.s32.totalorder %v8121_v39, 15 }
  0xd5   : > { %vm5411_vm3 = vcmp.eq.s32.totalorder %v8121_v39, 19  ;;  %v4692_v22 = vsel %vm4625_vm5, %v7671_v59, %v4561_v17  ;;  %v5085_v10 = vsel %vm5018_vm4, %v7684_v23, %v4954_v27  ;;  %vm5542_vm8 = vcmp.eq.s32.totalorder %v8121_v39, 23 }
  0xd6   : > { %vm5673_vm13 = vcmp.eq.s32.totalorder %v8121_v39, 27  ;;  %v4823_v19 = vsel %vm4756_vm15, %v7674_v63, %v4692_v22  ;;  %v5216_v25 = vsel %vm5149_vm14, %v7688_v26, %v5085_v10  ;;  %vm5804_vm11 = vcmp.eq.s32.totalorder %v8121_v39, 31 }
  0xd7   : > { %v5935_v18 = vadd.f32 %v3775_v49, %v2727_v28  ;;  %v5347_v33 = vsel %vm5280_vm2, %v7693_v57, %v5216_v25  ;;  %vm1744_vm10 = vcmp.eq.s32.totalorder %v8126_v37, 0  ;;  %vm1875_vm12 = vcmp.eq.s32.totalorder %v8126_v37, 4 }
  0xd8   : > { %vm2006_vm9 = vcmp.eq.s32.totalorder %v8126_v37, 8  ;;  %v5478_v17 = vsel %vm5411_vm3, %v7696_v58, %v5347_v33  ;;  %v1811_v31 = vsel %vm1744_vm10, %v7527_v35, 0.0  ;;  %vm2137_vm0 = vcmp.eq.s32.totalorder %v8126_v37, 12 }
  0xd9   : > { %v5999_v27 = vadd.f32 %v5935_v18, %v4823_v19  ;;  %v5609_v22 = vsel %vm5542_vm8, %v7699_v0, %v5478_v17  ;;  %v1942_v28 = vsel %vm1875_vm12, %v7539_v38, %v1811_v31  ;;  %vm2268_vm1 = vcmp.eq.s32.totalorder %v8126_v37, 16  ;;  %v6191_v19 = vld [vmem:[%s7432_s28 + $0x20] sm:$0xff] }
  0xda   : > { %vm2399_vm6 = vcmp.eq.s32.totalorder %v8126_v37, 20  ;;  %v5740_v49 = vsel %vm5673_vm13, %v7705_v9, %v5609_v22  ;;  %v2073_v10 = vsel %vm2006_vm9, %v7548_v42, %v1942_v28  ;;  %vm2530_vm5 = vcmp.eq.s32.totalorder %v8126_v37, 24 }
  0xdb   : > { %vm2661_vm15 = vcmp.eq.s32.totalorder %v8126_v37, 28  ;;  %v5871_v33 = vsel %vm5804_vm11, %v7714_v11, %v5740_v49  ;;  %v2204_v31 = vsel %vm2137_vm0, %v7551_v43, %v2073_v10  ;;  %vm2792_vm7 = vcmp.eq.s32.totalorder %v8126_v37, 1 }
  0xdc   : > { %vm2923_vm4 = vcmp.eq.s32.totalorder %v8126_v37, 5  ;;  %v8225_v25 = vadd.f32 %v5999_v27, %v5871_v33  ;;  %v2335_v18 = vsel %vm2268_vm1, %v7558_v46, %v2204_v31  ;;  %v2859_v17 = vsel %vm2792_vm7, %v7584_v56, 0.0 }
  0xdd   : > { %vm3054_vm14 = vcmp.eq.s32.totalorder %v8126_v37, 9  ;;  %v2466_v22 = vsel %vm2399_vm6, %v7561_v47, %v2335_v18  ;;  %v2990_v39 = vsel %vm2923_vm4, %v7589_v60, %v2859_v17  ;;  %vm3185_vm2 = vcmp.eq.s32.totalorder %v8126_v37, 13 }
  0xde   : > { %14329 = vst [vmem:[#allocation27_spill] sm:$0xff] %v8225_v25  ;;  %vm3316_vm3 = vcmp.eq.s32.totalorder %v8126_v37, 17  ;;  %v6383_v28 = vadd.f32 %v6191_v19, %v8225_v25  ;;  %v2597_v27 = vsel %vm2530_vm5, %v7572_v51, %v2466_v22  ;;  %v3121_v49 = vsel %vm3054_vm14, %v7592_v61, %v2990_v39 }
  0xdf   : > { %vm3447_vm8 = vcmp.eq.s32.totalorder %v8126_v37, 21  ;;  %v2728_v10 = vsel %vm2661_vm15, %v7581_v55, %v2597_v27  ;;  %v3252_v33 = vsel %vm3185_vm2, %v7599_v3, %v3121_v49  ;;  %vm3578_vm13 = vcmp.eq.s32.totalorder %v8126_v37, 25 }
  0xe0   : > { %vm3709_vm11 = vcmp.eq.s32.totalorder %v8126_v37, 29  ;;  %6511 = vst [vmem:[%s7867_s27 + $0x20] sm:$0xff] %v6383_v28  ;;  %v3383_v19 = vsel %vm3316_vm3, %v7605_v6, %v3252_v33  ;;  %vm3840_vm10 = vcmp.eq.s32.totalorder %v8126_v37, 2  ;;  %vm3971_vm12 = vcmp.eq.s32.totalorder %v8126_v37, 6 }
  0xe1   : > { %vm4102_vm9 = vcmp.eq.s32.totalorder %v8126_v37, 10  ;;  %v3514_v31 = vsel %vm3447_vm8, %v7616_v12, %v3383_v19  ;;  %v3907_v18 = vsel %vm3840_vm10, %v7631_v21, 0.0  ;;  %vm4233_vm0 = vcmp.eq.s32.totalorder %v8126_v37, 14 }
  0xe2   : > { %vm4364_vm1 = vcmp.eq.s32.totalorder %v8126_v37, 18  ;;  %v3645_v17 = vsel %vm3578_vm13, %v7622_v15, %v3514_v31  ;;  %v4038_v22 = vsel %vm3971_vm12, %v7640_v24, %v3907_v18  ;;  %vm4495_vm6 = vcmp.eq.s32.totalorder %v8126_v37, 22 }
  0xe3   : > { %vm4626_vm5 = vcmp.eq.s32.totalorder %v8126_v37, 26  ;;  %v3776_v39 = vsel %vm3709_vm11, %v7625_v16, %v3645_v17  ;;  %v4169_v28 = vsel %vm4102_vm9, %v7650_v32, %v4038_v22  ;;  %vm4757_vm15 = vcmp.eq.s32.totalorder %v8126_v37, 30 }
  0xe4   : > { %vm4888_vm7 = vcmp.eq.s32.totalorder %v8126_v37, 3  ;;  %v4300_v27 = vsel %vm4233_vm0, %v7656_v40, %v4169_v28  ;;  %vm5019_vm4 = vcmp.eq.s32.totalorder %v8126_v37, 7  ;;  %vm5150_vm14 = vcmp.eq.s32.totalorder %v8126_v37, 11 }
  0xe5   : > { %v4955_v49 = vsel %vm4888_vm7, %v7679_v14, 0.0  ;;  %v4431_v33 = vsel %vm4364_vm1, %v7663_v52, %v4300_v27  ;;  %vm5281_vm2 = vcmp.eq.s32.totalorder %v8126_v37, 15  ;;  %vm5412_vm3 = vcmp.eq.s32.totalorder %v8126_v37, 19 }
  0xe6   : > { %v5086_v19 = vsel %vm5019_vm4, %v7684_v23, %v4955_v49  ;;  %v4562_v31 = vsel %vm4495_vm6, %v7666_v53, %v4431_v33  ;;  %vm5543_vm8 = vcmp.eq.s32.totalorder %v8126_v37, 23  ;;  %vm5674_vm13 = vcmp.eq.s32.totalorder %v8126_v37, 27 }
  0xe7   : > { %v5217_v18 = vsel %vm5150_vm14, %v7688_v26, %v5086_v19  ;;  %v4693_v17 = vsel %vm4626_vm5, %v7671_v59, %v4562_v31  ;;  %vm5805_vm11 = vcmp.eq.s32.totalorder %v8126_v37, 31  ;;  %v5936_v28 = vadd.f32 %v3776_v39, %v2728_v10 }
  0xe8   : > { %v5348_v22 = vsel %vm5281_vm2, %v7693_v57, %v5217_v18  ;;  %v4824_v27 = vsel %vm4757_vm15, %v7674_v63, %v4693_v17  ;;  %v6866_v33 = vcvt.f32.s32 %v6865_v7  ;;  %v6868_v19 = vcvt.f32.s32 %v6867_v20  ;;  %v6192_v7 = vld [vmem:[%s7432_s28 + $0x28] sm:$0xff] }
  0xe9   : > { %v5479_v49 = vsel %vm5412_vm3, %v7696_v58, %v5348_v22  ;;  %v6000_v25 = vadd.f32 %v5936_v28, %v4824_v27  ;;  %v527_v18 = vmul.u32 16, %v8111_v50  ;;  %v14330_v10 = vsub.s32 %v7613_v8, %v7449_v4 }
  0xea   : > { %v5610_v31 = vsel %vm5543_vm8, %v7699_v0, %v5479_v49  ;;  %vm719_vm10 = vcmp.lt.s32.totalorder %v7578_v54, 8  ;;  %v1425_v17 = vadd.s32 8, %v6866_v33  ;;  %v1426_v22 = vadd.s32 8, %v6868_v19 }
  0xeb   : > { %v603_v39 = vsub.s32 0, %v14330_v10  ;;  %v5741_v37 = vsel %vm5674_vm13, %v7705_v9, %v5610_v31  ;;  %v978_v20 = vmul.f32 0.125, %v14331_v5  ;;  %v8301_v50 = vsub.s32 %v8132_v34, %v7443_v2 }
  0xec   : > { %v5872_v41 = vsel %vm5805_vm11, %v7714_v11, %v5741_v37  ;;  %vm1495_vm12 = vcmp.lt.s32.totalorder %v1425_v17, 15  ;;  %vm1497_vm9 = vcmp.lt.s32.totalorder %v1426_v22, 15  ;;  %v340_v27 = vsub.s32 %v8132_v34, %v7449_v4 }
  0xed   : > { %v914_v28 = vcvt.s32.f32 %v603_v39  ;;  %v8303_v8 = vadd.f32 %v6000_v25, %v5872_v41  ;;  %v1496_v49 = vsel %vm1495_vm12, %v1425_v17, 15  ;;  %v1498_v33 = vsel %vm1497_vm9, %v1426_v22, 15 }
  0xee   : > { %v1617_v36 = vsel %vm719_vm10, %v7578_v54, %v1496_v49  ;;  %7092 = vlog2.f32 %v978_v20  ;;  %v8314_v25 = vadd.s32 48, %v7441_v1  ;;  %v8317_v39 = vadd.s32 16, %v1498_v33 }
  0xef   : > { %14332 = vst [vmem:[#allocation28_spill] sm:$0xff] %v8303_v8  ;;  %v979_v19 = vmul.f32 0.125, %v914_v28  ;;  %v6384_v31 = vadd.f32 %v6192_v7, %v8303_v8  ;;  %v8311_v10 = vadd.s32 %v1617_v36, %v527_v18  ;;  %v605_v34 = vsub.s32 0, %v8301_v50 }
  0xf0   : > { %v8320_v37 = vsub.s32 0, %v340_v27  ;;  %vm1746_vm12 = vcmp.eq.s32.totalorder %v8317_v39, 0 }
  0xf1   : > { %6512 = vst [vmem:[%s7867_s27 + $0x28] sm:$0xff] %v6384_v31  ;;  %7094 = vlog2.f32 %v979_v19  ;;  %vm1745_vm0 = vcmp.eq.s32.totalorder %v8311_v10, 0  ;;  %vm1876_vm1 = vcmp.eq.s32.totalorder %v8311_v10, 4  ;;  %vm2007_vm6 = vcmp.eq.s32.totalorder %v8311_v10, 8 }
  0xf2   : > { %vm2138_vm5 = vcmp.eq.s32.totalorder %v8311_v10, 12  ;;  %v1812_v54 = vsel %vm1745_vm0, %v7527_v35, 0.0  ;;  %vm2269_vm15 = vcmp.eq.s32.totalorder %v8311_v10, 16  ;;  %vm2400_vm7 = vcmp.eq.s32.totalorder %v8311_v10, 20 }
  0xf3   : > { %vm2531_vm4 = vcmp.eq.s32.totalorder %v8311_v10, 24  ;;  %v1943_v18 = vsel %vm1876_vm1, %v7539_v38, %v1812_v54  ;;  %vm2662_vm14 = vcmp.eq.s32.totalorder %v8311_v10, 28  ;;  %vm2793_vm2 = vcmp.eq.s32.totalorder %v8311_v10, 1 }
  0xf4   : > { %vm2924_vm3 = vcmp.eq.s32.totalorder %v8311_v10, 5  ;;  %v2074_v17 = vsel %vm2007_vm6, %v7548_v42, %v1943_v18  ;;  %v2860_v22 = vsel %vm2793_vm2, %v7584_v56, 0.0  ;;  %vm3055_vm8 = vcmp.eq.s32.totalorder %v8311_v10, 9 }
  0xf5   : > { %vm3186_vm13 = vcmp.eq.s32.totalorder %v8311_v10, 13  ;;  %v2205_v41 = vsel %vm2138_vm5, %v7551_v43, %v2074_v17  ;;  %v2991_v7 = vsel %vm2924_vm3, %v7589_v60, %v2860_v22  ;;  %vm3317_vm11 = vcmp.eq.s32.totalorder %v8311_v10, 17 }
  0xf6   : > { %vm3448_vm10 = vcmp.eq.s32.totalorder %v8311_v10, 21  ;;  %v2336_v5 = vsel %vm2269_vm15, %v7558_v46, %v2205_v41  ;;  %v3122_v20 = vsel %vm3055_vm8, %v7592_v61, %v2991_v7  ;;  %vm3579_vm9 = vcmp.eq.s32.totalorder %v8311_v10, 25 }
  0xf7   : > { %vm3710_vm0 = vcmp.eq.s32.totalorder %v8311_v10, 29  ;;  %vm1877_vm1 = vcmp.eq.s32.totalorder %v8317_v39, 4  ;;  %v2467_v28 = vsel %vm2400_vm7, %v7561_v47, %v2336_v5  ;;  %v3253_v27 = vsel %vm3186_vm13, %v7599_v3, %v3122_v20 }
  0xf8   : > { %vm3841_vm6 = vcmp.eq.s32.totalorder %v8311_v10, 2  ;;  %vm3972_vm5 = vcmp.eq.s32.totalorder %v8311_v10, 6  ;;  %vm2008_vm15 = vcmp.eq.s32.totalorder %v8317_v39, 8  ;;  %v2598_v49 = vsel %vm2531_vm4, %v7572_v51, %v2467_v28  ;;  %v8364_v31 = vpop.eup %7092 }
  0xf9   : > { %v3384_v33 = vsel %vm3317_vm11, %v7605_v6, %v3253_v27  ;;  %v3908_v19 = vsel %vm3841_vm6, %v7631_v21, 0.0  ;;  %vm4103_vm2 = vcmp.eq.s32.totalorder %v8311_v10, 10  ;;  %vm2139_vm7 = vcmp.eq.s32.totalorder %v8317_v39, 12 }
  0xfa   : > { %v2729_v36 = vsel %vm2662_vm14, %v7581_v55, %v2598_v49  ;;  %v3515_v54 = vsel %vm3448_vm10, %v7616_v12, %v3384_v33  ;;  %v4039_v18 = vsel %vm3972_vm5, %v7640_v24, %v3908_v19  ;;  %vm4234_vm4 = vcmp.eq.s32.totalorder %v8311_v10, 14 }
  0xfb   : > { %v8374_v17 = vpop.eup %7094  ;;  %v3646_v22 = vsel %vm3579_vm9, %v7622_v15, %v3515_v54  ;;  %v4170_v41 = vsel %vm4103_vm2, %v7650_v32, %v4039_v18  ;;  %vm4365_vm3 = vcmp.eq.s32.totalorder %v8311_v10, 18  ;;  %vm4496_vm14 = vcmp.eq.s32.totalorder %v8311_v10, 22 }
  0xfc   : > { %v3777_v7 = vsel %vm3710_vm0, %v7625_v16, %v3646_v22  ;;  %v4301_v5 = vsel %vm4234_vm4, %v7656_v40, %v4170_v41  ;;  %vm4627_vm8 = vcmp.eq.s32.totalorder %v8311_v10, 26  ;;  %vm4758_vm13 = vcmp.eq.s32.totalorder %v8311_v10, 30 }
  0xfd   : > { %v4432_v20 = vsel %vm4365_vm3, %v7663_v52, %v4301_v5  ;;  %vm4889_vm11 = vcmp.eq.s32.totalorder %v8311_v10, 3  ;;  %vm5020_vm10 = vcmp.eq.s32.totalorder %v8311_v10, 7  ;;  %vm5151_vm9 = vcmp.eq.s32.totalorder %v8311_v10, 11 }
  0xfe   : > { %v4563_v28 = vsel %vm4496_vm14, %v7666_v53, %v4432_v20  ;;  %v4956_v27 = vsel %vm4889_vm11, %v7679_v14, 0.0  ;;  %vm5282_vm0 = vcmp.eq.s32.totalorder %v8311_v10, 15  ;;  %vm5413_vm6 = vcmp.eq.s32.totalorder %v8311_v10, 19 }
  0xff   : > { %v4694_v49 = vsel %vm4627_vm8, %v7671_v59, %v4563_v28  ;;  %v5087_v33 = vsel %vm5020_vm10, %v7684_v23, %v4956_v27  ;;  %vm5544_vm5 = vcmp.eq.s32.totalorder %v8311_v10, 23  ;;  %vm5675_vm2 = vcmp.eq.s32.totalorder %v8311_v10, 27 }
 0x100   : > { %v4825_v19 = vsel %vm4758_vm13, %v7674_v63, %v4694_v49  ;;  %v5218_v54 = vsel %vm5151_vm9, %v7688_v26, %v5087_v33  ;;  %vm5806_vm4 = vcmp.eq.s32.totalorder %v8311_v10, 31  ;;  %v5937_v18 = vadd.f32 %v3777_v7, %v2729_v36 }
 0x101   : > { %v5349_v22 = vsel %vm5282_vm0, %v7693_v57, %v5218_v54  ;;  %v1813_v41 = vsel %vm1746_vm12, %v7527_v35, 0.0  ;;  %vm2270_vm3 = vcmp.eq.s32.totalorder %v8317_v39, 16  ;;  %vm2401_vm14 = vcmp.eq.s32.totalorder %v8317_v39, 20  ;;  %v6193_v54 = vld [vmem:[%s7432_s28 + $0x30] sm:$0xff] }
 0x102   : > { %v5480_v5 = vsel %vm5413_vm6, %v7696_v58, %v5349_v22  ;;  %v6001_v20 = vadd.f32 %v5937_v18, %v4825_v19  ;;  %v1944_v28 = vsel %vm1877_vm1, %v7539_v38, %v1813_v41  ;;  %vm2532_vm8 = vcmp.eq.s32.totalorder %v8317_v39, 24 }
 0x103   : > { %v5611_v36 = vsel %vm5544_vm5, %v7699_v0, %v5480_v5  ;;  %v2075_v7 = vsel %vm2008_vm15, %v7548_v42, %v1944_v28  ;;  %vm2663_vm12 = vcmp.eq.s32.totalorder %v8317_v39, 28  ;;  %vm2794_vm13 = vcmp.eq.s32.totalorder %v8317_v39, 1 }
 0x104   : > { %v5742_v27 = vsel %vm5675_vm2, %v7705_v9, %v5611_v36  ;;  %v2206_v49 = vsel %vm2139_vm7, %v7551_v43, %v2075_v7  ;;  %v2861_v33 = vsel %vm2794_vm13, %v7584_v56, 0.0  ;;  %vm2925_vm1 = vcmp.eq.s32.totalorder %v8317_v39, 5 }
 0x105   : > { %v5873_v19 = vsel %vm5806_vm4, %v7714_v11, %v5742_v27  ;;  %v2337_v18 = vsel %vm2270_vm3, %v7558_v46, %v2206_v49  ;;  %v2992_v22 = vsel %vm2925_vm1, %v7589_v60, %v2861_v33  ;;  %vm3056_vm15 = vcmp.eq.s32.totalorder %v8317_v39, 9 }
 0x106   : > { %v8437_v41 = vadd.f32 %v6001_v20, %v5873_v19  ;;  %v2468_v5 = vsel %vm2401_vm14, %v7561_v47, %v2337_v18  ;;  %v3123_v28 = vsel %vm3056_vm15, %v7592_v61, %v2992_v22  ;;  %vm3187_vm7 = vcmp.eq.s32.totalorder %v8317_v39, 13 }
 0x107   : > { %v2599_v10 = vsel %vm2532_vm8, %v7572_v51, %v2468_v5  ;;  %v3254_v36 = vsel %vm3187_vm7, %v7599_v3, %v3123_v28  ;;  %vm3318_vm11 = vcmp.eq.s32.totalorder %v8317_v39, 17  ;;  %vm3449_vm10 = vcmp.eq.s32.totalorder %v8317_v39, 21 }
 0x108   : > { %14333 = vst [vmem:[#allocation29_spill] sm:$0xff] %v8437_v41  ;;  %v6385_v20 = vadd.f32 %v6193_v54, %v8437_v41  ;;  %v2730_v7 = vsel %vm2663_vm12, %v7581_v55, %v2599_v10  ;;  %v3385_v27 = vsel %vm3318_vm11, %v7605_v6, %v3254_v36  ;;  %vm3580_vm9 = vcmp.eq.s32.totalorder %v8317_v39, 25 }
 0x109   : > { %v3516_v49 = vsel %vm3449_vm10, %v7616_v12, %v3385_v27  ;;  %vm3711_vm0 = vcmp.eq.s32.totalorder %v8317_v39, 29  ;;  %vm3842_vm6 = vcmp.eq.s32.totalorder %v8317_v39, 2  ;;  %vm3973_vm5 = vcmp.eq.s32.totalorder %v8317_v39, 6 }
 0x10a   : > { %6513 = vst [vmem:[%s7867_s27 + $0x30] sm:$0xff] %v6385_v20  ;;  %v3647_v33 = vsel %vm3580_vm9, %v7622_v15, %v3516_v49  ;;  %v3909_v19 = vsel %vm3842_vm6, %v7631_v21, 0.0  ;;  %vm4104_vm2 = vcmp.eq.s32.totalorder %v8317_v39, 10  ;;  %vm4235_vm4 = vcmp.eq.s32.totalorder %v8317_v39, 14 }
 0x10b   : > { %v3778_v54 = vsel %vm3711_vm0, %v7625_v16, %v3647_v33  ;;  %v4040_v18 = vsel %vm3973_vm5, %v7640_v24, %v3909_v19  ;;  %vm4366_vm3 = vcmp.eq.s32.totalorder %v8317_v39, 18  ;;  %vm4497_vm14 = vcmp.eq.s32.totalorder %v8317_v39, 22 }
 0x10c   : > { %v4171_v22 = vsel %vm4104_vm2, %v7650_v32, %v4040_v18  ;;  %vm4628_vm8 = vcmp.eq.s32.totalorder %v8317_v39, 26  ;;  %vm4759_vm12 = vcmp.eq.s32.totalorder %v8317_v39, 30  ;;  %vm4890_vm13 = vcmp.eq.s32.totalorder %v8317_v39, 3 }
 0x10d   : > { %v4302_v5 = vsel %vm4235_vm4, %v7656_v40, %v4171_v22  ;;  %v4957_v28 = vsel %vm4890_vm13, %v7679_v14, 0.0  ;;  %vm5021_vm1 = vcmp.eq.s32.totalorder %v8317_v39, 7  ;;  %vm5152_vm15 = vcmp.eq.s32.totalorder %v8317_v39, 11 }
 0x10e   : > { %v4433_v10 = vsel %vm4366_vm3, %v7663_v52, %v4302_v5  ;;  %v5088_v36 = vsel %vm5021_vm1, %v7684_v23, %v4957_v28  ;;  %vm5283_vm7 = vcmp.eq.s32.totalorder %v8317_v39, 15  ;;  %vm5414_vm11 = vcmp.eq.s32.totalorder %v8317_v39, 19 }
 0x10f   : > { %v4564_v20 = vsel %vm4497_vm14, %v7666_v53, %v4433_v10  ;;  %v5219_v27 = vsel %vm5152_vm15, %v7688_v26, %v5088_v36  ;;  %vm5545_vm10 = vcmp.eq.s32.totalorder %v8317_v39, 23  ;;  %vm5676_vm9 = vcmp.eq.s32.totalorder %v8317_v39, 27 }
 0x110   : > { %v4695_v49 = vsel %vm4628_vm8, %v7671_v59, %v4564_v20  ;;  %v5350_v33 = vsel %vm5283_vm7, %v7693_v57, %v5219_v27  ;;  %vm5807_vm0 = vcmp.eq.s32.totalorder %v8317_v39, 31  ;;  %v5938_v19 = vadd.f32 %v3778_v54, %v2730_v7 }
 0x111   : > { %v4826_v18 = vsel %vm4759_vm12, %v7674_v63, %v4695_v49  ;;  %v5481_v22 = vsel %vm5414_vm11, %v7696_v58, %v5350_v33  ;;  %v1051_v5 = vmul.f32 0.6931472, %v8364_v31  ;;  %v1053_v28 = vmul.f32 0.6931472, %v8374_v17  ;;  %v6194_v17 = vld [vmem:[%s7432_s28 + $0x38] sm:$0xff] }
 0x112   : > { %v5612_v10 = vsel %vm5545_vm10, %v7699_v0, %v5481_v22  ;;  %v6002_v36 = vadd.f32 %v5938_v19, %v4826_v18  ;;  %v8498_v20 = vmin.u32 %v605_v34, %v8301_v50  ;;  %v916_v7 = vcvt.s32.f32 %v8320_v37 }
 0x113   : > { %v5743_v54 = vsel %vm5676_vm9, %v7705_v9, %v5612_v10  ;;  %v1171_v39 = vmul.f32 0.36067376, %v1051_v5  ;;  %v1172_v27 = vmul.f32 0.36067376, %v1053_v28  ;;  %v8504_v49 = vsub.s32 %v8314_v25, %v7443_v2 }
 0x114   : > { %v5874_v31 = vsel %vm5807_vm0, %v7714_v11, %v5743_v54  ;;  %vm797_vm6 = vcmp.gt.s32.totalorder %v8498_v20, 1  ;;  %v981_v33 = vmul.f32 0.125, %v916_v7  ;;  %vm401_vm5 = vcmp.lt.s32.totalorder %v7647_v29, 0 }
 0x115   : > { %v8509_v19 = vadd.f32 %v6002_v36, %v5874_v31  ;;  %v1235_v34 = vmul.f32 8.0, %v1171_v39  ;;  %v1236_v18 = vmul.f32 8.0, %v1172_v27  ;;  %v798_v37 = vsel %vm797_vm6, %v8498_v20, 1 }
 0x116   : > { %7096 = vlog2.f32 %v981_v33  ;;  %v609_v22 = vsub.s32 0, %v8504_v49  ;;  %v342_v36 = vsub.s32 %v8314_v25, %v7449_v4  ;;  %v915_v27 = vcvt.s32.f32 %v798_v37 }
 0x117   : > { %14334 = vst [vmem:[#allocation30_spill] sm:$0xff] %v8509_v19  ;;  %v6386_v5 = vadd.f32 %v6194_v17, %v8509_v19  ;;  %v1299_v28 = vadd.f32 0.0001, %v1235_v34  ;;  %v1300_v10 = vadd.f32 0.0001, %v1236_v18  ;;  %v264_v31 = vadd.s32 56, %v7441_v1 }
 0x118   : > { %v8516_v54 = vmin.u32 %v609_v22, %v8504_v49  ;;  %v465_v33 = vsel %vm401_vm5, 1, %v14327_v13  ;;  %v611_v17 = vsub.s32 0, %v342_v36  ;;  %vm721_vm4 = vcmp.lt.s32.totalorder %v7917_v44, 8 }
 0x119   : > { %6514 = vst [vmem:[%s7867_s27 + $0x38] sm:$0xff] %v6386_v5  ;;  %v6869_v7 = vtrunc.f32 %v1299_v28  ;;  %v6871_v39 = vtrunc.f32 %v1300_v10  ;;  %v8526_v22 = vsub.s32 %v264_v31, %v7443_v2  ;;  %v344_v5 = vsub.s32 %v264_v31, %v7449_v4 }
 0x11a   : > { %vm801_vm2 = vcmp.gt.s32.totalorder %v8516_v54, 1  ;;  %v918_v25 = vcvt.s32.f32 %v611_v17  ;;  %v980_v10 = vmul.f32 0.125, %v915_v27  ;;  %v529_v41 = vmul.u32 16, %v465_v33 }
 0x11b   : > { %v6870_v29 = vcvt.f32.s32 %v6869_v7  ;;  %v6872_v34 = vcvt.f32.s32 %v6871_v39  ;;  %v802_v18 = vsel %vm801_vm2, %v8516_v54, 1  ;;  %v613_v36 = vsub.s32 0, %v8526_v22 }
 0x11c   : > { %v917_v19 = vcvt.s32.f32 %v802_v18  ;;  %v615_v7 = vsub.s32 0, %v344_v5  ;;  %v983_v39 = vmul.f32 0.125, %v918_v25  ;;  %7098 = vlog2.f32 %v980_v10 }
 0x11d   : > { %v1427_v37 = vadd.s32 8, %v6870_v29  ;;  %v1428_v28 = vadd.s32 8, %v6872_v34  ;;  %v8535_v27 = vmin.u32 %v613_v36, %v8526_v22 }
 0x11e   : > { %v982_v8 = vmul.f32 0.125, %v917_v19  ;;  %v920_v18 = vcvt.s32.f32 %v615_v7  ;;  %v8538_v19 = vadd.s32 64, %v7441_v1 }
 0x11f   : > { %vm1499_vm3 = vcmp.lt.s32.totalorder %v1427_v37, 15  ;;  %vm1501_vm14 = vcmp.lt.s32.totalorder %v1428_v28, 15 }
 0x120   : > { %v7097_v45 = vpop.eup %7096  ;;  %v1500_v30 = vsel %vm1499_vm3, %v1427_v37, 15  ;;  %v1502_v48 = vsel %vm1501_vm14, %v1428_v28, 15  ;;  %7100 = vlog2.f32 %v982_v8  ;;  %v8544_v34 = vmul.f32 0.125, %v920_v18 }
 0x121   : > { %v1619_v17 = vsel %vm721_vm4, %v7917_v44, %v1500_v30  ;;  %v8540_v33 = vadd.s32 16, %v1502_v48  ;;  %v8542_v29 = vmul.f32 0.6931472, %v7097_v45  ;;  %7102 = vlog2.f32 %v983_v39 }
 0x122   : > { %v8532_v31 = vadd.s32 %v1619_v17, %v529_v41  ;;  %7104 = vlog2.f32 %v8544_v34 }
 0x123   : > { %vm1748_vm3 = vcmp.eq.s32.totalorder %v8540_v33, 0 }
 0x124   : > { %vm1747_vm8 = vcmp.eq.s32.totalorder %v8532_v31, 0  ;;  %vm1878_vm12 = vcmp.eq.s32.totalorder %v8532_v31, 4  ;;  %vm2009_vm13 = vcmp.eq.s32.totalorder %v8532_v31, 8  ;;  %vm2140_vm1 = vcmp.eq.s32.totalorder %v8532_v31, 12 }
 0x125   : > { %v1814_v44 = vsel %vm1747_vm8, %v7527_v35, 0.0  ;;  %vm2271_vm15 = vcmp.eq.s32.totalorder %v8532_v31, 16  ;;  %vm2402_vm7 = vcmp.eq.s32.totalorder %v8532_v31, 20  ;;  %vm2533_vm11 = vcmp.eq.s32.totalorder %v8532_v31, 24 }
 0x126   : > { %v1945_v48 = vsel %vm1878_vm12, %v7539_v38, %v1814_v44  ;;  %vm2664_vm10 = vcmp.eq.s32.totalorder %v8532_v31, 28  ;;  %vm2795_vm9 = vcmp.eq.s32.totalorder %v8532_v31, 1  ;;  %vm2926_vm0 = vcmp.eq.s32.totalorder %v8532_v31, 5  ;;  %v8581_v10 = vpop.eup %7098 }
 0x127   : > { %v2076_v30 = vsel %vm2009_vm13, %v7548_v42, %v1945_v48  ;;  %v2862_v45 = vsel %vm2795_vm9, %v7584_v56, 0.0  ;;  %vm3057_vm6 = vcmp.eq.s32.totalorder %v8532_v31, 9  ;;  %vm3188_vm5 = vcmp.eq.s32.totalorder %v8532_v31, 13 }
 0x128   : > { %v2207_v8 = vsel %vm2140_vm1, %v7551_v43, %v2076_v30  ;;  %v2993_v41 = vsel %vm2926_vm0, %v7589_v60, %v2862_v45  ;;  %vm3319_vm2 = vcmp.eq.s32.totalorder %v8532_v31, 17  ;;  %vm3450_vm4 = vcmp.eq.s32.totalorder %v8532_v31, 21 }
 0x129   : > { %v2338_v25 = vsel %vm2271_vm15, %v7558_v46, %v2207_v8  ;;  %v3124_v5 = vsel %vm3057_vm6, %v7592_v61, %v2993_v41  ;;  %vm3581_vm14 = vcmp.eq.s32.totalorder %v8532_v31, 25  ;;  %vm3712_vm8 = vcmp.eq.s32.totalorder %v8532_v31, 29 }
 0x12a   : > { %vm1879_vm12 = vcmp.eq.s32.totalorder %v8540_v33, 4  ;;  %v2469_v37 = vsel %vm2402_vm7, %v7561_v47, %v2338_v25  ;;  %v3255_v28 = vsel %vm3188_vm5, %v7599_v3, %v3124_v5  ;;  %vm3843_vm13 = vcmp.eq.s32.totalorder %v8532_v31, 2  ;;  %v8590_v18 = vpop.eup %7100 }
 0x12b   : > { %vm3974_vm1 = vcmp.eq.s32.totalorder %v8532_v31, 6  ;;  %vm2010_vm15 = vcmp.eq.s32.totalorder %v8540_v33, 8  ;;  %v2600_v36 = vsel %vm2533_vm11, %v7572_v51, %v2469_v37  ;;  %v3386_v7 = vsel %vm3319_vm2, %v7605_v6, %v3255_v28  ;;  %v8600_v30 = vpop.eup %7102 }
 0x12c   : > { %v3910_v39 = vsel %vm3843_vm13, %v7631_v21, 0.0  ;;  %vm4105_vm7 = vcmp.eq.s32.totalorder %v8532_v31, 10  ;;  %vm2141_vm9 = vcmp.eq.s32.totalorder %v8540_v33, 12  ;;  %v2731_v17 = vsel %vm2664_vm10, %v7581_v55, %v2600_v36 }
 0x12d   : > { %v3517_v44 = vsel %vm3450_vm4, %v7616_v12, %v3386_v7  ;;  %v4041_v48 = vsel %vm3974_vm1, %v7640_v24, %v3910_v39  ;;  %vm4236_vm11 = vcmp.eq.s32.totalorder %v8532_v31, 14  ;;  %vm4367_vm0 = vcmp.eq.s32.totalorder %v8532_v31, 18 }
 0x12e   : > { %v3648_v45 = vsel %vm3581_vm14, %v7622_v15, %v3517_v44  ;;  %v4172_v8 = vsel %vm4105_vm7, %v7650_v32, %v4041_v48  ;;  %vm4498_vm10 = vcmp.eq.s32.totalorder %v8532_v31, 22  ;;  %vm4629_vm6 = vcmp.eq.s32.totalorder %v8532_v31, 26 }
 0x12f   : > { %v3779_v41 = vsel %vm3712_vm8, %v7625_v16, %v3648_v45  ;;  %v4303_v25 = vsel %vm4236_vm11, %v7656_v40, %v4172_v8  ;;  %vm4760_vm5 = vcmp.eq.s32.totalorder %v8532_v31, 30  ;;  %vm4891_vm2 = vcmp.eq.s32.totalorder %v8532_v31, 3 }
 0x130   : > { %v4434_v5 = vsel %vm4367_vm0, %v7663_v52, %v4303_v25  ;;  %vm5022_vm4 = vcmp.eq.s32.totalorder %v8532_v31, 7  ;;  %vm5153_vm14 = vcmp.eq.s32.totalorder %v8532_v31, 11  ;;  %v4958_v28 = vsel %vm4891_vm2, %v7679_v14, 0.0 }
 0x131   : > { %v4565_v37 = vsel %vm4498_vm10, %v7666_v53, %v4434_v5  ;;  %vm5284_vm8 = vcmp.eq.s32.totalorder %v8532_v31, 15  ;;  %vm5415_vm13 = vcmp.eq.s32.totalorder %v8532_v31, 19  ;;  %v5089_v7 = vsel %vm5022_vm4, %v7684_v23, %v4958_v28 }
 0x132   : > { %v4696_v36 = vsel %vm4629_vm6, %v7671_v59, %v4565_v37  ;;  %vm5546_vm1 = vcmp.eq.s32.totalorder %v8532_v31, 23  ;;  %vm5677_vm7 = vcmp.eq.s32.totalorder %v8532_v31, 27  ;;  %v5220_v44 = vsel %vm5153_vm14, %v7688_v26, %v5089_v7 }
 0x133   : > { %v4827_v39 = vsel %vm4760_vm5, %v7674_v63, %v4696_v36  ;;  %vm5808_vm11 = vcmp.eq.s32.totalorder %v8532_v31, 31  ;;  %v5939_v48 = vadd.f32 %v3779_v41, %v2731_v17  ;;  %v5351_v45 = vsel %vm5284_vm8, %v7693_v57, %v5220_v44  ;;  %v6195_v44 = vld [vmem:[%s7432_s28 + $0x40] sm:$0xff] }
 0x134   : > { %v1815_v8 = vsel %vm1748_vm3, %v7527_v35, 0.0  ;;  %vm2272_vm0 = vcmp.eq.s32.totalorder %v8540_v33, 16  ;;  %vm2403_vm10 = vcmp.eq.s32.totalorder %v8540_v33, 20  ;;  %v5482_v25 = vsel %vm5415_vm13, %v7696_v58, %v5351_v45 }
 0x135   : > { %v6003_v5 = vadd.f32 %v5939_v48, %v4827_v39  ;;  %v1946_v37 = vsel %vm1879_vm12, %v7539_v38, %v1815_v8  ;;  %vm2534_vm6 = vcmp.eq.s32.totalorder %v8540_v33, 24  ;;  %v5613_v17 = vsel %vm5546_vm1, %v7699_v0, %v5482_v25 }
 0x136   : > { %v2077_v41 = vsel %vm2010_vm15, %v7548_v42, %v1946_v37  ;;  %vm2665_vm3 = vcmp.eq.s32.totalorder %v8540_v33, 28  ;;  %vm2796_vm5 = vcmp.eq.s32.totalorder %v8540_v33, 1  ;;  %v5744_v28 = vsel %vm5677_vm7, %v7705_v9, %v5613_v17 }
 0x137   : > { %v2208_v36 = vsel %vm2141_vm9, %v7551_v43, %v2077_v41  ;;  %v2863_v7 = vsel %vm2796_vm5, %v7584_v56, 0.0  ;;  %vm2927_vm12 = vcmp.eq.s32.totalorder %v8540_v33, 5  ;;  %v5875_v39 = vsel %vm5808_vm11, %v7714_v11, %v5744_v28 }
 0x138   : > { %v2339_v48 = vsel %vm2272_vm0, %v7558_v46, %v2208_v36  ;;  %v2994_v45 = vsel %vm2927_vm12, %v7589_v60, %v2863_v7  ;;  %vm3058_vm15 = vcmp.eq.s32.totalorder %v8540_v33, 9  ;;  %v8663_v8 = vadd.f32 %v6003_v5, %v5875_v39 }
 0x139   : > { %v2470_v25 = vsel %vm2403_vm10, %v7561_v47, %v2339_v48  ;;  %v3125_v37 = vsel %vm3058_vm15, %v7592_v61, %v2994_v45  ;;  %vm3189_vm9 = vcmp.eq.s32.totalorder %v8540_v33, 13  ;;  %vm3320_vm2 = vcmp.eq.s32.totalorder %v8540_v33, 17 }
 0x13a   : > { %14335 = vst [vmem:[#allocation31_spill] sm:$0xff] %v8663_v8  ;;  %v2601_v31 = vsel %vm2534_vm6, %v7572_v51, %v2470_v25  ;;  %v3256_v17 = vsel %vm3189_vm9, %v7599_v3, %v3125_v37  ;;  %vm3451_vm4 = vcmp.eq.s32.totalorder %v8540_v33, 21  ;;  %v6387_v5 = vadd.f32 %v6195_v44, %v8663_v8 }
 0x13b   : > { %v2732_v41 = vsel %vm2665_vm3, %v7581_v55, %v2601_v31  ;;  %v3387_v28 = vsel %vm3320_vm2, %v7605_v6, %v3256_v17  ;;  %vm3582_vm14 = vcmp.eq.s32.totalorder %v8540_v33, 25  ;;  %vm3713_vm8 = vcmp.eq.s32.totalorder %v8540_v33, 29 }
 0x13c   : > { %v3518_v36 = vsel %vm3451_vm4, %v7616_v12, %v3387_v28  ;;  %vm3844_vm13 = vcmp.eq.s32.totalorder %v8540_v33, 2  ;;  %vm3975_vm1 = vcmp.eq.s32.totalorder %v8540_v33, 6  ;;  %6515 = vst [vmem:[%s7867_s27 + $0x40] sm:$0xff] %v6387_v5  ;;  %vm4106_vm7 = vcmp.eq.s32.totalorder %v8540_v33, 10 }
 0x13d   : > { %v3649_v7 = vsel %vm3582_vm14, %v7622_v15, %v3518_v36  ;;  %v3911_v39 = vsel %vm3844_vm13, %v7631_v21, 0.0  ;;  %vm4237_vm11 = vcmp.eq.s32.totalorder %v8540_v33, 14  ;;  %vm805_vm0 = vcmp.gt.s32.totalorder %v8535_v27, 1 }
 0x13e   : > { %v3780_v44 = vsel %vm3713_vm8, %v7625_v16, %v3649_v7  ;;  %v4042_v48 = vsel %vm3975_vm1, %v7640_v24, %v3911_v39  ;;  %vm4368_vm10 = vcmp.eq.s32.totalorder %v8540_v33, 18  ;;  %vm4499_vm6 = vcmp.eq.s32.totalorder %v8540_v33, 22 }
 0x13f   : > { %v4173_v45 = vsel %vm4106_vm7, %v7650_v32, %v4042_v48  ;;  %vm4630_vm3 = vcmp.eq.s32.totalorder %v8540_v33, 26  ;;  %vm4761_vm5 = vcmp.eq.s32.totalorder %v8540_v33, 30  ;;  %vm4892_vm12 = vcmp.eq.s32.totalorder %v8540_v33, 3 }
 0x140   : > { %v4304_v25 = vsel %vm4237_vm11, %v7656_v40, %v4173_v45  ;;  %v4959_v37 = vsel %vm4892_vm12, %v7679_v14, 0.0  ;;  %vm5023_vm15 = vcmp.eq.s32.totalorder %v8540_v33, 7  ;;  %vm5154_vm9 = vcmp.eq.s32.totalorder %v8540_v33, 11 }
 0x141   : > { %v4435_v31 = vsel %vm4368_vm10, %v7663_v52, %v4304_v25  ;;  %v5090_v17 = vsel %vm5023_vm15, %v7684_v23, %v4959_v37  ;;  %vm5285_vm2 = vcmp.eq.s32.totalorder %v8540_v33, 15  ;;  %vm5416_vm4 = vcmp.eq.s32.totalorder %v8540_v33, 19 }
 0x142   : > { %v4566_v5 = vsel %vm4499_vm6, %v7666_v53, %v4435_v31  ;;  %v5221_v28 = vsel %vm5154_vm9, %v7688_v26, %v5090_v17  ;;  %vm5547_vm14 = vcmp.eq.s32.totalorder %v8540_v33, 23  ;;  %vm5678_vm8 = vcmp.eq.s32.totalorder %v8540_v33, 27 }
 0x143   : > { %v4697_v36 = vsel %vm4630_vm3, %v7671_v59, %v4566_v5  ;;  %v5352_v7 = vsel %vm5285_vm2, %v7693_v57, %v5221_v28  ;;  %vm5809_vm13 = vcmp.eq.s32.totalorder %v8540_v33, 31  ;;  %v5940_v39 = vadd.f32 %v3780_v44, %v2732_v41 }
 0x144   : > { %v4828_v48 = vsel %vm4761_vm5, %v7674_v63, %v4697_v36  ;;  %v5483_v45 = vsel %vm5416_vm4, %v7696_v58, %v5352_v7  ;;  %v1055_v25 = vmul.f32 0.6931472, %v8581_v10  ;;  %v1174_v37 = vmul.f32 0.36067376, %v8542_v29  ;;  %v6196_v36 = vld [vmem:[%s7432_s28 + $0x48] sm:$0xff] }
 0x145   : > { %v5614_v31 = vsel %vm5547_vm14, %v7699_v0, %v5483_v45  ;;  %v6004_v17 = vadd.f32 %v5940_v39, %v4828_v48  ;;  %v1059_v5 = vmul.f32 0.6931472, %v8590_v18  ;;  %v1061_v28 = vmul.f32 0.6931472, %v8600_v30 }
 0x146   : > { %v5745_v8 = vsel %vm5678_vm8, %v7705_v9, %v5614_v31  ;;  %vm403_vm1 = vcmp.lt.s32.totalorder %v8301_v50, 0  ;;  %v1173_v41 = vmul.f32 0.36067376, %v1055_v25  ;;  %v1238_v33 = vmul.f32 8.0, %v1174_v37 }
 0x147   : > { %v5876_v44 = vsel %vm5809_vm13, %v7714_v11, %v5745_v8  ;;  %v1175_v7 = vmul.f32 0.36067376, %v1059_v5  ;;  %v1176_v10 = vmul.f32 0.36067376, %v1061_v28  ;;  %v8730_v29 = vsub.s32 %v8538_v19, %v7443_v2 }
 0x148   : > { %v8732_v39 = vadd.f32 %v6004_v17, %v5876_v44  ;;  %v1237_v18 = vmul.f32 8.0, %v1173_v41  ;;  %v1302_v30 = vadd.f32 0.0001, %v1238_v33  ;;  %v806_v48 = vsel %vm805_vm0, %v8535_v27, 1 }
 0x149   : > { %v1239_v45 = vmul.f32 8.0, %v1175_v7  ;;  %v1240_v25 = vmul.f32 8.0, %v1176_v10  ;;  %v467_v5 = vsel %vm403_vm1, 1, %v14327_v13  ;;  %v919_v41 = vcvt.s32.f32 %v806_v48 }
 0x14a   : > { %14336 = vst [vmem:[#allocation32_spill] sm:$0xff] %v8732_v39  ;;  %v6388_v8 = vadd.f32 %v6196_v36, %v8732_v39  ;;  %v1301_v37 = vadd.f32 0.0001, %v1237_v18  ;;  %v6875_v31 = vtrunc.f32 %v1302_v30  ;;  %vm405_vm7 = vcmp.lt.s32.totalorder %v8504_v49, 0 }
 0x14b   : > { %v1303_v17 = vadd.f32 0.0001, %v1239_v45  ;;  %v1304_v28 = vadd.f32 0.0001, %v1240_v25  ;;  %v617_v7 = vsub.s32 0, %v8730_v29  ;;  %v531_v30 = vmul.u32 16, %v467_v5 }
 0x14c   : > { %6516 = vst [vmem:[%s7867_s27 + $0x48] sm:$0xff] %v6388_v8  ;;  %v6873_v33 = vtrunc.f32 %v1301_v37  ;;  %v6876_v44 = vcvt.f32.s32 %v6875_v31  ;;  %v8749_v50 = vsel %vm405_vm7, 1, %v14327_v13  ;;  %v984_v45 = vmul.f32 0.125, %v919_v41 }
 0x14d   : > { %v6877_v10 = vtrunc.f32 %v1303_v17  ;;  %v6879_v36 = vtrunc.f32 %v1304_v28  ;;  %v8746_v18 = vmin.u32 %v617_v7, %v8730_v29  ;;  %v346_v49 = vsub.s32 %v8538_v19, %v7449_v4  ;;  %v7105_v17 = vpop.eup %7104 }
 0x14e   : > { %v6874_v34 = vcvt.f32.s32 %v6873_v33  ;;  %v1430_v62 = vadd.s32 8, %v6876_v44  ;;  %vm723_vm10 = vcmp.lt.s32.totalorder %v8498_v20, 8  ;;  %v8756_v37 = vadd.s32 72, %v7441_v1 }
 0x14f   : > { %vm809_vm0 = vcmp.gt.s32.totalorder %v8746_v18, 1  ;;  %v6878_v8 = vcvt.f32.s32 %v6877_v10  ;;  %v6880_v5 = vcvt.f32.s32 %v6879_v36  ;;  %7106 = vlog2.f32 %v984_v45 }
 0x150   : > { %v1429_v48 = vadd.s32 8, %v6874_v34  ;;  %vm1505_vm11 = vcmp.lt.s32.totalorder %v1430_v62, 15  ;;  %v8762_v33 = vsel %vm809_vm0, %v8746_v18, 1  ;;  %v8776_v34 = vsub.s32 %v8756_v37, %v7443_v2 }
 0x151   : > { %v1506_v25 = vsel %vm1505_vm11, %v1430_v62, 15  ;;  %v8767_v62 = vsub.s32 0, %v346_v49  ;;  %v8772_v10 = vadd.s32 8, %v6878_v8  ;;  %v8783_v45 = vmul.f32 0.6931472, %v7105_v17 }
 0x152   : > { %vm1503_vm6 = vcmp.lt.s32.totalorder %v1429_v48, 15  ;;  %v8758_v31 = vadd.s32 16, %v1506_v25 }
 0x153   : > { %v1504_v28 = vsel %vm1503_vm6, %v1429_v48, 15 }
 0x154   : > { %v1621_v19 = vsel %vm723_vm10, %v8498_v20, %v1504_v28  ;;  %vm1750_vm3 = vcmp.eq.s32.totalorder %v8758_v31, 0  ;;  %vm1881_vm5 = vcmp.eq.s32.totalorder %v8758_v31, 4  ;;  %v8781_v20 = vadd.s32 8, %v6880_v5 }
 0x155   : > { %v8769_v44 = vadd.s32 %v1621_v19, %v531_v30  ;;  %v1817_v7 = vsel %vm1750_vm3, %v7527_v35, 0.0  ;;  %vm2012_vm3 = vcmp.eq.s32.totalorder %v8758_v31, 8 }
 0x156   : > { %v8779_v36 = vsel %vm1881_vm5, %v7539_v38, %v1817_v7 }
 0x157   : > { %vm1749_vm12 = vcmp.eq.s32.totalorder %v8769_v44, 0  ;;  %vm1880_vm15 = vcmp.eq.s32.totalorder %v8769_v44, 4  ;;  %vm2011_vm9 = vcmp.eq.s32.totalorder %v8769_v44, 8  ;;  %vm2142_vm2 = vcmp.eq.s32.totalorder %v8769_v44, 12 }
 0x158   : > { %v1816_v30 = vsel %vm1749_vm12, %v7527_v35, 0.0  ;;  %vm2273_vm4 = vcmp.eq.s32.totalorder %v8769_v44, 16  ;;  %vm2404_vm14 = vcmp.eq.s32.totalorder %v8769_v44, 20  ;;  %vm2535_vm8 = vcmp.eq.s32.totalorder %v8769_v44, 24 }
 0x159   : > { %v1947_v49 = vsel %vm1880_vm15, %v7539_v38, %v1816_v30  ;;  %vm2666_vm13 = vcmp.eq.s32.totalorder %v8769_v44, 28  ;;  %vm2797_vm1 = vcmp.eq.s32.totalorder %v8769_v44, 1  ;;  %vm2928_vm7 = vcmp.eq.s32.totalorder %v8769_v44, 5  ;;  %v8814_v7 = vpop.eup %7106 }
 0x15a   : > { %v2078_v25 = vsel %vm2011_vm9, %v7548_v42, %v1947_v49  ;;  %v2864_v8 = vsel %vm2797_vm1, %v7584_v56, 0.0  ;;  %vm3059_vm11 = vcmp.eq.s32.totalorder %v8769_v44, 9  ;;  %vm3190_vm0 = vcmp.eq.s32.totalorder %v8769_v44, 13 }
 0x15b   : > { %v2209_v5 = vsel %vm2142_vm2, %v7551_v43, %v2078_v25  ;;  %v2995_v17 = vsel %vm2928_vm7, %v7589_v60, %v2864_v8  ;;  %vm3321_vm10 = vcmp.eq.s32.totalorder %v8769_v44, 17  ;;  %vm3452_vm6 = vcmp.eq.s32.totalorder %v8769_v44, 21 }
 0x15c   : > { %v2340_v28 = vsel %vm2273_vm4, %v7558_v46, %v2209_v5  ;;  %v3126_v19 = vsel %vm3059_vm11, %v7592_v61, %v2995_v17  ;;  %vm3583_vm5 = vcmp.eq.s32.totalorder %v8769_v44, 25  ;;  %vm3714_vm12 = vcmp.eq.s32.totalorder %v8769_v44, 29 }
 0x15d   : > { %vm2143_vm15 = vcmp.eq.s32.totalorder %v8758_v31, 12  ;;  %v2471_v30 = vsel %vm2404_vm14, %v7561_v47, %v2340_v28  ;;  %v3257_v49 = vsel %vm3190_vm0, %v7599_v3, %v3126_v19  ;;  %vm3845_vm9 = vcmp.eq.s32.totalorder %v8769_v44, 2 }
 0x15e   : > { %vm3976_vm2 = vcmp.eq.s32.totalorder %v8769_v44, 6  ;;  %vm2274_vm4 = vcmp.eq.s32.totalorder %v8758_v31, 16  ;;  %v2602_v25 = vsel %vm2535_vm8, %v7572_v51, %v2471_v30  ;;  %v3388_v8 = vsel %vm3321_vm10, %v7605_v6, %v3257_v49 }
 0x15f   : > { %v3912_v5 = vsel %vm3845_vm9, %v7631_v21, 0.0  ;;  %vm4107_vm1 = vcmp.eq.s32.totalorder %v8769_v44, 10  ;;  %vm2405_vm14 = vcmp.eq.s32.totalorder %v8758_v31, 20  ;;  %v2733_v17 = vsel %vm2666_vm13, %v7581_v55, %v2602_v25 }
 0x160   : > { %v3519_v28 = vsel %vm3452_vm6, %v7616_v12, %v3388_v8  ;;  %v4043_v19 = vsel %vm3976_vm2, %v7640_v24, %v3912_v5  ;;  %vm4238_vm8 = vcmp.eq.s32.totalorder %v8769_v44, 14  ;;  %vm2536_vm7 = vcmp.eq.s32.totalorder %v8758_v31, 24 }
 0x161   : > { %v3650_v30 = vsel %vm3583_vm5, %v7622_v15, %v3519_v28  ;;  %v4174_v49 = vsel %vm4107_vm1, %v7650_v32, %v4043_v19  ;;  %vm4369_vm11 = vcmp.eq.s32.totalorder %v8769_v44, 18  ;;  %vm4500_vm13 = vcmp.eq.s32.totalorder %v8769_v44, 22 }
 0x162   : > { %vm2667_vm0 = vcmp.eq.s32.totalorder %v8758_v31, 28  ;;  %v3781_v25 = vsel %vm3714_vm12, %v7625_v16, %v3650_v30  ;;  %v4305_v8 = vsel %vm4238_vm8, %v7656_v40, %v4174_v49  ;;  %vm4631_vm10 = vcmp.eq.s32.totalorder %v8769_v44, 26 }
 0x163   : > { %vm4762_vm6 = vcmp.eq.s32.totalorder %v8769_v44, 30  ;;  %v4436_v5 = vsel %vm4369_vm11, %v7663_v52, %v4305_v8  ;;  %vm4893_vm5 = vcmp.eq.s32.totalorder %v8769_v44, 3  ;;  %vm5024_vm9 = vcmp.eq.s32.totalorder %v8769_v44, 7 }
 0x164   : > { %vm5155_vm2 = vcmp.eq.s32.totalorder %v8769_v44, 11  ;;  %v4567_v28 = vsel %vm4500_vm13, %v7666_v53, %v4436_v5  ;;  %v4960_v19 = vsel %vm4893_vm5, %v7679_v14, 0.0  ;;  %vm5286_vm12 = vcmp.eq.s32.totalorder %v8769_v44, 15 }
 0x165   : > { %vm5417_vm1 = vcmp.eq.s32.totalorder %v8769_v44, 19  ;;  %v4698_v30 = vsel %vm4631_vm10, %v7671_v59, %v4567_v28  ;;  %v5091_v49 = vsel %vm5024_vm9, %v7684_v23, %v4960_v19  ;;  %vm5548_vm8 = vcmp.eq.s32.totalorder %v8769_v44, 23 }
 0x166   : > { %vm5679_vm11 = vcmp.eq.s32.totalorder %v8769_v44, 27  ;;  %v4829_v8 = vsel %vm4762_vm6, %v7674_v63, %v4698_v30  ;;  %v5222_v48 = vsel %vm5155_vm2, %v7688_v26, %v5091_v49  ;;  %vm5810_vm13 = vcmp.eq.s32.totalorder %v8769_v44, 31 }
 0x167   : > { %v5941_v5 = vadd.f32 %v3781_v25, %v2733_v17  ;;  %v5353_v41 = vsel %vm5286_vm12, %v7693_v57, %v5222_v48  ;;  %v2079_v28 = vsel %vm2012_vm3, %v7548_v42, %v8779_v36  ;;  %vm2798_vm10 = vcmp.eq.s32.totalorder %v8758_v31, 1 }
 0x168   : > { %vm2929_vm5 = vcmp.eq.s32.totalorder %v8758_v31, 5  ;;  %v5484_v19 = vsel %vm5417_vm1, %v7696_v58, %v5353_v41  ;;  %v2210_v49 = vsel %vm2143_vm15, %v7551_v43, %v2079_v28  ;;  %v2865_v17 = vsel %vm2798_vm10, %v7584_v56, 0.0 }
 0x169   : > { %v6005_v30 = vadd.f32 %v5941_v5, %v4829_v8  ;;  %v5615_v48 = vsel %vm5548_vm8, %v7699_v0, %v5484_v19  ;;  %v2341_v36 = vsel %vm2274_vm4, %v7558_v46, %v2210_v49  ;;  %v2996_v25 = vsel %vm2929_vm5, %v7589_v60, %v2865_v17  ;;  %v6197_v19 = vld [vmem:[%s7432_s28 + $0x50] sm:$0xff] }
 0x16a   : > { %vm3060_vm3 = vcmp.eq.s32.totalorder %v8758_v31, 9  ;;  %v5746_v41 = vsel %vm5679_vm11, %v7705_v9, %v5615_v48  ;;  %v2472_v8 = vsel %vm2405_vm14, %v7561_v47, %v2341_v36  ;;  %vm3191_vm15 = vcmp.eq.s32.totalorder %v8758_v31, 13 }
 0x16b   : > { %v3127_v5 = vsel %vm3060_vm3, %v7592_v61, %v2996_v25  ;;  %vm1507_vm6 = vcmp.lt.s32.totalorder %v8772_v10, 15  ;;  %v5877_v28 = vsel %vm5810_vm13, %v7714_v11, %v5746_v41  ;;  %v2603_v49 = vsel %vm2536_vm7, %v7572_v51, %v2472_v8 }
 0x16c   : > { %v3258_v17 = vsel %vm3191_vm15, %v7599_v3, %v3127_v5  ;;  %vm3322_vm4 = vcmp.eq.s32.totalorder %v8758_v31, 17  ;;  %vm725_vm14 = vcmp.lt.s32.totalorder %v8516_v54, 8  ;;  %vm1509_vm9 = vcmp.lt.s32.totalorder %v8781_v20, 15 }
 0x16d   : > { %v8905_v48 = vadd.f32 %v6005_v30, %v5877_v28  ;;  %v2734_v44 = vsel %vm2667_vm0, %v7581_v55, %v2603_v49  ;;  %v3389_v36 = vsel %vm3322_vm4, %v7605_v6, %v3258_v17  ;;  %vm3453_vm2 = vcmp.eq.s32.totalorder %v8758_v31, 21 }
 0x16e   : > { %v3520_v25 = vsel %vm3453_vm2, %v7616_v12, %v3389_v36  ;;  %vm3584_vm7 = vcmp.eq.s32.totalorder %v8758_v31, 25  ;;  %vm3715_vm12 = vcmp.eq.s32.totalorder %v8758_v31, 29  ;;  %vm3846_vm1 = vcmp.eq.s32.totalorder %v8758_v31, 2 }
 0x16f   : > { %14337 = vst [vmem:[#allocation33_spill] sm:$0xff] %v8905_v48  ;;  %v6389_v30 = vadd.f32 %v6197_v19, %v8905_v48  ;;  %v3651_v41 = vsel %vm3584_vm7, %v7622_v15, %v3520_v25  ;;  %v3913_v8 = vsel %vm3846_vm1, %v7631_v21, 0.0  ;;  %vm3977_vm0 = vcmp.eq.s32.totalorder %v8758_v31, 6 }
 0x170   : > { %v3782_v5 = vsel %vm3715_vm12, %v7625_v16, %v3651_v41  ;;  %v4044_v28 = vsel %vm3977_vm0, %v7640_v24, %v3913_v8  ;;  %vm4108_vm8 = vcmp.eq.s32.totalorder %v8758_v31, 10  ;;  %vm4239_vm11 = vcmp.eq.s32.totalorder %v8758_v31, 14 }
 0x171   : > { %6517 = vst [vmem:[%s7867_s27 + $0x50] sm:$0xff] %v6389_v30  ;;  %v4175_v49 = vsel %vm4108_vm8, %v7650_v32, %v4044_v28  ;;  %vm4370_vm13 = vcmp.eq.s32.totalorder %v8758_v31, 18  ;;  %vm4501_vm10 = vcmp.eq.s32.totalorder %v8758_v31, 22  ;;  %vm4632_vm5 = vcmp.eq.s32.totalorder %v8758_v31, 26 }
 0x172   : > { %v4306_v19 = vsel %vm4239_vm11, %v7656_v40, %v4175_v49  ;;  %vm4763_vm3 = vcmp.eq.s32.totalorder %v8758_v31, 30  ;;  %vm4894_vm15 = vcmp.eq.s32.totalorder %v8758_v31, 3  ;;  %vm5025_vm4 = vcmp.eq.s32.totalorder %v8758_v31, 7 }
 0x173   : > { %v4437_v17 = vsel %vm4370_vm13, %v7663_v52, %v4306_v19  ;;  %v4961_v36 = vsel %vm4894_vm15, %v7679_v14, 0.0  ;;  %vm5156_vm2 = vcmp.eq.s32.totalorder %v8758_v31, 11  ;;  %vm5287_vm7 = vcmp.eq.s32.totalorder %v8758_v31, 15 }
 0x174   : > { %v4568_v25 = vsel %vm4501_vm10, %v7666_v53, %v4437_v17  ;;  %v5092_v30 = vsel %vm5025_vm4, %v7684_v23, %v4961_v36  ;;  %vm5418_vm12 = vcmp.eq.s32.totalorder %v8758_v31, 19  ;;  %vm5549_vm1 = vcmp.eq.s32.totalorder %v8758_v31, 23 }
 0x175   : > { %v4699_v41 = vsel %vm4632_vm5, %v7671_v59, %v4568_v25  ;;  %v5223_v8 = vsel %vm5156_vm2, %v7688_v26, %v5092_v30  ;;  %vm5680_vm0 = vcmp.eq.s32.totalorder %v8758_v31, 27  ;;  %vm5811_vm8 = vcmp.eq.s32.totalorder %v8758_v31, 31 }
 0x176   : > { %v4830_v28 = vsel %vm4763_vm3, %v7674_v63, %v4699_v41  ;;  %v5354_v49 = vsel %vm5287_vm7, %v7693_v57, %v5223_v8  ;;  %v5942_v19 = vadd.f32 %v3782_v5, %v2734_v44  ;;  %v1508_v17 = vsel %vm1507_vm6, %v8772_v10, 15 }
 0x177   : > { %v5485_v36 = vsel %vm5418_vm12, %v7696_v58, %v5354_v49  ;;  %v1623_v25 = vsel %vm725_vm14, %v8516_v54, %v1508_v17  ;;  %v1510_v30 = vsel %vm1509_vm9, %v8781_v20, 15  ;;  %v1063_v41 = vmul.f32 0.6931472, %v8814_v7 }
 0x178   : > { %v5616_v8 = vsel %vm5549_vm1, %v7699_v0, %v5485_v36  ;;  %v6006_v48 = vadd.f32 %v5942_v19, %v4830_v28  ;;  %v14338_v44 = vmul.u32 16, %v8749_v50  ;;  %v8963_v10 = vadd.s32 16, %v1510_v30  ;;  %v6198_v50 = vld [vmem:[%s7432_s28 + $0x58] sm:$0xff] }
 0x179   : > { %v5747_v49 = vsel %vm5680_vm0, %v7705_v9, %v5616_v8  ;;  %v8966_v39 = vmul.f32 0.36067376, %v1063_v41  ;;  %v8969_v54 = vmul.f32 0.36067376, %v8783_v45  ;;  %v14339_v20 = vcvt.s32.f32 %v8762_v33 }
 0x17a   : > { %v8961_v5 = vadd.s32 %v1623_v25, %v14338_v44  ;;  %v5878_v7 = vsel %vm5811_vm8, %v7714_v11, %v5747_v49 }
 0x17b   : > { %v8973_v17 = vmul.f32 0.125, %v14339_v20  ;;  %v8982_v28 = vadd.f32 %v6006_v48, %v5878_v7 }
 0x17c   : > { %vm1751_vm6 = vcmp.eq.s32.totalorder %v8961_v5, 0  ;;  %vm1882_vm14 = vcmp.eq.s32.totalorder %v8961_v5, 4  ;;  %vm2013_vm9 = vcmp.eq.s32.totalorder %v8961_v5, 8  ;;  %vm2144_vm11 = vcmp.eq.s32.totalorder %v8961_v5, 12 }
 0x17d   : > { %14340 = vst [vmem:[#allocation34_spill] sm:$0xff] %v8982_v28  ;;  %v1818_v45 = vsel %vm1751_vm6, %v7527_v35, 0.0  ;;  %vm2275_vm13 = vcmp.eq.s32.totalorder %v8961_v5, 16  ;;  %vm2406_vm10 = vcmp.eq.s32.totalorder %v8961_v5, 20  ;;  %vm2537_vm5 = vcmp.eq.s32.totalorder %v8961_v5, 24 }
 0x17e   : > { %v1949_v33 = vsel %vm1882_vm14, %v7539_v38, %v1818_v45  ;;  %vm2668_vm3 = vcmp.eq.s32.totalorder %v8961_v5, 28  ;;  %v6390_v31 = vadd.f32 %v6198_v50, %v8982_v28  ;;  %vm2799_vm15 = vcmp.eq.s32.totalorder %v8961_v5, 1 }
 0x17f   : > { %v2080_v48 = vsel %vm2013_vm9, %v7548_v42, %v1949_v33  ;;  %vm2930_vm4 = vcmp.eq.s32.totalorder %v8961_v5, 5  ;;  %v2866_v36 = vsel %vm2799_vm15, %v7584_v56, 0.0  ;;  %vm3061_vm2 = vcmp.eq.s32.totalorder %v8961_v5, 9 }
 0x180   : > { %v2211_v19 = vsel %vm2144_vm11, %v7551_v43, %v2080_v48  ;;  %vm3192_vm7 = vcmp.eq.s32.totalorder %v8961_v5, 13  ;;  %6518 = vst [vmem:[%s7867_s27 + $0x58] sm:$0xff] %v6390_v31  ;;  %v2997_v30 = vsel %vm2930_vm4, %v7589_v60, %v2866_v36  ;;  %vm3323_vm12 = vcmp.eq.s32.totalorder %v8961_v5, 17 }
 0x181   : > { %v2342_v25 = vsel %vm2275_vm13, %v7558_v46, %v2211_v19  ;;  %vm3454_vm1 = vcmp.eq.s32.totalorder %v8961_v5, 21  ;;  %v3128_v8 = vsel %vm3061_vm2, %v7592_v61, %v2997_v30  ;;  %vm3585_vm0 = vcmp.eq.s32.totalorder %v8961_v5, 25 }
 0x182   : > { %v2473_v41 = vsel %vm2406_vm10, %v7561_v47, %v2342_v25  ;;  %vm3716_vm8 = vcmp.eq.s32.totalorder %v8961_v5, 29  ;;  %v3259_v49 = vsel %vm3192_vm7, %v7599_v3, %v3128_v8  ;;  %vm3847_vm6 = vcmp.eq.s32.totalorder %v8961_v5, 2 }
 0x183   : > { %v2604_v44 = vsel %vm2537_vm5, %v7572_v51, %v2473_v41  ;;  %vm3978_vm14 = vcmp.eq.s32.totalorder %v8961_v5, 6  ;;  %v3390_v7 = vsel %vm3323_vm12, %v7605_v6, %v3259_v49  ;;  %v3914_v50 = vsel %vm3847_vm6, %v7631_v21, 0.0 }
 0x184   : > { %v2735_v20 = vsel %vm2668_vm3, %v7581_v55, %v2604_v44  ;;  %vm4109_vm9 = vcmp.eq.s32.totalorder %v8961_v5, 10  ;;  %v3521_v45 = vsel %vm3454_vm1, %v7616_v12, %v3390_v7  ;;  %v4045_v33 = vsel %vm3978_vm14, %v7640_v24, %v3914_v50 }
 0x185   : > { %vm4240_vm11 = vcmp.eq.s32.totalorder %v8961_v5, 14  ;;  %vm4371_vm13 = vcmp.eq.s32.totalorder %v8961_v5, 18  ;;  %v3652_v31 = vsel %vm3585_vm0, %v7622_v15, %v3521_v45  ;;  %v4176_v48 = vsel %vm4109_vm9, %v7650_v32, %v4045_v33 }
 0x186   : > { %vm4502_vm10 = vcmp.eq.s32.totalorder %v8961_v5, 22  ;;  %vm4633_vm5 = vcmp.eq.s32.totalorder %v8961_v5, 26  ;;  %v3783_v19 = vsel %vm3716_vm8, %v7625_v16, %v3652_v31  ;;  %v4307_v36 = vsel %vm4240_vm11, %v7656_v40, %v4176_v48 }
 0x187   : > { %vm4764_vm3 = vcmp.eq.s32.totalorder %v8961_v5, 30  ;;  %vm4895_vm15 = vcmp.eq.s32.totalorder %v8961_v5, 3  ;;  %v4438_v25 = vsel %vm4371_vm13, %v7663_v52, %v4307_v36  ;;  %vm5026_vm4 = vcmp.eq.s32.totalorder %v8961_v5, 7 }
 0x188   : > { %v4962_v30 = vsel %vm4895_vm15, %v7679_v14, 0.0  ;;  %vm5157_vm2 = vcmp.eq.s32.totalorder %v8961_v5, 11  ;;  %v4569_v41 = vsel %vm4502_vm10, %v7666_v53, %v4438_v25  ;;  %vm5288_vm7 = vcmp.eq.s32.totalorder %v8961_v5, 15 }
 0x189   : > { %v5093_v8 = vsel %vm5026_vm4, %v7684_v23, %v4962_v30  ;;  %vm5419_vm12 = vcmp.eq.s32.totalorder %v8961_v5, 19  ;;  %v4700_v44 = vsel %vm4633_vm5, %v7671_v59, %v4569_v41  ;;  %vm5550_vm1 = vcmp.eq.s32.totalorder %v8961_v5, 23 }
 0x18a   : > { %v5224_v49 = vsel %vm5157_vm2, %v7688_v26, %v5093_v8  ;;  %vm5681_vm0 = vcmp.eq.s32.totalorder %v8961_v5, 27  ;;  %v4831_v7 = vsel %vm4764_vm3, %v7674_v63, %v4700_v44  ;;  %vm5812_vm8 = vcmp.eq.s32.totalorder %v8961_v5, 31 }
 0x18b   : > { %v5355_v50 = vsel %vm5288_vm7, %v7693_v57, %v5224_v49  ;;  %v5943_v45 = vadd.f32 %v3783_v19, %v2735_v20  ;;  %vm1752_vm6 = vcmp.eq.s32.totalorder %v8963_v10, 0  ;;  %vm1883_vm14 = vcmp.eq.s32.totalorder %v8963_v10, 4  ;;  %v6199_v19 = vld [vmem:[%s7432_s28 + $0x60] sm:$0xff] }
 0x18c   : > { %v5486_v33 = vsel %vm5419_vm12, %v7696_v58, %v5355_v50  ;;  %vm2014_vm9 = vcmp.eq.s32.totalorder %v8963_v10, 8  ;;  %v1819_v36 = vsel %vm1752_vm6, %v7527_v35, 0.0  ;;  %vm2145_vm11 = vcmp.eq.s32.totalorder %v8963_v10, 12 }
 0x18d   : > { %v5617_v31 = vsel %vm5550_vm1, %v7699_v0, %v5486_v33  ;;  %v6007_v48 = vadd.f32 %v5943_v45, %v4831_v7  ;;  %v1950_v5 = vsel %vm1883_vm14, %v7539_v38, %v1819_v36  ;;  %vm2276_vm13 = vcmp.eq.s32.totalorder %v8963_v10, 16 }
 0x18e   : > { %v5748_v25 = vsel %vm5681_vm0, %v7705_v9, %v5617_v31  ;;  %vm2407_vm10 = vcmp.eq.s32.totalorder %v8963_v10, 20  ;;  %v2081_v30 = vsel %vm2014_vm9, %v7548_v42, %v1950_v5  ;;  %vm2538_vm5 = vcmp.eq.s32.totalorder %v8963_v10, 24 }
 0x18f   : > { %v5879_v20 = vsel %vm5812_vm8, %v7714_v11, %v5748_v25  ;;  %vm2669_vm3 = vcmp.eq.s32.totalorder %v8963_v10, 28  ;;  %v2212_v8 = vsel %vm2145_vm11, %v7551_v43, %v2081_v30  ;;  %vm2800_vm15 = vcmp.eq.s32.totalorder %v8963_v10, 1 }
 0x190   : > { %v9067_v41 = vadd.f32 %v6007_v48, %v5879_v20  ;;  %vm2931_vm4 = vcmp.eq.s32.totalorder %v8963_v10, 5  ;;  %v2343_v44 = vsel %vm2276_vm13, %v7558_v46, %v2212_v8  ;;  %v2867_v49 = vsel %vm2800_vm15, %v7584_v56, 0.0 }
 0x191   : > { %vm3062_vm2 = vcmp.eq.s32.totalorder %v8963_v10, 9  ;;  %vm3193_vm7 = vcmp.eq.s32.totalorder %v8963_v10, 13  ;;  %v2474_v50 = vsel %vm2407_vm10, %v7561_v47, %v2343_v44  ;;  %v2998_v45 = vsel %vm2931_vm4, %v7589_v60, %v2867_v49 }
 0x192   : > { %14341 = vst [vmem:[#allocation35_spill] sm:$0xff] %v9067_v41  ;;  %v6391_v7 = vadd.f32 %v6199_v19, %v9067_v41  ;;  %vm3324_vm12 = vcmp.eq.s32.totalorder %v8963_v10, 17  ;;  %v2605_v33 = vsel %vm2538_vm5, %v7572_v51, %v2474_v50  ;;  %v3129_v31 = vsel %vm3062_vm2, %v7592_v61, %v2998_v45 }
 0x193   : > { %vm3455_vm1 = vcmp.eq.s32.totalorder %v8963_v10, 21  ;;  %vm3586_vm0 = vcmp.eq.s32.totalorder %v8963_v10, 25  ;;  %v2736_v48 = vsel %vm2669_vm3, %v7581_v55, %v2605_v33  ;;  %v3260_v36 = vsel %vm3193_vm7, %v7599_v3, %v3129_v31 }
 0x194   : > { %6519 = vst [vmem:[%s7867_s27 + $0x60] sm:$0xff] %v6391_v7  ;;  %vm3717_vm8 = vcmp.eq.s32.totalorder %v8963_v10, 29  ;;  %vm3848_vm6 = vcmp.eq.s32.totalorder %v8963_v10, 2  ;;  %v3391_v25 = vsel %vm3324_vm12, %v7605_v6, %v3260_v36  ;;  %vm3979_vm14 = vcmp.eq.s32.totalorder %v8963_v10, 6 }
 0x195   : > { %v3915_v5 = vsel %vm3848_vm6, %v7631_v21, 0.0  ;;  %vm4110_vm9 = vcmp.eq.s32.totalorder %v8963_v10, 10  ;;  %vm407_vm11 = vcmp.lt.s32.totalorder %v8526_v22, 0  ;;  %v3522_v20 = vsel %vm3455_vm1, %v7616_v12, %v3391_v25 }
 0x196   : > { %v4046_v19 = vsel %vm3979_vm14, %v7640_v24, %v3915_v5  ;;  %vm4241_vm13 = vcmp.eq.s32.totalorder %v8963_v10, 14  ;;  %vm4372_vm10 = vcmp.eq.s32.totalorder %v8963_v10, 18  ;;  %v3653_v30 = vsel %vm3586_vm0, %v7622_v15, %v3522_v20 }
 0x197   : > { %v4177_v8 = vsel %vm4110_vm9, %v7650_v32, %v4046_v19  ;;  %vm4503_vm5 = vcmp.eq.s32.totalorder %v8963_v10, 22  ;;  %vm4634_vm3 = vcmp.eq.s32.totalorder %v8963_v10, 26  ;;  %v3784_v44 = vsel %vm3717_vm8, %v7625_v16, %v3653_v30 }
 0x198   : > { %v4308_v49 = vsel %vm4241_vm13, %v7656_v40, %v4177_v8  ;;  %vm4765_vm15 = vcmp.eq.s32.totalorder %v8963_v10, 30  ;;  %vm4896_vm4 = vcmp.eq.s32.totalorder %v8963_v10, 3  ;;  %vm5027_vm2 = vcmp.eq.s32.totalorder %v8963_v10, 7 }
 0x199   : > { %v4439_v7 = vsel %vm4372_vm10, %v7663_v52, %v4308_v49  ;;  %v4963_v50 = vsel %vm4896_vm4, %v7679_v14, 0.0  ;;  %vm5158_vm7 = vcmp.eq.s32.totalorder %v8963_v10, 11  ;;  %vm5289_vm12 = vcmp.eq.s32.totalorder %v8963_v10, 15 }
 0x19a   : > { %v4570_v45 = vsel %vm4503_vm5, %v7666_v53, %v4439_v7  ;;  %v5094_v33 = vsel %vm5027_vm2, %v7684_v23, %v4963_v50  ;;  %vm5420_vm1 = vcmp.eq.s32.totalorder %v8963_v10, 19  ;;  %vm5551_vm0 = vcmp.eq.s32.totalorder %v8963_v10, 23 }
 0x19b   : > { %v4701_v31 = vsel %vm4634_vm3, %v7671_v59, %v4570_v45  ;;  %v5225_v36 = vsel %vm5158_vm7, %v7688_v26, %v5094_v33  ;;  %vm5682_vm8 = vcmp.eq.s32.totalorder %v8963_v10, 27  ;;  %vm5813_vm6 = vcmp.eq.s32.totalorder %v8963_v10, 31 }
 0x19c   : > { %v4832_v25 = vsel %vm4765_vm15, %v7674_v63, %v4701_v31  ;;  %v5356_v5 = vsel %vm5289_vm12, %v7693_v57, %v5225_v36  ;;  %v5944_v20 = vadd.f32 %v3784_v44, %v2736_v48  ;;  %v1241_v30 = vmul.f32 8.0, %v8966_v39  ;;  %v6200_v36 = vld [vmem:[%s7432_s28 + $0x68] sm:$0xff] }
 0x19d   : > { %v5487_v19 = vsel %vm5420_vm1, %v7696_v58, %v5356_v5  ;;  %v1242_v8 = vmul.f32 8.0, %v8969_v54  ;;  %7108 = vlog2.f32 %v8973_v17  ;;  %v471_v10 = vsel %vm407_vm11, 1, %v14327_v13 }
 0x19e   : > { %v5618_v49 = vsel %vm5551_vm0, %v7699_v0, %v5487_v19  ;;  %v6008_v7 = vadd.f32 %v5944_v20, %v4832_v25  ;;  %v1305_v45 = vadd.f32 0.0001, %v1241_v30  ;;  %v922_v39 = vcvt.s32.f32 %v8767_v62 }
 0x19f   : > { %v5749_v50 = vsel %vm5682_vm8, %v7705_v9, %v5618_v49  ;;  %v1306_v33 = vadd.f32 0.0001, %v1242_v8  ;;  %v621_v54 = vsub.s32 0, %v8776_v34  ;;  %v348_v25 = vsub.s32 %v8756_v37, %v7449_v4 }
 0x1a0   : > { %v5880_v31 = vsel %vm5813_vm6, %v7714_v11, %v5749_v50  ;;  %v6881_v48 = vtrunc.f32 %v1305_v45  ;;  %v267_v20 = vadd.s32 80, %v7441_v1  ;;  %v535_v8 = vmul.u32 16, %v471_v10 }
 0x1a1   : > { %v9136_v17 = vadd.f32 %v6008_v7, %v5880_v31  ;;  %v6883_v44 = vtrunc.f32 %v1306_v33  ;;  %v9141_v5 = vmin.u32 %v621_v54, %v8776_v34  ;;  %v623_v62 = vsub.s32 0, %v348_v25 }
 0x1a2   : > { %v6882_v19 = vcvt.f32.s32 %v6881_v48  ;;  %v987_v49 = vmul.f32 0.125, %v922_v39  ;;  %v9147_v7 = vsub.s32 %v267_v20, %v7443_v2  ;;  %vm727_vm9 = vcmp.lt.s32.totalorder %v8535_v27, 8 }
 0x1a3   : > { %14342 = vst [vmem:[#allocation36_spill] sm:$0xff] %v9136_v17  ;;  %v6392_v22 = vadd.f32 %v6200_v36, %v9136_v17  ;;  %v6884_v30 = vcvt.f32.s32 %v6883_v44  ;;  %vm813_vm14 = vcmp.gt.s32.totalorder %v9141_v5, 1  ;;  %v924_v33 = vcvt.s32.f32 %v623_v62 }
 0x1a4   : > { %v1433_v50 = vadd.s32 8, %v6882_v19  ;;  %v814_v45 = vsel %vm813_vm14, %v9141_v5, 1  ;;  %vm409_vm11 = vcmp.lt.s32.totalorder %v8730_v29, 0  ;;  %v350_v36 = vsub.s32 %v267_v20, %v7449_v4 }
 0x1a5   : > { %6520 = vst [vmem:[%s7867_s27 + $0x68] sm:$0xff] %v6392_v22  ;;  %v1434_v37 = vadd.s32 8, %v6884_v30  ;;  %v923_v31 = vcvt.s32.f32 %v814_v45  ;;  %v989_v39 = vmul.f32 0.125, %v924_v33  ;;  %v625_v54 = vsub.s32 0, %v9147_v7 }
 0x1a6   : > { %vm1511_vm13 = vcmp.lt.s32.totalorder %v1433_v50, 15  ;;  %7110 = vlog2.f32 %v987_v49  ;;  %v9159_v29 = vsel %vm409_vm11, 1, %v14327_v13  ;;  %v9161_v20 = vsub.s32 0, %v350_v36 }
 0x1a7   : > { %v7109_v10 = vpop.eup %7108  ;;  %vm1513_vm10 = vcmp.lt.s32.totalorder %v1434_v37, 15  ;;  %v1512_v48 = vsel %vm1511_vm13, %v1433_v50, 15  ;;  %v988_v22 = vmul.f32 0.125, %v923_v31  ;;  %7112 = vlog2.f32 %v989_v39 }
 0x1a8   : > { %v1514_v44 = vsel %vm1513_vm10, %v1434_v37, 15  ;;  %v1067_v25 = vmul.f32 0.6931472, %v7109_v10  ;;  %v1625_v19 = vsel %vm727_vm9, %v8535_v27, %v1512_v48  ;;  %v9168_v50 = vmin.u32 %v625_v54, %v9147_v7 }
 0x1a9   : > { %v9156_v30 = vadd.s32 %v1625_v19, %v535_v8  ;;  %v9163_v62 = vadd.s32 16, %v1514_v44  ;;  %7114 = vlog2.f32 %v988_v22 }
 0x1aa   : > { %v9165_v45 = vmul.f32 0.36067376, %v1067_v25 }
 0x1ab   : > { %vm1753_vm5 = vcmp.eq.s32.totalorder %v9156_v30, 0  ;;  %vm1884_vm3 = vcmp.eq.s32.totalorder %v9156_v30, 4  ;;  %vm2015_vm15 = vcmp.eq.s32.totalorder %v9156_v30, 8  ;;  %vm2146_vm4 = vcmp.eq.s32.totalorder %v9156_v30, 12 }
 0x1ac   : > { %v1820_v27 = vsel %vm1753_vm5, %v7527_v35, 0.0  ;;  %vm2277_vm2 = vcmp.eq.s32.totalorder %v9156_v30, 16  ;;  %vm2408_vm7 = vcmp.eq.s32.totalorder %v9156_v30, 20  ;;  %vm2539_vm12 = vcmp.eq.s32.totalorder %v9156_v30, 24 }
 0x1ad   : > { %v1951_v8 = vsel %vm1884_vm3, %v7539_v38, %v1820_v27  ;;  %vm2670_vm1 = vcmp.eq.s32.totalorder %v9156_v30, 28  ;;  %vm2801_vm0 = vcmp.eq.s32.totalorder %v9156_v30, 1  ;;  %vm2932_vm8 = vcmp.eq.s32.totalorder %v9156_v30, 5 }
 0x1ae   : > { %v2082_v49 = vsel %vm2015_vm15, %v7548_v42, %v1951_v8  ;;  %v2868_v37 = vsel %vm2801_vm0, %v7584_v56, 0.0  ;;  %vm3063_vm6 = vcmp.eq.s32.totalorder %v9156_v30, 9  ;;  %vm3194_vm14 = vcmp.eq.s32.totalorder %v9156_v30, 13 }
 0x1af   : > { %v2213_v33 = vsel %vm2146_vm4, %v7551_v43, %v2082_v49  ;;  %v2999_v31 = vsel %vm2932_vm8, %v7589_v60, %v2868_v37  ;;  %vm3325_vm9 = vcmp.eq.s32.totalorder %v9156_v30, 17  ;;  %vm3456_vm11 = vcmp.eq.s32.totalorder %v9156_v30, 21 }
 0x1b0   : > { %vm1754_vm13 = vcmp.eq.s32.totalorder %v9163_v62, 0  ;;  %v2344_v36 = vsel %vm2277_vm2, %v7558_v46, %v2213_v33  ;;  %v3130_v10 = vsel %vm3063_vm6, %v7592_v61, %v2999_v31  ;;  %vm3587_vm10 = vcmp.eq.s32.totalorder %v9156_v30, 25  ;;  %v9205_v48 = vpop.eup %7110 }
 0x1b1   : > { %vm3718_vm5 = vcmp.eq.s32.totalorder %v9156_v30, 29  ;;  %vm1885_vm3 = vcmp.eq.s32.totalorder %v9163_v62, 4  ;;  %v2475_v39 = vsel %vm2408_vm7, %v7561_v47, %v2344_v36  ;;  %v3261_v54 = vsel %vm3194_vm14, %v7599_v3, %v3130_v10  ;;  %v9214_v19 = vpop.eup %7112 }
 0x1b2   : > { %vm3849_vm15 = vcmp.eq.s32.totalorder %v9156_v30, 2  ;;  %vm3980_vm4 = vcmp.eq.s32.totalorder %v9156_v30, 6  ;;  %vm2016_vm2 = vcmp.eq.s32.totalorder %v9163_v62, 8  ;;  %v2606_v44 = vsel %vm2539_vm12, %v7572_v51, %v2475_v39 }
 0x1b3   : > { %v3392_v25 = vsel %vm3325_vm9, %v7605_v6, %v3261_v54  ;;  %v3916_v22 = vsel %vm3849_vm15, %v7631_v21, 0.0  ;;  %vm4111_vm7 = vcmp.eq.s32.totalorder %v9156_v30, 10  ;;  %vm2147_vm0 = vcmp.eq.s32.totalorder %v9163_v62, 12  ;;  %v9224_v37 = vpop.eup %7114 }
 0x1b4   : > { %v2737_v27 = vsel %vm2670_vm1, %v7581_v55, %v2606_v44  ;;  %v3523_v8 = vsel %vm3456_vm11, %v7616_v12, %v3392_v25  ;;  %v4047_v49 = vsel %vm3980_vm4, %v7640_v24, %v3916_v22  ;;  %vm4242_vm12 = vcmp.eq.s32.totalorder %v9156_v30, 14 }
 0x1b5   : > { %v3654_v33 = vsel %vm3587_vm10, %v7622_v15, %v3523_v8  ;;  %v4178_v31 = vsel %vm4111_vm7, %v7650_v32, %v4047_v49  ;;  %vm4373_vm8 = vcmp.eq.s32.totalorder %v9156_v30, 18  ;;  %vm4504_vm1 = vcmp.eq.s32.totalorder %v9156_v30, 22 }
 0x1b6   : > { %v3785_v36 = vsel %vm3718_vm5, %v7625_v16, %v3654_v33  ;;  %v4309_v10 = vsel %vm4242_vm12, %v7656_v40, %v4178_v31  ;;  %vm4635_vm6 = vcmp.eq.s32.totalorder %v9156_v30, 26  ;;  %vm4766_vm14 = vcmp.eq.s32.totalorder %v9156_v30, 30 }
 0x1b7   : > { %v4440_v39 = vsel %vm4373_vm8, %v7663_v52, %v4309_v10  ;;  %vm4897_vm9 = vcmp.eq.s32.totalorder %v9156_v30, 3  ;;  %vm5028_vm11 = vcmp.eq.s32.totalorder %v9156_v30, 7  ;;  %vm5159_vm10 = vcmp.eq.s32.totalorder %v9156_v30, 11 }
 0x1b8   : > { %v4571_v54 = vsel %vm4504_vm1, %v7666_v53, %v4440_v39  ;;  %v4964_v44 = vsel %vm4897_vm9, %v7679_v14, 0.0  ;;  %vm5290_vm5 = vcmp.eq.s32.totalorder %v9156_v30, 15  ;;  %vm5421_vm15 = vcmp.eq.s32.totalorder %v9156_v30, 19 }
 0x1b9   : > { %v4702_v25 = vsel %vm4635_vm6, %v7671_v59, %v4571_v54  ;;  %v5095_v22 = vsel %vm5028_vm11, %v7684_v23, %v4964_v44  ;;  %vm5552_vm4 = vcmp.eq.s32.totalorder %v9156_v30, 23  ;;  %vm5683_vm7 = vcmp.eq.s32.totalorder %v9156_v30, 27 }
 0x1ba   : > { %v4833_v8 = vsel %vm4766_vm14, %v7674_v63, %v4702_v25  ;;  %v5226_v49 = vsel %vm5159_vm10, %v7688_v26, %v5095_v22  ;;  %vm5814_vm12 = vcmp.eq.s32.totalorder %v9156_v30, 31  ;;  %v5945_v33 = vadd.f32 %v3785_v36, %v2737_v27 }
 0x1bb   : > { %v5357_v31 = vsel %vm5290_vm5, %v7693_v57, %v5226_v49  ;;  %v1821_v10 = vsel %vm1754_vm13, %v7527_v35, 0.0  ;;  %vm2278_vm8 = vcmp.eq.s32.totalorder %v9163_v62, 16  ;;  %vm2409_vm1 = vcmp.eq.s32.totalorder %v9163_v62, 20 }
 0x1bc   : > { %v5488_v39 = vsel %vm5421_vm15, %v7696_v58, %v5357_v31  ;;  %v6009_v54 = vadd.f32 %v5945_v33, %v4833_v8  ;;  %v1952_v44 = vsel %vm1885_vm3, %v7539_v38, %v1821_v10  ;;  %vm2540_vm6 = vcmp.eq.s32.totalorder %v9163_v62, 24  ;;  %v6201_v33 = vld [vmem:[%s7432_s28 + $0x70] sm:$0xff] }
 0x1bd   : > { %v5619_v27 = vsel %vm5552_vm4, %v7699_v0, %v5488_v39  ;;  %v2083_v36 = vsel %vm2016_vm2, %v7548_v42, %v1952_v44  ;;  %vm2671_vm13 = vcmp.eq.s32.totalorder %v9163_v62, 28  ;;  %vm2802_vm14 = vcmp.eq.s32.totalorder %v9163_v62, 1 }
 0x1be   : > { %v5750_v25 = vsel %vm5683_vm7, %v7705_v9, %v5619_v27  ;;  %v2214_v22 = vsel %vm2147_vm0, %v7551_v43, %v2083_v36  ;;  %v2869_v8 = vsel %vm2802_vm14, %v7584_v56, 0.0  ;;  %vm2933_vm3 = vcmp.eq.s32.totalorder %v9163_v62, 5 }
 0x1bf   : > { %v5881_v49 = vsel %vm5814_vm12, %v7714_v11, %v5750_v25  ;;  %v2345_v31 = vsel %vm2278_vm8, %v7558_v46, %v2214_v22  ;;  %v3000_v10 = vsel %vm2933_vm3, %v7589_v60, %v2869_v8  ;;  %vm3064_vm2 = vcmp.eq.s32.totalorder %v9163_v62, 9 }
 0x1c0   : > { %v9287_v39 = vadd.f32 %v6009_v54, %v5881_v49  ;;  %v2476_v44 = vsel %vm2409_vm1, %v7561_v47, %v2345_v31  ;;  %v3131_v27 = vsel %vm3064_vm2, %v7592_v61, %v3000_v10  ;;  %vm3195_vm0 = vcmp.eq.s32.totalorder %v9163_v62, 13 }
 0x1c1   : > { %v2607_v30 = vsel %vm2540_vm6, %v7572_v51, %v2476_v44  ;;  %v3262_v36 = vsel %vm3195_vm0, %v7599_v3, %v3131_v27  ;;  %vm3326_vm9 = vcmp.eq.s32.totalorder %v9163_v62, 17  ;;  %vm3457_vm11 = vcmp.eq.s32.totalorder %v9163_v62, 21 }
 0x1c2   : > { %14343 = vst [vmem:[#allocation37_spill] sm:$0xff] %v9287_v39  ;;  %v6393_v54 = vadd.f32 %v6201_v33, %v9287_v39  ;;  %v2738_v25 = vsel %vm2671_vm13, %v7581_v55, %v2607_v30  ;;  %v3393_v22 = vsel %vm3326_vm9, %v7605_v6, %v3262_v36  ;;  %vm3588_vm10 = vcmp.eq.s32.totalorder %v9163_v62, 25 }
 0x1c3   : > { %v3524_v8 = vsel %vm3457_vm11, %v7616_v12, %v3393_v22  ;;  %vm3719_vm5 = vcmp.eq.s32.totalorder %v9163_v62, 29  ;;  %vm3850_vm15 = vcmp.eq.s32.totalorder %v9163_v62, 2  ;;  %vm3981_vm4 = vcmp.eq.s32.totalorder %v9163_v62, 6 }
 0x1c4   : > { %6521 = vst [vmem:[%s7867_s27 + $0x70] sm:$0xff] %v6393_v54  ;;  %v3655_v49 = vsel %vm3588_vm10, %v7622_v15, %v3524_v8  ;;  %v3917_v33 = vsel %vm3850_vm15, %v7631_v21, 0.0  ;;  %vm4112_vm7 = vcmp.eq.s32.totalorder %v9163_v62, 10  ;;  %vm4243_vm12 = vcmp.eq.s32.totalorder %v9163_v62, 14 }
 0x1c5   : > { %v3786_v31 = vsel %vm3719_vm5, %v7625_v16, %v3655_v49  ;;  %v4048_v10 = vsel %vm3981_vm4, %v7640_v24, %v3917_v33  ;;  %vm4374_vm8 = vcmp.eq.s32.totalorder %v9163_v62, 18  ;;  %vm4505_vm1 = vcmp.eq.s32.totalorder %v9163_v62, 22 }
 0x1c6   : > { %v4179_v44 = vsel %vm4112_vm7, %v7650_v32, %v4048_v10  ;;  %vm4636_vm6 = vcmp.eq.s32.totalorder %v9163_v62, 26  ;;  %vm4767_vm13 = vcmp.eq.s32.totalorder %v9163_v62, 30  ;;  %vm4898_vm14 = vcmp.eq.s32.totalorder %v9163_v62, 3 }
 0x1c7   : > { %v4310_v27 = vsel %vm4243_vm12, %v7656_v40, %v4179_v44  ;;  %v4965_v30 = vsel %vm4898_vm14, %v7679_v14, 0.0  ;;  %vm5029_vm3 = vcmp.eq.s32.totalorder %v9163_v62, 7  ;;  %vm5160_vm2 = vcmp.eq.s32.totalorder %v9163_v62, 11 }
 0x1c8   : > { %v4441_v36 = vsel %vm4374_vm8, %v7663_v52, %v4310_v27  ;;  %v5096_v54 = vsel %vm5029_vm3, %v7684_v23, %v4965_v30  ;;  %vm5291_vm0 = vcmp.eq.s32.totalorder %v9163_v62, 15  ;;  %vm5422_vm9 = vcmp.eq.s32.totalorder %v9163_v62, 19 }
 0x1c9   : > { %vm411_vm11 = vcmp.lt.s32.totalorder %v8776_v34, 0  ;;  %v4572_v22 = vsel %vm4505_vm1, %v7666_v53, %v4441_v36  ;;  %v5227_v8 = vsel %vm5160_vm2, %v7688_v26, %v5096_v54  ;;  %vm5553_vm10 = vcmp.eq.s32.totalorder %v9163_v62, 23 }
 0x1ca   : > { %vm5684_vm5 = vcmp.eq.s32.totalorder %v9163_v62, 27  ;;  %v4703_v49 = vsel %vm4636_vm6, %v7671_v59, %v4572_v22  ;;  %v5358_v33 = vsel %vm5291_vm0, %v7693_v57, %v5227_v8  ;;  %vm5815_vm15 = vcmp.eq.s32.totalorder %v9163_v62, 31 }
 0x1cb   : > { %v5946_v10 = vadd.f32 %v3786_v31, %v2738_v25  ;;  %v4834_v44 = vsel %vm4767_vm13, %v7674_v63, %v4703_v49  ;;  %v5489_v27 = vsel %vm5422_vm9, %v7696_v58, %v5358_v33  ;;  %v1243_v30 = vmul.f32 8.0, %v9165_v45  ;;  %v6202_v33 = vld [vmem:[%s7432_s28 + $0x78] sm:$0xff] }
 0x1cc   : > { %v1069_v36 = vmul.f32 0.6931472, %v9205_v48  ;;  %v5620_v54 = vsel %vm5553_vm10, %v7699_v0, %v5489_v27  ;;  %v1071_v22 = vmul.f32 0.6931472, %v9224_v37  ;;  %v1073_v8 = vmul.f32 0.6931472, %v9214_v19 }
 0x1cd   : > { %v6010_v39 = vadd.f32 %v5946_v10, %v4834_v44  ;;  %v5751_v17 = vsel %vm5684_vm5, %v7705_v9, %v5620_v54  ;;  %v1307_v25 = vadd.f32 0.0001, %v1243_v30  ;;  %v9352_v62 = vadd.s32 88, %v7441_v1 }
 0x1ce   : > { %v1180_v31 = vmul.f32 0.36067376, %v1069_v36  ;;  %v5882_v49 = vsel %vm5815_vm15, %v7714_v11, %v5751_v17  ;;  %v1181_v45 = vmul.f32 0.36067376, %v1071_v22  ;;  %v1182_v41 = vmul.f32 0.36067376, %v1073_v8 }
 0x1cf   : > { %vm817_vm4 = vcmp.gt.s32.totalorder %v9168_v50, 1  ;;  %v9357_v48 = vadd.f32 %v6010_v39, %v5882_v49  ;;  %v6885_v37 = vtrunc.f32 %v1307_v25  ;;  %v926_v36 = vcvt.s32.f32 %v9161_v20 }
 0x1d0   : > { %v1244_v10 = vmul.f32 8.0, %v1180_v31  ;;  %v818_v19 = vsel %vm817_vm4, %v9168_v50, 1  ;;  %v1245_v44 = vmul.f32 8.0, %v1181_v45  ;;  %v1246_v27 = vmul.f32 8.0, %v1182_v41 }
 0x1d1   : > { %14344 = vst [vmem:[#allocation38_spill] sm:$0xff] %v9357_v48  ;;  %v925_v30 = vcvt.s32.f32 %v818_v19  ;;  %v6394_v54 = vadd.f32 %v6202_v33, %v9357_v48  ;;  %v6886_v17 = vcvt.f32.s32 %v6885_v37  ;;  %v9364_v22 = vsub.s32 %v9352_v62, %v7443_v2 }
 0x1d2   : > { %v1308_v28 = vadd.f32 0.0001, %v1244_v10  ;;  %v537_v39 = vmul.u32 16, %v9159_v29  ;;  %vm729_vm7 = vcmp.lt.s32.totalorder %v8746_v18, 8  ;;  %v1309_v8 = vadd.f32 0.0001, %v1245_v44 }
 0x1d3   : > { %v1310_v25 = vadd.f32 0.0001, %v1246_v27  ;;  %6522 = vst [vmem:[%s7867_s27 + $0x78] sm:$0xff] %v6394_v54  ;;  %v1435_v31 = vadd.s32 8, %v6886_v17  ;;  %v9372_v20 = vsel %vm411_vm11, 1, %v14327_v13  ;;  %v990_v49 = vmul.f32 0.125, %v925_v30 }
 0x1d4   : > { %v6887_v41 = vtrunc.f32 %v1308_v28  ;;  %v6889_v33 = vtrunc.f32 %v1309_v8  ;;  %v991_v37 = vmul.f32 0.125, %v926_v36  ;;  %v629_v10 = vsub.s32 0, %v9364_v22 }
 0x1d5   : > { %v6891_v45 = vtrunc.f32 %v1310_v25  ;;  %vm1515_vm12 = vcmp.lt.s32.totalorder %v1435_v31, 15  ;;  %v539_v27 = vmul.u32 16, %v9372_v20  ;;  %7116 = vlog2.f32 %v990_v49 }
 0x1d6   : > { %v6888_v29 = vcvt.f32.s32 %v6887_v41  ;;  %v1516_v19 = vsel %vm1515_vm12, %v1435_v31, 15  ;;  %v6890_v48 = vcvt.f32.s32 %v6889_v33  ;;  %7118 = vlog2.f32 %v991_v37 }
 0x1d7   : > { %v6892_v44 = vcvt.f32.s32 %v6891_v45  ;;  %v1627_v28 = vsel %vm729_vm7, %v8746_v18, %v1516_v19  ;;  %v9384_v36 = vmin.u32 %v629_v10, %v9364_v22  ;;  %v352_v8 = vsub.s32 %v9352_v62, %v7449_v4 }
 0x1d8   : > { %v9379_v34 = vadd.s32 %v1627_v28, %v537_v39  ;;  %v9381_v30 = vadd.s32 8, %v6888_v29  ;;  %v9386_v54 = vadd.s32 8, %v6890_v48  ;;  %v9393_v18 = vadd.s32 96, %v7441_v1 }
 0x1d9   : > { %v9388_v17 = vadd.s32 8, %v6892_v44 }
 0x1da   : > { %vm1755_vm8 = vcmp.eq.s32.totalorder %v9379_v34, 0  ;;  %vm1886_vm1 = vcmp.eq.s32.totalorder %v9379_v34, 4  ;;  %vm2017_vm6 = vcmp.eq.s32.totalorder %v9379_v34, 8  ;;  %vm2148_vm13 = vcmp.eq.s32.totalorder %v9379_v34, 12 }
 0x1db   : > { %v1822_v39 = vsel %vm1755_vm8, %v7527_v35, 0.0  ;;  %vm2279_vm14 = vcmp.eq.s32.totalorder %v9379_v34, 16  ;;  %vm2410_vm3 = vcmp.eq.s32.totalorder %v9379_v34, 20  ;;  %vm2541_vm2 = vcmp.eq.s32.totalorder %v9379_v34, 24 }
 0x1dc   : > { %v1953_v48 = vsel %vm1886_vm1, %v7539_v38, %v1822_v39  ;;  %vm2672_vm0 = vcmp.eq.s32.totalorder %v9379_v34, 28  ;;  %vm2803_vm9 = vcmp.eq.s32.totalorder %v9379_v34, 1  ;;  %vm2934_vm11 = vcmp.eq.s32.totalorder %v9379_v34, 5 }
 0x1dd   : > { %v2084_v25 = vsel %vm2017_vm6, %v7548_v42, %v1953_v48  ;;  %v2870_v31 = vsel %vm2803_vm9, %v7584_v56, 0.0  ;;  %vm3065_vm10 = vcmp.eq.s32.totalorder %v9379_v34, 9  ;;  %vm3196_vm5 = vcmp.eq.s32.totalorder %v9379_v34, 13 }
 0x1de   : > { %v2215_v41 = vsel %vm2148_vm13, %v7551_v43, %v2084_v25  ;;  %v3001_v49 = vsel %vm2934_vm11, %v7589_v60, %v2870_v31  ;;  %vm3327_vm15 = vcmp.eq.s32.totalorder %v9379_v34, 17  ;;  %vm3458_vm4 = vcmp.eq.s32.totalorder %v9379_v34, 21 }
 0x1df   : > { %vm1517_vm7 = vcmp.lt.s32.totalorder %v9381_v30, 15  ;;  %v2346_v33 = vsel %vm2279_vm14, %v7558_v46, %v2215_v41  ;;  %v3132_v45 = vsel %vm3065_vm10, %v7592_v61, %v3001_v49  ;;  %vm3589_vm12 = vcmp.eq.s32.totalorder %v9379_v34, 25  ;;  %v9429_v29 = vpop.eup %7116 }
 0x1e0   : > { %vm3720_vm8 = vcmp.eq.s32.totalorder %v9379_v34, 29  ;;  %v2477_v37 = vsel %vm2410_vm3, %v7561_v47, %v2346_v33  ;;  %v3263_v10 = vsel %vm3196_vm5, %v7599_v3, %v3132_v45  ;;  %vm3851_vm1 = vcmp.eq.s32.totalorder %v9379_v34, 2  ;;  %v9437_v39 = vpop.eup %7118 }
 0x1e1   : > { %vm3982_vm6 = vcmp.eq.s32.totalorder %v9379_v34, 6  ;;  %vm731_vm13 = vcmp.lt.s32.totalorder %v9141_v5, 8  ;;  %v2608_v19 = vsel %vm2541_vm2, %v7572_v51, %v2477_v37  ;;  %v3394_v44 = vsel %vm3327_vm15, %v7605_v6, %v3263_v10 }
 0x1e2   : > { %v3918_v28 = vsel %vm3851_vm1, %v7631_v21, 0.0  ;;  %vm4113_vm14 = vcmp.eq.s32.totalorder %v9379_v34, 10  ;;  %v2739_v48 = vsel %vm2672_vm0, %v7581_v55, %v2608_v19  ;;  %v3525_v25 = vsel %vm3458_vm4, %v7616_v12, %v3394_v44 }
 0x1e3   : > { %v4049_v31 = vsel %vm3982_vm6, %v7640_v24, %v3918_v28  ;;  %vm4244_vm3 = vcmp.eq.s32.totalorder %v9379_v34, 14  ;;  %v3656_v41 = vsel %vm3589_vm12, %v7622_v15, %v3525_v25  ;;  %vm4375_vm2 = vcmp.eq.s32.totalorder %v9379_v34, 18 }
 0x1e4   : > { %v4180_v49 = vsel %vm4113_vm14, %v7650_v32, %v4049_v31  ;;  %vm4506_vm9 = vcmp.eq.s32.totalorder %v9379_v34, 22  ;;  %v3787_v33 = vsel %vm3720_vm8, %v7625_v16, %v3656_v41  ;;  %vm4637_vm0 = vcmp.eq.s32.totalorder %v9379_v34, 26 }
 0x1e5   : > { %v4311_v45 = vsel %vm4244_vm3, %v7656_v40, %v4180_v49  ;;  %vm4768_vm11 = vcmp.eq.s32.totalorder %v9379_v34, 30  ;;  %vm4899_vm10 = vcmp.eq.s32.totalorder %v9379_v34, 3  ;;  %vm5030_vm5 = vcmp.eq.s32.totalorder %v9379_v34, 7 }
 0x1e6   : > { %v4442_v37 = vsel %vm4375_vm2, %v7663_v52, %v4311_v45  ;;  %vm5161_vm15 = vcmp.eq.s32.totalorder %v9379_v34, 11  ;;  %v4966_v19 = vsel %vm4899_vm10, %v7679_v14, 0.0  ;;  %vm5292_vm4 = vcmp.eq.s32.totalorder %v9379_v34, 15 }
 0x1e7   : > { %v4573_v10 = vsel %vm4506_vm9, %v7666_v53, %v4442_v37  ;;  %vm5423_vm12 = vcmp.eq.s32.totalorder %v9379_v34, 19  ;;  %v5097_v28 = vsel %vm5030_vm5, %v7684_v23, %v4966_v19  ;;  %vm5554_vm8 = vcmp.eq.s32.totalorder %v9379_v34, 23 }
 0x1e8   : > { %v4704_v44 = vsel %vm4637_vm0, %v7671_v59, %v4573_v10  ;;  %vm5685_vm1 = vcmp.eq.s32.totalorder %v9379_v34, 27  ;;  %v5228_v31 = vsel %vm5161_vm15, %v7688_v26, %v5097_v28  ;;  %vm5816_vm6 = vcmp.eq.s32.totalorder %v9379_v34, 31 }
 0x1e9   : > { %v4835_v25 = vsel %vm4768_vm11, %v7674_v63, %v4704_v44  ;;  %v5947_v41 = vadd.f32 %v3787_v33, %v2739_v48  ;;  %v5359_v49 = vsel %vm5292_vm4, %v7693_v57, %v5228_v31  ;;  %v1518_v45 = vsel %vm1517_vm7, %v9381_v30, 15 }
 0x1ea   : > { %vm1519_vm14 = vcmp.lt.s32.totalorder %v9386_v54, 15  ;;  %vm1521_vm3 = vcmp.lt.s32.totalorder %v9388_v17, 15  ;;  %v5490_v37 = vsel %vm5423_vm12, %v7696_v58, %v5359_v49  ;;  %v9481_v19 = vadd.s32 16, %v1518_v45 }
 0x1eb   : > { %v6011_v10 = vadd.f32 %v5947_v41, %v4835_v25  ;;  %v1520_v44 = vsel %vm1519_vm14, %v9386_v54, 15  ;;  %v5621_v48 = vsel %vm5554_vm8, %v7699_v0, %v5490_v37  ;;  %v9491_v30 = vsel %vm1521_vm3, %v9388_v17, 15  ;;  %v6203_v54 = vld [vmem:[%s7432_s28 + $0x80] sm:$0xff] }
 0x1ec   : > { %v9488_v33 = vsel %vm731_vm13, %v9141_v5, %v1520_v44  ;;  %v9496_v28 = vsub.s32 0, %v352_v8  ;;  %v5752_v25 = vsel %vm5685_vm1, %v7705_v9, %v5621_v48  ;;  %vm1756_vm7 = vcmp.eq.s32.totalorder %v9481_v19, 0 }
 0x1ed   : > { %vm1887_vm2 = vcmp.eq.s32.totalorder %v9481_v19, 4  ;;  %vm2018_vm9 = vcmp.eq.s32.totalorder %v9481_v19, 8  ;;  %v5883_v5 = vsel %vm5816_vm6, %v7714_v11, %v5752_v25  ;;  %v1823_v17 = vsel %vm1756_vm7, %v7527_v35, 0.0 }
 0x1ee   : > { %vm2149_vm13 = vcmp.eq.s32.totalorder %v9481_v19, 12  ;;  %vm2280_vm0 = vcmp.eq.s32.totalorder %v9481_v19, 16  ;;  %v9511_v62 = vadd.f32 %v6011_v10, %v5883_v5  ;;  %v1954_v8 = vsel %vm1887_vm2, %v7539_v38, %v1823_v17 }
 0x1ef   : > { %vm2411_vm11 = vcmp.eq.s32.totalorder %v9481_v19, 20  ;;  %vm2542_vm10 = vcmp.eq.s32.totalorder %v9481_v19, 24  ;;  %v2085_v31 = vsel %vm2018_vm9, %v7548_v42, %v1954_v8  ;;  %vm2673_vm5 = vcmp.eq.s32.totalorder %v9481_v19, 28 }
 0x1f0   : > { %14345 = vst [vmem:[#allocation39_spill] sm:$0xff] %v9511_v62  ;;  %vm2804_vm15 = vcmp.eq.s32.totalorder %v9481_v19, 1  ;;  %vm2935_vm4 = vcmp.eq.s32.totalorder %v9481_v19, 5  ;;  %v6395_v34 = vadd.f32 %v6203_v54, %v9511_v62  ;;  %v2216_v41 = vsel %vm2149_vm13, %v7551_v43, %v2085_v31 }
 0x1f1   : > { %v2871_v49 = vsel %vm2804_vm15, %v7584_v56, 0.0  ;;  %vm3066_vm12 = vcmp.eq.s32.totalorder %v9481_v19, 9  ;;  %v2347_v45 = vsel %vm2280_vm0, %v7558_v46, %v2216_v41  ;;  %vm3197_vm8 = vcmp.eq.s32.totalorder %v9481_v19, 13 }
 0x1f2   : > { %v3002_v37 = vsel %vm2935_vm4, %v7589_v60, %v2871_v49  ;;  %vm3328_vm1 = vcmp.eq.s32.totalorder %v9481_v19, 17  ;;  %6523 = vst [vmem:[%s7867_s27 + $0x80] sm:$0xff] %v6395_v34  ;;  %v2478_v10 = vsel %vm2411_vm11, %v7561_v47, %v2347_v45  ;;  %vm3459_vm6 = vcmp.eq.s32.totalorder %v9481_v19, 21 }
 0x1f3   : > { %v3133_v44 = vsel %vm3066_vm12, %v7592_v61, %v3002_v37  ;;  %vm3590_vm14 = vcmp.eq.s32.totalorder %v9481_v19, 25  ;;  %v2609_v48 = vsel %vm2542_vm10, %v7572_v51, %v2478_v10  ;;  %vm3721_vm3 = vcmp.eq.s32.totalorder %v9481_v19, 29 }
 0x1f4   : > { %v3264_v25 = vsel %vm3197_vm8, %v7599_v3, %v3133_v44  ;;  %vm3852_vm7 = vcmp.eq.s32.totalorder %v9481_v19, 2  ;;  %v2740_v5 = vsel %vm2673_vm5, %v7581_v55, %v2609_v48  ;;  %vm3983_vm2 = vcmp.eq.s32.totalorder %v9481_v19, 6 }
 0x1f5   : > { %v3395_v54 = vsel %vm3328_vm1, %v7605_v6, %v3264_v25  ;;  %v3919_v17 = vsel %vm3852_vm7, %v7631_v21, 0.0  ;;  %vm4114_vm9 = vcmp.eq.s32.totalorder %v9481_v19, 10  ;;  %vm4245_vm13 = vcmp.eq.s32.totalorder %v9481_v19, 14 }
 0x1f6   : > { %v3526_v8 = vsel %vm3459_vm6, %v7616_v12, %v3395_v54  ;;  %v4050_v31 = vsel %vm3983_vm2, %v7640_v24, %v3919_v17  ;;  %vm4376_vm0 = vcmp.eq.s32.totalorder %v9481_v19, 18  ;;  %vm4507_vm11 = vcmp.eq.s32.totalorder %v9481_v19, 22 }
 0x1f7   : > { %v3657_v34 = vsel %vm3590_vm14, %v7622_v15, %v3526_v8  ;;  %v4181_v41 = vsel %vm4114_vm9, %v7650_v32, %v4050_v31  ;;  %vm4638_vm10 = vcmp.eq.s32.totalorder %v9481_v19, 26  ;;  %vm4769_vm5 = vcmp.eq.s32.totalorder %v9481_v19, 30 }
 0x1f8   : > { %v3788_v49 = vsel %vm3721_vm3, %v7625_v16, %v3657_v34  ;;  %v4312_v45 = vsel %vm4245_vm13, %v7656_v40, %v4181_v41  ;;  %vm4900_vm15 = vcmp.eq.s32.totalorder %v9481_v19, 3  ;;  %vm5031_vm4 = vcmp.eq.s32.totalorder %v9481_v19, 7 }
 0x1f9   : > { %v4443_v37 = vsel %vm4376_vm0, %v7663_v52, %v4312_v45  ;;  %vm5162_vm12 = vcmp.eq.s32.totalorder %v9481_v19, 11  ;;  %v4967_v44 = vsel %vm4900_vm15, %v7679_v14, 0.0  ;;  %vm5293_vm8 = vcmp.eq.s32.totalorder %v9481_v19, 15 }
 0x1fa   : > { %v4574_v10 = vsel %vm4507_vm11, %v7666_v53, %v4443_v37  ;;  %v1075_v48 = vmul.f32 0.6931472, %v9429_v29  ;;  %v5098_v54 = vsel %vm5031_vm4, %v7684_v23, %v4967_v44  ;;  %vm5424_vm1 = vcmp.eq.s32.totalorder %v9481_v19, 19 }
 0x1fb   : > { %v4705_v25 = vsel %vm4638_vm10, %v7671_v59, %v4574_v10  ;;  %vm5555_vm6 = vcmp.eq.s32.totalorder %v9481_v19, 23  ;;  %v5229_v8 = vsel %vm5162_vm12, %v7688_v26, %v5098_v54  ;;  %vm5686_vm14 = vcmp.eq.s32.totalorder %v9481_v19, 27 }
 0x1fc   : > { %v4836_v17 = vsel %vm4769_vm5, %v7674_v63, %v4705_v25  ;;  %v5948_v31 = vadd.f32 %v3788_v49, %v2740_v5  ;;  %v5360_v34 = vsel %vm5293_vm8, %v7693_v57, %v5229_v8  ;;  %vm5817_vm3 = vcmp.eq.s32.totalorder %v9481_v19, 31 }
 0x1fd   : > { %v9577_v29 = vadd.s32 %v9488_v33, %v539_v27  ;;  %v9580_v41 = vadd.s32 16, %v9491_v30  ;;  %v5491_v45 = vsel %vm5424_vm1, %v7696_v58, %v5360_v34  ;;  %v9583_v10 = vmul.f32 0.36067376, %v1075_v48 }
 0x1fe   : > { %v6012_v37 = vadd.f32 %v5948_v31, %v4836_v17  ;;  %v9586_v5 = vmul.f32 0.6931472, %v9437_v39  ;;  %v5622_v49 = vsel %vm5555_vm6, %v7699_v0, %v5491_v45  ;;  %v6204_v39 = vld [vmem:[%s7432_s28 + $0x88] sm:$0xff] }
 0x1ff   : > { %vm1757_vm7 = vcmp.eq.s32.totalorder %v9577_v29, 0  ;;  %vm1888_vm2 = vcmp.eq.s32.totalorder %v9577_v29, 4  ;;  %vm2019_vm9 = vcmp.eq.s32.totalorder %v9577_v29, 8  ;;  %v5753_v20 = vsel %vm5686_vm14, %v7705_v9, %v5622_v49 }
 0x200   : > { %v1824_v27 = vsel %vm1757_vm7, %v7527_v35, 0.0  ;;  %vm2150_vm13 = vcmp.eq.s32.totalorder %v9577_v29, 12  ;;  %vm2281_vm0 = vcmp.eq.s32.totalorder %v9577_v29, 16  ;;  %v5884_v19 = vsel %vm5817_vm3, %v7714_v11, %v5753_v20 }
 0x201   : > { %v1955_v33 = vsel %vm1888_vm2, %v7539_v38, %v1824_v27  ;;  %vm2412_vm11 = vcmp.eq.s32.totalorder %v9577_v29, 20  ;;  %vm2543_vm10 = vcmp.eq.s32.totalorder %v9577_v29, 24  ;;  %v9601_v30 = vadd.f32 %v6012_v37, %v5884_v19 }
 0x202   : > { %v2086_v44 = vsel %vm2019_vm9, %v7548_v42, %v1955_v33  ;;  %vm2674_vm5 = vcmp.eq.s32.totalorder %v9577_v29, 28  ;;  %vm2805_vm15 = vcmp.eq.s32.totalorder %v9577_v29, 1  ;;  %vm2936_vm4 = vcmp.eq.s32.totalorder %v9577_v29, 5 }
 0x203   : > { %14346 = vst [vmem:[#allocation40_spill] sm:$0xff] %v9601_v30  ;;  %v2217_v48 = vsel %vm2150_vm13, %v7551_v43, %v2086_v44  ;;  %v2872_v25 = vsel %vm2805_vm15, %v7584_v56, 0.0  ;;  %vm3067_vm12 = vcmp.eq.s32.totalorder %v9577_v29, 9  ;;  %v6396_v54 = vadd.f32 %v6204_v39, %v9601_v30 }
 0x204   : > { %v2348_v17 = vsel %vm2281_vm0, %v7558_v46, %v2217_v48  ;;  %v3003_v8 = vsel %vm2936_vm4, %v7589_v60, %v2872_v25  ;;  %vm3198_vm8 = vcmp.eq.s32.totalorder %v9577_v29, 13  ;;  %vm3329_vm1 = vcmp.eq.s32.totalorder %v9577_v29, 17 }
 0x205   : > { %v2479_v31 = vsel %vm2412_vm11, %v7561_v47, %v2348_v17  ;;  %v3134_v34 = vsel %vm3067_vm12, %v7592_v61, %v3003_v8  ;;  %vm3460_vm6 = vcmp.eq.s32.totalorder %v9577_v29, 21  ;;  %6524 = vst [vmem:[%s7867_s27 + $0x88] sm:$0xff] %v6396_v54  ;;  %vm3591_vm14 = vcmp.eq.s32.totalorder %v9577_v29, 25 }
 0x206   : > { %v2610_v45 = vsel %vm2543_vm10, %v7572_v51, %v2479_v31  ;;  %v3265_v37 = vsel %vm3198_vm8, %v7599_v3, %v3134_v34  ;;  %vm3722_vm3 = vcmp.eq.s32.totalorder %v9577_v29, 29  ;;  %vm3853_vm7 = vcmp.eq.s32.totalorder %v9577_v29, 2 }
 0x207   : > { %v2741_v49 = vsel %vm2674_vm5, %v7581_v55, %v2610_v45  ;;  %v3396_v20 = vsel %vm3329_vm1, %v7605_v6, %v3265_v37  ;;  %vm3984_vm2 = vcmp.eq.s32.totalorder %v9577_v29, 6  ;;  %vm821_vm9 = vcmp.gt.s32.totalorder %v9384_v36, 1 }
 0x208   : > { %v3527_v27 = vsel %vm3460_vm6, %v7616_v12, %v3396_v20  ;;  %v3920_v19 = vsel %vm3853_vm7, %v7631_v21, 0.0  ;;  %vm4115_vm13 = vcmp.eq.s32.totalorder %v9577_v29, 10  ;;  %vm4246_vm0 = vcmp.eq.s32.totalorder %v9577_v29, 14 }
 0x209   : > { %v3658_v39 = vsel %vm3591_vm14, %v7622_v15, %v3527_v27  ;;  %v4051_v33 = vsel %vm3984_vm2, %v7640_v24, %v3920_v19  ;;  %vm4377_vm11 = vcmp.eq.s32.totalorder %v9577_v29, 18  ;;  %vm4508_vm10 = vcmp.eq.s32.totalorder %v9577_v29, 22 }
 0x20a   : > { %v3789_v44 = vsel %vm3722_vm3, %v7625_v16, %v3658_v39  ;;  %v4182_v48 = vsel %vm4115_vm13, %v7650_v32, %v4051_v33  ;;  %vm4639_vm5 = vcmp.eq.s32.totalorder %v9577_v29, 26  ;;  %vm4770_vm15 = vcmp.eq.s32.totalorder %v9577_v29, 30 }
 0x20b   : > { %v4313_v25 = vsel %vm4246_vm0, %v7656_v40, %v4182_v48  ;;  %vm4901_vm4 = vcmp.eq.s32.totalorder %v9577_v29, 3  ;;  %vm5032_vm12 = vcmp.eq.s32.totalorder %v9577_v29, 7  ;;  %vm5163_vm8 = vcmp.eq.s32.totalorder %v9577_v29, 11 }
 0x20c   : > { %v4444_v54 = vsel %vm4377_vm11, %v7663_v52, %v4313_v25  ;;  %v4968_v17 = vsel %vm4901_vm4, %v7679_v14, 0.0  ;;  %vm5294_vm1 = vcmp.eq.s32.totalorder %v9577_v29, 15  ;;  %vm5425_vm6 = vcmp.eq.s32.totalorder %v9577_v29, 19 }
 0x20d   : > { %v4575_v8 = vsel %vm4508_vm10, %v7666_v53, %v4444_v54  ;;  %v5099_v31 = vsel %vm5032_vm12, %v7684_v23, %v4968_v17  ;;  %vm5556_vm14 = vcmp.eq.s32.totalorder %v9577_v29, 23  ;;  %vm5687_vm3 = vcmp.eq.s32.totalorder %v9577_v29, 27 }
 0x20e   : > { %v4706_v34 = vsel %vm4639_vm5, %v7671_v59, %v4575_v8  ;;  %v5230_v45 = vsel %vm5163_vm8, %v7688_v26, %v5099_v31  ;;  %vm5818_vm7 = vcmp.eq.s32.totalorder %v9577_v29, 31  ;;  %v5949_v37 = vadd.f32 %v3789_v44, %v2741_v49  ;;  %v6205_v8 = vld [vmem:[%s7432_s28 + $0x90] sm:$0xff] }
 0x20f   : > { %v4837_v20 = vsel %vm4770_vm15, %v7674_v63, %v4706_v34  ;;  %v5361_v27 = vsel %vm5294_vm1, %v7693_v57, %v5230_v45  ;;  %vm1758_vm2 = vcmp.eq.s32.totalorder %v9580_v41, 0  ;;  %vm1889_vm13 = vcmp.eq.s32.totalorder %v9580_v41, 4 }
 0x210   : > { %v5492_v19 = vsel %vm5425_vm6, %v7696_v58, %v5361_v27  ;;  %v6013_v39 = vadd.f32 %v5949_v37, %v4837_v20  ;;  %v1825_v33 = vsel %vm1758_vm2, %v7527_v35, 0.0  ;;  %vm2020_vm0 = vcmp.eq.s32.totalorder %v9580_v41, 8 }
 0x211   : > { %v5623_v49 = vsel %vm5556_vm14, %v7699_v0, %v5492_v19  ;;  %v1956_v44 = vsel %vm1889_vm13, %v7539_v38, %v1825_v33  ;;  %vm2151_vm11 = vcmp.eq.s32.totalorder %v9580_v41, 12  ;;  %vm2282_vm10 = vcmp.eq.s32.totalorder %v9580_v41, 16 }
 0x212   : > { %v5754_v48 = vsel %vm5687_vm3, %v7705_v9, %v5623_v49  ;;  %v2087_v25 = vsel %vm2020_vm0, %v7548_v42, %v1956_v44  ;;  %vm2413_vm5 = vcmp.eq.s32.totalorder %v9580_v41, 20  ;;  %v9680_v54 = vsel %vm821_vm9, %v9384_v36, 1 }
 0x213   : > { %v5885_v17 = vsel %vm5818_vm7, %v7714_v11, %v5754_v48  ;;  %v2218_v31 = vsel %vm2151_vm11, %v7551_v43, %v2087_v25  ;;  %vm2544_vm15 = vcmp.eq.s32.totalorder %v9580_v41, 24  ;;  %vm2806_vm4 = vcmp.eq.s32.totalorder %v9580_v41, 1 }
 0x214   : > { %v9689_v34 = vadd.f32 %v6013_v39, %v5885_v17  ;;  %v2349_v45 = vsel %vm2282_vm10, %v7558_v46, %v2218_v31  ;;  %v2873_v37 = vsel %vm2806_vm4, %v7584_v56, 0.0  ;;  %vm2937_vm9 = vcmp.eq.s32.totalorder %v9580_v41, 5 }
 0x215   : > { %v2480_v20 = vsel %vm2413_vm5, %v7561_v47, %v2349_v45  ;;  %v3004_v29 = vsel %vm2937_vm9, %v7589_v60, %v2873_v37  ;;  %vm3068_vm12 = vcmp.eq.s32.totalorder %v9580_v41, 9  ;;  %vm3199_vm8 = vcmp.eq.s32.totalorder %v9580_v41, 13 }
 0x216   : > { %14347 = vst [vmem:[#allocation41_spill] sm:$0xff] %v9689_v34  ;;  %v6397_v27 = vadd.f32 %v6205_v8, %v9689_v34  ;;  %vm2675_vm1 = vcmp.eq.s32.totalorder %v9580_v41, 28  ;;  %v3135_v19 = vsel %vm3068_vm12, %v7592_v61, %v3004_v29  ;;  %vm3330_vm6 = vcmp.eq.s32.totalorder %v9580_v41, 17 }
 0x217   : > { %v2611_v39 = vsel %vm2544_vm15, %v7572_v51, %v2480_v20  ;;  %v3266_v33 = vsel %vm3199_vm8, %v7599_v3, %v3135_v19  ;;  %vm3461_vm14 = vcmp.eq.s32.totalorder %v9580_v41, 21  ;;  %vm3592_vm3 = vcmp.eq.s32.totalorder %v9580_v41, 25 }
 0x218   : > { %6525 = vst [vmem:[%s7867_s27 + $0x90] sm:$0xff] %v6397_v27  ;;  %v3397_v49 = vsel %vm3330_vm6, %v7605_v6, %v3266_v33  ;;  %vm3723_vm7 = vcmp.eq.s32.totalorder %v9580_v41, 29  ;;  %vm3854_vm2 = vcmp.eq.s32.totalorder %v9580_v41, 2  ;;  %vm3985_vm13 = vcmp.eq.s32.totalorder %v9580_v41, 6 }
 0x219   : > { %vm413_vm0 = vcmp.lt.s32.totalorder %v9147_v7, 0  ;;  %v3528_v44 = vsel %vm3461_vm14, %v7616_v12, %v3397_v49  ;;  %v3921_v48 = vsel %vm3854_vm2, %v7631_v21, 0.0  ;;  %vm4116_vm11 = vcmp.eq.s32.totalorder %v9580_v41, 10 }
 0x21a   : > { %vm4247_vm10 = vcmp.eq.s32.totalorder %v9580_v41, 14  ;;  %v2742_v25 = vsel %vm2675_vm1, %v7581_v55, %v2611_v39  ;;  %v3659_v17 = vsel %vm3592_vm3, %v7622_v15, %v3528_v44  ;;  %v4052_v8 = vsel %vm3985_vm13, %v7640_v24, %v3921_v48 }
 0x21b   : > { %vm4378_vm5 = vcmp.eq.s32.totalorder %v9580_v41, 18  ;;  %v3790_v31 = vsel %vm3723_vm7, %v7625_v16, %v3659_v17  ;;  %v4183_v45 = vsel %vm4116_vm11, %v7650_v32, %v4052_v8  ;;  %vm4509_vm15 = vcmp.eq.s32.totalorder %v9580_v41, 22 }
 0x21c   : > { %vm4640_vm4 = vcmp.eq.s32.totalorder %v9580_v41, 26  ;;  %v4314_v37 = vsel %vm4247_vm10, %v7656_v40, %v4183_v45  ;;  %vm4902_vm9 = vcmp.eq.s32.totalorder %v9580_v41, 3  ;;  %vm5033_vm12 = vcmp.eq.s32.totalorder %v9580_v41, 7 }
 0x21d   : > { %vm5164_vm8 = vcmp.eq.s32.totalorder %v9580_v41, 11  ;;  %v4445_v20 = vsel %vm4378_vm5, %v7663_v52, %v4314_v37  ;;  %vm4771_vm1 = vcmp.eq.s32.totalorder %v9580_v41, 30  ;;  %v4969_v29 = vsel %vm4902_vm9, %v7679_v14, 0.0 }
 0x21e   : > { %vm5295_vm6 = vcmp.eq.s32.totalorder %v9580_v41, 15  ;;  %v4576_v27 = vsel %vm4509_vm15, %v7666_v53, %v4445_v20  ;;  %v5100_v19 = vsel %vm5033_vm12, %v7684_v23, %v4969_v29  ;;  %vm5426_vm14 = vcmp.eq.s32.totalorder %v9580_v41, 19 }
 0x21f   : > { %vm5557_vm3 = vcmp.eq.s32.totalorder %v9580_v41, 23  ;;  %v4707_v39 = vsel %vm4640_vm4, %v7671_v59, %v4576_v27  ;;  %v5231_v33 = vsel %vm5164_vm8, %v7688_v26, %v5100_v19  ;;  %vm5688_vm7 = vcmp.eq.s32.totalorder %v9580_v41, 27 }
 0x220   : > { %v5950_v49 = vadd.f32 %v3790_v31, %v2742_v25  ;;  %v4838_v44 = vsel %vm4771_vm1, %v7674_v63, %v4707_v39  ;;  %v5362_v48 = vsel %vm5295_vm6, %v7693_v57, %v5231_v33  ;;  %v1247_v17 = vmul.f32 8.0, %v9583_v10 }
 0x221   : > { %v1184_v8 = vmul.f32 0.36067376, %v9586_v5  ;;  %v5493_v45 = vsel %vm5426_vm14, %v7696_v58, %v5362_v48  ;;  %vm5819_vm2 = vcmp.eq.s32.totalorder %v9580_v41, 31  ;;  %v9749_v20 = vsub.s32 %v9393_v18, %v7443_v2  ;;  %v6206_v41 = vld [vmem:[%s7432_s28 + $0x98] sm:$0xff] }
 0x222   : > { %v6014_v37 = vadd.f32 %v5950_v49, %v4838_v44  ;;  %v5624_v25 = vsel %vm5557_vm3, %v7699_v0, %v5493_v45  ;;  %v1311_v31 = vadd.f32 0.0001, %v1247_v17  ;;  %v477_v10 = vsel %vm413_vm0, 1, %v14327_v13 }
 0x223   : > { %v1248_v29 = vmul.f32 8.0, %v1184_v8  ;;  %v5755_v27 = vsel %vm5688_vm7, %v7705_v9, %v5624_v25  ;;  %v927_v5 = vcvt.s32.f32 %v9680_v54  ;;  %v928_v49 = vcvt.s32.f32 %v9496_v28 }
 0x224   : > { %v5886_v19 = vsel %vm5819_vm2, %v7714_v11, %v5755_v27  ;;  %v6893_v39 = vtrunc.f32 %v1311_v31  ;;  %v633_v48 = vsub.s32 0, %v9749_v20  ;;  %v354_v17 = vsub.s32 %v9393_v18, %v7449_v4 }
 0x225   : > { %v1312_v33 = vadd.f32 0.0001, %v1248_v29  ;;  %v9760_v44 = vadd.f32 %v6014_v37, %v5886_v19  ;;  %v541_v8 = vmul.u32 16, %v477_v10  ;;  %v9766_v54 = vadd.s32 104, %v7441_v1 }
 0x226   : > { %v6894_v7 = vcvt.f32.s32 %v6893_v39  ;;  %v992_v31 = vmul.f32 0.125, %v927_v5  ;;  %v9770_v29 = vmin.u32 %v633_v48, %v9749_v20  ;;  %v635_v28 = vsub.s32 0, %v354_v17 }
 0x227   : > { %14348 = vst [vmem:[#allocation42_spill] sm:$0xff] %v9760_v44  ;;  %v6895_v45 = vtrunc.f32 %v1312_v33  ;;  %v6398_v25 = vadd.f32 %v6206_v41, %v9760_v44  ;;  %v993_v19 = vmul.f32 0.125, %v928_v49  ;;  %v9774_v34 = vsub.s32 %v9766_v54, %v7443_v2 }
 0x228   : > { %v1439_v37 = vadd.s32 8, %v6894_v7  ;;  %vm733_vm13 = vcmp.lt.s32.totalorder %v9168_v50, 8  ;;  %vm825_vm0 = vcmp.gt.s32.totalorder %v9770_v29, 1  ;;  %v930_v18 = vcvt.s32.f32 %v635_v28 }
 0x229   : > { %v6896_v27 = vcvt.f32.s32 %v6895_v45  ;;  %6526 = vst [vmem:[%s7867_s27 + $0x98] sm:$0xff] %v6398_v25  ;;  %v9780_v10 = vadd.s32 112, %v7441_v1  ;;  %v826_v41 = vsel %vm825_vm0, %v9770_v29, 1  ;;  %7120 = vlog2.f32 %v992_v31 }
 0x22a   : > { %vm1523_vm11 = vcmp.lt.s32.totalorder %v1439_v37, 15  ;;  %v929_v33 = vcvt.s32.f32 %v826_v41  ;;  %v995_v49 = vmul.f32 0.125, %v930_v18  ;;  %7122 = vlog2.f32 %v993_v19 }
 0x22b   : > { %v1440_v5 = vadd.s32 8, %v6896_v27  ;;  %v1524_v39 = vsel %vm1523_vm11, %v1439_v37, 15  ;;  %v637_v17 = vsub.s32 0, %v9774_v34  ;;  %v9791_v28 = vsub.s32 %v9780_v10, %v7443_v2 }
 0x22c   : > { %v1631_v48 = vsel %vm733_vm13, %v9168_v50, %v1524_v39  ;;  %v9795_v31 = vmul.f32 0.125, %v929_v33  ;;  %7124 = vlog2.f32 %v995_v49 }
 0x22d   : > { %vm1525_vm10 = vcmp.lt.s32.totalorder %v1440_v5, 15  ;;  %v9785_v7 = vadd.s32 %v1631_v48, %v541_v8  ;;  %v9798_v50 = vmin.u32 %v637_v17, %v9774_v34 }
 0x22e   : > { %v1526_v45 = vsel %vm1525_vm10, %v1440_v5, 15  ;;  %7126 = vlog2.f32 %v9795_v31 }
 0x22f   : > { %v9793_v37 = vadd.s32 16, %v1526_v45  ;;  %vm1759_vm5 = vcmp.eq.s32.totalorder %v9785_v7, 0  ;;  %vm1890_vm15 = vcmp.eq.s32.totalorder %v9785_v7, 4  ;;  %vm2021_vm4 = vcmp.eq.s32.totalorder %v9785_v7, 8 }
 0x230   : > { %vm2152_vm9 = vcmp.eq.s32.totalorder %v9785_v7, 12  ;;  %v1826_v8 = vsel %vm1759_vm5, %v7527_v35, 0.0  ;;  %vm2283_vm12 = vcmp.eq.s32.totalorder %v9785_v7, 16  ;;  %vm2414_vm8 = vcmp.eq.s32.totalorder %v9785_v7, 20 }
 0x231   : > { %vm2545_vm1 = vcmp.eq.s32.totalorder %v9785_v7, 24  ;;  %v1957_v27 = vsel %vm1890_vm15, %v7539_v38, %v1826_v8  ;;  %vm2676_vm6 = vcmp.eq.s32.totalorder %v9785_v7, 28  ;;  %vm2807_vm14 = vcmp.eq.s32.totalorder %v9785_v7, 1 }
 0x232   : > { %vm2938_vm3 = vcmp.eq.s32.totalorder %v9785_v7, 5  ;;  %v2088_v19 = vsel %vm2021_vm4, %v7548_v42, %v1957_v27  ;;  %v2874_v18 = vsel %vm2807_vm14, %v7584_v56, 0.0  ;;  %vm3069_vm7 = vcmp.eq.s32.totalorder %v9785_v7, 9 }
 0x233   : > { %vm3200_vm2 = vcmp.eq.s32.totalorder %v9785_v7, 13  ;;  %v2219_v5 = vsel %vm2152_vm9, %v7551_v43, %v2088_v19  ;;  %v3005_v41 = vsel %vm2938_vm3, %v7589_v60, %v2874_v18  ;;  %vm3331_vm13 = vcmp.eq.s32.totalorder %v9785_v7, 17  ;;  %v9824_v49 = vpop.eup %7120 }
 0x234   : > { %vm3462_vm0 = vcmp.eq.s32.totalorder %v9785_v7, 21  ;;  %v2350_v39 = vsel %vm2283_vm12, %v7558_v46, %v2219_v5  ;;  %v3136_v33 = vsel %vm3069_vm7, %v7592_v61, %v3005_v41  ;;  %vm3593_vm11 = vcmp.eq.s32.totalorder %v9785_v7, 25  ;;  %v9832_v45 = vpop.eup %7122 }
 0x235   : > { %vm3724_vm10 = vcmp.eq.s32.totalorder %v9785_v7, 29  ;;  %v2481_v48 = vsel %vm2414_vm8, %v7561_v47, %v2350_v39  ;;  %v3267_v17 = vsel %vm3200_vm2, %v7599_v3, %v3136_v33  ;;  %vm3855_vm5 = vcmp.eq.s32.totalorder %v9785_v7, 2 }
 0x236   : > { %vm3986_vm15 = vcmp.eq.s32.totalorder %v9785_v7, 6  ;;  %v2612_v8 = vsel %vm2545_vm1, %v7572_v51, %v2481_v48  ;;  %v3398_v27 = vsel %vm3331_vm13, %v7605_v6, %v3267_v17  ;;  %v3922_v19 = vsel %vm3855_vm5, %v7631_v21, 0.0  ;;  %v9848_v39 = vpop.eup %7124 }
 0x237   : > { %vm4117_vm4 = vcmp.eq.s32.totalorder %v9785_v7, 10  ;;  %v2743_v18 = vsel %vm2676_vm6, %v7581_v55, %v2612_v8  ;;  %v3529_v5 = vsel %vm3462_vm0, %v7616_v12, %v3398_v27  ;;  %v4053_v41 = vsel %vm3986_vm15, %v7640_v24, %v3922_v19 }
 0x238   : > { %vm4248_vm9 = vcmp.eq.s32.totalorder %v9785_v7, 14  ;;  %v3660_v33 = vsel %vm3593_vm11, %v7622_v15, %v3529_v5  ;;  %v4184_v48 = vsel %vm4117_vm4, %v7650_v32, %v4053_v41  ;;  %vm4379_vm12 = vcmp.eq.s32.totalorder %v9785_v7, 18 }
 0x239   : > { %vm4510_vm8 = vcmp.eq.s32.totalorder %v9785_v7, 22  ;;  %v3791_v17 = vsel %vm3724_vm10, %v7625_v16, %v3660_v33  ;;  %v4315_v8 = vsel %vm4248_vm9, %v7656_v40, %v4184_v48  ;;  %vm4641_vm1 = vcmp.eq.s32.totalorder %v9785_v7, 26 }
 0x23a   : > { %vm4772_vm6 = vcmp.eq.s32.totalorder %v9785_v7, 30  ;;  %v4446_v27 = vsel %vm4379_vm12, %v7663_v52, %v4315_v8  ;;  %vm4903_vm14 = vcmp.eq.s32.totalorder %v9785_v7, 3  ;;  %vm5034_vm3 = vcmp.eq.s32.totalorder %v9785_v7, 7 }
 0x23b   : > { %vm5165_vm7 = vcmp.eq.s32.totalorder %v9785_v7, 11  ;;  %v4577_v19 = vsel %vm4510_vm8, %v7666_v53, %v4446_v27  ;;  %v4970_v5 = vsel %vm4903_vm14, %v7679_v14, 0.0  ;;  %vm5296_vm2 = vcmp.eq.s32.totalorder %v9785_v7, 15 }
 0x23c   : > { %vm5427_vm13 = vcmp.eq.s32.totalorder %v9785_v7, 19  ;;  %v4708_v41 = vsel %vm4641_vm1, %v7671_v59, %v4577_v19  ;;  %v5101_v33 = vsel %vm5034_vm3, %v7684_v23, %v4970_v5  ;;  %vm5558_vm0 = vcmp.eq.s32.totalorder %v9785_v7, 23 }
 0x23d   : > { %vm5689_vm11 = vcmp.eq.s32.totalorder %v9785_v7, 27  ;;  %v4839_v48 = vsel %vm4772_vm6, %v7674_v63, %v4708_v41  ;;  %v5232_v8 = vsel %vm5165_vm7, %v7688_v26, %v5101_v33  ;;  %vm5820_vm10 = vcmp.eq.s32.totalorder %v9785_v7, 31 }
 0x23e   : > { %v5951_v27 = vadd.f32 %v3791_v17, %v2743_v18  ;;  %v5363_v25 = vsel %vm5296_vm2, %v7693_v57, %v5232_v8  ;;  %vm1760_vm5 = vcmp.eq.s32.totalorder %v9793_v37, 0  ;;  %vm1891_vm15 = vcmp.eq.s32.totalorder %v9793_v37, 4 }
 0x23f   : > { %vm2022_vm4 = vcmp.eq.s32.totalorder %v9793_v37, 8  ;;  %v5494_v19 = vsel %vm5427_vm13, %v7696_v58, %v5363_v25  ;;  %v1827_v44 = vsel %vm1760_vm5, %v7527_v35, 0.0  ;;  %vm2153_vm9 = vcmp.eq.s32.totalorder %v9793_v37, 12 }
 0x240   : > { %v6015_v5 = vadd.f32 %v5951_v27, %v4839_v48  ;;  %v5625_v41 = vsel %vm5558_vm0, %v7699_v0, %v5494_v19  ;;  %v1958_v18 = vsel %vm1891_vm15, %v7539_v38, %v1827_v44  ;;  %vm2284_vm12 = vcmp.eq.s32.totalorder %v9793_v37, 16  ;;  %v6207_v48 = vld [vmem:[%s7432_s28 + $0xa0] sm:$0xff] }
 0x241   : > { %vm2415_vm8 = vcmp.eq.s32.totalorder %v9793_v37, 20  ;;  %v5756_v17 = vsel %vm5689_vm11, %v7705_v9, %v5625_v41  ;;  %v2089_v33 = vsel %vm2022_vm4, %v7548_v42, %v1958_v18  ;;  %vm2546_vm1 = vcmp.eq.s32.totalorder %v9793_v37, 24 }
 0x242   : > { %vm2677_vm6 = vcmp.eq.s32.totalorder %v9793_v37, 28  ;;  %v5887_v25 = vsel %vm5820_vm10, %v7714_v11, %v5756_v17  ;;  %v2220_v44 = vsel %vm2153_vm9, %v7551_v43, %v2089_v33  ;;  %vm2808_vm14 = vcmp.eq.s32.totalorder %v9793_v37, 1 }
 0x243   : > { %vm2939_vm3 = vcmp.eq.s32.totalorder %v9793_v37, 5  ;;  %v9901_v8 = vadd.f32 %v6015_v5, %v5887_v25  ;;  %v2351_v27 = vsel %vm2284_vm12, %v7558_v46, %v2220_v44  ;;  %v2875_v19 = vsel %vm2808_vm14, %v7584_v56, 0.0 }
 0x244   : > { %vm3070_vm7 = vcmp.eq.s32.totalorder %v9793_v37, 9  ;;  %v2482_v41 = vsel %vm2415_vm8, %v7561_v47, %v2351_v27  ;;  %v3006_v7 = vsel %vm2939_vm3, %v7589_v60, %v2875_v19  ;;  %vm3201_vm2 = vcmp.eq.s32.totalorder %v9793_v37, 13 }
 0x245   : > { %14349 = vst [vmem:[#allocation43_spill] sm:$0xff] %v9901_v8  ;;  %vm3332_vm13 = vcmp.eq.s32.totalorder %v9793_v37, 17  ;;  %v6399_v18 = vadd.f32 %v6207_v48, %v9901_v8  ;;  %v2613_v5 = vsel %vm2546_vm1, %v7572_v51, %v2482_v41  ;;  %v3137_v17 = vsel %vm3070_vm7, %v7592_v61, %v3006_v7 }
 0x246   : > { %vm3463_vm0 = vcmp.eq.s32.totalorder %v9793_v37, 21  ;;  %v2744_v33 = vsel %vm2677_vm6, %v7581_v55, %v2613_v5  ;;  %v3268_v25 = vsel %vm3201_vm2, %v7599_v3, %v3137_v17  ;;  %vm3594_vm11 = vcmp.eq.s32.totalorder %v9793_v37, 25 }
 0x247   : > { %vm3725_vm10 = vcmp.eq.s32.totalorder %v9793_v37, 29  ;;  %6527 = vst [vmem:[%s7867_s27 + $0xa0] sm:$0xff] %v6399_v18  ;;  %v3399_v48 = vsel %vm3332_vm13, %v7605_v6, %v3268_v25  ;;  %vm3856_vm5 = vcmp.eq.s32.totalorder %v9793_v37, 2  ;;  %vm3987_vm15 = vcmp.eq.s32.totalorder %v9793_v37, 6 }
 0x248   : > { %vm4118_vm4 = vcmp.eq.s32.totalorder %v9793_v37, 10  ;;  %v3530_v44 = vsel %vm3463_vm0, %v7616_v12, %v3399_v48  ;;  %v3923_v27 = vsel %vm3856_vm5, %v7631_v21, 0.0  ;;  %vm4249_vm9 = vcmp.eq.s32.totalorder %v9793_v37, 14 }
 0x249   : > { %vm4380_vm12 = vcmp.eq.s32.totalorder %v9793_v37, 18  ;;  %v3661_v19 = vsel %vm3594_vm11, %v7622_v15, %v3530_v44  ;;  %v4054_v41 = vsel %vm3987_vm15, %v7640_v24, %v3923_v27  ;;  %vm4511_vm8 = vcmp.eq.s32.totalorder %v9793_v37, 22 }
 0x24a   : > { %vm4642_vm1 = vcmp.eq.s32.totalorder %v9793_v37, 26  ;;  %v3792_v7 = vsel %vm3725_vm10, %v7625_v16, %v3661_v19  ;;  %v4185_v18 = vsel %vm4118_vm4, %v7650_v32, %v4054_v41  ;;  %vm4773_vm6 = vcmp.eq.s32.totalorder %v9793_v37, 30 }
 0x24b   : > { %vm4904_vm14 = vcmp.eq.s32.totalorder %v9793_v37, 3  ;;  %v4316_v5 = vsel %vm4249_vm9, %v7656_v40, %v4185_v18  ;;  %vm5035_vm3 = vcmp.eq.s32.totalorder %v9793_v37, 7  ;;  %vm5166_vm7 = vcmp.eq.s32.totalorder %v9793_v37, 11 }
 0x24c   : > { %v4971_v17 = vsel %vm4904_vm14, %v7679_v14, 0.0  ;;  %v4447_v25 = vsel %vm4380_vm12, %v7663_v52, %v4316_v5  ;;  %vm5297_vm2 = vcmp.eq.s32.totalorder %v9793_v37, 15  ;;  %vm5428_vm13 = vcmp.eq.s32.totalorder %v9793_v37, 19 }
 0x24d   : > { %v5102_v48 = vsel %vm5035_vm3, %v7684_v23, %v4971_v17  ;;  %v4578_v44 = vsel %vm4511_vm8, %v7666_v53, %v4447_v25  ;;  %vm5559_vm0 = vcmp.eq.s32.totalorder %v9793_v37, 23  ;;  %vm5690_vm11 = vcmp.eq.s32.totalorder %v9793_v37, 27 }
 0x24e   : > { %v5233_v27 = vsel %vm5166_vm7, %v7688_v26, %v5102_v48  ;;  %v4709_v19 = vsel %vm4642_vm1, %v7671_v59, %v4578_v44  ;;  %vm5821_vm10 = vcmp.eq.s32.totalorder %v9793_v37, 31  ;;  %v5952_v18 = vadd.f32 %v3792_v7, %v2744_v33 }
 0x24f   : > { %v5364_v41 = vsel %vm5297_vm2, %v7693_v57, %v5233_v27  ;;  %v4840_v5 = vsel %vm4773_vm6, %v7674_v63, %v4709_v19  ;;  %v1079_v25 = vmul.f32 0.6931472, %v9824_v49  ;;  %v1081_v48 = vmul.f32 0.6931472, %v9832_v45  ;;  %v6208_v19 = vld [vmem:[%s7432_s28 + $0xa8] sm:$0xff] }
 0x250   : > { %v5495_v17 = vsel %vm5428_vm13, %v7696_v58, %v5364_v41  ;;  %v6016_v30 = vadd.f32 %v5952_v18, %v4840_v5  ;;  %v1085_v44 = vmul.f32 0.6931472, %v9848_v39  ;;  %vm415_vm5 = vcmp.lt.s32.totalorder %v9364_v22, 0 }
 0x251   : > { %v5626_v8 = vsel %vm5559_vm0, %v7699_v0, %v5495_v17  ;;  %v1185_v33 = vmul.f32 0.36067376, %v1079_v25  ;;  %v1186_v37 = vmul.f32 0.36067376, %v1081_v48  ;;  %vm829_vm15 = vcmp.gt.s32.totalorder %v9798_v50, 1 }
 0x252   : > { %v5757_v27 = vsel %vm5690_vm11, %v7705_v9, %v5626_v8  ;;  %v1188_v49 = vmul.f32 0.36067376, %v1085_v44  ;;  %v14350_v45 = vsub.s32 %v9766_v54, %v7449_v4  ;;  %v641_v8 = vsub.s32 0, %v9791_v28 }
 0x253   : > { %v5888_v7 = vsel %vm5821_vm10, %v7714_v11, %v5757_v27  ;;  %v1249_v39 = vmul.f32 8.0, %v1185_v33  ;;  %v1250_v18 = vmul.f32 8.0, %v1186_v37  ;;  %v830_v27 = vsel %vm829_vm15, %v9798_v50, 1 }
 0x254   : > { %v639_v41 = vsub.s32 0, %v14350_v45  ;;  %v9973_v31 = vadd.f32 %v6016_v30, %v5888_v7  ;;  %v1252_v5 = vmul.f32 8.0, %v1188_v49  ;;  %v479_v44 = vsel %vm415_vm5, 1, %v14327_v13 }
 0x255   : > { %v1313_v25 = vadd.f32 0.0001, %v1249_v39  ;;  %v1314_v48 = vadd.f32 0.0001, %v1250_v18  ;;  %vm417_vm4 = vcmp.lt.s32.totalorder %v9749_v20, 0  ;;  %v9984_v7 = vmin.u32 %v641_v8, %v9791_v28  ;;  %v7127_v18 = vpop.eup %7126 }
 0x256   : > { %14351 = vst [vmem:[#allocation44_spill] sm:$0xff] %v9973_v31  ;;  %v6400_v17 = vadd.f32 %v6208_v19, %v9973_v31  ;;  %v1316_v54 = vadd.f32 0.0001, %v1252_v5  ;;  %v932_v37 = vcvt.s32.f32 %v639_v41  ;;  %v931_v19 = vcvt.s32.f32 %v830_v27 }
 0x257   : > { %v6897_v30 = vtrunc.f32 %v1313_v25  ;;  %v6899_v33 = vtrunc.f32 %v1314_v48  ;;  %vm833_vm9 = vcmp.gt.s32.totalorder %v9984_v7, 1  ;;  %v358_v22 = vsub.s32 %v9780_v10, %v7449_v4 }
 0x258   : > { %6528 = vst [vmem:[%s7867_s27 + $0xa8] sm:$0xff] %v6400_v17  ;;  %v6903_v49 = vtrunc.f32 %v1316_v54  ;;  %v543_v31 = vmul.u32 16, %v479_v44  ;;  %vm735_vm12 = vcmp.lt.s32.totalorder %v9384_v36, 8  ;;  %v9993_v41 = vsel %vm417_vm4, 1, %v14327_v13 }
 0x259   : > { %v6898_v45 = vcvt.f32.s32 %v6897_v30  ;;  %v6900_v39 = vcvt.f32.s32 %v6899_v33  ;;  %v1083_v25 = vmul.f32 0.6931472, %v7127_v18  ;;  %v997_v48 = vmul.f32 0.125, %v932_v37 }
 0x25a   : > { %v6904_v8 = vcvt.f32.s32 %v6903_v49  ;;  %v996_v54 = vmul.f32 0.125, %v931_v19  ;;  %v9996_v30 = vsel %vm833_vm9, %v9984_v7, 1  ;;  %v9999_v10 = vadd.s32 120, %v7441_v1 }
 0x25b   : > { %v1441_v5 = vadd.s32 8, %v6898_v45  ;;  %v1442_v17 = vadd.s32 8, %v6900_v39  ;;  %v1187_v44 = vmul.f32 0.36067376, %v1083_v25  ;;  %v10001_v33 = vsub.s32 0, %v358_v22 }
 0x25c   : > { %v1444_v27 = vadd.s32 8, %v6904_v8  ;;  %7128 = vlog2.f32 %v997_v48  ;;  %v10012_v22 = vsub.s32 %v9999_v10, %v7443_v2 }
 0x25d   : > { %vm1527_vm8 = vcmp.lt.s32.totalorder %v1441_v5, 15  ;;  %vm1529_vm1 = vcmp.lt.s32.totalorder %v1442_v17, 15  ;;  %7130 = vlog2.f32 %v996_v54  ;;  %v10016_v8 = vmul.f32 8.0, %v1187_v44 }
 0x25e   : > { %v1528_v20 = vsel %vm1527_vm8, %v1441_v5, 15  ;;  %v1530_v62 = vsel %vm1529_vm1, %v1442_v17, 15  ;;  %vm1533_vm6 = vcmp.lt.s32.totalorder %v1444_v27, 15 }
 0x25f   : > { %v1633_v37 = vsel %vm735_vm12, %v9384_v36, %v1528_v20  ;;  %v1534_v19 = vsel %vm1533_vm6, %v1444_v27, 15  ;;  %v10014_v18 = vadd.s32 16, %v1530_v62 }
 0x260   : > { %v10007_v45 = vadd.s32 %v1633_v37, %v543_v31  ;;  %v10018_v5 = vadd.s32 16, %v1534_v19 }
 0x261   : > { %vm1762_vm1 = vcmp.eq.s32.totalorder %v10014_v18, 0 }
 0x262   : > { %vm1761_vm14 = vcmp.eq.s32.totalorder %v10007_v45, 0  ;;  %vm1892_vm3 = vcmp.eq.s32.totalorder %v10007_v45, 4  ;;  %vm2023_vm7 = vcmp.eq.s32.totalorder %v10007_v45, 8  ;;  %vm2154_vm2 = vcmp.eq.s32.totalorder %v10007_v45, 12 }
 0x263   : > { %v1828_v31 = vsel %vm1761_vm14, %v7527_v35, 0.0  ;;  %vm2285_vm13 = vcmp.eq.s32.totalorder %v10007_v45, 16  ;;  %vm2416_vm0 = vcmp.eq.s32.totalorder %v10007_v45, 20  ;;  %vm2547_vm11 = vcmp.eq.s32.totalorder %v10007_v45, 24 }
 0x264   : > { %v1959_v62 = vsel %vm1892_vm3, %v7539_v38, %v1828_v31  ;;  %vm2678_vm10 = vcmp.eq.s32.totalorder %v10007_v45, 28  ;;  %vm2809_vm5 = vcmp.eq.s32.totalorder %v10007_v45, 1  ;;  %vm2940_vm15 = vcmp.eq.s32.totalorder %v10007_v45, 5 }
 0x265   : > { %v2090_v17 = vsel %vm2023_vm7, %v7548_v42, %v1959_v62  ;;  %v2876_v25 = vsel %vm2809_vm5, %v7584_v56, 0.0  ;;  %vm3071_vm4 = vcmp.eq.s32.totalorder %v10007_v45, 9  ;;  %vm3202_vm9 = vcmp.eq.s32.totalorder %v10007_v45, 13 }
 0x266   : > { %v2221_v48 = vsel %vm2154_vm2, %v7551_v43, %v2090_v17  ;;  %v3007_v27 = vsel %vm2940_vm15, %v7589_v60, %v2876_v25  ;;  %vm3333_vm12 = vcmp.eq.s32.totalorder %v10007_v45, 17  ;;  %vm3464_vm8 = vcmp.eq.s32.totalorder %v10007_v45, 21  ;;  %v10056_v19 = vpop.eup %7128 }
 0x267   : > { %v2352_v54 = vsel %vm2285_vm13, %v7558_v46, %v2221_v48  ;;  %v3138_v44 = vsel %vm3071_vm4, %v7592_v61, %v3007_v27  ;;  %vm3595_vm6 = vcmp.eq.s32.totalorder %v10007_v45, 25  ;;  %vm3726_vm14 = vcmp.eq.s32.totalorder %v10007_v45, 29  ;;  %v10065_v25 = vpop.eup %7130 }
 0x268   : > { %vm1893_vm3 = vcmp.eq.s32.totalorder %v10014_v18, 4  ;;  %v2483_v20 = vsel %vm2416_vm0, %v7561_v47, %v2352_v54  ;;  %v3269_v37 = vsel %vm3202_vm9, %v7599_v3, %v3138_v44  ;;  %vm3857_vm7 = vcmp.eq.s32.totalorder %v10007_v45, 2 }
 0x269   : > { %vm3988_vm2 = vcmp.eq.s32.totalorder %v10007_v45, 6  ;;  %vm2024_vm13 = vcmp.eq.s32.totalorder %v10014_v18, 8  ;;  %v2614_v31 = vsel %vm2547_vm11, %v7572_v51, %v2483_v20  ;;  %v3400_v62 = vsel %vm3333_vm12, %v7605_v6, %v3269_v37 }
 0x26a   : > { %v3924_v17 = vsel %vm3857_vm7, %v7631_v21, 0.0  ;;  %vm4119_vm0 = vcmp.eq.s32.totalorder %v10007_v45, 10  ;;  %vm2155_vm5 = vcmp.eq.s32.totalorder %v10014_v18, 12  ;;  %v2745_v48 = vsel %vm2678_vm10, %v7581_v55, %v2614_v31 }
 0x26b   : > { %v3531_v27 = vsel %vm3464_vm8, %v7616_v12, %v3400_v62  ;;  %v4055_v54 = vsel %vm3988_vm2, %v7640_v24, %v3924_v17  ;;  %vm4250_vm11 = vcmp.eq.s32.totalorder %v10007_v45, 14  ;;  %vm4381_vm15 = vcmp.eq.s32.totalorder %v10007_v45, 18 }
 0x26c   : > { %v3662_v44 = vsel %vm3595_vm6, %v7622_v15, %v3531_v27  ;;  %v4186_v20 = vsel %vm4119_vm0, %v7650_v32, %v4055_v54  ;;  %vm4512_vm4 = vcmp.eq.s32.totalorder %v10007_v45, 22  ;;  %vm4643_vm10 = vcmp.eq.s32.totalorder %v10007_v45, 26 }
 0x26d   : > { %v3793_v37 = vsel %vm3726_vm14, %v7625_v16, %v3662_v44  ;;  %v4317_v31 = vsel %vm4250_vm11, %v7656_v40, %v4186_v20  ;;  %vm4774_vm9 = vcmp.eq.s32.totalorder %v10007_v45, 30  ;;  %vm4905_vm12 = vcmp.eq.s32.totalorder %v10007_v45, 3 }
 0x26e   : > { %v4448_v62 = vsel %vm4381_vm15, %v7663_v52, %v4317_v31  ;;  %vm5036_vm8 = vcmp.eq.s32.totalorder %v10007_v45, 7  ;;  %vm5167_vm6 = vcmp.eq.s32.totalorder %v10007_v45, 11  ;;  %v4972_v27 = vsel %vm4905_vm12, %v7679_v14, 0.0 }
 0x26f   : > { %v4579_v17 = vsel %vm4512_vm4, %v7666_v53, %v4448_v62  ;;  %vm5298_vm14 = vcmp.eq.s32.totalorder %v10007_v45, 15  ;;  %vm5429_vm7 = vcmp.eq.s32.totalorder %v10007_v45, 19  ;;  %v5103_v44 = vsel %vm5036_vm8, %v7684_v23, %v4972_v27 }
 0x270   : > { %v4710_v54 = vsel %vm4643_vm10, %v7671_v59, %v4579_v17  ;;  %vm5560_vm2 = vcmp.eq.s32.totalorder %v10007_v45, 23  ;;  %vm5691_vm0 = vcmp.eq.s32.totalorder %v10007_v45, 27  ;;  %v5234_v31 = vsel %vm5167_vm6, %v7688_v26, %v5103_v44 }
 0x271   : > { %v4841_v20 = vsel %vm4774_vm9, %v7674_v63, %v4710_v54  ;;  %vm5822_vm11 = vcmp.eq.s32.totalorder %v10007_v45, 31  ;;  %v5953_v62 = vadd.f32 %v3793_v37, %v2745_v48  ;;  %v5365_v49 = vsel %vm5298_vm14, %v7693_v57, %v5234_v31  ;;  %v6209_v31 = vld [vmem:[%s7432_s28 + $0xb0] sm:$0xff] }
 0x272   : > { %v1829_v36 = vsel %vm1762_vm1, %v7527_v35, 0.0  ;;  %vm2286_vm15 = vcmp.eq.s32.totalorder %v10014_v18, 16  ;;  %vm2417_vm4 = vcmp.eq.s32.totalorder %v10014_v18, 20  ;;  %v5496_v17 = vsel %vm5429_vm7, %v7696_v58, %v5365_v49 }
 0x273   : > { %v6017_v27 = vadd.f32 %v5953_v62, %v4841_v20  ;;  %v1960_v54 = vsel %vm1893_vm3, %v7539_v38, %v1829_v36  ;;  %vm2548_vm10 = vcmp.eq.s32.totalorder %v10014_v18, 24  ;;  %v5627_v48 = vsel %vm5560_vm2, %v7699_v0, %v5496_v17 }
 0x274   : > { %v2091_v37 = vsel %vm2024_vm13, %v7548_v42, %v1960_v54  ;;  %vm2679_vm1 = vcmp.eq.s32.totalorder %v10014_v18, 28  ;;  %vm2810_vm9 = vcmp.eq.s32.totalorder %v10014_v18, 1  ;;  %v5758_v49 = vsel %vm5691_vm0, %v7705_v9, %v5627_v48 }
 0x275   : > { %v2222_v36 = vsel %vm2155_vm5, %v7551_v43, %v2091_v37  ;;  %v2877_v44 = vsel %vm2810_vm9, %v7584_v56, 0.0  ;;  %vm2941_vm3 = vcmp.eq.s32.totalorder %v10014_v18, 5  ;;  %v5889_v20 = vsel %vm5822_vm11, %v7714_v11, %v5758_v49 }
 0x276   : > { %v2353_v62 = vsel %vm2286_vm15, %v7558_v46, %v2222_v36  ;;  %v3008_v17 = vsel %vm2941_vm3, %v7589_v60, %v2877_v44  ;;  %vm3072_vm13 = vcmp.eq.s32.totalorder %v10014_v18, 9  ;;  %v10136_v54 = vadd.f32 %v6017_v27, %v5889_v20 }
 0x277   : > { %v2484_v48 = vsel %vm2417_vm4, %v7561_v47, %v2353_v62  ;;  %v3139_v37 = vsel %vm3072_vm13, %v7592_v61, %v3008_v17  ;;  %vm3203_vm5 = vcmp.eq.s32.totalorder %v10014_v18, 13  ;;  %vm3334_vm12 = vcmp.eq.s32.totalorder %v10014_v18, 17 }
 0x278   : > { %14352 = vst [vmem:[#allocation45_spill] sm:$0xff] %v10136_v54  ;;  %v2615_v45 = vsel %vm2548_vm10, %v7572_v51, %v2484_v48  ;;  %v3270_v49 = vsel %vm3203_vm5, %v7599_v3, %v3139_v37  ;;  %vm3465_vm8 = vcmp.eq.s32.totalorder %v10014_v18, 21  ;;  %v6401_v27 = vadd.f32 %v6209_v31, %v10136_v54 }
 0x279   : > { %v2746_v36 = vsel %vm2679_vm1, %v7581_v55, %v2615_v45  ;;  %v3401_v44 = vsel %vm3334_vm12, %v7605_v6, %v3270_v49  ;;  %vm3596_vm6 = vcmp.eq.s32.totalorder %v10014_v18, 25  ;;  %vm3727_vm14 = vcmp.eq.s32.totalorder %v10014_v18, 29 }
 0x27a   : > { %v3532_v20 = vsel %vm3465_vm8, %v7616_v12, %v3401_v44  ;;  %vm3858_vm7 = vcmp.eq.s32.totalorder %v10014_v18, 2  ;;  %vm3989_vm2 = vcmp.eq.s32.totalorder %v10014_v18, 6  ;;  %6529 = vst [vmem:[%s7867_s27 + $0xb0] sm:$0xff] %v6401_v27  ;;  %vm4120_vm0 = vcmp.eq.s32.totalorder %v10014_v18, 10 }
 0x27b   : > { %v3663_v62 = vsel %vm3596_vm6, %v7622_v15, %v3532_v20  ;;  %v3925_v31 = vsel %vm3858_vm7, %v7631_v21, 0.0  ;;  %vm4251_vm11 = vcmp.eq.s32.totalorder %v10014_v18, 14  ;;  %vm4382_vm15 = vcmp.eq.s32.totalorder %v10014_v18, 18 }
 0x27c   : > { %v3794_v17 = vsel %vm3727_vm14, %v7625_v16, %v3663_v62  ;;  %v4056_v48 = vsel %vm3989_vm2, %v7640_v24, %v3925_v31  ;;  %vm4513_vm4 = vcmp.eq.s32.totalorder %v10014_v18, 22  ;;  %vm4644_vm10 = vcmp.eq.s32.totalorder %v10014_v18, 26 }
 0x27d   : > { %v4187_v37 = vsel %vm4120_vm0, %v7650_v32, %v4056_v48  ;;  %vm4775_vm1 = vcmp.eq.s32.totalorder %v10014_v18, 30  ;;  %vm4906_vm9 = vcmp.eq.s32.totalorder %v10014_v18, 3  ;;  %vm5037_vm3 = vcmp.eq.s32.totalorder %v10014_v18, 7 }
 0x27e   : > { %v4318_v45 = vsel %vm4251_vm11, %v7656_v40, %v4187_v37  ;;  %v4973_v49 = vsel %vm4906_vm9, %v7679_v14, 0.0  ;;  %vm5168_vm13 = vcmp.eq.s32.totalorder %v10014_v18, 11  ;;  %vm5299_vm5 = vcmp.eq.s32.totalorder %v10014_v18, 15 }
 0x27f   : > { %v4449_v27 = vsel %vm4382_vm15, %v7663_v52, %v4318_v45  ;;  %v5104_v44 = vsel %vm5037_vm3, %v7684_v23, %v4973_v49  ;;  %vm5430_vm12 = vcmp.eq.s32.totalorder %v10014_v18, 19  ;;  %vm5561_vm8 = vcmp.eq.s32.totalorder %v10014_v18, 23 }
 0x280   : > { %v4580_v20 = vsel %vm4513_vm4, %v7666_v53, %v4449_v27  ;;  %v5235_v62 = vsel %vm5168_vm13, %v7688_v26, %v5104_v44  ;;  %vm5692_vm6 = vcmp.eq.s32.totalorder %v10014_v18, 27  ;;  %vm5823_vm14 = vcmp.eq.s32.totalorder %v10014_v18, 31 }
 0x281   : > { %v4711_v31 = vsel %vm4644_vm10, %v7671_v59, %v4580_v20  ;;  %v5366_v48 = vsel %vm5299_vm5, %v7693_v57, %v5235_v62  ;;  %v5954_v37 = vadd.f32 %v3794_v17, %v2746_v36  ;;  %vm737_vm7 = vcmp.lt.s32.totalorder %v9770_v29, 8 }
 0x282   : > { %v4842_v45 = vsel %vm4775_vm1, %v7674_v63, %v4711_v31  ;;  %v5497_v49 = vsel %vm5430_vm12, %v7696_v58, %v5366_v48  ;;  %v1315_v27 = vadd.f32 0.0001, %v10016_v8  ;;  %vm1764_vm2 = vcmp.eq.s32.totalorder %v10018_v5, 0  ;;  %v6210_v31 = vld [vmem:[%s7432_s28 + $0xb8] sm:$0xff] }
 0x283   : > { %v5628_v44 = vsel %vm5561_vm8, %v7699_v0, %v5497_v49  ;;  %v6018_v20 = vadd.f32 %v5954_v37, %v4842_v45  ;;  %v1831_v62 = vsel %vm1764_vm2, %v7527_v35, 0.0  ;;  %vm1895_vm0 = vcmp.eq.s32.totalorder %v10018_v5, 4 }
 0x284   : > { %v5759_v36 = vsel %vm5692_vm6, %v7705_v9, %v5628_v44  ;;  %v6901_v17 = vtrunc.f32 %v1315_v27  ;;  %v1962_v39 = vsel %vm1895_vm0, %v7539_v38, %v1831_v62  ;;  %vm2026_vm11 = vcmp.eq.s32.totalorder %v10018_v5, 8 }
 0x285   : > { %v5890_v18 = vsel %vm5823_vm14, %v7714_v11, %v5759_v36  ;;  %v2093_v8 = vsel %vm2026_vm11, %v7548_v42, %v1962_v39  ;;  %vm2157_vm15 = vcmp.eq.s32.totalorder %v10018_v5, 12  ;;  %vm2288_vm4 = vcmp.eq.s32.totalorder %v10018_v5, 16 }
 0x286   : > { %v10205_v48 = vadd.f32 %v6018_v20, %v5890_v18  ;;  %v6902_v37 = vcvt.f32.s32 %v6901_v17  ;;  %v2224_v45 = vsel %vm2157_vm15, %v7551_v43, %v2093_v8  ;;  %vm2419_vm10 = vcmp.eq.s32.totalorder %v10018_v5, 20 }
 0x287   : > { %v2355_v49 = vsel %vm2288_vm4, %v7558_v46, %v2224_v45  ;;  %vm2550_vm1 = vcmp.eq.s32.totalorder %v10018_v5, 24  ;;  %vm2812_vm9 = vcmp.eq.s32.totalorder %v10018_v5, 1  ;;  %v645_v39 = vsub.s32 0, %v10012_v22 }
 0x288   : > { %14353 = vst [vmem:[#allocation46_spill] sm:$0xff] %v10205_v48  ;;  %v6402_v27 = vadd.f32 %v6210_v31, %v10205_v48  ;;  %v1443_v44 = vadd.s32 8, %v6902_v37  ;;  %v2486_v20 = vsel %vm2419_vm10, %v7561_v47, %v2355_v49  ;;  %v2879_v62 = vsel %vm2812_vm9, %v7584_v56, 0.0 }
 0x289   : > { %vm2943_vm3 = vcmp.eq.s32.totalorder %v10018_v5, 5  ;;  %vm3074_vm13 = vcmp.eq.s32.totalorder %v10018_v5, 9  ;;  %vm3205_vm5 = vcmp.eq.s32.totalorder %v10018_v5, 13  ;;  %v14354_v36 = vcvt.s32.f32 %v9996_v30 }
 0x28a   : > { %6530 = vst [vmem:[%s7867_s27 + $0xb8] sm:$0xff] %v6402_v27  ;;  %vm1531_vm12 = vcmp.lt.s32.totalorder %v1443_v44, 15  ;;  %vm2681_vm8 = vcmp.eq.s32.totalorder %v10018_v5, 28  ;;  %v3010_v18 = vsel %vm2943_vm3, %v7589_v60, %v2879_v62  ;;  %vm3336_vm6 = vcmp.eq.s32.totalorder %v10018_v5, 17 }
 0x28b   : > { %v998_v17 = vmul.f32 0.125, %v14354_v36  ;;  %v1532_v31 = vsel %vm1531_vm12, %v1443_v44, 15  ;;  %v2617_v8 = vsel %vm2550_vm1, %v7572_v51, %v2486_v20  ;;  %v3141_v37 = vsel %vm3074_vm13, %v7592_v61, %v3010_v18 }
 0x28c   : > { %vm3467_vm14 = vcmp.eq.s32.totalorder %v10018_v5, 21  ;;  %v1635_v30 = vsel %vm737_vm7, %v9770_v29, %v1532_v31  ;;  %v3272_v45 = vsel %vm3205_vm5, %v7599_v3, %v3141_v37  ;;  %vm3860_vm2 = vcmp.eq.s32.totalorder %v10018_v5, 2 }
 0x28d   : > { %v14355_v49 = vcvt.s32.f32 %v10001_v33  ;;  %v14356_v44 = vmul.u32 16, %v9993_v41  ;;  %v3403_v20 = vsel %vm3336_vm6, %v7605_v6, %v3272_v45  ;;  %v3927_v36 = vsel %vm3860_vm2, %v7631_v21, 0.0 }
 0x28e   : > { %vm3991_vm0 = vcmp.eq.s32.totalorder %v10018_v5, 6  ;;  %v10247_v29 = vsel %vm2681_vm8, %v7581_v55, %v2617_v8  ;;  %v10250_v18 = vsel %vm3467_vm14, %v7616_v12, %v3403_v20  ;;  %7132 = vlog2.f32 %v998_v17 }
 0x28f   : > { %v10237_v27 = vmul.f32 0.125, %v14355_v49  ;;  %v10241_v62 = vadd.s32 %v1635_v30, %v14356_v44  ;;  %v10253_v33 = vsel %vm3991_vm0, %v7640_v24, %v3927_v36  ;;  %vm3598_vm2 = vcmp.eq.s32.totalorder %v10018_v5, 25 }
 0x290   : > { %vm4122_vm0 = vcmp.eq.s32.totalorder %v10018_v5, 10 }
 0x291   : > { %vm1763_vm7 = vcmp.eq.s32.totalorder %v10241_v62, 0  ;;  %vm1894_vm11 = vcmp.eq.s32.totalorder %v10241_v62, 4  ;;  %vm2025_vm15 = vcmp.eq.s32.totalorder %v10241_v62, 8  ;;  %vm2156_vm4 = vcmp.eq.s32.totalorder %v10241_v62, 12 }
 0x292   : > { %v1830_v41 = vsel %vm1763_vm7, %v7527_v35, 0.0  ;;  %vm2287_vm10 = vcmp.eq.s32.totalorder %v10241_v62, 16  ;;  %vm2418_vm1 = vcmp.eq.s32.totalorder %v10241_v62, 20  ;;  %vm2549_vm9 = vcmp.eq.s32.totalorder %v10241_v62, 24 }
 0x293   : > { %v1961_v31 = vsel %vm1894_vm11, %v7539_v38, %v1830_v41  ;;  %vm2680_vm3 = vcmp.eq.s32.totalorder %v10241_v62, 28  ;;  %vm2811_vm13 = vcmp.eq.s32.totalorder %v10241_v62, 1  ;;  %vm2942_vm5 = vcmp.eq.s32.totalorder %v10241_v62, 5 }
 0x294   : > { %v2092_v17 = vsel %vm2025_vm15, %v7548_v42, %v1961_v31  ;;  %v2878_v8 = vsel %vm2811_vm13, %v7584_v56, 0.0  ;;  %vm3073_vm12 = vcmp.eq.s32.totalorder %v10241_v62, 9  ;;  %vm3204_vm8 = vcmp.eq.s32.totalorder %v10241_v62, 13 }
 0x295   : > { %v2223_v37 = vsel %vm2156_vm4, %v7551_v43, %v2092_v17  ;;  %v3009_v30 = vsel %vm2942_vm5, %v7589_v60, %v2878_v8  ;;  %vm3335_vm6 = vcmp.eq.s32.totalorder %v10241_v62, 17  ;;  %vm3466_vm14 = vcmp.eq.s32.totalorder %v10241_v62, 21 }
 0x296   : > { %v2354_v45 = vsel %vm2287_vm10, %v7558_v46, %v2223_v37  ;;  %v3140_v49 = vsel %vm3073_vm12, %v7592_v61, %v3009_v30  ;;  %vm3597_vm7 = vcmp.eq.s32.totalorder %v10241_v62, 25  ;;  %vm3728_vm11 = vcmp.eq.s32.totalorder %v10241_v62, 29 }
 0x297   : > { %vm3729_vm15 = vcmp.eq.s32.totalorder %v10018_v5, 29  ;;  %vm4253_vm4 = vcmp.eq.s32.totalorder %v10018_v5, 14  ;;  %v2485_v44 = vsel %vm2418_vm1, %v7561_v47, %v2354_v45  ;;  %v3271_v20 = vsel %vm3204_vm8, %v7599_v3, %v3140_v49 }
 0x298   : > { %vm3859_vm13 = vcmp.eq.s32.totalorder %v10241_v62, 2  ;;  %vm3990_vm10 = vcmp.eq.s32.totalorder %v10241_v62, 6  ;;  %v2616_v36 = vsel %vm2549_vm9, %v7572_v51, %v2485_v44  ;;  %v3402_v41 = vsel %vm3335_vm6, %v7605_v6, %v3271_v20  ;;  %v10305_v30 = vpop.eup %7132 }
 0x299   : > { %v3926_v31 = vsel %vm3859_vm13, %v7631_v21, 0.0  ;;  %vm4121_vm5 = vcmp.eq.s32.totalorder %v10241_v62, 10  ;;  %v2747_v17 = vsel %vm2680_vm3, %v7581_v55, %v2616_v36  ;;  %v3533_v8 = vsel %vm3466_vm14, %v7616_v12, %v3402_v41 }
 0x29a   : > { %v4057_v37 = vsel %vm3990_vm10, %v7640_v24, %v3926_v31  ;;  %vm4252_vm1 = vcmp.eq.s32.totalorder %v10241_v62, 14  ;;  %v3664_v45 = vsel %vm3597_vm7, %v7622_v15, %v3533_v8  ;;  %vm4383_vm9 = vcmp.eq.s32.totalorder %v10241_v62, 18 }
 0x29b   : > { %v4188_v49 = vsel %vm4121_vm5, %v7650_v32, %v4057_v37  ;;  %vm4514_vm3 = vcmp.eq.s32.totalorder %v10241_v62, 22  ;;  %v3795_v44 = vsel %vm3728_vm11, %v7625_v16, %v3664_v45  ;;  %vm4645_vm12 = vcmp.eq.s32.totalorder %v10241_v62, 26 }
 0x29c   : > { %v4319_v20 = vsel %vm4252_vm1, %v7656_v40, %v4188_v49  ;;  %vm4776_vm8 = vcmp.eq.s32.totalorder %v10241_v62, 30  ;;  %vm4907_vm6 = vcmp.eq.s32.totalorder %v10241_v62, 3  ;;  %vm5038_vm14 = vcmp.eq.s32.totalorder %v10241_v62, 7 }
 0x29d   : > { %v4450_v36 = vsel %vm4383_vm9, %v7663_v52, %v4319_v20  ;;  %vm5169_vm7 = vcmp.eq.s32.totalorder %v10241_v62, 11  ;;  %v4974_v31 = vsel %vm4907_vm6, %v7679_v14, 0.0  ;;  %vm5300_vm11 = vcmp.eq.s32.totalorder %v10241_v62, 15 }
 0x29e   : > { %v4581_v41 = vsel %vm4514_vm3, %v7666_v53, %v4450_v36  ;;  %vm5431_vm13 = vcmp.eq.s32.totalorder %v10241_v62, 19  ;;  %v5105_v37 = vsel %vm5038_vm14, %v7684_v23, %v4974_v31  ;;  %vm5562_vm10 = vcmp.eq.s32.totalorder %v10241_v62, 23 }
 0x29f   : > { %v4712_v8 = vsel %vm4645_vm12, %v7671_v59, %v4581_v41  ;;  %vm5693_vm5 = vcmp.eq.s32.totalorder %v10241_v62, 27  ;;  %v5236_v49 = vsel %vm5169_vm7, %v7688_v26, %v5105_v37  ;;  %vm5824_vm1 = vcmp.eq.s32.totalorder %v10241_v62, 31 }
 0x2a0   : > { %v4843_v45 = vsel %vm4776_vm8, %v7674_v63, %v4712_v8  ;;  %v5955_v20 = vadd.f32 %v3795_v44, %v2747_v17  ;;  %v5367_v36 = vsel %vm5300_vm11, %v7693_v57, %v5236_v49  ;;  %v3665_v41 = vsel %vm3598_vm2, %v7622_v15, %v10250_v18 }
 0x2a1   : > { %v4189_v31 = vsel %vm4122_vm0, %v7650_v32, %v10253_v33  ;;  %vm4384_vm9 = vcmp.eq.s32.totalorder %v10018_v5, 18  ;;  %v5498_v8 = vsel %vm5431_vm13, %v7696_v58, %v5367_v36  ;;  %v3796_v17 = vsel %vm3729_vm15, %v7625_v16, %v3665_v41  ;;  %v6211_v36 = vld [vmem:[%s7432_s28 + $0xc0] sm:$0xff] }
 0x2a2   : > { %v6019_v37 = vadd.f32 %v5955_v20, %v4843_v45  ;;  %v4320_v44 = vsel %vm4253_vm4, %v7656_v40, %v4189_v31  ;;  %v5629_v18 = vsel %vm5562_vm10, %v7699_v0, %v5498_v8  ;;  %vm4515_vm2 = vcmp.eq.s32.totalorder %v10018_v5, 22 }
 0x2a3   : > { %v4451_v49 = vsel %vm4384_vm9, %v7663_v52, %v4320_v44  ;;  %vm4646_vm0 = vcmp.eq.s32.totalorder %v10018_v5, 26  ;;  %v5760_v33 = vsel %vm5693_vm5, %v7705_v9, %v5629_v18  ;;  %vm4777_vm15 = vcmp.eq.s32.totalorder %v10018_v5, 30 }
 0x2a4   : > { %v4582_v45 = vsel %vm4515_vm2, %v7666_v53, %v4451_v49  ;;  %vm4908_vm3 = vcmp.eq.s32.totalorder %v10018_v5, 3  ;;  %v5891_v20 = vsel %vm5824_vm1, %v7714_v11, %v5760_v33  ;;  %vm5039_vm4 = vcmp.eq.s32.totalorder %v10018_v5, 7 }
 0x2a5   : > { %v4713_v41 = vsel %vm4646_vm0, %v7671_v59, %v4582_v45  ;;  %v4975_v31 = vsel %vm4908_vm3, %v7679_v14, 0.0  ;;  %v10368_v8 = vadd.f32 %v6019_v37, %v5891_v20  ;;  %vm5170_vm12 = vcmp.eq.s32.totalorder %v10018_v5, 11 }
 0x2a6   : > { %v4844_v44 = vsel %vm4777_vm15, %v7674_v63, %v4713_v41  ;;  %v5106_v18 = vsel %vm5039_vm4, %v7684_v23, %v4975_v31  ;;  %vm5301_vm8 = vcmp.eq.s32.totalorder %v10018_v5, 15  ;;  %vm5432_vm6 = vcmp.eq.s32.totalorder %v10018_v5, 19 }
 0x2a7   : > { %14357 = vst [vmem:[#allocation47_spill] sm:$0xff] %v10368_v8  ;;  %v5237_v49 = vsel %vm5170_vm12, %v7688_v26, %v5106_v18  ;;  %vm5563_vm14 = vcmp.eq.s32.totalorder %v10018_v5, 23  ;;  %v6403_v62 = vadd.f32 %v6211_v36, %v10368_v8  ;;  %vm5694_vm7 = vcmp.eq.s32.totalorder %v10018_v5, 27 }
 0x2a8   : > { %v5368_v37 = vsel %vm5301_vm8, %v7693_v57, %v5237_v49  ;;  %vm5825_vm11 = vcmp.eq.s32.totalorder %v10018_v5, 31  ;;  %v5956_v45 = vadd.f32 %v3796_v17, %v10247_v29  ;;  %v1087_v20 = vmul.f32 0.6931472, %v10065_v25 }
 0x2a9   : > { %v5499_v33 = vsel %vm5432_vm6, %v7696_v58, %v5368_v37  ;;  %v1089_v41 = vmul.f32 0.6931472, %v10056_v19  ;;  %6531 = vst [vmem:[%s7867_s27 + $0xc0] sm:$0xff] %v6403_v62  ;;  %v1091_v36 = vmul.f32 0.6931472, %v10305_v30  ;;  %7134 = vlog2.f32 %v10237_v27  ;;  %v6212_v19 = vld [vmem:[%s7432_s28 + $0xc8] sm:$0xff] }
 0x2aa   : > { %v5630_v31 = vsel %vm5563_vm14, %v7699_v0, %v5499_v33  ;;  %v10392_v18 = vmin.u32 %v645_v39, %v10012_v22  ;;  %v6020_v49 = vadd.f32 %v5956_v45, %v4844_v44  ;;  %v1189_v29 = vmul.f32 0.36067376, %v1087_v20 }
 0x2ab   : > { %v5761_v5 = vsel %vm5694_vm7, %v7705_v9, %v5630_v31  ;;  %v1190_v17 = vmul.f32 0.36067376, %v1089_v41  ;;  %vm419_vm13 = vcmp.lt.s32.totalorder %v9774_v34, 0  ;;  %v1191_v62 = vmul.f32 0.36067376, %v1091_v36 }
 0x2ac   : > { %v5892_v25 = vsel %vm5825_vm11, %v7714_v11, %v5761_v5  ;;  %v1253_v27 = vmul.f32 8.0, %v1189_v29  ;;  %vm421_vm10 = vcmp.lt.s32.totalorder %v9791_v28, 0  ;;  %vm837_vm5 = vcmp.gt.s32.totalorder %v10392_v18, 1 }
 0x2ad   : > { %v10398_v30 = vadd.f32 %v6020_v49, %v5892_v25  ;;  %v1254_v37 = vmul.f32 8.0, %v1190_v17  ;;  %v1255_v39 = vmul.f32 8.0, %v1191_v62  ;;  %v360_v44 = vsub.s32 %v9999_v10, %v7449_v4 }
 0x2ae   : > { %v273_v33 = vadd.s32 128, %v7441_v1  ;;  %v1317_v20 = vadd.f32 0.0001, %v1253_v27  ;;  %v838_v31 = vsel %vm837_vm5, %v10392_v18, 1  ;;  %v483_v49 = vsel %vm419_vm13, 1, %v14327_v13 }
 0x2af   : > { %14358 = vst [vmem:[#allocation48_spill] sm:$0xff] %v10398_v30  ;;  %v6404_v45 = vadd.f32 %v6212_v19, %v10398_v30  ;;  %v1318_v41 = vadd.f32 0.0001, %v1254_v37  ;;  %v1319_v36 = vadd.f32 0.0001, %v1255_v39  ;;  %v10407_v5 = vsub.s32 0, %v360_v44 }
 0x2b0   : > { %v6905_v29 = vtrunc.f32 %v1317_v20  ;;  %v935_v25 = vcvt.s32.f32 %v838_v31  ;;  %v10416_v10 = vsel %vm421_vm10, 1, %v14327_v13  ;;  %v10421_v39 = vsub.s32 %v273_v33, %v7449_v4 }
 0x2b1   : > { %6532 = vst [vmem:[%s7867_s27 + $0xc8] sm:$0xff] %v6404_v45  ;;  %v6907_v17 = vtrunc.f32 %v1318_v41  ;;  %v6909_v19 = vtrunc.f32 %v1319_v36  ;;  %vm839_vm1 = vcmp.gt.s32.totalorder %v10407_v5, 1  ;;  %v547_v44 = vmul.u32 16, %v483_v49 }
 0x2b2   : > { %v6906_v62 = vcvt.f32.s32 %v6905_v29  ;;  %v840_v37 = vsel %vm839_vm1, %v10407_v5, 1  ;;  %vm739_vm9 = vcmp.lt.s32.totalorder %v9798_v50, 8  ;;  %v1000_v30 = vmul.f32 0.125, %v935_v25 }
 0x2b3   : > { %v6908_v27 = vcvt.f32.s32 %v6907_v17  ;;  %v7135_v34 = vpop.eup %7134  ;;  %v6910_v45 = vcvt.f32.s32 %v6909_v19  ;;  %v936_v20 = vcvt.s32.f32 %v840_v37  ;;  %v549_v36 = vmul.u32 16, %v10416_v10 }
 0x2b4   : > { %v1445_v41 = vadd.s32 8, %v6906_v62  ;;  %v1093_v31 = vmul.f32 0.6931472, %v7135_v34  ;;  %vm423_vm2 = vcmp.lt.s32.totalorder %v10012_v22, 0  ;;  %v651_v48 = vsub.s32 0, %v10421_v39 }
 0x2b5   : > { %v1446_v28 = vadd.s32 8, %v6908_v27  ;;  %v1447_v8 = vadd.s32 8, %v6910_v45  ;;  %v1001_v29 = vmul.f32 0.125, %v936_v20  ;;  %vm741_vm3 = vcmp.lt.s32.totalorder %v9984_v7, 8 }
 0x2b6   : > { %vm1535_vm0 = vcmp.lt.s32.totalorder %v1445_v41, 15  ;;  %v1192_v17 = vmul.f32 0.36067376, %v1093_v31  ;;  %v10432_v62 = vsel %vm423_vm2, 1, %v14327_v13  ;;  %7136 = vlog2.f32 %v1000_v30 }
 0x2b7   : > { %vm1537_vm15 = vcmp.lt.s32.totalorder %v1446_v28, 15  ;;  %v1536_v49 = vsel %vm1535_vm0, %v1445_v41, 15  ;;  %vm1539_vm4 = vcmp.lt.s32.totalorder %v1447_v8, 15  ;;  %7138 = vlog2.f32 %v1001_v29 }
 0x2b8   : > { %v1538_v54 = vsel %vm1537_vm15, %v1446_v28, 15  ;;  %v1637_v25 = vsel %vm739_vm9, %v9798_v50, %v1536_v49  ;;  %v1540_v19 = vsel %vm1539_vm4, %v1447_v8, 15  ;;  %v10437_v27 = vsub.s32 %v273_v33, %v7443_v2 }
 0x2b9   : > { %v10434_v22 = vadd.s32 %v1637_v25, %v547_v44  ;;  %v10440_v37 = vadd.s32 136, %v7441_v1  ;;  %v10442_v34 = vadd.s32 16, %v1538_v54  ;;  %v10445_v45 = vsel %vm741_vm3, %v9984_v7, %v1540_v19 }
 0x2ba   : > { %v10447_v50 = vmul.f32 8.0, %v1192_v17  ;;  %v10450_v8 = vmin.u32 %v651_v48, %v10421_v39 }
 0x2bb   : > { %vm1765_vm12 = vcmp.eq.s32.totalorder %v10434_v22, 0  ;;  %vm1896_vm8 = vcmp.eq.s32.totalorder %v10434_v22, 4  ;;  %vm2027_vm6 = vcmp.eq.s32.totalorder %v10434_v22, 8  ;;  %vm2158_vm14 = vcmp.eq.s32.totalorder %v10434_v22, 12 }
 0x2bc   : > { %v1832_v30 = vsel %vm1765_vm12, %v7527_v35, 0.0  ;;  %vm2289_vm7 = vcmp.eq.s32.totalorder %v10434_v22, 16  ;;  %vm2420_vm11 = vcmp.eq.s32.totalorder %v10434_v22, 20  ;;  %vm2551_vm13 = vcmp.eq.s32.totalorder %v10434_v22, 24 }
 0x2bd   : > { %v1963_v7 = vsel %vm1896_vm8, %v7539_v38, %v1832_v30  ;;  %vm2682_vm10 = vcmp.eq.s32.totalorder %v10434_v22, 28  ;;  %vm2813_vm5 = vcmp.eq.s32.totalorder %v10434_v22, 1  ;;  %vm2944_vm1 = vcmp.eq.s32.totalorder %v10434_v22, 5 }
 0x2be   : > { %v2094_v54 = vsel %vm2027_vm6, %v7548_v42, %v1963_v7  ;;  %v2880_v48 = vsel %vm2813_vm5, %v7584_v56, 0.0  ;;  %vm3075_vm9 = vcmp.eq.s32.totalorder %v10434_v22, 9  ;;  %vm3206_vm2 = vcmp.eq.s32.totalorder %v10434_v22, 13 }
 0x2bf   : > { %v2225_v33 = vsel %vm2158_vm14, %v7551_v43, %v2094_v54  ;;  %v3011_v44 = vsel %vm2944_vm1, %v7589_v60, %v2880_v48  ;;  %vm3337_vm0 = vcmp.eq.s32.totalorder %v10434_v22, 17  ;;  %vm3468_vm15 = vcmp.eq.s32.totalorder %v10434_v22, 21 }
 0x2c0   : > { %vm1766_vm3 = vcmp.eq.s32.totalorder %v10442_v34, 0  ;;  %v2356_v20 = vsel %vm2289_vm7, %v7558_v46, %v2225_v33  ;;  %v3142_v41 = vsel %vm3075_vm9, %v7592_v61, %v3011_v44  ;;  %vm3599_vm4 = vcmp.eq.s32.totalorder %v10434_v22, 25  ;;  %v10487_v29 = vpop.eup %7136 }
 0x2c1   : > { %vm3730_vm12 = vcmp.eq.s32.totalorder %v10434_v22, 29  ;;  %vm1897_vm8 = vcmp.eq.s32.totalorder %v10442_v34, 4  ;;  %v2487_v28 = vsel %vm2420_vm11, %v7561_v47, %v2356_v20  ;;  %v3273_v31 = vsel %vm3206_vm2, %v7599_v3, %v3142_v41  ;;  %v10496_v19 = vpop.eup %7138 }
 0x2c2   : > { %vm3861_vm6 = vcmp.eq.s32.totalorder %v10434_v22, 2  ;;  %vm3992_vm14 = vcmp.eq.s32.totalorder %v10434_v22, 6  ;;  %vm2028_vm7 = vcmp.eq.s32.totalorder %v10442_v34, 8  ;;  %v2618_v17 = vsel %vm2551_vm13, %v7572_v51, %v2487_v28 }
 0x2c3   : > { %v3404_v49 = vsel %vm3337_vm0, %v7605_v6, %v3273_v31  ;;  %v3928_v25 = vsel %vm3861_vm6, %v7631_v21, 0.0  ;;  %vm4123_vm11 = vcmp.eq.s32.totalorder %v10434_v22, 10  ;;  %vm2159_vm5 = vcmp.eq.s32.totalorder %v10442_v34, 12 }
 0x2c4   : > { %v2749_v30 = vsel %vm2682_vm10, %v7581_v55, %v2618_v17  ;;  %v3535_v7 = vsel %vm3468_vm15, %v7616_v12, %v3404_v49  ;;  %v4059_v54 = vsel %vm3992_vm14, %v7640_v24, %v3928_v25  ;;  %vm4254_vm13 = vcmp.eq.s32.totalorder %v10434_v22, 14 }
 0x2c5   : > { %v3666_v48 = vsel %vm3599_vm4, %v7622_v15, %v3535_v7  ;;  %v4190_v33 = vsel %vm4123_vm11, %v7650_v32, %v4059_v54  ;;  %vm4385_vm1 = vcmp.eq.s32.totalorder %v10434_v22, 18  ;;  %vm4516_vm9 = vcmp.eq.s32.totalorder %v10434_v22, 22 }
 0x2c6   : > { %v3797_v44 = vsel %vm3730_vm12, %v7625_v16, %v3666_v48  ;;  %v4321_v20 = vsel %vm4254_vm13, %v7656_v40, %v4190_v33  ;;  %vm4647_vm10 = vcmp.eq.s32.totalorder %v10434_v22, 26  ;;  %vm4778_vm2 = vcmp.eq.s32.totalorder %v10434_v22, 30 }
 0x2c7   : > { %v4452_v41 = vsel %vm4385_vm1, %v7663_v52, %v4321_v20  ;;  %vm4909_vm0 = vcmp.eq.s32.totalorder %v10434_v22, 3  ;;  %vm5040_vm15 = vcmp.eq.s32.totalorder %v10434_v22, 7  ;;  %vm5171_vm4 = vcmp.eq.s32.totalorder %v10434_v22, 11 }
 0x2c8   : > { %v4583_v28 = vsel %vm4516_vm9, %v7666_v53, %v4452_v41  ;;  %v4976_v31 = vsel %vm4909_vm0, %v7679_v14, 0.0  ;;  %vm5302_vm12 = vcmp.eq.s32.totalorder %v10434_v22, 15  ;;  %vm5433_vm6 = vcmp.eq.s32.totalorder %v10434_v22, 19 }
 0x2c9   : > { %v4714_v17 = vsel %vm4647_vm10, %v7671_v59, %v4583_v28  ;;  %v5107_v49 = vsel %vm5040_vm15, %v7684_v23, %v4976_v31  ;;  %vm5564_vm14 = vcmp.eq.s32.totalorder %v10434_v22, 23  ;;  %vm5695_vm11 = vcmp.eq.s32.totalorder %v10434_v22, 27 }
 0x2ca   : > { %v4845_v25 = vsel %vm4778_vm2, %v7674_v63, %v4714_v17  ;;  %v5238_v7 = vsel %vm5171_vm4, %v7688_v26, %v5107_v49  ;;  %vm5826_vm13 = vcmp.eq.s32.totalorder %v10434_v22, 31  ;;  %v5957_v54 = vadd.f32 %v3797_v44, %v2749_v30 }
 0x2cb   : > { %v5369_v48 = vsel %vm5302_vm12, %v7693_v57, %v5238_v7  ;;  %v1833_v33 = vsel %vm1766_vm3, %v7527_v35, 0.0  ;;  %vm2290_vm1 = vcmp.eq.s32.totalorder %v10442_v34, 16  ;;  %vm2421_vm9 = vcmp.eq.s32.totalorder %v10442_v34, 20  ;;  %v6213_v7 = vld [vmem:[%s7432_s28 + $0xd0] sm:$0xff] }
 0x2cc   : > { %v5500_v20 = vsel %vm5433_vm6, %v7696_v58, %v5369_v48  ;;  %v6021_v41 = vadd.f32 %v5957_v54, %v4845_v25  ;;  %v1964_v28 = vsel %vm1897_vm8, %v7539_v38, %v1833_v33  ;;  %vm2552_vm10 = vcmp.eq.s32.totalorder %v10442_v34, 24 }
 0x2cd   : > { %v5631_v30 = vsel %vm5564_vm14, %v7699_v0, %v5500_v20  ;;  %v2095_v44 = vsel %vm2028_vm7, %v7548_v42, %v1964_v28  ;;  %vm2683_vm3 = vcmp.eq.s32.totalorder %v10442_v34, 28  ;;  %vm2814_vm2 = vcmp.eq.s32.totalorder %v10442_v34, 1 }
 0x2ce   : > { %v5762_v31 = vsel %vm5695_vm11, %v7705_v9, %v5631_v30  ;;  %v2226_v17 = vsel %vm2159_vm5, %v7551_v43, %v2095_v44  ;;  %v2881_v49 = vsel %vm2814_vm2, %v7584_v56, 0.0  ;;  %vm2945_vm8 = vcmp.eq.s32.totalorder %v10442_v34, 5 }
 0x2cf   : > { %v5893_v25 = vsel %vm5826_vm13, %v7714_v11, %v5762_v31  ;;  %v2357_v54 = vsel %vm2290_vm1, %v7558_v46, %v2226_v17  ;;  %v3012_v48 = vsel %vm2945_vm8, %v7589_v60, %v2881_v49  ;;  %vm3076_vm7 = vcmp.eq.s32.totalorder %v10442_v34, 9 }
 0x2d0   : > { %v10567_v33 = vadd.f32 %v6021_v41, %v5893_v25  ;;  %v2488_v20 = vsel %vm2421_vm9, %v7561_v47, %v2357_v54  ;;  %v3143_v28 = vsel %vm3076_vm7, %v7592_v61, %v3012_v48  ;;  %vm3207_vm5 = vcmp.eq.s32.totalorder %v10442_v34, 13 }
 0x2d1   : > { %v2619_v22 = vsel %vm2552_vm10, %v7572_v51, %v2488_v20  ;;  %v3274_v30 = vsel %vm3207_vm5, %v7599_v3, %v3143_v28  ;;  %vm3338_vm0 = vcmp.eq.s32.totalorder %v10442_v34, 17  ;;  %vm3469_vm15 = vcmp.eq.s32.totalorder %v10442_v34, 21 }
 0x2d2   : > { %14359 = vst [vmem:[#allocation49_spill] sm:$0xff] %v10567_v33  ;;  %v6405_v41 = vadd.f32 %v6213_v7, %v10567_v33  ;;  %v2750_v44 = vsel %vm2683_vm3, %v7581_v55, %v2619_v22  ;;  %v3405_v31 = vsel %vm3338_vm0, %v7605_v6, %v3274_v30  ;;  %vm3600_vm4 = vcmp.eq.s32.totalorder %v10442_v34, 25 }
 0x2d3   : > { %v3536_v17 = vsel %vm3469_vm15, %v7616_v12, %v3405_v31  ;;  %vm3731_vm12 = vcmp.eq.s32.totalorder %v10442_v34, 29  ;;  %vm3862_vm6 = vcmp.eq.s32.totalorder %v10442_v34, 2  ;;  %vm3993_vm14 = vcmp.eq.s32.totalorder %v10442_v34, 6 }
 0x2d4   : > { %6533 = vst [vmem:[%s7867_s27 + $0xd0] sm:$0xff] %v6405_v41  ;;  %v3667_v49 = vsel %vm3600_vm4, %v7622_v15, %v3536_v17  ;;  %v3929_v25 = vsel %vm3862_vm6, %v7631_v21, 0.0  ;;  %vm4124_vm11 = vcmp.eq.s32.totalorder %v10442_v34, 10  ;;  %vm4255_vm13 = vcmp.eq.s32.totalorder %v10442_v34, 14 }
 0x2d5   : > { %v3798_v7 = vsel %vm3731_vm12, %v7625_v16, %v3667_v49  ;;  %v4060_v54 = vsel %vm3993_vm14, %v7640_v24, %v3929_v25  ;;  %vm4386_vm1 = vcmp.eq.s32.totalorder %v10442_v34, 18  ;;  %vm4517_vm9 = vcmp.eq.s32.totalorder %v10442_v34, 22 }
 0x2d6   : > { %v4191_v48 = vsel %vm4124_vm11, %v7650_v32, %v4060_v54  ;;  %vm4648_vm10 = vcmp.eq.s32.totalorder %v10442_v34, 26  ;;  %vm4779_vm3 = vcmp.eq.s32.totalorder %v10442_v34, 30  ;;  %vm4910_vm2 = vcmp.eq.s32.totalorder %v10442_v34, 3 }
 0x2d7   : > { %v4322_v20 = vsel %vm4255_vm13, %v7656_v40, %v4191_v48  ;;  %v4977_v28 = vsel %vm4910_vm2, %v7679_v14, 0.0  ;;  %vm5041_vm8 = vcmp.eq.s32.totalorder %v10442_v34, 7  ;;  %vm5172_vm7 = vcmp.eq.s32.totalorder %v10442_v34, 11 }
 0x2d8   : > { %v4453_v22 = vsel %vm4386_vm1, %v7663_v52, %v4322_v20  ;;  %v5108_v30 = vsel %vm5041_vm8, %v7684_v23, %v4977_v28  ;;  %vm5303_vm5 = vcmp.eq.s32.totalorder %v10442_v34, 15  ;;  %vm5434_vm0 = vcmp.eq.s32.totalorder %v10442_v34, 19 }
 0x2d9   : > { %v4584_v41 = vsel %vm4517_vm9, %v7666_v53, %v4453_v22  ;;  %v5239_v31 = vsel %vm5172_vm7, %v7688_v26, %v5108_v30  ;;  %vm5565_vm15 = vcmp.eq.s32.totalorder %v10442_v34, 23  ;;  %vm5696_vm4 = vcmp.eq.s32.totalorder %v10442_v34, 27 }
 0x2da   : > { %v4715_v17 = vsel %vm4648_vm10, %v7671_v59, %v4584_v41  ;;  %v5370_v49 = vsel %vm5303_vm5, %v7693_v57, %v5239_v31  ;;  %vm5827_vm12 = vcmp.eq.s32.totalorder %v10442_v34, 31  ;;  %v5958_v25 = vadd.f32 %v3798_v7, %v2750_v44 }
 0x2db   : > { %v4846_v54 = vsel %vm4779_vm3, %v7674_v63, %v4715_v17  ;;  %v5501_v48 = vsel %vm5434_vm0, %v7696_v58, %v5370_v49  ;;  %v10625_v20 = vadd.s32 %v10445_v45, %v549_v36  ;;  %v10628_v28 = vadd.f32 0.0001, %v10447_v50  ;;  %v6214_v36 = vld [vmem:[%s7432_s28 + $0xd8] sm:$0xff] }
 0x2dc   : > { %v5632_v22 = vsel %vm5565_vm15, %v7699_v0, %v5501_v48  ;;  %v6022_v30 = vadd.f32 %v5958_v25, %v4846_v54  ;;  %v10632_v41 = vmul.f32 0.6931472, %v10487_v29  ;;  %v10635_v44 = vmul.f32 0.6931472, %v10496_v19 }
 0x2dd   : > { %v5763_v34 = vsel %vm5696_vm4, %v7705_v9, %v5632_v22  ;;  %vm1767_vm6 = vcmp.eq.s32.totalorder %v10625_v20, 0  ;;  %vm1898_vm14 = vcmp.eq.s32.totalorder %v10625_v20, 4  ;;  %vm2029_vm11 = vcmp.eq.s32.totalorder %v10625_v20, 8 }
 0x2de   : > { %v5894_v10 = vsel %vm5827_vm12, %v7714_v11, %v5763_v34  ;;  %v1834_v45 = vsel %vm1767_vm6, %v7527_v35, 0.0  ;;  %vm2160_vm13 = vcmp.eq.s32.totalorder %v10625_v20, 12  ;;  %vm2291_vm1 = vcmp.eq.s32.totalorder %v10625_v20, 16 }
 0x2df   : > { %v10646_v50 = vadd.f32 %v6022_v30, %v5894_v10  ;;  %v1965_v29 = vsel %vm1898_vm14, %v7539_v38, %v1834_v45  ;;  %vm2422_vm9 = vcmp.eq.s32.totalorder %v10625_v20, 20  ;;  %vm2553_vm10 = vcmp.eq.s32.totalorder %v10625_v20, 24 }
 0x2e0   : > { %vm841_vm3 = vcmp.gt.s32.totalorder %v10437_v27, 1  ;;  %v2096_v19 = vsel %vm2029_vm11, %v7548_v42, %v1965_v29  ;;  %vm2684_vm2 = vcmp.eq.s32.totalorder %v10625_v20, 28  ;;  %vm2815_vm8 = vcmp.eq.s32.totalorder %v10625_v20, 1 }
 0x2e1   : > { %14360 = vst [vmem:[#allocation50_spill] sm:$0xff] %v10646_v50  ;;  %vm2946_vm7 = vcmp.eq.s32.totalorder %v10625_v20, 5  ;;  %v6406_v7 = vadd.f32 %v6214_v36, %v10646_v50  ;;  %v2227_v31 = vsel %vm2160_vm13, %v7551_v43, %v2096_v19  ;;  %v2882_v17 = vsel %vm2815_vm8, %v7584_v56, 0.0 }
 0x2e2   : > { %vm3077_vm5 = vcmp.eq.s32.totalorder %v10625_v20, 9  ;;  %v2358_v49 = vsel %vm2291_vm1, %v7558_v46, %v2227_v31  ;;  %v3013_v25 = vsel %vm2946_vm7, %v7589_v60, %v2882_v17  ;;  %vm3208_vm0 = vcmp.eq.s32.totalorder %v10625_v20, 13 }
 0x2e3   : > { %vm3339_vm15 = vcmp.eq.s32.totalorder %v10625_v20, 17  ;;  %6534 = vst [vmem:[%s7867_s27 + $0xd8] sm:$0xff] %v6406_v7  ;;  %v2489_v54 = vsel %vm2422_vm9, %v7561_v47, %v2358_v49  ;;  %v3144_v48 = vsel %vm3077_vm5, %v7592_v61, %v3013_v25  ;;  %vm3470_vm4 = vcmp.eq.s32.totalorder %v10625_v20, 21 }
 0x2e4   : > { %vm3601_vm12 = vcmp.eq.s32.totalorder %v10625_v20, 25  ;;  %v2620_v22 = vsel %vm2553_vm10, %v7572_v51, %v2489_v54  ;;  %v3275_v30 = vsel %vm3208_vm0, %v7599_v3, %v3144_v48  ;;  %vm3732_vm6 = vcmp.eq.s32.totalorder %v10625_v20, 29 }
 0x2e5   : > { %vm3863_vm14 = vcmp.eq.s32.totalorder %v10625_v20, 2  ;;  %v2751_v34 = vsel %vm2684_vm2, %v7581_v55, %v2620_v22  ;;  %v3406_v10 = vsel %vm3339_vm15, %v7605_v6, %v3275_v30  ;;  %vm3994_vm11 = vcmp.eq.s32.totalorder %v10625_v20, 6 }
 0x2e6   : > { %v3930_v36 = vsel %vm3863_vm14, %v7631_v21, 0.0  ;;  %v3537_v45 = vsel %vm3470_vm4, %v7616_v12, %v3406_v10  ;;  %vm4125_vm13 = vcmp.eq.s32.totalorder %v10625_v20, 10  ;;  %vm4256_vm1 = vcmp.eq.s32.totalorder %v10625_v20, 14 }
 0x2e7   : > { %v4061_v29 = vsel %vm3994_vm11, %v7640_v24, %v3930_v36  ;;  %v3668_v19 = vsel %vm3601_vm12, %v7622_v15, %v3537_v45  ;;  %vm4387_vm9 = vcmp.eq.s32.totalorder %v10625_v20, 18  ;;  %vm4518_vm10 = vcmp.eq.s32.totalorder %v10625_v20, 22 }
 0x2e8   : > { %v4192_v7 = vsel %vm4125_vm13, %v7650_v32, %v4061_v29  ;;  %v3799_v31 = vsel %vm3732_vm6, %v7625_v16, %v3668_v19  ;;  %vm4649_vm2 = vcmp.eq.s32.totalorder %v10625_v20, 26  ;;  %vm4780_vm8 = vcmp.eq.s32.totalorder %v10625_v20, 30 }
 0x2e9   : > { %v4323_v17 = vsel %vm4256_vm1, %v7656_v40, %v4192_v7  ;;  %vm4911_vm7 = vcmp.eq.s32.totalorder %v10625_v20, 3  ;;  %vm5042_vm5 = vcmp.eq.s32.totalorder %v10625_v20, 7  ;;  %vm5173_vm0 = vcmp.eq.s32.totalorder %v10625_v20, 11 }
 0x2ea   : > { %v4454_v49 = vsel %vm4387_vm9, %v7663_v52, %v4323_v17  ;;  %v4978_v54 = vsel %vm4911_vm7, %v7679_v14, 0.0  ;;  %vm5304_vm15 = vcmp.eq.s32.totalorder %v10625_v20, 15  ;;  %v842_v48 = vsel %vm841_vm3, %v10437_v27, 1 }
 0x2eb   : > { %v4585_v25 = vsel %vm4518_vm10, %v7666_v53, %v4454_v49  ;;  %v5109_v30 = vsel %vm5042_vm5, %v7684_v23, %v4978_v54  ;;  %vm5435_vm4 = vcmp.eq.s32.totalorder %v10625_v20, 19  ;;  %vm5566_vm12 = vcmp.eq.s32.totalorder %v10625_v20, 23 }
 0x2ec   : > { %v4716_v22 = vsel %vm4649_vm2, %v7671_v59, %v4585_v25  ;;  %v5240_v36 = vsel %vm5173_vm0, %v7688_v26, %v5109_v30  ;;  %vm5697_vm6 = vcmp.eq.s32.totalorder %v10625_v20, 27  ;;  %v5959_v45 = vadd.f32 %v3799_v31, %v2751_v34 }
 0x2ed   : > { %v4847_v10 = vsel %vm4780_vm8, %v7674_v63, %v4716_v22  ;;  %v5371_v29 = vsel %vm5304_vm15, %v7693_v57, %v5240_v36  ;;  %v6911_v19 = vtrunc.f32 %v10628_v28  ;;  %v1193_v7 = vmul.f32 0.36067376, %v10632_v41 }
 0x2ee   : > { %v1194_v17 = vmul.f32 0.36067376, %v10635_v44  ;;  %v5502_v49 = vsel %vm5435_vm4, %v7696_v58, %v5371_v29  ;;  %vm5828_vm3 = vcmp.eq.s32.totalorder %v10625_v20, 31  ;;  %v6023_v25 = vadd.f32 %v5959_v45, %v4847_v10  ;;  %v6215_v29 = vld [vmem:[%s7432_s28 + $0xe0] sm:$0xff] }
 0x2ef   : > { %vm843_vm14 = vcmp.gt.s32.totalorder %v10450_v8, 1  ;;  %v5633_v54 = vsel %vm5566_vm12, %v7699_v0, %v5502_v49  ;;  %v6912_v22 = vcvt.f32.s32 %v6911_v19  ;;  %v1257_v34 = vmul.f32 8.0, %v1193_v7 }
 0x2f0   : > { %v1258_v31 = vmul.f32 8.0, %v1194_v17  ;;  %v5764_v30 = vsel %vm5697_vm6, %v7705_v9, %v5633_v54  ;;  %v844_v28 = vsel %vm843_vm14, %v10450_v8, 1  ;;  %v937_v36 = vcvt.s32.f32 %v842_v48 }
 0x2f1   : > { %v363_v41 = vsub.s32 %v10440_v37, %v7443_v2  ;;  %v5895_v44 = vsel %vm5828_vm3, %v7714_v11, %v5764_v30  ;;  %v1448_v20 = vadd.s32 8, %v6912_v22  ;;  %v1321_v10 = vadd.f32 0.0001, %v1257_v34 }
 0x2f2   : > { %v1322_v45 = vadd.f32 0.0001, %v1258_v31  ;;  %v10726_v50 = vadd.f32 %v6023_v25, %v5895_v44  ;;  %v938_v19 = vcvt.s32.f32 %v844_v28  ;;  %v1002_v7 = vmul.f32 0.125, %v937_v36 }
 0x2f3   : > { %v10730_v17 = vsub.s32 %v10440_v37, %v7449_v4  ;;  %vm1541_vm11 = vcmp.lt.s32.totalorder %v1448_v20, 15  ;;  %v6913_v48 = vtrunc.f32 %v1321_v10  ;;  %v939_v25 = vcvt.s32.f32 %v363_v41 }
 0x2f4   : > { %14361 = vst [vmem:[#allocation51_spill] sm:$0xff] %v10726_v50  ;;  %v6915_v49 = vtrunc.f32 %v1322_v45  ;;  %v6407_v54 = vadd.f32 %v6215_v29, %v10726_v50  ;;  %v1542_v33 = vsel %vm1541_vm11, %v1448_v20, 15  ;;  %v1003_v30 = vmul.f32 0.125, %v938_v19 }
 0x2f5   : > { %v10733_v2 = vadd.s32 16, %v1542_v33  ;;  %7140 = vlog2.f32 %v1002_v7  ;;  %v10737_v34 = vcvt.f32.s32 %v6913_v48 }
 0x2f6   : > { %6535 = vst [vmem:[%s7867_s27 + $0xe0] sm:$0xff] %v6407_v54  ;;  %v10739_v31 = vcvt.f32.s32 %v6915_v49  ;;  %7142 = vlog2.f32 %v1003_v30 }
 0x2f7   : > { %vm1768_vm13 = vcmp.eq.s32.totalorder %v10733_v2, 0  ;;  %vm1899_vm1 = vcmp.eq.s32.totalorder %v10733_v2, 4  ;;  %vm2030_vm9 = vcmp.eq.s32.totalorder %v10733_v2, 8  ;;  %vm2161_vm10 = vcmp.eq.s32.totalorder %v10733_v2, 12 }
 0x2f8   : > { %v1835_v33 = vsel %vm1768_vm13, %v7527_v35, 0.0  ;;  %vm2292_vm2 = vcmp.eq.s32.totalorder %v10733_v2, 16  ;;  %vm2423_vm8 = vcmp.eq.s32.totalorder %v10733_v2, 20  ;;  %vm2554_vm7 = vcmp.eq.s32.totalorder %v10733_v2, 24 }
 0x2f9   : > { %v1966_v28 = vsel %vm1899_vm1, %v7539_v38, %v1835_v33  ;;  %vm2685_vm5 = vcmp.eq.s32.totalorder %v10733_v2, 28  ;;  %vm2816_vm0 = vcmp.eq.s32.totalorder %v10733_v2, 1  ;;  %vm2947_vm15 = vcmp.eq.s32.totalorder %v10733_v2, 5 }
 0x2fa   : > { %v2097_v36 = vsel %vm2030_vm9, %v7548_v42, %v1966_v28  ;;  %v2883_v41 = vsel %vm2816_vm0, %v7584_v56, 0.0  ;;  %vm3078_vm4 = vcmp.eq.s32.totalorder %v10733_v2, 9  ;;  %vm3209_vm12 = vcmp.eq.s32.totalorder %v10733_v2, 13 }
 0x2fb   : > { %v2228_v44 = vsel %vm2161_vm10, %v7551_v43, %v2097_v36  ;;  %v3014_v29 = vsel %vm2947_vm15, %v7589_v60, %v2883_v41  ;;  %vm3340_vm6 = vcmp.eq.s32.totalorder %v10733_v2, 17  ;;  %vm3471_vm3 = vcmp.eq.s32.totalorder %v10733_v2, 21 }
 0x2fc   : > { %v2359_v20 = vsel %vm2292_vm2, %v7558_v46, %v2228_v44  ;;  %v3145_v10 = vsel %vm3078_vm4, %v7592_v61, %v3014_v29  ;;  %vm3602_vm14 = vcmp.eq.s32.totalorder %v10733_v2, 25  ;;  %vm3733_vm11 = vcmp.eq.s32.totalorder %v10733_v2, 29 }
 0x2fd   : > { %v2490_v45 = vsel %vm2423_vm8, %v7561_v47, %v2359_v20  ;;  %v3276_v19 = vsel %vm3209_vm12, %v7599_v3, %v3145_v10  ;;  %vm3864_vm13 = vcmp.eq.s32.totalorder %v10733_v2, 2  ;;  %vm3995_vm1 = vcmp.eq.s32.totalorder %v10733_v2, 6 }
 0x2fe   : > { %v2621_v7 = vsel %vm2554_vm7, %v7572_v51, %v2490_v45  ;;  %v3407_v48 = vsel %vm3340_vm6, %v7605_v6, %v3276_v19  ;;  %v3931_v49 = vsel %vm3864_vm13, %v7631_v21, 0.0  ;;  %vm4126_vm9 = vcmp.eq.s32.totalorder %v10733_v2, 10 }
 0x2ff   : > { %v7141_v54 = vpop.eup %7140  ;;  %v2752_v30 = vsel %vm2685_vm5, %v7581_v55, %v2621_v7  ;;  %v3538_v33 = vsel %vm3471_vm3, %v7616_v12, %v3407_v48  ;;  %v4062_v28 = vsel %vm3995_vm1, %v7640_v24, %v3931_v49  ;;  %vm4257_vm10 = vcmp.eq.s32.totalorder %v10733_v2, 14 }
 0x300   : > { %vm743_vm2 = vcmp.lt.s32.totalorder %v10392_v18, 8  ;;  %vm744_vm8 = vcmp.lt.s32.totalorder %v10407_v5, 8  ;;  %v7143_v36 = vpop.eup %7142  ;;  %v3669_v41 = vsel %vm3602_vm14, %v7622_v15, %v3538_v33  ;;  %v4193_v44 = vsel %vm4126_vm9, %v7650_v32, %v4062_v28 }
 0x301   : > { %vm4388_vm7 = vcmp.eq.s32.totalorder %v10733_v2, 18  ;;  %vm4519_vm5 = vcmp.eq.s32.totalorder %v10733_v2, 22  ;;  %vm426_vm0 = vcmp.lt.s32.totalorder %v10421_v39, 0  ;;  %v3800_v29 = vsel %vm3733_vm11, %v7625_v16, %v3669_v41 }
 0x302   : > { %v4324_v20 = vsel %vm4257_vm10, %v7656_v40, %v4193_v44  ;;  %vm4650_vm15 = vcmp.eq.s32.totalorder %v10733_v2, 26  ;;  %vm4781_vm4 = vcmp.eq.s32.totalorder %v10733_v2, 30  ;;  %vm4912_vm12 = vcmp.eq.s32.totalorder %v10733_v2, 3 }
 0x303   : > { %v4455_v10 = vsel %vm4388_vm7, %v7663_v52, %v4324_v20  ;;  %vm5043_vm6 = vcmp.eq.s32.totalorder %v10733_v2, 7  ;;  %vm5174_vm3 = vcmp.eq.s32.totalorder %v10733_v2, 11  ;;  %v4979_v19 = vsel %vm4912_vm12, %v7679_v14, 0.0 }
 0x304   : > { %v4586_v45 = vsel %vm4519_vm5, %v7666_v53, %v4455_v10  ;;  %vm5305_vm14 = vcmp.eq.s32.totalorder %v10733_v2, 15  ;;  %v1004_v7 = vmul.f32 0.125, %v939_v25  ;;  %v5110_v49 = vsel %vm5043_vm6, %v7684_v23, %v4979_v19 }
 0x305   : > { %v4717_v48 = vsel %vm4650_vm15, %v7671_v59, %v4586_v45  ;;  %vm5436_vm11 = vcmp.eq.s32.totalorder %v10733_v2, 19  ;;  %vm5567_vm13 = vcmp.eq.s32.totalorder %v10733_v2, 23  ;;  %v5241_v28 = vsel %vm5174_vm3, %v7688_v26, %v5110_v49 }
 0x306   : > { %v4848_v33 = vsel %vm4781_vm4, %v7674_v63, %v4717_v48  ;;  %vm5698_vm1 = vcmp.eq.s32.totalorder %v10733_v2, 27  ;;  %v5960_v41 = vadd.f32 %v3800_v29, %v2752_v30  ;;  %v5372_v44 = vsel %vm5305_vm14, %v7693_v57, %v5241_v28 }
 0x307   : > { %v1449_v20 = vadd.s32 8, %v10737_v34  ;;  %v1450_v25 = vadd.s32 8, %v10739_v31  ;;  %v1099_v10 = vmul.f32 0.6931472, %v7141_v54  ;;  %v5503_v45 = vsel %vm5436_vm11, %v7696_v58, %v5372_v44  ;;  %v6216_v31 = vld [vmem:[%s7432_s28 + $0xe8] sm:$0xff] }
 0x308   : > { %vm5829_vm9 = vcmp.eq.s32.totalorder %v10733_v2, 31  ;;  %v6024_v19 = vadd.f32 %v5960_v41, %v4848_v33  ;;  %v1101_v37 = vmul.f32 0.6931472, %v7143_v36  ;;  %v5634_v48 = vsel %vm5567_vm13, %v7699_v0, %v5503_v45 }
 0x309   : > { %vm1543_vm10 = vcmp.lt.s32.totalorder %v1449_v20, 15  ;;  %vm1545_vm7 = vcmp.lt.s32.totalorder %v1450_v25, 15  ;;  %v1195_v49 = vmul.f32 0.36067376, %v1099_v10  ;;  %v5765_v30 = vsel %vm5698_vm1, %v7705_v9, %v5634_v48 }
 0x30a   : > { %v1544_v29 = vsel %vm1543_vm10, %v1449_v20, 15  ;;  %v1546_v28 = vsel %vm1545_vm7, %v1450_v25, 15  ;;  %v1196_v34 = vmul.f32 0.36067376, %v1101_v37  ;;  %v5896_v22 = vsel %vm5829_vm9, %v7714_v11, %v5765_v30 }
 0x30b   : > { %v1641_v54 = vsel %vm743_vm2, %v10392_v18, %v1544_v29  ;;  %v1642_v2 = vsel %vm744_vm8, %v10407_v5, %v1546_v28  ;;  %v1259_v36 = vmul.f32 8.0, %v1195_v49  ;;  %v10828_v33 = vadd.f32 %v6024_v19, %v5896_v22 }
 0x30c   : > { %v14363_v41 = vmul.u32 16, %v10432_v62  ;;  %v10834_v37 = vadd.s32 16, %v1642_v2  ;;  %v10839_v20 = vsel %vm426_vm0, 1, %v14327_v13  ;;  %v10841_v18 = vmul.f32 8.0, %v1196_v34 }
 0x30d   : > { %14362 = vst [vmem:[#allocation52_spill] sm:$0xff] %v10828_v33  ;;  %v10843_v25 = vadd.f32 0.0001, %v1259_v36  ;;  %v14364_v5 = vsub.s32 0, %v10730_v17  ;;  %7144 = vlog2.f32 %v1004_v7  ;;  %v6408_v62 = vadd.f32 %v6216_v31, %v10828_v33 }
 0x30e   : > { %v10832_v44 = vadd.s32 %v1641_v54, %v14363_v41 }
 0x30f   : > { %v10848_v22 = vmin.u32 %v14364_v5, %v10730_v17  ;;  %6536 = vst [vmem:[%s7867_s27 + $0xe8] sm:$0xff] %v6408_v62 }
 0x310   : > { %vm1769_vm2 = vcmp.eq.s32.totalorder %v10832_v44, 0  ;;  %vm1900_vm8 = vcmp.eq.s32.totalorder %v10832_v44, 4  ;;  %vm2031_vm5 = vcmp.eq.s32.totalorder %v10832_v44, 8  ;;  %vm2162_vm0 = vcmp.eq.s32.totalorder %v10832_v44, 12 }
 0x311   : > { %v1836_v39 = vsel %vm1769_vm2, %v7527_v35, 0.0  ;;  %vm2293_vm15 = vcmp.eq.s32.totalorder %v10832_v44, 16  ;;  %vm2424_vm4 = vcmp.eq.s32.totalorder %v10832_v44, 20  ;;  %vm2555_vm12 = vcmp.eq.s32.totalorder %v10832_v44, 24 }
 0x312   : > { %v1967_v10 = vsel %vm1900_vm8, %v7539_v38, %v1836_v39  ;;  %vm2686_vm6 = vcmp.eq.s32.totalorder %v10832_v44, 28  ;;  %vm2817_vm3 = vcmp.eq.s32.totalorder %v10832_v44, 1  ;;  %vm2948_vm14 = vcmp.eq.s32.totalorder %v10832_v44, 5 }
 0x313   : > { %v2098_v7 = vsel %vm2031_vm5, %v7548_v42, %v1967_v10  ;;  %v2884_v45 = vsel %vm2817_vm3, %v7584_v56, 0.0  ;;  %vm3079_vm11 = vcmp.eq.s32.totalorder %v10832_v44, 9  ;;  %vm3210_vm13 = vcmp.eq.s32.totalorder %v10832_v44, 13 }
 0x314   : > { %v2229_v19 = vsel %vm2162_vm0, %v7551_v43, %v2098_v7  ;;  %v3015_v48 = vsel %vm2948_vm14, %v7589_v60, %v2884_v45  ;;  %vm3341_vm1 = vcmp.eq.s32.totalorder %v10832_v44, 17  ;;  %vm3472_vm9 = vcmp.eq.s32.totalorder %v10832_v44, 21 }
 0x315   : > { %v2360_v49 = vsel %vm2293_vm15, %v7558_v46, %v2229_v19  ;;  %v3146_v30 = vsel %vm3079_vm11, %v7592_v61, %v3015_v48  ;;  %vm3603_vm10 = vcmp.eq.s32.totalorder %v10832_v44, 25  ;;  %vm3734_vm7 = vcmp.eq.s32.totalorder %v10832_v44, 29 }
 0x316   : > { %v2491_v29 = vsel %vm2424_vm4, %v7561_v47, %v2360_v49  ;;  %v3277_v28 = vsel %vm3210_vm13, %v7599_v3, %v3146_v30  ;;  %vm3865_vm2 = vcmp.eq.s32.totalorder %v10832_v44, 2  ;;  %vm3996_vm8 = vcmp.eq.s32.totalorder %v10832_v44, 6 }
 0x317   : > { %v2622_v34 = vsel %vm2555_vm12, %v7572_v51, %v2491_v29  ;;  %v3408_v31 = vsel %vm3341_vm1, %v7605_v6, %v3277_v28  ;;  %v3932_v54 = vsel %vm3865_vm2, %v7631_v21, 0.0  ;;  %vm4127_vm5 = vcmp.eq.s32.totalorder %v10832_v44, 10  ;;  %v10893_v5 = vpop.eup %7144 }
 0x318   : > { %v2753_v2 = vsel %vm2686_vm6, %v7581_v55, %v2622_v34  ;;  %v3539_v36 = vsel %vm3472_vm9, %v7616_v12, %v3408_v31  ;;  %v4063_v41 = vsel %vm3996_vm8, %v7640_v24, %v3932_v54  ;;  %vm4258_vm0 = vcmp.eq.s32.totalorder %v10832_v44, 14 }
 0x319   : > { %v3670_v62 = vsel %vm3603_vm10, %v7622_v15, %v3539_v36  ;;  %v4194_v39 = vsel %vm4127_vm5, %v7650_v32, %v4063_v41  ;;  %vm4389_vm15 = vcmp.eq.s32.totalorder %v10832_v44, 18  ;;  %vm4520_vm4 = vcmp.eq.s32.totalorder %v10832_v44, 22 }
 0x31a   : > { %v3801_v10 = vsel %vm3734_vm7, %v7625_v16, %v3670_v62  ;;  %v4325_v7 = vsel %vm4258_vm0, %v7656_v40, %v4194_v39  ;;  %vm4651_vm12 = vcmp.eq.s32.totalorder %v10832_v44, 26  ;;  %vm4782_vm6 = vcmp.eq.s32.totalorder %v10832_v44, 30 }
 0x31b   : > { %v4456_v45 = vsel %vm4389_vm15, %v7663_v52, %v4325_v7  ;;  %vm4913_vm3 = vcmp.eq.s32.totalorder %v10832_v44, 3  ;;  %vm5044_vm14 = vcmp.eq.s32.totalorder %v10832_v44, 7  ;;  %vm5175_vm11 = vcmp.eq.s32.totalorder %v10832_v44, 11 }
 0x31c   : > { %v4587_v19 = vsel %vm4520_vm4, %v7666_v53, %v4456_v45  ;;  %v4980_v48 = vsel %vm4913_vm3, %v7679_v14, 0.0  ;;  %vm5306_vm13 = vcmp.eq.s32.totalorder %v10832_v44, 15  ;;  %vm5437_vm1 = vcmp.eq.s32.totalorder %v10832_v44, 19 }
 0x31d   : > { %v4718_v49 = vsel %vm4651_vm12, %v7671_v59, %v4587_v19  ;;  %v5111_v30 = vsel %vm5044_vm14, %v7684_v23, %v4980_v48  ;;  %vm5568_vm9 = vcmp.eq.s32.totalorder %v10832_v44, 23  ;;  %vm5699_vm10 = vcmp.eq.s32.totalorder %v10832_v44, 27  ;;  %v6217_v19 = vld [vmem:[%s7432_s28 + $0xf0] sm:$0xff] }
 0x31e   : > { %v4849_v29 = vsel %vm4782_vm6, %v7674_v63, %v4718_v49  ;;  %v5242_v28 = vsel %vm5175_vm11, %v7688_v26, %v5111_v30  ;;  %vm5830_vm7 = vcmp.eq.s32.totalorder %v10832_v44, 31  ;;  %v5961_v31 = vadd.f32 %v3801_v10, %v2753_v2 }
 0x31f   : > { %v5373_v34 = vsel %vm5306_vm13, %v7693_v57, %v5242_v28  ;;  %vm1770_vm2 = vcmp.eq.s32.totalorder %v10834_v37, 0  ;;  %vm1901_vm8 = vcmp.eq.s32.totalorder %v10834_v37, 4  ;;  %vm2032_vm5 = vcmp.eq.s32.totalorder %v10834_v37, 8 }
 0x320   : > { %v5504_v54 = vsel %vm5437_vm1, %v7696_v58, %v5373_v34  ;;  %v1837_v36 = vsel %vm1770_vm2, %v7527_v35, 0.0  ;;  %vm2163_vm0 = vcmp.eq.s32.totalorder %v10834_v37, 12  ;;  %v6025_v62 = vadd.f32 %v5961_v31, %v4849_v29 }
 0x321   : > { %v5635_v41 = vsel %vm5568_vm9, %v7699_v0, %v5504_v54  ;;  %v1968_v39 = vsel %vm1901_vm8, %v7539_v38, %v1837_v36  ;;  %vm2294_vm15 = vcmp.eq.s32.totalorder %v10834_v37, 16  ;;  %vm2425_vm4 = vcmp.eq.s32.totalorder %v10834_v37, 20 }
 0x322   : > { %v5766_v2 = vsel %vm5699_vm10, %v7705_v9, %v5635_v41  ;;  %v2099_v10 = vsel %vm2032_vm5, %v7548_v42, %v1968_v39  ;;  %v10933_v7 = vadd.s32 144, %v7441_v1  ;;  %vm2556_vm12 = vcmp.eq.s32.totalorder %v10834_v37, 24 }
 0x323   : > { %v5897_v45 = vsel %vm5830_vm7, %v7714_v11, %v5766_v2  ;;  %v2230_v48 = vsel %vm2163_vm0, %v7551_v43, %v2099_v10  ;;  %vm2818_vm6 = vcmp.eq.s32.totalorder %v10834_v37, 1  ;;  %vm2949_vm3 = vcmp.eq.s32.totalorder %v10834_v37, 5 }
 0x324   : > { %v10942_v49 = vadd.f32 %v6025_v62, %v5897_v45  ;;  %v2361_v30 = vsel %vm2294_vm15, %v7558_v46, %v2230_v48  ;;  %v2885_v29 = vsel %vm2818_vm6, %v7584_v56, 0.0  ;;  %vm3080_vm14 = vcmp.eq.s32.totalorder %v10834_v37, 9 }
 0x325   : > { %v2492_v28 = vsel %vm2425_vm4, %v7561_v47, %v2361_v30  ;;  %v3016_v44 = vsel %vm2949_vm3, %v7589_v60, %v2885_v29  ;;  %vm3211_vm11 = vcmp.eq.s32.totalorder %v10834_v37, 13  ;;  %vm2687_vm13 = vcmp.eq.s32.totalorder %v10834_v37, 28 }
 0x326   : > { %14365 = vst [vmem:[#allocation53_spill] sm:$0xff] %v10942_v49  ;;  %v6409_v34 = vadd.f32 %v6217_v19, %v10942_v49  ;;  %v3147_v31 = vsel %vm3080_vm14, %v7592_v61, %v3016_v44  ;;  %vm3342_vm1 = vcmp.eq.s32.totalorder %v10834_v37, 17  ;;  %v2623_v54 = vsel %vm2556_vm12, %v7572_v51, %v2492_v28 }
 0x327   : > { %v3278_v36 = vsel %vm3211_vm11, %v7599_v3, %v3147_v31  ;;  %vm3473_vm9 = vcmp.eq.s32.totalorder %v10834_v37, 21  ;;  %vm3604_vm10 = vcmp.eq.s32.totalorder %v10834_v37, 25  ;;  %vm3735_vm7 = vcmp.eq.s32.totalorder %v10834_v37, 29 }
 0x328   : > { %6537 = vst [vmem:[%s7867_s27 + $0xf0] sm:$0xff] %v6409_v34  ;;  %v3409_v41 = vsel %vm3342_vm1, %v7605_v6, %v3278_v36  ;;  %vm3866_vm2 = vcmp.eq.s32.totalorder %v10834_v37, 2  ;;  %vm3997_vm8 = vcmp.eq.s32.totalorder %v10834_v37, 6  ;;  %vm4128_vm5 = vcmp.eq.s32.totalorder %v10834_v37, 10 }
 0x329   : > { %v3540_v62 = vsel %vm3473_vm9, %v7616_v12, %v3409_v41  ;;  %v3933_v39 = vsel %vm3866_vm2, %v7631_v21, 0.0  ;;  %vm4259_vm0 = vcmp.eq.s32.totalorder %v10834_v37, 14  ;;  %v2754_v2 = vsel %vm2687_vm13, %v7581_v55, %v2623_v54 }
 0x32a   : > { %v3671_v10 = vsel %vm3604_vm10, %v7622_v15, %v3540_v62  ;;  %v4064_v45 = vsel %vm3997_vm8, %v7640_v24, %v3933_v39  ;;  %vm4390_vm15 = vcmp.eq.s32.totalorder %v10834_v37, 18  ;;  %vm4521_vm4 = vcmp.eq.s32.totalorder %v10834_v37, 22 }
 0x32b   : > { %v3802_v19 = vsel %vm3735_vm7, %v7625_v16, %v3671_v10  ;;  %v4195_v48 = vsel %vm4128_vm5, %v7650_v32, %v4064_v45  ;;  %vm4652_vm12 = vcmp.eq.s32.totalorder %v10834_v37, 26  ;;  %vm4914_vm6 = vcmp.eq.s32.totalorder %v10834_v37, 3 }
 0x32c   : > { %v4326_v30 = vsel %vm4259_vm0, %v7656_v40, %v4195_v48  ;;  %vm5045_vm3 = vcmp.eq.s32.totalorder %v10834_v37, 7  ;;  %vm5176_vm14 = vcmp.eq.s32.totalorder %v10834_v37, 11  ;;  %vm4783_vm11 = vcmp.eq.s32.totalorder %v10834_v37, 30 }
 0x32d   : > { %v4457_v29 = vsel %vm4390_vm15, %v7663_v52, %v4326_v30  ;;  %v4981_v28 = vsel %vm4914_vm6, %v7679_v14, 0.0  ;;  %vm5307_vm13 = vcmp.eq.s32.totalorder %v10834_v37, 15  ;;  %vm5438_vm1 = vcmp.eq.s32.totalorder %v10834_v37, 19 }
 0x32e   : > { %v4588_v44 = vsel %vm4521_vm4, %v7666_v53, %v4457_v29  ;;  %v5112_v34 = vsel %vm5045_vm3, %v7684_v23, %v4981_v28  ;;  %vm5569_vm9 = vcmp.eq.s32.totalorder %v10834_v37, 23  ;;  %vm5700_vm10 = vcmp.eq.s32.totalorder %v10834_v37, 27 }
 0x32f   : > { %v4719_v31 = vsel %vm4652_vm12, %v7671_v59, %v4588_v44  ;;  %v5243_v54 = vsel %vm5176_vm14, %v7688_v26, %v5112_v34  ;;  %v5962_v36 = vadd.f32 %v3802_v19, %v2754_v2  ;;  %v1324_v39 = vadd.f32 0.0001, %v10841_v18 }
 0x330   : > { %v4850_v41 = vsel %vm4783_vm11, %v7674_v63, %v4719_v31  ;;  %v5374_v62 = vsel %vm5307_vm13, %v7693_v57, %v5243_v54  ;;  %v6917_v10 = vtrunc.f32 %v10843_v25  ;;  %vm5831_vm7 = vcmp.eq.s32.totalorder %v10834_v37, 31  ;;  %v6218_v31 = vld [vmem:[%s7432_s28 + $0xf8] sm:$0xff] }
 0x331   : > { %v5505_v45 = vsel %vm5438_vm1, %v7696_v58, %v5374_v62  ;;  %v6026_v48 = vadd.f32 %v5962_v36, %v4850_v41  ;;  %vm847_vm2 = vcmp.gt.s32.totalorder %v10848_v22, 1  ;;  %v6919_v2 = vtrunc.f32 %v1324_v39 }
 0x332   : > { %v5636_v30 = vsel %vm5569_vm9, %v7699_v0, %v5505_v45  ;;  %v6918_v29 = vcvt.f32.s32 %v6917_v10  ;;  %v848_v19 = vsel %vm847_vm2, %v10848_v22, 1  ;;  %v554_v44 = vmul.u32 16, %v10839_v20 }
 0x333   : > { %v5767_v28 = vsel %vm5700_vm10, %v7705_v9, %v5636_v30  ;;  %v940_v18 = vcvt.s32.f32 %v848_v19  ;;  %v1103_v25 = vmul.f32 0.6931472, %v10893_v5  ;;  %v6920_v37 = vcvt.f32.s32 %v6919_v2  ;;  %v14367_v30 = vld [vmem:[#allocation22_spill] sm:$0xff] }
 0x334   : > { %v5898_v34 = vsel %vm5831_vm7, %v7714_v11, %v5767_v28  ;;  %v1451_v54 = vadd.s32 8, %v6918_v29  ;;  %v11009_v36 = vsub.s32 %v10933_v7, %v7449_v4  ;;  %vm745_vm8 = vcmp.lt.s32.totalorder %v10437_v27, 8 }
 0x335   : > { %v11011_v41 = vadd.f32 %v6026_v48, %v5898_v34  ;;  %v1005_v62 = vmul.f32 0.125, %v940_v18  ;;  %v1197_v39 = vmul.f32 0.36067376, %v1103_v25  ;;  %vm746_vm5 = vcmp.lt.s32.totalorder %v10450_v8, 8 }
 0x336   : > { %v1452_v20 = vadd.s32 8, %v6920_v37  ;;  %vm1547_vm0 = vcmp.lt.s32.totalorder %v1451_v54, 15  ;;  %v659_v5 = vsub.s32 0, %v11009_v36  ;;  %v365_v29 = vsub.s32 %v10933_v7, %v14367_v30 }
 0x337   : > { %14366 = vst [vmem:[#allocation54_spill] sm:$0xff] %v11011_v41  ;;  %v6410_v10 = vadd.f32 %v6218_v31, %v11011_v41  ;;  %v1548_v45 = vsel %vm1547_vm0, %v1451_v54, 15  ;;  %7146 = vlog2.f32 %v1005_v62  ;;  %v11022_v2 = vmul.f32 8.0, %v1197_v39 }
 0x338   : > { %vm1549_vm15 = vcmp.lt.s32.totalorder %v1452_v20, 15  ;;  %v11020_v48 = vsel %vm745_vm8, %v10437_v27, %v1548_v45  ;;  %v11025_v19 = vmin.u32 %v659_v5, %v11009_v36 }
 0x339   : > { %6538 = vst [vmem:[%s7867_s27 + $0xf8] sm:$0xff] %v6410_v10  ;;  %v1550_v28 = vsel %vm1549_vm15, %v1452_v20, 15  ;;  %vm1771_vm4 = vcmp.eq.s32.totalorder %v11020_v48, 0  ;;  %vm1902_vm12 = vcmp.eq.s32.totalorder %v11020_v48, 4  ;;  %vm2033_vm6 = vcmp.eq.s32.totalorder %v11020_v48, 8 }
 0x33a   : > { %v1644_v18 = vsel %vm746_vm5, %v10450_v8, %v1550_v28  ;;  %v1838_v27 = vsel %vm1771_vm4, %v7527_v35, 0.0  ;;  %vm2164_vm3 = vcmp.eq.s32.totalorder %v11020_v48, 12  ;;  %vm2295_vm14 = vcmp.eq.s32.totalorder %v11020_v48, 16 }
 0x33b   : > { %v11037_v25 = vadd.s32 %v1644_v18, %v554_v44  ;;  %v1969_v34 = vsel %vm1902_vm12, %v7539_v38, %v1838_v27  ;;  %vm2426_vm11 = vcmp.eq.s32.totalorder %v11020_v48, 20  ;;  %vm2557_vm13 = vcmp.eq.s32.totalorder %v11020_v48, 24 }
 0x33c   : > { %v2100_v31 = vsel %vm2033_vm6, %v7548_v42, %v1969_v34  ;;  %vm2688_vm1 = vcmp.eq.s32.totalorder %v11020_v48, 28  ;;  %vm2819_vm9 = vcmp.eq.s32.totalorder %v11020_v48, 1  ;;  %vm2950_vm10 = vcmp.eq.s32.totalorder %v11020_v48, 5 }
 0x33d   : > { %v2231_v8 = vsel %vm2164_vm3, %v7551_v43, %v2100_v31  ;;  %v2886_v37 = vsel %vm2819_vm9, %v7584_v56, 0.0  ;;  %vm3081_vm7 = vcmp.eq.s32.totalorder %v11020_v48, 9  ;;  %vm3212_vm2 = vcmp.eq.s32.totalorder %v11020_v48, 13 }
 0x33e   : > { %v2362_v44 = vsel %vm2295_vm14, %v7558_v46, %v2231_v8  ;;  %v3017_v54 = vsel %vm2950_vm10, %v7589_v60, %v2886_v37  ;;  %vm3343_vm8 = vcmp.eq.s32.totalorder %v11020_v48, 17  ;;  %vm3474_vm5 = vcmp.eq.s32.totalorder %v11020_v48, 21 }
 0x33f   : > { %v2493_v62 = vsel %vm2426_vm11, %v7561_v47, %v2362_v44  ;;  %v3148_v39 = vsel %vm3081_vm7, %v7592_v61, %v3017_v54  ;;  %vm3605_vm0 = vcmp.eq.s32.totalorder %v11020_v48, 25  ;;  %vm3736_vm15 = vcmp.eq.s32.totalorder %v11020_v48, 29 }
 0x340   : > { %v2624_v20 = vsel %vm2557_vm13, %v7572_v51, %v2493_v62  ;;  %v3279_v5 = vsel %vm3212_vm2, %v7599_v3, %v3148_v39  ;;  %vm3867_vm4 = vcmp.eq.s32.totalorder %v11020_v48, 2  ;;  %vm3998_vm12 = vcmp.eq.s32.totalorder %v11020_v48, 6 }
 0x341   : > { %v11064_v10 = vpop.eup %7146  ;;  %v2755_v45 = vsel %vm2688_vm1, %v7581_v55, %v2624_v20  ;;  %v3410_v28 = vsel %vm3343_vm8, %v7605_v6, %v3279_v5  ;;  %v3934_v18 = vsel %vm3867_vm4, %v7631_v21, 0.0  ;;  %vm4129_vm6 = vcmp.eq.s32.totalorder %v11020_v48, 10 }
 0x342   : > { %v3541_v27 = vsel %vm3474_vm5, %v7616_v12, %v3410_v28  ;;  %v4065_v34 = vsel %vm3998_vm12, %v7640_v24, %v3934_v18  ;;  %vm4260_vm3 = vcmp.eq.s32.totalorder %v11020_v48, 14  ;;  %vm4391_vm14 = vcmp.eq.s32.totalorder %v11020_v48, 18 }
 0x343   : > { %v3672_v31 = vsel %vm3605_vm0, %v7622_v15, %v3541_v27  ;;  %v4196_v8 = vsel %vm4129_vm6, %v7650_v32, %v4065_v34  ;;  %vm4522_vm11 = vcmp.eq.s32.totalorder %v11020_v48, 22  ;;  %vm4653_vm13 = vcmp.eq.s32.totalorder %v11020_v48, 26 }
 0x344   : > { %v3803_v37 = vsel %vm3736_vm15, %v7625_v16, %v3672_v31  ;;  %v4327_v44 = vsel %vm4260_vm3, %v7656_v40, %v4196_v8  ;;  %vm4784_vm1 = vcmp.eq.s32.totalorder %v11020_v48, 30  ;;  %vm4915_vm9 = vcmp.eq.s32.totalorder %v11020_v48, 3 }
 0x345   : > { %v4458_v54 = vsel %vm4391_vm14, %v7663_v52, %v4327_v44  ;;  %v4982_v62 = vsel %vm4915_vm9, %v7679_v14, 0.0  ;;  %vm5046_vm10 = vcmp.eq.s32.totalorder %v11020_v48, 7  ;;  %vm5177_vm7 = vcmp.eq.s32.totalorder %v11020_v48, 11 }
 0x346   : > { %v4589_v39 = vsel %vm4522_vm11, %v7666_v53, %v4458_v54  ;;  %v5113_v20 = vsel %vm5046_vm10, %v7684_v23, %v4982_v62  ;;  %vm5308_vm2 = vcmp.eq.s32.totalorder %v11020_v48, 15  ;;  %vm5439_vm8 = vcmp.eq.s32.totalorder %v11020_v48, 19 }
 0x347   : > { %v4720_v5 = vsel %vm4653_vm13, %v7671_v59, %v4589_v39  ;;  %v5244_v28 = vsel %vm5177_vm7, %v7688_v26, %v5113_v20  ;;  %vm5570_vm5 = vcmp.eq.s32.totalorder %v11020_v48, 23  ;;  %vm5701_vm0 = vcmp.eq.s32.totalorder %v11020_v48, 27 }
 0x348   : > { %v4851_v18 = vsel %vm4784_vm1, %v7674_v63, %v4720_v5  ;;  %v5375_v27 = vsel %vm5308_vm2, %v7693_v57, %v5244_v28  ;;  %vm5832_vm15 = vcmp.eq.s32.totalorder %v11020_v48, 31  ;;  %v5963_v34 = vadd.f32 %v3803_v37, %v2755_v45  ;;  %v6219_v37 = vld [vmem:[%s7432_s28 + $0x100] sm:$0xff] }
 0x349   : > { %v5506_v31 = vsel %vm5439_vm8, %v7696_v58, %v5375_v27  ;;  %vm1772_vm4 = vcmp.eq.s32.totalorder %v11037_v25, 0  ;;  %vm1903_vm12 = vcmp.eq.s32.totalorder %v11037_v25, 4  ;;  %vm2034_vm6 = vcmp.eq.s32.totalorder %v11037_v25, 8 }
 0x34a   : > { %v5637_v8 = vsel %vm5570_vm5, %v7699_v0, %v5506_v31  ;;  %v6027_v44 = vadd.f32 %v5963_v34, %v4851_v18  ;;  %v1839_v54 = vsel %vm1772_vm4, %v7527_v35, 0.0  ;;  %vm2165_vm3 = vcmp.eq.s32.totalorder %v11037_v25, 12 }
 0x34b   : > { %v5768_v62 = vsel %vm5701_vm0, %v7705_v9, %v5637_v8  ;;  %v1970_v48 = vsel %vm1903_vm12, %v7539_v38, %v1839_v54  ;;  %vm2296_vm14 = vcmp.eq.s32.totalorder %v11037_v25, 16  ;;  %vm2427_vm11 = vcmp.eq.s32.totalorder %v11037_v25, 20 }
 0x34c   : > { %v5899_v45 = vsel %vm5832_vm15, %v7714_v11, %v5768_v62  ;;  %v2101_v39 = vsel %vm2034_vm6, %v7548_v42, %v1970_v48  ;;  %vm2558_vm13 = vcmp.eq.s32.totalorder %v11037_v25, 24  ;;  %vm2689_vm1 = vcmp.eq.s32.totalorder %v11037_v25, 28 }
 0x34d   : > { %v11117_v20 = vadd.f32 %v6027_v44, %v5899_v45  ;;  %v2232_v5 = vsel %vm2165_vm3, %v7551_v43, %v2101_v39  ;;  %vm2820_vm9 = vcmp.eq.s32.totalorder %v11037_v25, 1  ;;  %vm2951_vm10 = vcmp.eq.s32.totalorder %v11037_v25, 5 }
 0x34e   : > { %v2363_v28 = vsel %vm2296_vm14, %v7558_v46, %v2232_v5  ;;  %v2887_v18 = vsel %vm2820_vm9, %v7584_v56, 0.0  ;;  %vm3082_vm7 = vcmp.eq.s32.totalorder %v11037_v25, 9  ;;  %vm3213_vm2 = vcmp.eq.s32.totalorder %v11037_v25, 13 }
 0x34f   : > { %14368 = vst [vmem:[#allocation22_spill] sm:$0xff] %v11117_v20  ;;  %v6411_v27 = vadd.f32 %v6219_v37, %v11117_v20  ;;  %v2494_v34 = vsel %vm2427_vm11, %v7561_v47, %v2363_v28  ;;  %v3018_v31 = vsel %vm2951_vm10, %v7589_v60, %v2887_v18  ;;  %vm3344_vm8 = vcmp.eq.s32.totalorder %v11037_v25, 17 }
 0x350   : > { %v2625_v8 = vsel %vm2558_vm13, %v7572_v51, %v2494_v34  ;;  %v3149_v44 = vsel %vm3082_vm7, %v7592_v61, %v3018_v31  ;;  %vm3475_vm5 = vcmp.eq.s32.totalorder %v11037_v25, 21  ;;  %vm3606_vm0 = vcmp.eq.s32.totalorder %v11037_v25, 25 }
 0x351   : > { %6539 = vst [vmem:[%s7867_s27 + $0x100] sm:$0xff] %v6411_v27  ;;  %v2756_v54 = vsel %vm2689_vm1, %v7581_v55, %v2625_v8  ;;  %v3280_v62 = vsel %vm3213_vm2, %v7599_v3, %v3149_v44  ;;  %vm3737_vm15 = vcmp.eq.s32.totalorder %v11037_v25, 29  ;;  %vm3868_vm4 = vcmp.eq.s32.totalorder %v11037_v25, 2 }
 0x352   : > { %v3411_v48 = vsel %vm3344_vm8, %v7605_v6, %v3280_v62  ;;  %v3935_v45 = vsel %vm3868_vm4, %v7631_v21, 0.0  ;;  %vm3999_vm12 = vcmp.eq.s32.totalorder %v11037_v25, 6  ;;  %vm4130_vm6 = vcmp.eq.s32.totalorder %v11037_v25, 10 }
 0x353   : > { %v3542_v37 = vsel %vm3475_vm5, %v7616_v12, %v3411_v48  ;;  %v4066_v39 = vsel %vm3999_vm12, %v7640_v24, %v3935_v45  ;;  %vm4261_vm3 = vcmp.eq.s32.totalorder %v11037_v25, 14  ;;  %vm4392_vm14 = vcmp.eq.s32.totalorder %v11037_v25, 18 }
 0x354   : > { %v3673_v5 = vsel %vm3606_vm0, %v7622_v15, %v3542_v37  ;;  %v4197_v28 = vsel %vm4130_vm6, %v7650_v32, %v4066_v39  ;;  %vm4523_vm11 = vcmp.eq.s32.totalorder %v11037_v25, 22  ;;  %vm4654_vm13 = vcmp.eq.s32.totalorder %v11037_v25, 26 }
 0x355   : > { %v3804_v18 = vsel %vm3737_vm15, %v7625_v16, %v3673_v5  ;;  %v4328_v27 = vsel %vm4261_vm3, %v7656_v40, %v4197_v28  ;;  %vm4785_vm1 = vcmp.eq.s32.totalorder %v11037_v25, 30  ;;  %vm4916_vm9 = vcmp.eq.s32.totalorder %v11037_v25, 3 }
 0x356   : > { %v4459_v34 = vsel %vm4392_vm14, %v7663_v52, %v4328_v27  ;;  %v4983_v31 = vsel %vm4916_vm9, %v7679_v14, 0.0  ;;  %vm5047_vm10 = vcmp.eq.s32.totalorder %v11037_v25, 7  ;;  %vm5178_vm7 = vcmp.eq.s32.totalorder %v11037_v25, 11 }
 0x357   : > { %v4590_v8 = vsel %vm4523_vm11, %v7666_v53, %v4459_v34  ;;  %v5114_v44 = vsel %vm5047_vm10, %v7684_v23, %v4983_v31  ;;  %vm5309_vm2 = vcmp.eq.s32.totalorder %v11037_v25, 15  ;;  %vm5440_vm8 = vcmp.eq.s32.totalorder %v11037_v25, 19 }
 0x358   : > { %v4721_v62 = vsel %vm4654_vm13, %v7671_v59, %v4590_v8  ;;  %v5245_v48 = vsel %vm5178_vm7, %v7688_v26, %v5114_v44  ;;  %vm5571_vm5 = vcmp.eq.s32.totalorder %v11037_v25, 23  ;;  %v941_v45 = vcvt.s32.f32 %v365_v29 }
 0x359   : > { %v4852_v37 = vsel %vm4785_vm1, %v7674_v63, %v4721_v62  ;;  %v5376_v39 = vsel %vm5309_vm2, %v7693_v57, %v5245_v48  ;;  %vm5702_vm0 = vcmp.eq.s32.totalorder %v11037_v25, 27  ;;  %v5964_v5 = vadd.f32 %v3804_v18, %v2756_v54 }
 0x35a   : > { %v5507_v28 = vsel %vm5440_vm8, %v7696_v58, %v5376_v39  ;;  %vm5833_vm15 = vcmp.eq.s32.totalorder %v11037_v25, 31  ;;  %v1105_v27 = vmul.f32 0.6931472, %v11064_v10  ;;  %v1325_v34 = vadd.f32 0.0001, %v11022_v2  ;;  %v6220_v25 = vld [vmem:[%s7432_s28 + $0x108] sm:$0xff] }
 0x35b   : > { %v5638_v31 = vsel %vm5571_vm5, %v7699_v0, %v5507_v28  ;;  %v6028_v7 = vadd.f32 %v5964_v5, %v4852_v37  ;;  %vm428_vm4 = vcmp.lt.s32.totalorder %v10730_v17, 0  ;;  %vm851_vm12 = vcmp.gt.s32.totalorder %v11025_v19, 1 }
 0x35c   : > { %v5769_v29 = vsel %vm5702_vm0, %v7705_v9, %v5638_v31  ;;  %v1198_v8 = vmul.f32 0.36067376, %v1105_v27  ;;  %v6921_v44 = vtrunc.f32 %v1325_v34  ;;  %v852_v54 = vsel %vm851_vm12, %v11025_v19, 1 }
 0x35d   : > { %v5900_v18 = vsel %vm5833_vm15, %v7714_v11, %v5769_v29  ;;  %v942_v62 = vcvt.s32.f32 %v852_v54  ;;  %v1006_v10 = vmul.f32 0.125, %v941_v45  ;;  %v276_v2 = vadd.s32 152, %v7441_v1 }
 0x35e   : > { %v11186_v48 = vadd.f32 %v6028_v7, %v5900_v18  ;;  %v492_v17 = vsel %vm428_vm4, 1, %v14327_v13  ;;  %v1262_v37 = vmul.f32 8.0, %v1198_v8  ;;  %v6922_v39 = vcvt.f32.s32 %v6921_v44 }
 0x35f   : > { %v1007_v5 = vmul.f32 0.125, %v942_v62  ;;  %v367_v28 = vsub.s32 %v276_v2, %v14367_v30  ;;  %v11191_v27 = vsub.s32 %v276_v2, %v7449_v4  ;;  %v11194_v34 = vadd.s32 160, %v7441_v1 }
 0x360   : > { %14369 = vst [vmem:[#allocation55_spill] sm:$0xff] %v11186_v48  ;;  %v6412_v45 = vadd.f32 %v6220_v25, %v11186_v48  ;;  %v1326_v31 = vadd.f32 0.0001, %v1262_v37  ;;  %v1453_v29 = vadd.s32 8, %v6922_v39  ;;  %v556_v54 = vmul.u32 16, %v492_v17 }
 0x361   : > { %vm748_vm6 = vcmp.lt.s32.totalorder %v10848_v22, 8  ;;  %7148 = vlog2.f32 %v1006_v10  ;;  %v663_v7 = vsub.s32 0, %v11191_v27  ;;  %v11207_v25 = vcvt.s32.f32 %v367_v28 }
 0x362   : > { %6540 = vst [vmem:[%s7867_s27 + $0x108] sm:$0xff] %v6412_v45  ;;  %v6923_v8 = vtrunc.f32 %v1326_v31  ;;  %vm1551_vm3 = vcmp.lt.s32.totalorder %v1453_v29, 15  ;;  %7150 = vlog2.f32 %v1007_v5  ;;  %v11211_v2 = vsub.s32 %v11194_v34, %v7449_v4 }
 0x363   : > { %v11202_v18 = vsel %vm1551_vm3, %v1453_v29, 15  ;;  %v11205_v62 = vmin.u32 %v663_v7, %v11191_v27 }
 0x364   : > { %v6924_v10 = vcvt.f32.s32 %v6923_v8  ;;  %vm1773_vm14 = vcmp.eq.s32.totalorder %v11202_v18, 0  ;;  %vm1904_vm11 = vcmp.eq.s32.totalorder %v11202_v18, 4  ;;  %vm2035_vm13 = vcmp.eq.s32.totalorder %v11202_v18, 8 }
 0x365   : > { %v1840_v17 = vsel %vm1773_vm14, %v7527_v35, 0.0  ;;  %vm2166_vm1 = vcmp.eq.s32.totalorder %v11202_v18, 12  ;;  %vm2297_vm9 = vcmp.eq.s32.totalorder %v11202_v18, 16  ;;  %vm2428_vm10 = vcmp.eq.s32.totalorder %v11202_v18, 20 }
 0x366   : > { %v1454_v37 = vadd.s32 8, %v6924_v10  ;;  %v1971_v39 = vsel %vm1904_vm11, %v7539_v38, %v1840_v17  ;;  %vm2559_vm7 = vcmp.eq.s32.totalorder %v11202_v18, 24  ;;  %vm2690_vm2 = vcmp.eq.s32.totalorder %v11202_v18, 28 }
 0x367   : > { %v2102_v5 = vsel %vm2035_vm13, %v7548_v42, %v1971_v39  ;;  %vm2821_vm8 = vcmp.eq.s32.totalorder %v11202_v18, 1  ;;  %vm2952_vm5 = vcmp.eq.s32.totalorder %v11202_v18, 5  ;;  %vm3083_vm0 = vcmp.eq.s32.totalorder %v11202_v18, 9 }
 0x368   : > { %vm1553_vm15 = vcmp.lt.s32.totalorder %v1454_v37, 15  ;;  %v2233_v28 = vsel %vm2166_vm1, %v7551_v43, %v2102_v5  ;;  %v2888_v45 = vsel %vm2821_vm8, %v7584_v56, 0.0  ;;  %vm3214_vm4 = vcmp.eq.s32.totalorder %v11202_v18, 13 }
 0x369   : > { %v1554_v31 = vsel %vm1553_vm15, %v1454_v37, 15  ;;  %v2364_v29 = vsel %vm2297_vm9, %v7558_v46, %v2233_v28  ;;  %v3019_v7 = vsel %vm2952_vm5, %v7589_v60, %v2888_v45  ;;  %vm3345_vm12 = vcmp.eq.s32.totalorder %v11202_v18, 17 }
 0x36a   : > { %v1646_v8 = vsel %vm748_vm6, %v10848_v22, %v1554_v31  ;;  %v2495_v10 = vsel %vm2428_vm10, %v7561_v47, %v2364_v29  ;;  %v3150_v17 = vsel %vm3083_vm0, %v7592_v61, %v3019_v7  ;;  %vm3476_vm3 = vcmp.eq.s32.totalorder %v11202_v18, 21 }
 0x36b   : > { %v11241_v39 = vpop.eup %7148  ;;  %v11243_v37 = vadd.s32 %v1646_v8, %v556_v54  ;;  %v2626_v5 = vsel %vm2559_vm7, %v7572_v51, %v2495_v10  ;;  %v3281_v28 = vsel %vm3214_vm4, %v7599_v3, %v3150_v17  ;;  %vm3607_vm6 = vcmp.eq.s32.totalorder %v11202_v18, 25 }
 0x36c   : > { %v11250_v22 = vpop.eup %7150  ;;  %v2757_v45 = vsel %vm2690_vm2, %v7581_v55, %v2626_v5  ;;  %v3412_v31 = vsel %vm3345_vm12, %v7605_v6, %v3281_v28  ;;  %vm3738_vm14 = vcmp.eq.s32.totalorder %v11202_v18, 29  ;;  %vm3869_vm11 = vcmp.eq.s32.totalorder %v11202_v18, 2 }
 0x36d   : > { %v3543_v54 = vsel %vm3476_vm3, %v7616_v12, %v3412_v31  ;;  %v3936_v29 = vsel %vm3869_vm11, %v7631_v21, 0.0  ;;  %vm4000_vm13 = vcmp.eq.s32.totalorder %v11202_v18, 6  ;;  %vm4131_vm1 = vcmp.eq.s32.totalorder %v11202_v18, 10 }
 0x36e   : > { %v3674_v7 = vsel %vm3607_vm6, %v7622_v15, %v3543_v54  ;;  %v4067_v8 = vsel %vm4000_vm13, %v7640_v24, %v3936_v29  ;;  %vm4262_vm9 = vcmp.eq.s32.totalorder %v11202_v18, 14  ;;  %vm4393_vm10 = vcmp.eq.s32.totalorder %v11202_v18, 18 }
 0x36f   : > { %v3805_v10 = vsel %vm3738_vm14, %v7625_v16, %v3674_v7  ;;  %v4198_v17 = vsel %vm4131_vm1, %v7650_v32, %v4067_v8  ;;  %vm4524_vm7 = vcmp.eq.s32.totalorder %v11202_v18, 22  ;;  %vm4655_vm2 = vcmp.eq.s32.totalorder %v11202_v18, 26 }
 0x370   : > { %v4329_v5 = vsel %vm4262_vm9, %v7656_v40, %v4198_v17  ;;  %vm4786_vm8 = vcmp.eq.s32.totalorder %v11202_v18, 30  ;;  %vm4917_vm5 = vcmp.eq.s32.totalorder %v11202_v18, 3  ;;  %vm5048_vm0 = vcmp.eq.s32.totalorder %v11202_v18, 7 }
 0x371   : > { %v4460_v28 = vsel %vm4393_vm10, %v7663_v52, %v4329_v5  ;;  %v4984_v31 = vsel %vm4917_vm5, %v7679_v14, 0.0  ;;  %vm5179_vm15 = vcmp.eq.s32.totalorder %v11202_v18, 11  ;;  %vm5310_vm4 = vcmp.eq.s32.totalorder %v11202_v18, 15 }
 0x372   : > { %v4591_v54 = vsel %vm4524_vm7, %v7666_v53, %v4460_v28  ;;  %v5115_v29 = vsel %vm5048_vm0, %v7684_v23, %v4984_v31  ;;  %vm5441_vm12 = vcmp.eq.s32.totalorder %v11202_v18, 19  ;;  %vm5572_vm3 = vcmp.eq.s32.totalorder %v11202_v18, 23 }
 0x373   : > { %v4722_v7 = vsel %vm4655_vm2, %v7671_v59, %v4591_v54  ;;  %v5246_v8 = vsel %vm5179_vm15, %v7688_v26, %v5115_v29  ;;  %vm5703_vm6 = vcmp.eq.s32.totalorder %v11202_v18, 27  ;;  %vm5834_vm14 = vcmp.eq.s32.totalorder %v11202_v18, 31 }
 0x374   : > { %v4853_v17 = vsel %vm4786_vm8, %v7674_v63, %v4722_v7  ;;  %v5377_v5 = vsel %vm5310_vm4, %v7693_v57, %v5246_v8  ;;  %v5965_v28 = vadd.f32 %v3805_v10, %v2757_v45  ;;  %vm1774_vm11 = vcmp.eq.s32.totalorder %v11243_v37, 0  ;;  %v6221_v8 = vld [vmem:[%s7432_s28 + $0x110] sm:$0xff] }
 0x375   : > { %v5508_v31 = vsel %vm5441_vm12, %v7696_v58, %v5377_v5  ;;  %v1841_v44 = vsel %vm1774_vm11, %v7527_v35, 0.0  ;;  %vm1905_vm13 = vcmp.eq.s32.totalorder %v11243_v37, 4  ;;  %vm2036_vm1 = vcmp.eq.s32.totalorder %v11243_v37, 8 }
 0x376   : > { %v5639_v54 = vsel %vm5572_vm3, %v7699_v0, %v5508_v31  ;;  %v6029_v29 = vadd.f32 %v5965_v28, %v4853_v17  ;;  %v1972_v48 = vsel %vm1905_vm13, %v7539_v38, %v1841_v44  ;;  %vm2167_vm9 = vcmp.eq.s32.totalorder %v11243_v37, 12 }
 0x377   : > { %v5770_v7 = vsel %vm5703_vm6, %v7705_v9, %v5639_v54  ;;  %v2103_v45 = vsel %vm2036_vm1, %v7548_v42, %v1972_v48  ;;  %vm2298_vm10 = vcmp.eq.s32.totalorder %v11243_v37, 16  ;;  %vm2429_vm7 = vcmp.eq.s32.totalorder %v11243_v37, 20 }
 0x378   : > { %v5901_v10 = vsel %vm5834_vm14, %v7714_v11, %v5770_v7  ;;  %v2234_v5 = vsel %vm2167_vm9, %v7551_v43, %v2103_v45  ;;  %vm2560_vm2 = vcmp.eq.s32.totalorder %v11243_v37, 24  ;;  %vm2691_vm8 = vcmp.eq.s32.totalorder %v11243_v37, 28 }
 0x379   : > { %v11307_v44 = vadd.f32 %v6029_v29, %v5901_v10  ;;  %v2365_v48 = vsel %vm2298_vm10, %v7558_v46, %v2234_v5  ;;  %vm2822_vm5 = vcmp.eq.s32.totalorder %v11243_v37, 1  ;;  %vm2953_vm0 = vcmp.eq.s32.totalorder %v11243_v37, 5 }
 0x37a   : > { %v2496_v17 = vsel %vm2429_vm7, %v7561_v47, %v2365_v48  ;;  %v2889_v18 = vsel %vm2822_vm5, %v7584_v56, 0.0  ;;  %vm3084_vm15 = vcmp.eq.s32.totalorder %v11243_v37, 9  ;;  %vm3215_vm4 = vcmp.eq.s32.totalorder %v11243_v37, 13 }
 0x37b   : > { %14370 = vst [vmem:[#allocation56_spill] sm:$0xff] %v11307_v44  ;;  %v6413_v28 = vadd.f32 %v6221_v8, %v11307_v44  ;;  %v2627_v31 = vsel %vm2560_vm2, %v7572_v51, %v2496_v17  ;;  %v3020_v54 = vsel %vm2953_vm0, %v7589_v60, %v2889_v18  ;;  %vm3346_vm12 = vcmp.eq.s32.totalorder %v11243_v37, 17 }
 0x37c   : > { %v2758_v29 = vsel %vm2691_vm8, %v7581_v55, %v2627_v31  ;;  %v3151_v7 = vsel %vm3084_vm15, %v7592_v61, %v3020_v54  ;;  %vm3477_vm3 = vcmp.eq.s32.totalorder %v11243_v37, 21  ;;  %vm3608_vm6 = vcmp.eq.s32.totalorder %v11243_v37, 25 }
 0x37d   : > { %6541 = vst [vmem:[%s7867_s27 + $0x110] sm:$0xff] %v6413_v28  ;;  %v3282_v45 = vsel %vm3215_vm4, %v7599_v3, %v3151_v7  ;;  %vm3739_vm14 = vcmp.eq.s32.totalorder %v11243_v37, 29  ;;  %vm3870_vm11 = vcmp.eq.s32.totalorder %v11243_v37, 2  ;;  %vm4001_vm13 = vcmp.eq.s32.totalorder %v11243_v37, 6 }
 0x37e   : > { %v3413_v10 = vsel %vm3346_vm12, %v7605_v6, %v3282_v45  ;;  %v3937_v8 = vsel %vm3870_vm11, %v7631_v21, 0.0  ;;  %vm4132_vm1 = vcmp.eq.s32.totalorder %v11243_v37, 10  ;;  %vm4263_vm9 = vcmp.eq.s32.totalorder %v11243_v37, 14 }
 0x37f   : > { %v3544_v5 = vsel %vm3477_vm3, %v7616_v12, %v3413_v10  ;;  %v4068_v48 = vsel %vm4001_vm13, %v7640_v24, %v3937_v8  ;;  %vm4394_vm10 = vcmp.eq.s32.totalorder %v11243_v37, 18  ;;  %vm4525_vm7 = vcmp.eq.s32.totalorder %v11243_v37, 22 }
 0x380   : > { %v3675_v17 = vsel %vm3608_vm6, %v7622_v15, %v3544_v5  ;;  %v4199_v18 = vsel %vm4132_vm1, %v7650_v32, %v4068_v48  ;;  %vm4656_vm2 = vcmp.eq.s32.totalorder %v11243_v37, 26  ;;  %vm4787_vm8 = vcmp.eq.s32.totalorder %v11243_v37, 30 }
 0x381   : > { %v3806_v28 = vsel %vm3739_vm14, %v7625_v16, %v3675_v17  ;;  %v4330_v31 = vsel %vm4263_vm9, %v7656_v40, %v4199_v18  ;;  %vm4918_vm5 = vcmp.eq.s32.totalorder %v11243_v37, 3  ;;  %vm5049_vm0 = vcmp.eq.s32.totalorder %v11243_v37, 7 }
 0x382   : > { %v4461_v54 = vsel %vm4394_vm10, %v7663_v52, %v4330_v31  ;;  %v4985_v7 = vsel %vm4918_vm5, %v7679_v14, 0.0  ;;  %vm5180_vm15 = vcmp.eq.s32.totalorder %v11243_v37, 11  ;;  %vm5311_vm4 = vcmp.eq.s32.totalorder %v11243_v37, 15 }
 0x383   : > { %v4592_v45 = vsel %vm4525_vm7, %v7666_v53, %v4461_v54  ;;  %v5116_v10 = vsel %vm5049_vm0, %v7684_v23, %v4985_v7  ;;  %vm5442_vm12 = vcmp.eq.s32.totalorder %v11243_v37, 19  ;;  %v1008_v8 = vmul.f32 0.125, %v11207_v25 }
 0x384   : > { %v4723_v5 = vsel %vm4656_vm2, %v7671_v59, %v4592_v45  ;;  %v5247_v48 = vsel %vm5180_vm15, %v7688_v26, %v5116_v10  ;;  %vm5573_vm3 = vcmp.eq.s32.totalorder %v11243_v37, 23  ;;  %vm5704_vm6 = vcmp.eq.s32.totalorder %v11243_v37, 27 }
 0x385   : > { %v4854_v17 = vsel %vm4787_vm8, %v7674_v63, %v4723_v5  ;;  %v5378_v18 = vsel %vm5311_vm4, %v7693_v57, %v5247_v48  ;;  %v5966_v31 = vadd.f32 %v3806_v28, %v2758_v29  ;;  %v1107_v54 = vmul.f32 0.6931472, %v11241_v39  ;;  %v6222_v29 = vld [vmem:[%s7432_s28 + $0x118] sm:$0xff] }
 0x386   : > { %v5509_v25 = vsel %vm5442_vm12, %v7696_v58, %v5378_v18  ;;  %vm5835_vm14 = vcmp.eq.s32.totalorder %v11243_v37, 31  ;;  %v1109_v7 = vmul.f32 0.6931472, %v11250_v22  ;;  %vm855_vm11 = vcmp.gt.s32.totalorder %v11205_v62, 1 }
 0x387   : > { %v5640_v45 = vsel %vm5573_vm3, %v7699_v0, %v5509_v25  ;;  %v6030_v10 = vadd.f32 %v5966_v31, %v4854_v17  ;;  %v1199_v44 = vmul.f32 0.36067376, %v1107_v54  ;;  %v856_v5 = vsel %vm855_vm11, %v11205_v62, 1 }
 0x388   : > { %v5771_v20 = vsel %vm5704_vm6, %v7705_v9, %v5640_v45  ;;  %v1200_v48 = vmul.f32 0.36067376, %v1109_v7  ;;  %7152 = vlog2.f32 %v1008_v8  ;;  %v944_v18 = vcvt.s32.f32 %v856_v5 }
 0x389   : > { %v5902_v39 = vsel %vm5835_vm14, %v7714_v11, %v5771_v20  ;;  %v1263_v28 = vmul.f32 8.0, %v1199_v44  ;;  %v667_v37 = vsub.s32 0, %v11211_v2  ;;  %vm430_vm13 = vcmp.lt.s32.totalorder %v11009_v36, 0 }
 0x38a   : > { %v11372_v22 = vadd.f32 %v6030_v10, %v5902_v39  ;;  %v1264_v17 = vmul.f32 8.0, %v1200_v48  ;;  %v14372_v8 = vsub.s32 %v11194_v34, %v14367_v30  ;;  %vm432_vm1 = vcmp.lt.s32.totalorder %v11191_v27, 0 }
 0x38b   : > { %v1327_v31 = vadd.f32 0.0001, %v1263_v28  ;;  %v11376_v54 = vmin.u32 %v667_v37, %v11211_v2  ;;  %v278_v7 = vadd.s32 168, %v7441_v1  ;;  %v494_v45 = vsel %vm430_vm13, 1, %v14327_v13 }
 0x38c   : > { %14371 = vst [vmem:[#allocation57_spill] sm:$0xff] %v11372_v22  ;;  %v945_v25 = vcvt.s32.f32 %v14372_v8  ;;  %v6414_v20 = vadd.f32 %v6222_v29, %v11372_v22  ;;  %v1328_v44 = vadd.f32 0.0001, %v1264_v17  ;;  %v1009_v36 = vmul.f32 0.125, %v944_v18 }
 0x38d   : > { %v6925_v10 = vtrunc.f32 %v1327_v31  ;;  %vm859_vm9 = vcmp.gt.s32.totalorder %v11376_v54, 1  ;;  %v11389_v34 = vsub.s32 %v278_v7, %v7449_v4  ;;  %v11392_v28 = vsel %vm432_vm1, 1, %v14327_v13 }
 0x38e   : > { %6542 = vst [vmem:[%s7867_s27 + $0x118] sm:$0xff] %v6414_v20  ;;  %v6927_v5 = vtrunc.f32 %v1328_v44  ;;  %v860_v48 = vsel %vm859_vm9, %v11376_v54, 1  ;;  %v1010_v39 = vmul.f32 0.125, %v945_v25  ;;  %v371_v37 = vsub.s32 %v278_v7, %v14367_v30 }
 0x38f   : > { %v6926_v29 = vcvt.f32.s32 %v6925_v10  ;;  %v946_v27 = vcvt.s32.f32 %v860_v48  ;;  %v671_v18 = vsub.s32 0, %v11389_v34  ;;  %v11397_v31 = vadd.s32 176, %v7441_v1 }
 0x390   : > { %v6928_v17 = vcvt.f32.s32 %v6927_v5  ;;  %v558_v8 = vmul.u32 16, %v494_v45  ;;  %7154 = vlog2.f32 %v1009_v36  ;;  %vm750_vm10 = vcmp.lt.s32.totalorder %v11025_v19, 8 }
 0x391   : > { %v1455_v20 = vadd.s32 8, %v6926_v29  ;;  %v1011_v25 = vmul.f32 0.125, %v946_v27  ;;  %7156 = vlog2.f32 %v1010_v39  ;;  %v11404_v7 = vmin.u32 %v671_v18, %v11389_v34 }
 0x392   : > { %v7153_v44 = vpop.eup %7152  ;;  %v1456_v10 = vadd.s32 8, %v6928_v17  ;;  %v11406_v5 = vcvt.s32.f32 %v371_v37  ;;  %v11412_v45 = vsub.s32 %v11397_v31, %v7449_v4 }
 0x393   : > { %vm1555_vm7 = vcmp.lt.s32.totalorder %v1455_v20, 15  ;;  %v11401_v48 = vmul.f32 0.6931472, %v7153_v44  ;;  %14373 = vst [vmem:[#allocation58_spill] sm:$0xff] %v11404_v7  ;;  %7158 = vlog2.f32 %v1011_v25 }
 0x394   : > { %v11408_v41 = vsel %vm1555_vm7, %v1455_v20, 15  ;;  %vm1557_vm2 = vcmp.lt.s32.totalorder %v1456_v10, 15 }
 0x395   : > { %v1558_v36 = vsel %vm1557_vm2, %v1456_v10, 15  ;;  %vm1775_vm8 = vcmp.eq.s32.totalorder %v11408_v41, 0  ;;  %vm1906_vm5 = vcmp.eq.s32.totalorder %v11408_v41, 4  ;;  %vm2037_vm0 = vcmp.eq.s32.totalorder %v11408_v41, 8 }
 0x396   : > { %v1648_v39 = vsel %vm750_vm10, %v11025_v19, %v1558_v36  ;;  %v1842_v29 = vsel %vm1775_vm8, %v7527_v35, 0.0  ;;  %vm2168_vm15 = vcmp.eq.s32.totalorder %v11408_v41, 12  ;;  %vm2299_vm4 = vcmp.eq.s32.totalorder %v11408_v41, 16 }
 0x397   : > { %v11423_v27 = vadd.s32 %v1648_v39, %v558_v8  ;;  %v1973_v37 = vsel %vm1906_vm5, %v7539_v38, %v1842_v29  ;;  %vm2430_vm12 = vcmp.eq.s32.totalorder %v11408_v41, 20  ;;  %vm2561_vm3 = vcmp.eq.s32.totalorder %v11408_v41, 24 }
 0x398   : > { %v2104_v17 = vsel %vm2037_vm0, %v7548_v42, %v1973_v37  ;;  %vm2692_vm6 = vcmp.eq.s32.totalorder %v11408_v41, 28  ;;  %vm2823_vm14 = vcmp.eq.s32.totalorder %v11408_v41, 1  ;;  %vm2954_vm11 = vcmp.eq.s32.totalorder %v11408_v41, 5 }
 0x399   : > { %v2235_v19 = vsel %vm2168_vm15, %v7551_v43, %v2104_v17  ;;  %v2890_v18 = vsel %vm2823_vm14, %v7584_v56, 0.0  ;;  %vm3085_vm13 = vcmp.eq.s32.totalorder %v11408_v41, 9  ;;  %vm3216_vm1 = vcmp.eq.s32.totalorder %v11408_v41, 13 }
 0x39a   : > { %v2366_v8 = vsel %vm2299_vm4, %v7558_v46, %v2235_v19  ;;  %v3021_v20 = vsel %vm2954_vm11, %v7589_v60, %v2890_v18  ;;  %vm3347_vm9 = vcmp.eq.s32.totalorder %v11408_v41, 17  ;;  %vm3478_vm10 = vcmp.eq.s32.totalorder %v11408_v41, 21  ;;  %v11440_v25 = vpop.eup %7154 }
 0x39b   : > { %v2497_v44 = vsel %vm2430_vm12, %v7561_v47, %v2366_v8  ;;  %v3152_v10 = vsel %vm3085_vm13, %v7592_v61, %v3021_v20  ;;  %vm3609_vm7 = vcmp.eq.s32.totalorder %v11408_v41, 25  ;;  %vm3740_vm2 = vcmp.eq.s32.totalorder %v11408_v41, 29  ;;  %v11446_v36 = vpop.eup %7156 }
 0x39c   : > { %v2628_v39 = vsel %vm2561_vm3, %v7572_v51, %v2497_v44  ;;  %v3283_v29 = vsel %vm3216_vm1, %v7599_v3, %v3152_v10  ;;  %vm3871_vm8 = vcmp.eq.s32.totalorder %v11408_v41, 2  ;;  %vm4002_vm5 = vcmp.eq.s32.totalorder %v11408_v41, 6 }
 0x39d   : > { %v2759_v37 = vsel %vm2692_vm6, %v7581_v55, %v2628_v39  ;;  %v3414_v17 = vsel %vm3347_vm9, %v7605_v6, %v3283_v29  ;;  %v3938_v19 = vsel %vm3871_vm8, %v7631_v21, 0.0  ;;  %vm4133_vm0 = vcmp.eq.s32.totalorder %v11408_v41, 10  ;;  %v11460_v18 = vpop.eup %7158 }
 0x39e   : > { %v3545_v8 = vsel %vm3478_vm10, %v7616_v12, %v3414_v17  ;;  %v4069_v20 = vsel %vm4002_vm5, %v7640_v24, %v3938_v19  ;;  %vm4264_vm15 = vcmp.eq.s32.totalorder %v11408_v41, 14  ;;  %vm4395_vm4 = vcmp.eq.s32.totalorder %v11408_v41, 18 }
 0x39f   : > { %v3676_v44 = vsel %vm3609_vm7, %v7622_v15, %v3545_v8  ;;  %v4200_v10 = vsel %vm4133_vm0, %v7650_v32, %v4069_v20  ;;  %vm4526_vm12 = vcmp.eq.s32.totalorder %v11408_v41, 22  ;;  %vm4657_vm3 = vcmp.eq.s32.totalorder %v11408_v41, 26 }
 0x3a0   : > { %v3807_v39 = vsel %vm3740_vm2, %v7625_v16, %v3676_v44  ;;  %v4331_v29 = vsel %vm4264_vm15, %v7656_v40, %v4200_v10  ;;  %vm4788_vm6 = vcmp.eq.s32.totalorder %v11408_v41, 30  ;;  %vm4919_vm14 = vcmp.eq.s32.totalorder %v11408_v41, 3 }
 0x3a1   : > { %v4462_v17 = vsel %vm4395_vm4, %v7663_v52, %v4331_v29  ;;  %v4986_v19 = vsel %vm4919_vm14, %v7679_v14, 0.0  ;;  %vm5050_vm11 = vcmp.eq.s32.totalorder %v11408_v41, 7  ;;  %vm5181_vm13 = vcmp.eq.s32.totalorder %v11408_v41, 11 }
 0x3a2   : > { %v4593_v8 = vsel %vm4526_vm12, %v7666_v53, %v4462_v17  ;;  %v5117_v20 = vsel %vm5050_vm11, %v7684_v23, %v4986_v19  ;;  %vm5312_vm1 = vcmp.eq.s32.totalorder %v11408_v41, 15  ;;  %vm5443_vm9 = vcmp.eq.s32.totalorder %v11408_v41, 19 }
 0x3a3   : > { %v4724_v44 = vsel %vm4657_vm3, %v7671_v59, %v4593_v8  ;;  %v5248_v10 = vsel %vm5181_vm13, %v7688_v26, %v5117_v20  ;;  %vm5574_vm10 = vcmp.eq.s32.totalorder %v11408_v41, 23  ;;  %vm5705_vm7 = vcmp.eq.s32.totalorder %v11408_v41, 27 }
 0x3a4   : > { %v4855_v29 = vsel %vm4788_vm6, %v7674_v63, %v4724_v44  ;;  %v5379_v22 = vsel %vm5312_vm1, %v7693_v57, %v5248_v10  ;;  %vm5836_vm2 = vcmp.eq.s32.totalorder %v11408_v41, 31  ;;  %v5967_v17 = vadd.f32 %v3807_v39, %v2759_v37  ;;  %v6223_v37 = vld [vmem:[%s7432_s28 + $0x120] sm:$0xff] }
 0x3a5   : > { %v5510_v19 = vsel %vm5443_vm9, %v7696_v58, %v5379_v22  ;;  %vm1776_vm8 = vcmp.eq.s32.totalorder %v11423_v27, 0  ;;  %vm1907_vm5 = vcmp.eq.s32.totalorder %v11423_v27, 4  ;;  %vm2038_vm0 = vcmp.eq.s32.totalorder %v11423_v27, 8 }
 0x3a6   : > { %v5641_v8 = vsel %vm5574_vm10, %v7699_v0, %v5510_v19  ;;  %v6031_v20 = vadd.f32 %v5967_v17, %v4855_v29  ;;  %v1843_v49 = vsel %vm1776_vm8, %v7527_v35, 0.0  ;;  %vm2169_vm15 = vcmp.eq.s32.totalorder %v11423_v27, 12 }
 0x3a7   : > { %v5772_v44 = vsel %vm5705_vm7, %v7705_v9, %v5641_v8  ;;  %v1974_v41 = vsel %vm1907_vm5, %v7539_v38, %v1843_v49  ;;  %vm2300_vm4 = vcmp.eq.s32.totalorder %v11423_v27, 16  ;;  %vm2431_vm12 = vcmp.eq.s32.totalorder %v11423_v27, 20 }
 0x3a8   : > { %v5903_v22 = vsel %vm5836_vm2, %v7714_v11, %v5772_v44  ;;  %v2105_v39 = vsel %vm2038_vm0, %v7548_v42, %v1974_v41  ;;  %vm2562_vm3 = vcmp.eq.s32.totalorder %v11423_v27, 24  ;;  %vm2693_vm6 = vcmp.eq.s32.totalorder %v11423_v27, 28 }
 0x3a9   : > { %v11511_v10 = vadd.f32 %v6031_v20, %v5903_v22  ;;  %v2236_v29 = vsel %vm2169_vm15, %v7551_v43, %v2105_v39  ;;  %vm2824_vm14 = vcmp.eq.s32.totalorder %v11423_v27, 1  ;;  %vm2955_vm11 = vcmp.eq.s32.totalorder %v11423_v27, 5 }
 0x3aa   : > { %v2367_v49 = vsel %vm2300_vm4, %v7558_v46, %v2236_v29  ;;  %v2891_v17 = vsel %vm2824_vm14, %v7584_v56, 0.0  ;;  %vm3086_vm13 = vcmp.eq.s32.totalorder %v11423_v27, 9  ;;  %vm3217_vm1 = vcmp.eq.s32.totalorder %v11423_v27, 13 }
 0x3ab   : > { %14374 = vst [vmem:[#allocation59_spill] sm:$0xff] %v11511_v10  ;;  %v6415_v19 = vadd.f32 %v6223_v37, %v11511_v10  ;;  %v2498_v8 = vsel %vm2431_vm12, %v7561_v47, %v2367_v49  ;;  %v3022_v20 = vsel %vm2955_vm11, %v7589_v60, %v2891_v17  ;;  %vm3348_vm9 = vcmp.eq.s32.totalorder %v11423_v27, 17 }
 0x3ac   : > { %v2629_v44 = vsel %vm2562_vm3, %v7572_v51, %v2498_v8  ;;  %v3153_v41 = vsel %vm3086_vm13, %v7592_v61, %v3022_v20  ;;  %vm3479_vm10 = vcmp.eq.s32.totalorder %v11423_v27, 21  ;;  %vm3610_vm7 = vcmp.eq.s32.totalorder %v11423_v27, 25 }
 0x3ad   : > { %vm863_vm2 = vcmp.gt.s32.totalorder %v11404_v7, 1  ;;  %6543 = vst [vmem:[%s7867_s27 + $0x120] sm:$0xff] %v6415_v19  ;;  %v2760_v22 = vsel %vm2693_vm6, %v7581_v55, %v2629_v44  ;;  %v3284_v37 = vsel %vm3217_vm1, %v7599_v3, %v3153_v41  ;;  %vm3741_vm8 = vcmp.eq.s32.totalorder %v11423_v27, 29 }
 0x3ae   : > { %vm3872_vm5 = vcmp.eq.s32.totalorder %v11423_v27, 2  ;;  %v3415_v39 = vsel %vm3348_vm9, %v7605_v6, %v3284_v37  ;;  %vm4003_vm0 = vcmp.eq.s32.totalorder %v11423_v27, 6  ;;  %vm4134_vm15 = vcmp.eq.s32.totalorder %v11423_v27, 10 }
 0x3af   : > { %v3939_v29 = vsel %vm3872_vm5, %v7631_v21, 0.0  ;;  %vm434_vm4 = vcmp.lt.s32.totalorder %v11211_v2, 0  ;;  %v3546_v49 = vsel %vm3479_vm10, %v7616_v12, %v3415_v39  ;;  %vm4265_vm12 = vcmp.eq.s32.totalorder %v11423_v27, 14 }
 0x3b0   : > { %v4070_v17 = vsel %vm4003_vm0, %v7640_v24, %v3939_v29  ;;  %vm4396_vm3 = vcmp.eq.s32.totalorder %v11423_v27, 18  ;;  %v3677_v19 = vsel %vm3610_vm7, %v7622_v15, %v3546_v49  ;;  %vm4527_vm6 = vcmp.eq.s32.totalorder %v11423_v27, 22 }
 0x3b1   : > { %v4201_v8 = vsel %vm4134_vm15, %v7650_v32, %v4070_v17  ;;  %vm4658_vm14 = vcmp.eq.s32.totalorder %v11423_v27, 26  ;;  %v3808_v20 = vsel %vm3741_vm8, %v7625_v16, %v3677_v19  ;;  %vm4789_vm11 = vcmp.eq.s32.totalorder %v11423_v27, 30 }
 0x3b2   : > { %v4332_v44 = vsel %vm4265_vm12, %v7656_v40, %v4201_v8  ;;  %vm4920_vm13 = vcmp.eq.s32.totalorder %v11423_v27, 3  ;;  %vm5051_vm1 = vcmp.eq.s32.totalorder %v11423_v27, 7  ;;  %vm5182_vm9 = vcmp.eq.s32.totalorder %v11423_v27, 11 }
 0x3b3   : > { %v4463_v41 = vsel %vm4396_vm3, %v7663_v52, %v4332_v44  ;;  %v4987_v37 = vsel %vm4920_vm13, %v7679_v14, 0.0  ;;  %vm5313_vm10 = vcmp.eq.s32.totalorder %v11423_v27, 15  ;;  %vm5444_vm7 = vcmp.eq.s32.totalorder %v11423_v27, 19 }
 0x3b4   : > { %v4594_v39 = vsel %vm4527_vm6, %v7666_v53, %v4463_v41  ;;  %v5118_v29 = vsel %vm5051_vm1, %v7684_v23, %v4987_v37  ;;  %vm5575_vm8 = vcmp.eq.s32.totalorder %v11423_v27, 23  ;;  %vm5706_vm5 = vcmp.eq.s32.totalorder %v11423_v27, 27 }
 0x3b5   : > { %v4725_v49 = vsel %vm4658_vm14, %v7671_v59, %v4594_v39  ;;  %v5249_v17 = vsel %vm5182_vm9, %v7688_v26, %v5118_v29  ;;  %vm5837_vm0 = vcmp.eq.s32.totalorder %v11423_v27, 31  ;;  %v5968_v44 = vadd.f32 %v3808_v20, %v2760_v22 }
 0x3b6   : > { %v4856_v19 = vsel %vm4789_vm11, %v7674_v63, %v4725_v49  ;;  %v5380_v8 = vsel %vm5313_vm10, %v7693_v57, %v5249_v17  ;;  %v1113_v37 = vmul.f32 0.6931472, %v11440_v25  ;;  %v1201_v39 = vmul.f32 0.36067376, %v11401_v48 }
 0x3b7   : > { %v5511_v41 = vsel %vm5444_vm7, %v7696_v58, %v5380_v8  ;;  %v1115_v29 = vmul.f32 0.6931472, %v11446_v36  ;;  %v6032_v33 = vadd.f32 %v5968_v44, %v4856_v19  ;;  %v1117_v50 = vmul.f32 0.6931472, %v11460_v18  ;;  %v6224_v8 = vld [vmem:[%s7432_s28 + $0x128] sm:$0xff] }
 0x3b8   : > { %v5642_v10 = vsel %vm5575_vm8, %v7699_v0, %v5511_v41  ;;  %v864_v49 = vsel %vm863_vm2, %v11404_v7, 1  ;;  %v1202_v22 = vmul.f32 0.36067376, %v1113_v37  ;;  %v1265_v20 = vmul.f32 8.0, %v1201_v39 }
 0x3b9   : > { %v5773_v27 = vsel %vm5706_vm5, %v7705_v9, %v5642_v10  ;;  %v1203_v17 = vmul.f32 0.36067376, %v1115_v29  ;;  %v11585_v48 = vsel %vm434_vm4, 1, %v14327_v13  ;;  %v1204_v36 = vmul.f32 0.36067376, %v1117_v50 }
 0x3ba   : > { %v5904_v25 = vsel %vm5837_vm0, %v7714_v11, %v5773_v27  ;;  %v948_v19 = vcvt.s32.f32 %v864_v49  ;;  %v1266_v44 = vmul.f32 8.0, %v1202_v22  ;;  %v1329_v41 = vadd.f32 0.0001, %v1265_v20 }
 0x3bb   : > { %v11587_v18 = vadd.f32 %v6032_v33, %v5904_v25  ;;  %v1267_v7 = vmul.f32 8.0, %v1203_v17  ;;  %v1268_v10 = vmul.f32 8.0, %v1204_v36  ;;  %v1012_v37 = vmul.f32 0.125, %v11406_v5 }
 0x3bc   : > { %v373_v39 = vsub.s32 %v11397_v31, %v14367_v30  ;;  %v675_v29 = vsub.s32 0, %v11412_v45  ;;  %v1330_v27 = vadd.f32 0.0001, %v1266_v44  ;;  %v6929_v13 = vtrunc.f32 %v1329_v41 }
 0x3bd   : > { %14375 = vst [vmem:[#allocation60_spill] sm:$0xff] %v11587_v18  ;;  %v6416_v2 = vadd.f32 %v6224_v8, %v11587_v18  ;;  %v1331_v50 = vadd.f32 0.0001, %v1267_v7  ;;  %vm752_vm2 = vcmp.lt.s32.totalorder %v11205_v62, 8  ;;  %v1332_v33 = vadd.f32 0.0001, %v1268_v10 }
 0x3be   : > { %v1013_v49 = vmul.f32 0.125, %v948_v19  ;;  %v11596_v22 = vmin.u32 %v675_v29, %v11412_v45  ;;  %v6930_v20 = vcvt.f32.s32 %v6929_v13  ;;  %v6931_v5 = vtrunc.f32 %v1330_v27 }
 0x3bf   : > { %6544 = vst [vmem:[%s7867_s27 + $0x128] sm:$0xff] %v6416_v2  ;;  %v562_v17 = vmul.u32 16, %v11585_v48  ;;  %v6933_v31 = vtrunc.f32 %v1331_v50  ;;  %v6935_v25 = vtrunc.f32 %v1332_v33  ;;  %7160 = vlog2.f32 %v1012_v37 }
 0x3c0   : > { %vm867_vm15 = vcmp.gt.s32.totalorder %v11596_v22, 1  ;;  %v949_v8 = vcvt.s32.f32 %v373_v39  ;;  %v6932_v36 = vcvt.f32.s32 %v6931_v5  ;;  %v1457_v7 = vadd.s32 8, %v6930_v20 }
 0x3c1   : > { %v6934_v44 = vcvt.f32.s32 %v6933_v31  ;;  %v868_v41 = vsel %vm867_vm15, %v11596_v22, 1  ;;  %v6936_v19 = vcvt.f32.s32 %v6935_v25  ;;  %7162 = vlog2.f32 %v1013_v49 }
 0x3c2   : > { %v950_v10 = vcvt.s32.f32 %v868_v41  ;;  %v1014_v29 = vmul.f32 0.125, %v949_v8  ;;  %v1458_v2 = vadd.s32 8, %v6932_v36  ;;  %vm1559_vm4 = vcmp.lt.s32.totalorder %v1457_v7, 15 }
 0x3c3   : > { %v11602_v13 = vadd.s32 8, %v6934_v44  ;;  %v11605_v27 = vadd.s32 184, %v7441_v1  ;;  %v11607_v37 = vsel %vm1559_vm4, %v1457_v7, 15  ;;  %v11609_v50 = vadd.s32 8, %v6936_v19 }
 0x3c4   : > { %v11611_v39 = vmul.f32 0.125, %v950_v10  ;;  %7164 = vlog2.f32 %v1014_v29  ;;  %vm1561_vm12 = vcmp.lt.s32.totalorder %v1458_v2, 15  ;;  %vm1777_vm3 = vcmp.eq.s32.totalorder %v11607_v37, 0 }
 0x3c5   : > { %vm1908_vm6 = vcmp.eq.s32.totalorder %v11607_v37, 4  ;;  %vm2039_vm14 = vcmp.eq.s32.totalorder %v11607_v37, 8  ;;  %v1562_v33 = vsel %vm1561_vm12, %v1458_v2, 15  ;;  %v1844_v49 = vsel %vm1777_vm3, %v7527_v35, 0.0 }
 0x3c6   : > { %vm2170_vm11 = vcmp.eq.s32.totalorder %v11607_v37, 12  ;;  %vm2301_vm13 = vcmp.eq.s32.totalorder %v11607_v37, 16  ;;  %v1650_v20 = vsel %vm752_vm2, %v11205_v62, %v1562_v33  ;;  %v1975_v5 = vsel %vm1908_vm6, %v7539_v38, %v1844_v49 }
 0x3c7   : > { %vm2432_vm1 = vcmp.eq.s32.totalorder %v11607_v37, 20  ;;  %vm2563_vm9 = vcmp.eq.s32.totalorder %v11607_v37, 24  ;;  %v14376_v31 = vmul.u32 16, %v11392_v28  ;;  %v2106_v8 = vsel %vm2039_vm14, %v7548_v42, %v1975_v5 }
 0x3c8   : > { %vm2694_vm10 = vcmp.eq.s32.totalorder %v11607_v37, 28  ;;  %vm2825_vm7 = vcmp.eq.s32.totalorder %v11607_v37, 1  ;;  %v2237_v36 = vsel %vm2170_vm11, %v7551_v43, %v2106_v8  ;;  %vm2956_vm8 = vcmp.eq.s32.totalorder %v11607_v37, 5 }
 0x3c9   : > { %v11627_v25 = vadd.s32 %v1650_v20, %v14376_v31  ;;  %v2892_v62 = vsel %vm2825_vm7, %v7584_v56, 0.0  ;;  %vm3087_vm5 = vcmp.eq.s32.totalorder %v11607_v37, 9  ;;  %v11636_v7 = vpop.eup %7160  ;;  %v2368_v28 = vsel %vm2301_vm13, %v7558_v46, %v2237_v36 }
 0x3ca   : > { %v3023_v44 = vsel %vm2956_vm8, %v7589_v60, %v2892_v62  ;;  %vm3218_vm0 = vcmp.eq.s32.totalorder %v11607_v37, 13  ;;  %vm3349_vm2 = vcmp.eq.s32.totalorder %v11607_v37, 17  ;;  %v2499_v41 = vsel %vm2432_vm1, %v7561_v47, %v2368_v28 }
 0x3cb   : > { %v3154_v19 = vsel %vm3087_vm5, %v7592_v61, %v3023_v44  ;;  %vm3480_vm15 = vcmp.eq.s32.totalorder %v11607_v37, 21  ;;  %vm3611_vm4 = vcmp.eq.s32.totalorder %v11607_v37, 25  ;;  %v11646_v10 = vpop.eup %7162  ;;  %v2630_v29 = vsel %vm2563_vm9, %v7572_v51, %v2499_v41 }
 0x3cc   : > { %v3285_v2 = vsel %vm3218_vm0, %v7599_v3, %v3154_v19  ;;  %vm3742_vm12 = vcmp.eq.s32.totalorder %v11607_v37, 29  ;;  %vm3873_vm3 = vcmp.eq.s32.totalorder %v11607_v37, 2  ;;  %v2761_v33 = vsel %vm2694_vm10, %v7581_v55, %v2630_v29 }
 0x3cd   : > { %v3416_v49 = vsel %vm3349_vm2, %v7605_v6, %v3285_v2  ;;  %v3940_v20 = vsel %vm3873_vm3, %v7631_v21, 0.0  ;;  %vm4004_vm6 = vcmp.eq.s32.totalorder %v11607_v37, 6  ;;  %vm4135_vm14 = vcmp.eq.s32.totalorder %v11607_v37, 10 }
 0x3ce   : > { %v11660_v5 = vpop.eup %7164  ;;  %v3547_v31 = vsel %vm3480_vm15, %v7616_v12, %v3416_v49  ;;  %v4071_v8 = vsel %vm4004_vm6, %v7640_v24, %v3940_v20  ;;  %vm4266_vm11 = vcmp.eq.s32.totalorder %v11607_v37, 14  ;;  %vm4397_vm13 = vcmp.eq.s32.totalorder %v11607_v37, 18 }
 0x3cf   : > { %v3678_v36 = vsel %vm3611_vm4, %v7622_v15, %v3547_v31  ;;  %v4202_v62 = vsel %vm4135_vm14, %v7650_v32, %v4071_v8  ;;  %vm4528_vm1 = vcmp.eq.s32.totalorder %v11607_v37, 22  ;;  %vm4659_vm9 = vcmp.eq.s32.totalorder %v11607_v37, 26 }
 0x3d0   : > { %v3809_v28 = vsel %vm3742_vm12, %v7625_v16, %v3678_v36  ;;  %v4333_v44 = vsel %vm4266_vm11, %v7656_v40, %v4202_v62  ;;  %vm4790_vm10 = vcmp.eq.s32.totalorder %v11607_v37, 30  ;;  %vm4921_vm7 = vcmp.eq.s32.totalorder %v11607_v37, 3 }
 0x3d1   : > { %v4464_v41 = vsel %vm4397_vm13, %v7663_v52, %v4333_v44  ;;  %vm5052_vm8 = vcmp.eq.s32.totalorder %v11607_v37, 7  ;;  %vm5183_vm5 = vcmp.eq.s32.totalorder %v11607_v37, 11  ;;  %v4988_v29 = vsel %vm4921_vm7, %v7679_v14, 0.0 }
 0x3d2   : > { %v4595_v19 = vsel %vm4528_vm1, %v7666_v53, %v4464_v41  ;;  %vm5314_vm0 = vcmp.eq.s32.totalorder %v11607_v37, 15  ;;  %vm5445_vm2 = vcmp.eq.s32.totalorder %v11607_v37, 19  ;;  %v5119_v49 = vsel %vm5052_vm8, %v7684_v23, %v4988_v29 }
 0x3d3   : > { %v4726_v2 = vsel %vm4659_vm9, %v7671_v59, %v4595_v19  ;;  %vm5576_vm15 = vcmp.eq.s32.totalorder %v11607_v37, 23  ;;  %vm5707_vm4 = vcmp.eq.s32.totalorder %v11607_v37, 27  ;;  %v5250_v31 = vsel %vm5183_vm5, %v7688_v26, %v5119_v49  ;;  %v6225_v49 = vld [vmem:[%s7432_s28 + $0x130] sm:$0xff] }
 0x3d4   : > { %v4857_v20 = vsel %vm4790_vm10, %v7674_v63, %v4726_v2  ;;  %vm5838_vm12 = vcmp.eq.s32.totalorder %v11607_v37, 31  ;;  %v5969_v8 = vadd.f32 %v3809_v28, %v2761_v33  ;;  %v5381_v36 = vsel %vm5314_vm0, %v7693_v57, %v5250_v31 }
 0x3d5   : > { %vm1778_vm3 = vcmp.eq.s32.totalorder %v11627_v25, 0  ;;  %vm1909_vm6 = vcmp.eq.s32.totalorder %v11627_v25, 4  ;;  %vm2040_vm14 = vcmp.eq.s32.totalorder %v11627_v25, 8  ;;  %v5512_v62 = vsel %vm5445_vm2, %v7696_v58, %v5381_v36 }
 0x3d6   : > { %v6033_v44 = vadd.f32 %v5969_v8, %v4857_v20  ;;  %v1845_v41 = vsel %vm1778_vm3, %v7527_v35, 0.0  ;;  %vm2171_vm11 = vcmp.eq.s32.totalorder %v11627_v25, 12  ;;  %v5643_v19 = vsel %vm5576_vm15, %v7699_v0, %v5512_v62 }
 0x3d7   : > { %v1976_v33 = vsel %vm1909_vm6, %v7539_v38, %v1845_v41  ;;  %vm2302_vm13 = vcmp.eq.s32.totalorder %v11627_v25, 16  ;;  %vm2433_vm1 = vcmp.eq.s32.totalorder %v11627_v25, 20  ;;  %v5774_v28 = vsel %vm5707_vm4, %v7705_v9, %v5643_v19 }
 0x3d8   : > { %v2107_v29 = vsel %vm2040_vm14, %v7548_v42, %v1976_v33  ;;  %vm2564_vm9 = vcmp.eq.s32.totalorder %v11627_v25, 24  ;;  %vm2695_vm10 = vcmp.eq.s32.totalorder %v11627_v25, 28  ;;  %v5905_v2 = vsel %vm5838_vm12, %v7714_v11, %v5774_v28 }
 0x3d9   : > { %v2238_v20 = vsel %vm2171_vm11, %v7551_v43, %v2107_v29  ;;  %vm2826_vm7 = vcmp.eq.s32.totalorder %v11627_v25, 1  ;;  %vm2957_vm8 = vcmp.eq.s32.totalorder %v11627_v25, 5  ;;  %v11713_v31 = vadd.f32 %v6033_v44, %v5905_v2 }
 0x3da   : > { %v2369_v8 = vsel %vm2302_vm13, %v7558_v46, %v2238_v20  ;;  %v2893_v36 = vsel %vm2826_vm7, %v7584_v56, 0.0  ;;  %vm3088_vm5 = vcmp.eq.s32.totalorder %v11627_v25, 9  ;;  %vm3219_vm0 = vcmp.eq.s32.totalorder %v11627_v25, 13 }
 0x3db   : > { %14377 = vst [vmem:[#allocation61_spill] sm:$0xff] %v11713_v31  ;;  %v2500_v62 = vsel %vm2433_vm1, %v7561_v47, %v2369_v8  ;;  %v3024_v37 = vsel %vm2957_vm8, %v7589_v60, %v2893_v36  ;;  %vm3350_vm2 = vcmp.eq.s32.totalorder %v11627_v25, 17  ;;  %v6417_v41 = vadd.f32 %v6225_v49, %v11713_v31 }
 0x3dc   : > { %v2631_v44 = vsel %vm2564_vm9, %v7572_v51, %v2500_v62  ;;  %v3155_v19 = vsel %vm3088_vm5, %v7592_v61, %v3024_v37  ;;  %vm3481_vm15 = vcmp.eq.s32.totalorder %v11627_v25, 21  ;;  %vm3612_vm4 = vcmp.eq.s32.totalorder %v11627_v25, 25 }
 0x3dd   : > { %v2762_v33 = vsel %vm2695_vm10, %v7581_v55, %v2631_v44  ;;  %v3286_v28 = vsel %vm3219_vm0, %v7599_v3, %v3155_v19  ;;  %vm3743_vm12 = vcmp.eq.s32.totalorder %v11627_v25, 29  ;;  %vm754_vm3 = vcmp.lt.s32.totalorder %v11376_v54, 8  ;;  %6545 = vst [vmem:[%s7867_s27 + $0x130] sm:$0xff] %v6417_v41 }
 0x3de   : > { %v3417_v29 = vsel %vm3350_vm2, %v7605_v6, %v3286_v28  ;;  %vm3874_vm6 = vcmp.eq.s32.totalorder %v11627_v25, 2  ;;  %vm4005_vm14 = vcmp.eq.s32.totalorder %v11627_v25, 6  ;;  %vm4136_vm11 = vcmp.eq.s32.totalorder %v11627_v25, 10 }
 0x3df   : > { %v3548_v2 = vsel %vm3481_vm15, %v7616_v12, %v3417_v29  ;;  %v3941_v49 = vsel %vm3874_vm6, %v7631_v21, 0.0  ;;  %vm4267_vm13 = vcmp.eq.s32.totalorder %v11627_v25, 14  ;;  %vm4398_vm1 = vcmp.eq.s32.totalorder %v11627_v25, 18 }
 0x3e0   : > { %v3679_v20 = vsel %vm3612_vm4, %v7622_v15, %v3548_v2  ;;  %v4072_v8 = vsel %vm4005_vm14, %v7640_v24, %v3941_v49  ;;  %vm4529_vm9 = vcmp.eq.s32.totalorder %v11627_v25, 22  ;;  %vm4660_vm10 = vcmp.eq.s32.totalorder %v11627_v25, 26 }
 0x3e1   : > { %v3810_v36 = vsel %vm3743_vm12, %v7625_v16, %v3679_v20  ;;  %v4203_v62 = vsel %vm4136_vm11, %v7650_v32, %v4072_v8  ;;  %vm4791_vm7 = vcmp.eq.s32.totalorder %v11627_v25, 30  ;;  %vm4922_vm8 = vcmp.eq.s32.totalorder %v11627_v25, 3 }
 0x3e2   : > { %v4334_v37 = vsel %vm4267_vm13, %v7656_v40, %v4203_v62  ;;  %v4989_v41 = vsel %vm4922_vm8, %v7679_v14, 0.0  ;;  %vm5053_vm5 = vcmp.eq.s32.totalorder %v11627_v25, 7  ;;  %vm5184_vm0 = vcmp.eq.s32.totalorder %v11627_v25, 11 }
 0x3e3   : > { %v4465_v44 = vsel %vm4398_vm1, %v7663_v52, %v4334_v37  ;;  %v5120_v19 = vsel %vm5053_vm5, %v7684_v23, %v4989_v41  ;;  %vm5315_vm2 = vcmp.eq.s32.totalorder %v11627_v25, 15  ;;  %vm5446_vm15 = vcmp.eq.s32.totalorder %v11627_v25, 19 }
 0x3e4   : > { %v4596_v28 = vsel %vm4529_vm9, %v7666_v53, %v4465_v44  ;;  %v5251_v29 = vsel %vm5184_vm0, %v7688_v26, %v5120_v19  ;;  %vm5577_vm4 = vcmp.eq.s32.totalorder %v11627_v25, 23  ;;  %vm5708_vm12 = vcmp.eq.s32.totalorder %v11627_v25, 27 }
 0x3e5   : > { %v4727_v2 = vsel %vm4660_vm10, %v7671_v59, %v4596_v28  ;;  %v5382_v49 = vsel %vm5315_vm2, %v7693_v57, %v5251_v29  ;;  %vm5839_vm6 = vcmp.eq.s32.totalorder %v11627_v25, 31  ;;  %v5970_v20 = vadd.f32 %v3810_v36, %v2762_v33  ;;  %v6226_v28 = vld [vmem:[%s7432_s28 + $0x138] sm:$0xff] }
 0x3e6   : > { %v4858_v8 = vsel %vm4791_vm7, %v7674_v63, %v4727_v2  ;;  %v5513_v62 = vsel %vm5446_vm15, %v7696_v58, %v5382_v49  ;;  %vm1563_vm14 = vcmp.lt.s32.totalorder %v11602_v13, 15  ;;  %vm1565_vm11 = vcmp.lt.s32.totalorder %v11609_v50, 15 }
 0x3e7   : > { %v5644_v37 = vsel %vm5577_vm4, %v7699_v0, %v5513_v62  ;;  %v6034_v41 = vadd.f32 %v5970_v20, %v4858_v8  ;;  %v11777_v44 = vsel %vm1563_vm14, %v11602_v13, 15  ;;  %v1566_v19 = vsel %vm1565_vm11, %v11609_v50, 15 }
 0x3e8   : > { %v5775_v33 = vsel %vm5708_vm12, %v7705_v9, %v5644_v37  ;;  %v1652_v25 = vsel %vm754_vm3, %v11376_v54, %v1566_v19  ;;  %vm1779_vm13 = vcmp.eq.s32.totalorder %v11777_v44, 0  ;;  %vm1910_vm1 = vcmp.eq.s32.totalorder %v11777_v44, 4 }
 0x3e9   : > { %v5906_v36 = vsel %vm5839_vm6, %v7714_v11, %v5775_v33  ;;  %v11790_v29 = vadd.s32 %v1652_v25, %v562_v17  ;;  %v1846_v13 = vsel %vm1779_vm13, %v7527_v35, 0.0  ;;  %vm2041_vm9 = vcmp.eq.s32.totalorder %v11777_v44, 8 }
 0x3ea   : > { %v11794_v50 = vadd.f32 %v6034_v41, %v5906_v36  ;;  %v1977_v54 = vsel %vm1910_vm1, %v7539_v38, %v1846_v13  ;;  %vm2172_vm3 = vcmp.eq.s32.totalorder %v11777_v44, 12  ;;  %vm2303_vm10 = vcmp.eq.s32.totalorder %v11777_v44, 16 }
 0x3eb   : > { %v2108_v2 = vsel %vm2041_vm9, %v7548_v42, %v1977_v54  ;;  %vm2434_vm7 = vcmp.eq.s32.totalorder %v11777_v44, 20  ;;  %vm2565_vm8 = vcmp.eq.s32.totalorder %v11777_v44, 24  ;;  %vm2696_vm5 = vcmp.eq.s32.totalorder %v11777_v44, 28 }
 0x3ec   : > { %14378 = vst [vmem:[#allocation62_spill] sm:$0xff] %v11794_v50  ;;  %v6418_v48 = vadd.f32 %v6226_v28, %v11794_v50  ;;  %v2239_v17 = vsel %vm2172_vm3, %v7551_v43, %v2108_v2  ;;  %vm2827_vm0 = vcmp.eq.s32.totalorder %v11777_v44, 1  ;;  %vm2958_vm2 = vcmp.eq.s32.totalorder %v11777_v44, 5 }
 0x3ed   : > { %v2370_v49 = vsel %vm2303_vm10, %v7558_v46, %v2239_v17  ;;  %v2894_v20 = vsel %vm2827_vm0, %v7584_v56, 0.0  ;;  %vm3089_vm15 = vcmp.eq.s32.totalorder %v11777_v44, 9  ;;  %vm3220_vm4 = vcmp.eq.s32.totalorder %v11777_v44, 13 }
 0x3ee   : > { %6546 = vst [vmem:[%s7867_s27 + $0x138] sm:$0xff] %v6418_v48  ;;  %v2501_v8 = vsel %vm2434_vm7, %v7561_v47, %v2370_v49  ;;  %v3025_v62 = vsel %vm2958_vm2, %v7589_v60, %v2894_v20  ;;  %vm3351_vm12 = vcmp.eq.s32.totalorder %v11777_v44, 17  ;;  %vm3482_vm6 = vcmp.eq.s32.totalorder %v11777_v44, 21 }
 0x3ef   : > { %v2632_v37 = vsel %vm2565_vm8, %v7572_v51, %v2501_v8  ;;  %v3156_v41 = vsel %vm3089_vm15, %v7592_v61, %v3025_v62  ;;  %vm3613_vm14 = vcmp.eq.s32.totalorder %v11777_v44, 25  ;;  %vm3744_vm11 = vcmp.eq.s32.totalorder %v11777_v44, 29 }
 0x3f0   : > { %v2763_v19 = vsel %vm2696_vm5, %v7581_v55, %v2632_v37  ;;  %v3287_v33 = vsel %vm3220_vm4, %v7599_v3, %v3156_v41  ;;  %vm3875_vm13 = vcmp.eq.s32.totalorder %v11777_v44, 2  ;;  %vm4006_vm1 = vcmp.eq.s32.totalorder %v11777_v44, 6 }
 0x3f1   : > { %v3418_v25 = vsel %vm3351_vm12, %v7605_v6, %v3287_v33  ;;  %v3942_v36 = vsel %vm3875_vm13, %v7631_v21, 0.0  ;;  %vm4137_vm9 = vcmp.eq.s32.totalorder %v11777_v44, 10  ;;  %vm4268_vm3 = vcmp.eq.s32.totalorder %v11777_v44, 14 }
 0x3f2   : > { %v3549_v28 = vsel %vm3482_vm6, %v7616_v12, %v3418_v25  ;;  %v4073_v13 = vsel %vm4006_vm1, %v7640_v24, %v3942_v36  ;;  %vm4399_vm10 = vcmp.eq.s32.totalorder %v11777_v44, 18  ;;  %vm4530_vm7 = vcmp.eq.s32.totalorder %v11777_v44, 22 }
 0x3f3   : > { %v3680_v54 = vsel %vm3613_vm14, %v7622_v15, %v3549_v28  ;;  %v4204_v2 = vsel %vm4137_vm9, %v7650_v32, %v4073_v13  ;;  %vm4661_vm8 = vcmp.eq.s32.totalorder %v11777_v44, 26  ;;  %vm4792_vm5 = vcmp.eq.s32.totalorder %v11777_v44, 30 }
 0x3f4   : > { %v3811_v48 = vsel %vm3744_vm11, %v7625_v16, %v3680_v54  ;;  %v4335_v17 = vsel %vm4268_vm3, %v7656_v40, %v4204_v2  ;;  %vm4923_vm0 = vcmp.eq.s32.totalorder %v11777_v44, 3  ;;  %vm5054_vm2 = vcmp.eq.s32.totalorder %v11777_v44, 7 }
 0x3f5   : > { %v4466_v49 = vsel %vm4399_vm10, %v7663_v52, %v4335_v17  ;;  %v4990_v20 = vsel %vm4923_vm0, %v7679_v14, 0.0  ;;  %vm5185_vm15 = vcmp.eq.s32.totalorder %v11777_v44, 11  ;;  %vm5316_vm4 = vcmp.eq.s32.totalorder %v11777_v44, 15 }
 0x3f6   : > { %v4597_v8 = vsel %vm4530_vm7, %v7666_v53, %v4466_v49  ;;  %v5121_v62 = vsel %vm5054_vm2, %v7684_v23, %v4990_v20  ;;  %vm5447_vm12 = vcmp.eq.s32.totalorder %v11777_v44, 19  ;;  %vm5578_vm6 = vcmp.eq.s32.totalorder %v11777_v44, 23  ;;  %v6227_v20 = vld [vmem:[%s7432_s28 + $0x140] sm:$0xff] }
 0x3f7   : > { %v4728_v37 = vsel %vm4661_vm8, %v7671_v59, %v4597_v8  ;;  %v5252_v41 = vsel %vm5185_vm15, %v7688_v26, %v5121_v62  ;;  %vm5709_vm14 = vcmp.eq.s32.totalorder %v11777_v44, 27  ;;  %vm5840_vm11 = vcmp.eq.s32.totalorder %v11777_v44, 31 }
 0x3f8   : > { %v4859_v33 = vsel %vm4792_vm5, %v7674_v63, %v4728_v37  ;;  %v5383_v25 = vsel %vm5316_vm4, %v7693_v57, %v5252_v41  ;;  %v5971_v36 = vadd.f32 %v3811_v48, %v2763_v19  ;;  %vm1780_vm13 = vcmp.eq.s32.totalorder %v11790_v29, 0 }
 0x3f9   : > { %v5514_v28 = vsel %vm5447_vm12, %v7696_v58, %v5383_v25  ;;  %v1847_v13 = vsel %vm1780_vm13, %v7527_v35, 0.0  ;;  %vm1911_vm1 = vcmp.eq.s32.totalorder %v11790_v29, 4  ;;  %vm2042_vm9 = vcmp.eq.s32.totalorder %v11790_v29, 8 }
 0x3fa   : > { %v5645_v54 = vsel %vm5578_vm6, %v7699_v0, %v5514_v28  ;;  %v6035_v2 = vadd.f32 %v5971_v36, %v4859_v33  ;;  %v1978_v17 = vsel %vm1911_vm1, %v7539_v38, %v1847_v13  ;;  %vm2173_vm3 = vcmp.eq.s32.totalorder %v11790_v29, 12 }
 0x3fb   : > { %v5776_v49 = vsel %vm5709_vm14, %v7705_v9, %v5645_v54  ;;  %v2109_v19 = vsel %vm2042_vm9, %v7548_v42, %v1978_v17  ;;  %vm2304_vm10 = vcmp.eq.s32.totalorder %v11790_v29, 16  ;;  %vm2435_vm7 = vcmp.eq.s32.totalorder %v11790_v29, 20 }
 0x3fc   : > { %v5907_v48 = vsel %vm5840_vm11, %v7714_v11, %v5776_v49  ;;  %v2240_v8 = vsel %vm2173_vm3, %v7551_v43, %v2109_v19  ;;  %vm2566_vm8 = vcmp.eq.s32.totalorder %v11790_v29, 24  ;;  %vm2697_vm5 = vcmp.eq.s32.totalorder %v11790_v29, 28 }
 0x3fd   : > { %v11879_v62 = vadd.f32 %v6035_v2, %v5907_v48  ;;  %v2371_v37 = vsel %vm2304_vm10, %v7558_v46, %v2240_v8  ;;  %vm2828_vm0 = vcmp.eq.s32.totalorder %v11790_v29, 1  ;;  %vm2959_vm2 = vcmp.eq.s32.totalorder %v11790_v29, 5 }
 0x3fe   : > { %v2502_v41 = vsel %vm2435_vm7, %v7561_v47, %v2371_v37  ;;  %v2895_v44 = vsel %vm2828_vm0, %v7584_v56, 0.0  ;;  %vm3090_vm15 = vcmp.eq.s32.totalorder %v11790_v29, 9  ;;  %vm3221_vm4 = vcmp.eq.s32.totalorder %v11790_v29, 13 }
 0x3ff   : > { %14379 = vst [vmem:[#allocation63_spill] sm:$0xff] %v11879_v62  ;;  %v6419_v33 = vadd.f32 %v6227_v20, %v11879_v62  ;;  %v2633_v25 = vsel %vm2566_vm8, %v7572_v51, %v2502_v41  ;;  %v3026_v36 = vsel %vm2959_vm2, %v7589_v60, %v2895_v44  ;;  %vm3352_vm12 = vcmp.eq.s32.totalorder %v11790_v29, 17 }
 0x400   : > { %v2764_v28 = vsel %vm2697_vm5, %v7581_v55, %v2633_v25  ;;  %v3157_v13 = vsel %vm3090_vm15, %v7592_v61, %v3026_v36  ;;  %vm3483_vm6 = vcmp.eq.s32.totalorder %v11790_v29, 21  ;;  %vm3614_vm14 = vcmp.eq.s32.totalorder %v11790_v29, 25 }
 0x401   : > { %6547 = vst [vmem:[%s7867_s27 + $0x140] sm:$0xff] %v6419_v33  ;;  %v3288_v54 = vsel %vm3221_vm4, %v7599_v3, %v3157_v13  ;;  %vm3745_vm11 = vcmp.eq.s32.totalorder %v11790_v29, 29  ;;  %vm3876_vm13 = vcmp.eq.s32.totalorder %v11790_v29, 2  ;;  %vm4007_vm1 = vcmp.eq.s32.totalorder %v11790_v29, 6 }
 0x402   : > { %v3419_v2 = vsel %vm3352_vm12, %v7605_v6, %v3288_v54  ;;  %v3943_v17 = vsel %vm3876_vm13, %v7631_v21, 0.0  ;;  %vm4138_vm9 = vcmp.eq.s32.totalorder %v11790_v29, 10  ;;  %vm4269_vm3 = vcmp.eq.s32.totalorder %v11790_v29, 14 }
 0x403   : > { %v3550_v49 = vsel %vm3483_vm6, %v7616_v12, %v3419_v2  ;;  %v4074_v19 = vsel %vm4007_vm1, %v7640_v24, %v3943_v17  ;;  %vm4400_vm10 = vcmp.eq.s32.totalorder %v11790_v29, 18  ;;  %vm4531_vm7 = vcmp.eq.s32.totalorder %v11790_v29, 22 }
 0x404   : > { %v3681_v48 = vsel %vm3614_vm14, %v7622_v15, %v3550_v49  ;;  %v4205_v20 = vsel %vm4138_vm9, %v7650_v32, %v4074_v19  ;;  %vm4662_vm8 = vcmp.eq.s32.totalorder %v11790_v29, 26  ;;  %vm4793_vm5 = vcmp.eq.s32.totalorder %v11790_v29, 30 }
 0x405   : > { %v3812_v8 = vsel %vm3745_vm11, %v7625_v16, %v3681_v48  ;;  %v4336_v37 = vsel %vm4269_vm3, %v7656_v40, %v4205_v20  ;;  %vm4924_vm0 = vcmp.eq.s32.totalorder %v11790_v29, 3  ;;  %vm5055_vm2 = vcmp.eq.s32.totalorder %v11790_v29, 7 }
 0x406   : > { %vm436_vm15 = vcmp.lt.s32.totalorder %v11389_v34, 0  ;;  %v4467_v41 = vsel %vm4400_vm10, %v7663_v52, %v4336_v37  ;;  %v4991_v44 = vsel %vm4924_vm0, %v7679_v14, 0.0  ;;  %vm5186_vm4 = vcmp.eq.s32.totalorder %v11790_v29, 11 }
 0x407   : > { %vm5317_vm12 = vcmp.eq.s32.totalorder %v11790_v29, 15  ;;  %v4598_v33 = vsel %vm4531_vm7, %v7666_v53, %v4467_v41  ;;  %v5122_v25 = vsel %vm5055_vm2, %v7684_v23, %v4991_v44  ;;  %vm5448_vm6 = vcmp.eq.s32.totalorder %v11790_v29, 19 }
 0x408   : > { %vm5579_vm14 = vcmp.eq.s32.totalorder %v11790_v29, 23  ;;  %v4729_v36 = vsel %vm4662_vm8, %v7671_v59, %v4598_v33  ;;  %v5253_v13 = vsel %vm5186_vm4, %v7688_v26, %v5122_v25  ;;  %vm5710_vm11 = vcmp.eq.s32.totalorder %v11790_v29, 27 }
 0x409   : > { %vm5841_vm13 = vcmp.eq.s32.totalorder %v11790_v29, 31  ;;  %v4860_v54 = vsel %vm4793_vm5, %v7674_v63, %v4729_v36  ;;  %v5384_v2 = vsel %vm5317_vm12, %v7693_v57, %v5253_v13  ;;  %v5972_v17 = vadd.f32 %v3812_v8, %v2764_v28 }
 0x40a   : > { %v1119_v49 = vmul.f32 0.6931472, %v11636_v7  ;;  %v5515_v19 = vsel %vm5448_vm6, %v7696_v58, %v5384_v2  ;;  %v1121_v48 = vmul.f32 0.6931472, %v11646_v10  ;;  %v1123_v20 = vmul.f32 0.6931472, %v11660_v5 }
 0x40b   : > { %7166 = vlog2.f32 %v11611_v39  ;;  %v5646_v37 = vsel %vm5579_vm14, %v7699_v0, %v5515_v19  ;;  %v6036_v41 = vadd.f32 %v5972_v17, %v4860_v54  ;;  %v375_v33 = vsub.s32 %v11605_v27, %v14367_v30  ;;  %v6228_v39 = vld [vmem:[%s7432_s28 + $0x148] sm:$0xff] }
 0x40c   : > { %v1205_v44 = vmul.f32 0.36067376, %v1119_v49  ;;  %v5777_v25 = vsel %vm5710_vm11, %v7705_v9, %v5646_v37  ;;  %v1206_v28 = vmul.f32 0.36067376, %v1121_v48  ;;  %v1207_v8 = vmul.f32 0.36067376, %v1123_v20 }
 0x40d   : > { %v11945_v7 = vsub.s32 %v11605_v27, %v7449_v4  ;;  %v5908_v10 = vsel %vm5841_vm13, %v7714_v11, %v5777_v25  ;;  %vm438_vm1 = vcmp.lt.s32.totalorder %v11412_v45, 0  ;;  %v951_v36 = vcvt.s32.f32 %v375_v33 }
 0x40e   : > { %v1269_v5 = vmul.f32 8.0, %v1205_v44  ;;  %v11952_v13 = vadd.f32 %v6036_v41, %v5908_v10  ;;  %v1270_v54 = vmul.f32 8.0, %v1206_v28  ;;  %v1271_v2 = vmul.f32 8.0, %v1207_v8 }
 0x40f   : > { %v281_v17 = vadd.s32 192, %v7441_v1  ;;  %v679_v27 = vsub.s32 0, %v11945_v7  ;;  %v14381_v48 = vmov 0   ;;  %v1016_v28 = vmul.f32 0.125, %v951_v36 }
 0x410   : > { %14380 = vst [vmem:[#allocation64_spill] sm:$0xff] %v11952_v13  ;;  %v1333_v49 = vadd.f32 0.0001, %v1269_v5  ;;  %v6420_v19 = vadd.f32 %v6228_v39, %v11952_v13  ;;  %v500_v29 = vsel %vm436_vm15, 1, %v14381_v48  ;;  %v1334_v20 = vadd.f32 0.0001, %v1270_v54 }
 0x411   : > { %v1335_v37 = vadd.f32 0.0001, %v1271_v2  ;;  %v11961_v45 = vsel %vm438_vm1, 1, %v14381_v48  ;;  %v11964_v41 = vmin.u32 %v679_v27, %v11945_v7  ;;  %v11968_v8 = vsub.s32 %v281_v17, %v7449_v4  ;;  %v14382_v54 = vld [vmem:[#allocation58_spill] sm:$0xff] }
 0x412   : > { %v6937_v44 = vtrunc.f32 %v1333_v49  ;;  %6548 = vst [vmem:[%s7867_s27 + $0x148] sm:$0xff] %v6420_v19  ;;  %v6939_v33 = vtrunc.f32 %v1334_v20  ;;  %v564_v10 = vmul.u32 16, %v500_v29  ;;  %v377_v34 = vsub.s32 %v281_v17, %v14367_v30 }
 0x413   : > { %v6941_v25 = vtrunc.f32 %v1335_v37  ;;  %vm871_vm9 = vcmp.gt.s32.totalorder %v11964_v41, 1  ;;  %vm756_vm3 = vcmp.lt.s32.totalorder %v14382_v54, 8  ;;  %7168 = vlog2.f32 %v1016_v28 }
 0x414   : > { %v6938_v39 = vcvt.f32.s32 %v6937_v44  ;;  %v6940_v2 = vcvt.f32.s32 %v6939_v33  ;;  %v872_v27 = vsel %vm871_vm9, %v11964_v41, 1  ;;  %v683_v29 = vsub.s32 0, %v11968_v8 }
 0x415   : > { %v7167_v5 = vpop.eup %7166  ;;  %v6942_v49 = vcvt.f32.s32 %v6941_v25  ;;  %v952_v37 = vcvt.s32.f32 %v872_v27  ;;  %v11977_v44 = vadd.s32 200, %v7441_v1  ;;  %v11983_v33 = vcvt.s32.f32 %v377_v34 }
 0x416   : > { %v1461_v19 = vadd.s32 8, %v6938_v39  ;;  %v1125_v36 = vmul.f32 0.6931472, %v7167_v5  ;;  %v1462_v13 = vadd.s32 8, %v6940_v2  ;;  %v11990_v5 = vmin.u32 %v683_v29, %v11968_v8 }
 0x417   : > { %v11981_v62 = vadd.s32 8, %v6942_v49  ;;  %v11987_v39 = vmul.f32 0.125, %v952_v37 }
 0x418   : > { %vm1567_vm10 = vcmp.lt.s32.totalorder %v1461_v19, 15  ;;  %v11979_v17 = vmul.f32 0.36067376, %v1125_v36  ;;  %vm1569_vm7 = vcmp.lt.s32.totalorder %v1462_v13, 15 }
 0x419   : > { %v11985_v25 = vsel %vm1567_vm10, %v1461_v19, 15  ;;  %v1570_v28 = vsel %vm1569_vm7, %v1462_v13, 15  ;;  %7170 = vlog2.f32 %v11987_v39  ;;  %v379_v39 = vsub.s32 %v11977_v44, %v14367_v30 }
 0x41a   : > { %vm1781_vm8 = vcmp.eq.s32.totalorder %v11985_v25, 0  ;;  %vm1912_vm5 = vcmp.eq.s32.totalorder %v11985_v25, 4  ;;  %vm2043_vm0 = vcmp.eq.s32.totalorder %v11985_v25, 8  ;;  %v1654_v34 = vsel %vm756_vm3, %v14382_v54, %v1570_v28 }
 0x41b   : > { %v1848_v2 = vsel %vm1781_vm8, %v7527_v35, 0.0  ;;  %vm2174_vm2 = vcmp.eq.s32.totalorder %v11985_v25, 12  ;;  %vm2305_vm15 = vcmp.eq.s32.totalorder %v11985_v25, 16  ;;  %v12001_v49 = vadd.s32 %v1654_v34, %v564_v10 }
 0x41c   : > { %v1979_v13 = vsel %vm1912_vm5, %v7539_v38, %v1848_v2  ;;  %vm2436_vm4 = vcmp.eq.s32.totalorder %v11985_v25, 20  ;;  %vm2567_vm12 = vcmp.eq.s32.totalorder %v11985_v25, 24  ;;  %vm2698_vm6 = vcmp.eq.s32.totalorder %v11985_v25, 28 }
 0x41d   : > { %v2110_v27 = vsel %vm2043_vm0, %v7548_v42, %v1979_v13  ;;  %vm2829_vm14 = vcmp.eq.s32.totalorder %v11985_v25, 1  ;;  %vm2960_vm11 = vcmp.eq.s32.totalorder %v11985_v25, 5  ;;  %vm3091_vm13 = vcmp.eq.s32.totalorder %v11985_v25, 9  ;;  %v12022_v28 = vpop.eup %7168 }
 0x41e   : > { %v2241_v54 = vsel %vm2174_vm2, %v7551_v43, %v2110_v27  ;;  %v2896_v19 = vsel %vm2829_vm14, %v7584_v56, 0.0  ;;  %vm3222_vm1 = vcmp.eq.s32.totalorder %v11985_v25, 13  ;;  %vm3353_vm9 = vcmp.eq.s32.totalorder %v11985_v25, 17 }
 0x41f   : > { %v2372_v10 = vsel %vm2305_vm15, %v7558_v46, %v2241_v54  ;;  %v3027_v36 = vsel %vm2960_vm11, %v7589_v60, %v2896_v19  ;;  %vm3484_vm3 = vcmp.eq.s32.totalorder %v11985_v25, 21  ;;  %vm3615_vm10 = vcmp.eq.s32.totalorder %v11985_v25, 25 }
 0x420   : > { %v2503_v37 = vsel %vm2436_vm4, %v7561_v47, %v2372_v10  ;;  %v3158_v29 = vsel %vm3091_vm13, %v7592_v61, %v3027_v36  ;;  %vm3746_vm7 = vcmp.eq.s32.totalorder %v11985_v25, 29  ;;  %vm3877_vm8 = vcmp.eq.s32.totalorder %v11985_v25, 2 }
 0x421   : > { %v2634_v34 = vsel %vm2567_vm12, %v7572_v51, %v2503_v37  ;;  %v3289_v2 = vsel %vm3222_vm1, %v7599_v3, %v3158_v29  ;;  %vm4008_vm5 = vcmp.eq.s32.totalorder %v11985_v25, 6  ;;  %v3944_v54 = vsel %vm3877_vm8, %v7631_v21, 0.0 }
 0x422   : > { %v2765_v13 = vsel %vm2698_vm6, %v7581_v55, %v2634_v34  ;;  %v3420_v27 = vsel %vm3353_vm9, %v7605_v6, %v3289_v2  ;;  %vm4139_vm0 = vcmp.eq.s32.totalorder %v11985_v25, 10  ;;  %v4075_v10 = vsel %vm4008_vm5, %v7640_v24, %v3944_v54 }
 0x423   : > { %v3551_v19 = vsel %vm3484_vm3, %v7616_v12, %v3420_v27  ;;  %vm4270_vm2 = vcmp.eq.s32.totalorder %v11985_v25, 14  ;;  %vm4401_vm15 = vcmp.eq.s32.totalorder %v11985_v25, 18  ;;  %v4206_v37 = vsel %vm4139_vm0, %v7650_v32, %v4075_v10 }
 0x424   : > { %v3682_v36 = vsel %vm3615_vm10, %v7622_v15, %v3551_v19  ;;  %vm4532_vm4 = vcmp.eq.s32.totalorder %v11985_v25, 22  ;;  %vm4663_vm12 = vcmp.eq.s32.totalorder %v11985_v25, 26  ;;  %v4337_v34 = vsel %vm4270_vm2, %v7656_v40, %v4206_v37 }
 0x425   : > { %v3813_v29 = vsel %vm3746_vm7, %v7625_v16, %v3682_v36  ;;  %vm4794_vm6 = vcmp.eq.s32.totalorder %v11985_v25, 30  ;;  %vm4925_vm14 = vcmp.eq.s32.totalorder %v11985_v25, 3  ;;  %v4468_v2 = vsel %vm4401_vm15, %v7663_v52, %v4337_v34 }
 0x426   : > { %v4992_v27 = vsel %vm4925_vm14, %v7679_v14, 0.0  ;;  %vm5056_vm11 = vcmp.eq.s32.totalorder %v11985_v25, 7  ;;  %vm5187_vm13 = vcmp.eq.s32.totalorder %v11985_v25, 11  ;;  %v4599_v54 = vsel %vm4532_vm4, %v7666_v53, %v4468_v2 }
 0x427   : > { %v5123_v19 = vsel %vm5056_vm11, %v7684_v23, %v4992_v27  ;;  %vm5318_vm1 = vcmp.eq.s32.totalorder %v11985_v25, 15  ;;  %vm5449_vm9 = vcmp.eq.s32.totalorder %v11985_v25, 19  ;;  %v4730_v10 = vsel %vm4663_vm12, %v7671_v59, %v4599_v54 }
 0x428   : > { %v5254_v36 = vsel %vm5187_vm13, %v7688_v26, %v5123_v19  ;;  %vm5580_vm3 = vcmp.eq.s32.totalorder %v11985_v25, 23  ;;  %vm5711_vm10 = vcmp.eq.s32.totalorder %v11985_v25, 27  ;;  %v4861_v37 = vsel %vm4794_vm6, %v7674_v63, %v4730_v10 }
 0x429   : > { %v5385_v34 = vsel %vm5318_vm1, %v7693_v57, %v5254_v36  ;;  %vm5842_vm7 = vcmp.eq.s32.totalorder %v11985_v25, 31  ;;  %v5973_v2 = vadd.f32 %v3813_v29, %v2765_v13  ;;  %vm1782_vm8 = vcmp.eq.s32.totalorder %v12001_v49, 0  ;;  %v6229_v29 = vld [vmem:[%s7432_s28 + $0x150] sm:$0xff] }
 0x42a   : > { %v5516_v27 = vsel %vm5449_vm9, %v7696_v58, %v5385_v34  ;;  %vm1913_vm5 = vcmp.eq.s32.totalorder %v12001_v49, 4  ;;  %vm2044_vm0 = vcmp.eq.s32.totalorder %v12001_v49, 8  ;;  %v1849_v20 = vsel %vm1782_vm8, %v7527_v35, 0.0 }
 0x42b   : > { %v5647_v54 = vsel %vm5580_vm3, %v7699_v0, %v5516_v27  ;;  %v6037_v19 = vadd.f32 %v5973_v2, %v4861_v37  ;;  %vm2175_vm2 = vcmp.eq.s32.totalorder %v12001_v49, 12  ;;  %v1980_v25 = vsel %vm1913_vm5, %v7539_v38, %v1849_v20 }
 0x42c   : > { %v5778_v10 = vsel %vm5711_vm10, %v7705_v9, %v5647_v54  ;;  %vm2306_vm15 = vcmp.eq.s32.totalorder %v12001_v49, 16  ;;  %vm2437_vm4 = vcmp.eq.s32.totalorder %v12001_v49, 20  ;;  %v2111_v36 = vsel %vm2044_vm0, %v7548_v42, %v1980_v25 }
 0x42d   : > { %v5909_v13 = vsel %vm5842_vm7, %v7714_v11, %v5778_v10  ;;  %vm2568_vm12 = vcmp.eq.s32.totalorder %v12001_v49, 24  ;;  %vm2699_vm6 = vcmp.eq.s32.totalorder %v12001_v49, 28  ;;  %v2242_v34 = vsel %vm2175_vm2, %v7551_v43, %v2111_v36 }
 0x42e   : > { %v12081_v37 = vadd.f32 %v6037_v19, %v5909_v13  ;;  %vm2830_vm14 = vcmp.eq.s32.totalorder %v12001_v49, 1  ;;  %vm2961_vm11 = vcmp.eq.s32.totalorder %v12001_v49, 5  ;;  %v2373_v20 = vsel %vm2306_vm15, %v7558_v46, %v2242_v34 }
 0x42f   : > { %v2897_v2 = vsel %vm2830_vm14, %v7584_v56, 0.0  ;;  %vm3092_vm13 = vcmp.eq.s32.totalorder %v12001_v49, 9  ;;  %vm3223_vm1 = vcmp.eq.s32.totalorder %v12001_v49, 13  ;;  %v2504_v54 = vsel %vm2437_vm4, %v7561_v47, %v2373_v20 }
 0x430   : > { %14383 = vst [vmem:[#allocation58_spill] sm:$0xff] %v12081_v37  ;;  %v6421_v27 = vadd.f32 %v6229_v29, %v12081_v37  ;;  %v3028_v19 = vsel %vm2961_vm11, %v7589_v60, %v2897_v2  ;;  %vm3354_vm9 = vcmp.eq.s32.totalorder %v12001_v49, 17  ;;  %vm1571_vm3 = vcmp.lt.s32.totalorder %v11981_v62, 15 }
 0x431   : > { %v2635_v10 = vsel %vm2568_vm12, %v7572_v51, %v2504_v54  ;;  %v3159_v25 = vsel %vm3092_vm13, %v7592_v61, %v3028_v19  ;;  %vm3485_vm10 = vcmp.eq.s32.totalorder %v12001_v49, 21  ;;  %vm3616_vm7 = vcmp.eq.s32.totalorder %v12001_v49, 25 }
 0x432   : > { %6549 = vst [vmem:[%s7867_s27 + $0x150] sm:$0xff] %v6421_v27  ;;  %v2766_v13 = vsel %vm2699_vm6, %v7581_v55, %v2635_v10  ;;  %v3290_v29 = vsel %vm3223_vm1, %v7599_v3, %v3159_v25  ;;  %vm3747_vm8 = vcmp.eq.s32.totalorder %v12001_v49, 29  ;;  %vm3878_vm5 = vcmp.eq.s32.totalorder %v12001_v49, 2 }
 0x433   : > { %v3421_v36 = vsel %vm3354_vm9, %v7605_v6, %v3290_v29  ;;  %v3945_v34 = vsel %vm3878_vm5, %v7631_v21, 0.0  ;;  %vm4009_vm0 = vcmp.eq.s32.totalorder %v12001_v49, 6  ;;  %vm4140_vm2 = vcmp.eq.s32.totalorder %v12001_v49, 10 }
 0x434   : > { %v3552_v20 = vsel %vm3485_vm10, %v7616_v12, %v3421_v36  ;;  %v4076_v2 = vsel %vm4009_vm0, %v7640_v24, %v3945_v34  ;;  %vm4271_vm15 = vcmp.eq.s32.totalorder %v12001_v49, 14  ;;  %vm4402_vm4 = vcmp.eq.s32.totalorder %v12001_v49, 18 }
 0x435   : > { %v3683_v27 = vsel %vm3616_vm7, %v7622_v15, %v3552_v20  ;;  %v4207_v54 = vsel %vm4140_vm2, %v7650_v32, %v4076_v2  ;;  %vm4533_vm12 = vcmp.eq.s32.totalorder %v12001_v49, 22  ;;  %vm4664_vm6 = vcmp.eq.s32.totalorder %v12001_v49, 26 }
 0x436   : > { %v3814_v19 = vsel %vm3747_vm8, %v7625_v16, %v3683_v27  ;;  %v4338_v10 = vsel %vm4271_vm15, %v7656_v40, %v4207_v54  ;;  %vm4795_vm14 = vcmp.eq.s32.totalorder %v12001_v49, 30  ;;  %vm4926_vm11 = vcmp.eq.s32.totalorder %v12001_v49, 3 }
 0x437   : > { %v4469_v25 = vsel %vm4402_vm4, %v7663_v52, %v4338_v10  ;;  %v4993_v29 = vsel %vm4926_vm11, %v7679_v14, 0.0  ;;  %vm5057_vm13 = vcmp.eq.s32.totalorder %v12001_v49, 7  ;;  %vm5188_vm1 = vcmp.eq.s32.totalorder %v12001_v49, 11 }
 0x438   : > { %v4600_v36 = vsel %vm4533_vm12, %v7666_v53, %v4469_v25  ;;  %v5124_v34 = vsel %vm5057_vm13, %v7684_v23, %v4993_v29  ;;  %vm5319_vm9 = vcmp.eq.s32.totalorder %v12001_v49, 15  ;;  %vm5450_vm10 = vcmp.eq.s32.totalorder %v12001_v49, 19 }
 0x439   : > { %v4731_v20 = vsel %vm4664_vm6, %v7671_v59, %v4600_v36  ;;  %v5255_v2 = vsel %vm5188_vm1, %v7688_v26, %v5124_v34  ;;  %vm5581_vm7 = vcmp.eq.s32.totalorder %v12001_v49, 23  ;;  %vm5712_vm8 = vcmp.eq.s32.totalorder %v12001_v49, 27 }
 0x43a   : > { %v4862_v27 = vsel %vm4795_vm14, %v7674_v63, %v4731_v20  ;;  %v5386_v54 = vsel %vm5319_vm9, %v7693_v57, %v5255_v2  ;;  %vm5843_vm5 = vcmp.eq.s32.totalorder %v12001_v49, 31  ;;  %v5974_v10 = vadd.f32 %v3814_v19, %v2766_v13 }
 0x43b   : > { %v5517_v25 = vsel %vm5450_vm10, %v7696_v58, %v5386_v54  ;;  %v1272_v29 = vmul.f32 8.0, %v11979_v17  ;;  %v12142_v36 = vsel %vm1571_vm3, %v11981_v62, 15  ;;  %v12145_v34 = vmul.f32 0.6931472, %v12022_v28  ;;  %v6230_v28 = vld [vmem:[%s7432_s28 + $0x158] sm:$0xff] }
 0x43c   : > { %v5648_v20 = vsel %vm5581_vm7, %v7699_v0, %v5517_v25  ;;  %v6038_v37 = vadd.f32 %v5974_v10, %v4862_v27  ;;  %vm758_vm0 = vcmp.lt.s32.totalorder %v11596_v22, 8  ;;  %vm1783_vm2 = vcmp.eq.s32.totalorder %v12142_v36, 0 }
 0x43d   : > { %vm1914_vm15 = vcmp.eq.s32.totalorder %v12142_v36, 4  ;;  %v5779_v49 = vsel %vm5712_vm8, %v7705_v9, %v5648_v20  ;;  %v1336_v17 = vadd.f32 0.0001, %v1272_v29  ;;  %v1850_v13 = vsel %vm1783_vm2, %v7527_v35, 0.0 }
 0x43e   : > { %vm2045_vm3 = vcmp.eq.s32.totalorder %v12142_v36, 8  ;;  %v5910_v62 = vsel %vm5843_vm5, %v7714_v11, %v5779_v49  ;;  %v1981_v19 = vsel %vm1914_vm15, %v7539_v38, %v1850_v13  ;;  %vm2176_vm4 = vcmp.eq.s32.totalorder %v12142_v36, 12 }
 0x43f   : > { %vm2307_vm12 = vcmp.eq.s32.totalorder %v12142_v36, 16  ;;  %v12159_v2 = vadd.f32 %v6038_v37, %v5910_v62  ;;  %v6943_v27 = vtrunc.f32 %v1336_v17  ;;  %v2112_v54 = vsel %vm2045_vm3, %v7548_v42, %v1981_v19 }
 0x440   : > { %vm2438_vm6 = vcmp.eq.s32.totalorder %v12142_v36, 20  ;;  %v2243_v10 = vsel %vm2176_vm4, %v7551_v43, %v2112_v54  ;;  %vm2569_vm14 = vcmp.eq.s32.totalorder %v12142_v36, 24  ;;  %vm2700_vm11 = vcmp.eq.s32.totalorder %v12142_v36, 28 }
 0x441   : > { %14384 = vst [vmem:[#allocation65_spill] sm:$0xff] %v12159_v2  ;;  %vm2831_vm13 = vcmp.eq.s32.totalorder %v12142_v36, 1  ;;  %v6422_v25 = vadd.f32 %v6230_v28, %v12159_v2  ;;  %v6944_v29 = vcvt.f32.s32 %v6943_v27  ;;  %v2374_v37 = vsel %vm2307_vm12, %v7558_v46, %v2243_v10 }
 0x442   : > { %v2898_v20 = vsel %vm2831_vm13, %v7584_v56, 0.0  ;;  %v2505_v49 = vsel %vm2438_vm6, %v7561_v47, %v2374_v37  ;;  %vm2962_vm1 = vcmp.eq.s32.totalorder %v12142_v36, 5  ;;  %vm3093_vm9 = vcmp.eq.s32.totalorder %v12142_v36, 9 }
 0x443   : > { %vm3224_vm10 = vcmp.eq.s32.totalorder %v12142_v36, 13  ;;  %6550 = vst [vmem:[%s7867_s27 + $0x158] sm:$0xff] %v6422_v25  ;;  %v1464_v17 = vadd.s32 8, %v6944_v29  ;;  %v2636_v13 = vsel %vm2569_vm14, %v7572_v51, %v2505_v49  ;;  %v3029_v62 = vsel %vm2962_vm1, %v7589_v60, %v2898_v20 }
 0x444   : > { %vm3355_vm7 = vcmp.eq.s32.totalorder %v12142_v36, 17  ;;  %v2767_v28 = vsel %vm2700_vm11, %v7581_v55, %v2636_v13  ;;  %v3160_v19 = vsel %vm3093_vm9, %v7592_v61, %v3029_v62  ;;  %vm3486_vm8 = vcmp.eq.s32.totalorder %v12142_v36, 21 }
 0x445   : > { %vm3617_vm5 = vcmp.eq.s32.totalorder %v12142_v36, 25  ;;  %vm1573_vm2 = vcmp.lt.s32.totalorder %v1464_v17, 15  ;;  %v3291_v27 = vsel %vm3224_vm10, %v7599_v3, %v3160_v19  ;;  %vm3748_vm15 = vcmp.eq.s32.totalorder %v12142_v36, 29 }
 0x446   : > { %vm3879_vm3 = vcmp.eq.s32.totalorder %v12142_v36, 2  ;;  %v1574_v54 = vsel %vm1573_vm2, %v1464_v17, 15  ;;  %v3422_v10 = vsel %vm3355_vm7, %v7605_v6, %v3291_v27  ;;  %vm4010_vm4 = vcmp.eq.s32.totalorder %v12142_v36, 6 }
 0x447   : > { %v3946_v25 = vsel %vm3879_vm3, %v7631_v21, 0.0  ;;  %v1656_v29 = vsel %vm758_vm0, %v11596_v22, %v1574_v54  ;;  %v3553_v37 = vsel %vm3486_vm8, %v7616_v12, %v3422_v10  ;;  %vm4141_vm12 = vcmp.eq.s32.totalorder %v12142_v36, 10 }
 0x448   : > { %v4077_v20 = vsel %vm4010_vm4, %v7640_v24, %v3946_v25  ;;  %v14385_v49 = vmul.u32 16, %v11961_v45  ;;  %v3684_v17 = vsel %vm3617_vm5, %v7622_v15, %v3553_v37  ;;  %vm4272_vm6 = vcmp.eq.s32.totalorder %v12142_v36, 14 }
 0x449   : > { %v4208_v62 = vsel %vm4141_vm12, %v7650_v32, %v4077_v20  ;;  %v3815_v19 = vsel %vm3748_vm15, %v7625_v16, %v3684_v17  ;;  %vm4403_vm0 = vcmp.eq.s32.totalorder %v12142_v36, 18  ;;  %vm4534_vm14 = vcmp.eq.s32.totalorder %v12142_v36, 22 }
 0x44a   : > { %v12196_v13 = vadd.s32 %v1656_v29, %v14385_v49  ;;  %v4339_v22 = vsel %vm4272_vm6, %v7656_v40, %v4208_v62  ;;  %vm4665_vm11 = vcmp.eq.s32.totalorder %v12142_v36, 26  ;;  %vm4796_vm13 = vcmp.eq.s32.totalorder %v12142_v36, 30 }
 0x44b   : > { %v4470_v27 = vsel %vm4403_vm0, %v7663_v52, %v4339_v22  ;;  %vm4927_vm1 = vcmp.eq.s32.totalorder %v12142_v36, 3  ;;  %vm5058_vm9 = vcmp.eq.s32.totalorder %v12142_v36, 7  ;;  %vm5189_vm10 = vcmp.eq.s32.totalorder %v12142_v36, 11 }
 0x44c   : > { %v4601_v45 = vsel %vm4534_vm14, %v7666_v53, %v4470_v27  ;;  %v4994_v54 = vsel %vm4927_vm1, %v7679_v14, 0.0  ;;  %vm5320_vm7 = vcmp.eq.s32.totalorder %v12142_v36, 15  ;;  %vm5451_vm8 = vcmp.eq.s32.totalorder %v12142_v36, 19 }
 0x44d   : > { %v4732_v10 = vsel %vm4665_vm11, %v7671_v59, %v4601_v45  ;;  %v5125_v25 = vsel %vm5058_vm9, %v7684_v23, %v4994_v54  ;;  %vm5582_vm5 = vcmp.eq.s32.totalorder %v12142_v36, 23  ;;  %vm5713_vm2 = vcmp.eq.s32.totalorder %v12142_v36, 27  ;;  %v6231_v54 = vld [vmem:[%s7432_s28 + $0x160] sm:$0xff] }
 0x44e   : > { %v4863_v29 = vsel %vm4796_vm13, %v7674_v63, %v4732_v10  ;;  %v5256_v37 = vsel %vm5189_vm10, %v7688_v26, %v5125_v25  ;;  %vm5844_vm15 = vcmp.eq.s32.totalorder %v12142_v36, 31  ;;  %v5975_v49 = vadd.f32 %v3815_v19, %v2767_v28 }
 0x44f   : > { %v5387_v20 = vsel %vm5320_vm7, %v7693_v57, %v5256_v37  ;;  %vm1784_vm3 = vcmp.eq.s32.totalorder %v12196_v13, 0  ;;  %vm1915_vm4 = vcmp.eq.s32.totalorder %v12196_v13, 4  ;;  %vm2046_vm12 = vcmp.eq.s32.totalorder %v12196_v13, 8 }
 0x450   : > { %v5518_v17 = vsel %vm5451_vm8, %v7696_v58, %v5387_v20  ;;  %v1851_v62 = vsel %vm1784_vm3, %v7527_v35, 0.0  ;;  %v6039_v27 = vadd.f32 %v5975_v49, %v4863_v29  ;;  %vm2177_vm6 = vcmp.eq.s32.totalorder %v12196_v13, 12 }
 0x451   : > { %v5649_v22 = vsel %vm5582_vm5, %v7699_v0, %v5518_v17  ;;  %v1982_v45 = vsel %vm1915_vm4, %v7539_v38, %v1851_v62  ;;  %vm2308_vm0 = vcmp.eq.s32.totalorder %v12196_v13, 16  ;;  %vm2439_vm14 = vcmp.eq.s32.totalorder %v12196_v13, 20 }
 0x452   : > { %v5780_v36 = vsel %vm5713_vm2, %v7705_v9, %v5649_v22  ;;  %v2113_v28 = vsel %vm2046_vm12, %v7548_v42, %v1982_v45  ;;  %vm2570_vm11 = vcmp.eq.s32.totalorder %v12196_v13, 24  ;;  %vm2701_vm13 = vcmp.eq.s32.totalorder %v12196_v13, 28 }
 0x453   : > { %v5911_v19 = vsel %vm5844_vm15, %v7714_v11, %v5780_v36  ;;  %v2244_v10 = vsel %vm2177_vm6, %v7551_v43, %v2113_v28  ;;  %vm2832_vm1 = vcmp.eq.s32.totalorder %v12196_v13, 1  ;;  %vm2963_vm9 = vcmp.eq.s32.totalorder %v12196_v13, 5 }
 0x454   : > { %v12240_v25 = vadd.f32 %v6039_v27, %v5911_v19  ;;  %v2375_v29 = vsel %vm2308_vm0, %v7558_v46, %v2244_v10  ;;  %v2899_v20 = vsel %vm2832_vm1, %v7584_v56, 0.0  ;;  %vm3094_vm10 = vcmp.eq.s32.totalorder %v12196_v13, 9 }
 0x455   : > { %v2506_v37 = vsel %vm2439_vm14, %v7561_v47, %v2375_v29  ;;  %vm3225_vm7 = vcmp.eq.s32.totalorder %v12196_v13, 13  ;;  %v3030_v62 = vsel %vm2963_vm9, %v7589_v60, %v2899_v20  ;;  %vm3356_vm8 = vcmp.eq.s32.totalorder %v12196_v13, 17 }
 0x456   : > { %14386 = vst [vmem:[#allocation66_spill] sm:$0xff] %v12240_v25  ;;  %v6423_v49 = vadd.f32 %v6231_v54, %v12240_v25  ;;  %v2637_v17 = vsel %vm2570_vm11, %v7572_v51, %v2506_v37  ;;  %v3161_v27 = vsel %vm3094_vm10, %v7592_v61, %v3030_v62  ;;  %vm3487_vm5 = vcmp.eq.s32.totalorder %v12196_v13, 21 }
 0x457   : > { %v2768_v22 = vsel %vm2701_vm13, %v7581_v55, %v2637_v17  ;;  %vm3618_vm2 = vcmp.eq.s32.totalorder %v12196_v13, 25  ;;  %v3292_v45 = vsel %vm3225_vm7, %v7599_v3, %v3161_v27  ;;  %vm3749_vm15 = vcmp.eq.s32.totalorder %v12196_v13, 29 }
 0x458   : > { %6551 = vst [vmem:[%s7867_s27 + $0x160] sm:$0xff] %v6423_v49  ;;  %vm3880_vm3 = vcmp.eq.s32.totalorder %v12196_v13, 2  ;;  %vm4011_vm4 = vcmp.eq.s32.totalorder %v12196_v13, 6  ;;  %v3423_v36 = vsel %vm3356_vm8, %v7605_v6, %v3292_v45  ;;  %vm4142_vm12 = vcmp.eq.s32.totalorder %v12196_v13, 10 }
 0x459   : > { %v3947_v28 = vsel %vm3880_vm3, %v7631_v21, 0.0  ;;  %vm4273_vm6 = vcmp.eq.s32.totalorder %v12196_v13, 14  ;;  %v3554_v19 = vsel %vm3487_vm5, %v7616_v12, %v3423_v36  ;;  %vm4404_vm0 = vcmp.eq.s32.totalorder %v12196_v13, 18 }
 0x45a   : > { %v4078_v54 = vsel %vm4011_vm4, %v7640_v24, %v3947_v28  ;;  %vm4535_vm14 = vcmp.eq.s32.totalorder %v12196_v13, 22  ;;  %v3685_v10 = vsel %vm3618_vm2, %v7622_v15, %v3554_v19  ;;  %vm4666_vm11 = vcmp.eq.s32.totalorder %v12196_v13, 26 }
 0x45b   : > { %v4209_v29 = vsel %vm4142_vm12, %v7650_v32, %v4078_v54  ;;  %vm4797_vm13 = vcmp.eq.s32.totalorder %v12196_v13, 30  ;;  %v3816_v37 = vsel %vm3749_vm15, %v7625_v16, %v3685_v10  ;;  %vm4928_vm1 = vcmp.eq.s32.totalorder %v12196_v13, 3 }
 0x45c   : > { %v4340_v20 = vsel %vm4273_vm6, %v7656_v40, %v4209_v29  ;;  %vm5059_vm9 = vcmp.eq.s32.totalorder %v12196_v13, 7  ;;  %vm440_vm10 = vcmp.lt.s32.totalorder %v11945_v7, 0  ;;  %v4995_v17 = vsel %vm4928_vm1, %v7679_v14, 0.0 }
 0x45d   : > { %v4471_v49 = vsel %vm4404_vm0, %v7663_v52, %v4340_v20  ;;  %vm5190_vm7 = vcmp.eq.s32.totalorder %v12196_v13, 11  ;;  %vm5321_vm8 = vcmp.eq.s32.totalorder %v12196_v13, 15  ;;  %v5126_v27 = vsel %vm5059_vm9, %v7684_v23, %v4995_v17 }
 0x45e   : > { %v4602_v62 = vsel %vm4535_vm14, %v7666_v53, %v4471_v49  ;;  %vm5452_vm5 = vcmp.eq.s32.totalorder %v12196_v13, 19  ;;  %v1018_v45 = vmul.f32 0.125, %v11983_v33  ;;  %v5257_v28 = vsel %vm5190_vm7, %v7688_v26, %v5126_v27 }
 0x45f   : > { %v4733_v36 = vsel %vm4666_vm11, %v7671_v59, %v4602_v62  ;;  %vm5583_vm2 = vcmp.eq.s32.totalorder %v12196_v13, 23  ;;  %vm5714_vm15 = vcmp.eq.s32.totalorder %v12196_v13, 27  ;;  %v5388_v54 = vsel %vm5321_vm8, %v7693_v57, %v5257_v28 }
 0x460   : > { %v4864_v19 = vsel %vm4797_vm13, %v7674_v63, %v4733_v36  ;;  %v5976_v10 = vadd.f32 %v3816_v37, %v2768_v22  ;;  %v5519_v33 = vsel %vm5452_vm5, %v7696_v58, %v5388_v54  ;;  %vm5845_vm3 = vcmp.eq.s32.totalorder %v12196_v13, 31  ;;  %v6232_v13 = vld [vmem:[%s7432_s28 + $0x168] sm:$0xff] }
 0x461   : > { %v1209_v29 = vmul.f32 0.36067376, %v12145_v34  ;;  %vm875_vm4 = vcmp.gt.s32.totalorder %v11990_v5, 1  ;;  %v5650_v20 = vsel %vm5583_vm2, %v7699_v0, %v5519_v33  ;;  %7172 = vlog2.f32 %v1018_v45 }
 0x462   : > { %v6040_v49 = vadd.f32 %v5976_v10, %v4864_v19  ;;  %v876_v17 = vsel %vm875_vm4, %v11990_v5, 1  ;;  %v5781_v62 = vsel %vm5714_vm15, %v7705_v9, %v5650_v20  ;;  %vm442_vm12 = vcmp.lt.s32.totalorder %v11968_v8, 0 }
 0x463   : > { %v1273_v27 = vmul.f32 8.0, %v1209_v29  ;;  %v954_v22 = vcvt.s32.f32 %v876_v17  ;;  %v5912_v37 = vsel %vm5845_vm3, %v7714_v11, %v5781_v62  ;;  %v380_v34 = vsub.s32 %v11977_v44, %v7449_v4 }
 0x464   : > { %v283_v36 = vadd.s32 208, %v7441_v1  ;;  %v12311_v28 = vadd.f32 %v6040_v49, %v5912_v37  ;;  %v955_v19 = vcvt.s32.f32 %v379_v39  ;;  %v12319_v8 = vsel %vm440_vm10, 1, %v14381_v48 }
 0x465   : > { %v1337_v45 = vadd.f32 0.0001, %v1273_v27  ;;  %v1019_v54 = vmul.f32 0.125, %v954_v22  ;;  %v687_v10 = vsub.s32 0, %v380_v34  ;;  %v12322_v17 = vsel %vm442_vm12, 1, %v14381_v48 }
 0x466   : > { %14387 = vst [vmem:[#allocation67_spill] sm:$0xff] %v12311_v28  ;;  %v381_v33 = vsub.s32 %v283_v36, %v14367_v30  ;;  %v382_v29 = vsub.s32 %v283_v36, %v7449_v4  ;;  %v6424_v20 = vadd.f32 %v6232_v13, %v12311_v28  ;;  %vm444_vm6 = vcmp.lt.s32.totalorder %v380_v34, 0  ;;  %v7171_v13 = vpop.eup %7170 }
 0x467   : > { %v6945_v44 = vtrunc.f32 %v1337_v45  ;;  %v12324_v49 = vmin.u32 %v687_v10, %v380_v34  ;;  %v1020_v62 = vmul.f32 0.125, %v955_v19  ;;  %v12327_v27 = vadd.s32 216, %v7441_v1 }
 0x468   : > { %6552 = vst [vmem:[%s7867_s27 + $0x168] sm:$0xff] %v6424_v20  ;;  %vm446_vm0 = vcmp.lt.s32.totalorder %v382_v29, 0  ;;  %v691_v39 = vsub.s32 0, %v382_v29  ;;  %v957_v37 = vcvt.s32.f32 %v381_v33  ;;  %7174 = vlog2.f32 %v1019_v54 }
 0x469   : > { %v6946_v22 = vcvt.f32.s32 %v6945_v44  ;;  %vm879_vm14 = vcmp.gt.s32.totalorder %v12324_v49, 1  ;;  %v1129_v45 = vmul.f32 0.6931472, %v7171_v13  ;;  %v12335_v19 = vsel %vm444_vm6, 1, %v14381_v48 }
 0x46a   : > { %v880_v20 = vsel %vm879_vm14, %v12324_v49, 1  ;;  %7176 = vlog2.f32 %v1020_v62  ;;  %v12339_v33 = vsel %vm446_vm0, 1, %v14381_v48  ;;  %v1022_v7 = vmul.f32 0.125, %v957_v37 }
 0x46b   : > { %v1465_v10 = vadd.s32 8, %v6946_v22  ;;  %v7173_v44 = vpop.eup %7172  ;;  %v956_v28 = vcvt.s32.f32 %v880_v20  ;;  %v1210_v25 = vmul.f32 0.36067376, %v1129_v45  ;;  %v12341_v54 = vmin.u32 %v691_v39, %v382_v29 }
 0x46c   : > { %v12345_v22 = vsub.s32 %v12327_v27, %v7449_v4  ;;  %v12349_v13 = vmul.f32 0.6931472, %v7173_v44  ;;  %7178 = vlog2.f32 %v1022_v7  ;;  %vm760_vm10 = vcmp.lt.s32.totalorder %v11964_v41, 8 }
 0x46d   : > { %vm1575_vm11 = vcmp.lt.s32.totalorder %v1465_v10, 15  ;;  %v12351_v36 = vmul.f32 0.125, %v956_v28  ;;  %v1274_v62 = vmul.f32 8.0, %v1210_v25 }
 0x46e   : > { %v12347_v34 = vsel %vm1575_vm11, %v1465_v10, 15 }
 0x46f   : > { %vm1785_vm13 = vcmp.eq.s32.totalorder %v12347_v34, 0  ;;  %vm1916_vm1 = vcmp.eq.s32.totalorder %v12347_v34, 4  ;;  %vm2047_vm9 = vcmp.eq.s32.totalorder %v12347_v34, 8  ;;  %vm2178_vm7 = vcmp.eq.s32.totalorder %v12347_v34, 12 }
 0x470   : > { %v1852_v29 = vsel %vm1785_vm13, %v7527_v35, 0.0  ;;  %vm2309_vm8 = vcmp.eq.s32.totalorder %v12347_v34, 16  ;;  %vm2440_vm5 = vcmp.eq.s32.totalorder %v12347_v34, 20  ;;  %v1338_v28 = vadd.f32 0.0001, %v1274_v62 }
 0x471   : > { %v1983_v39 = vsel %vm1916_vm1, %v7539_v38, %v1852_v29  ;;  %vm2571_vm2 = vcmp.eq.s32.totalorder %v12347_v34, 24  ;;  %vm2702_vm15 = vcmp.eq.s32.totalorder %v12347_v34, 28  ;;  %vm2833_vm3 = vcmp.eq.s32.totalorder %v12347_v34, 1 }
 0x472   : > { %v2114_v25 = vsel %vm2047_vm9, %v7548_v42, %v1983_v39  ;;  %vm2964_vm4 = vcmp.eq.s32.totalorder %v12347_v34, 5  ;;  %vm3095_vm12 = vcmp.eq.s32.totalorder %v12347_v34, 9  ;;  %v6947_v37 = vtrunc.f32 %v1338_v28  ;;  %v12371_v10 = vpop.eup %7174 }
 0x473   : > { %v2245_v7 = vsel %vm2178_vm7, %v7551_v43, %v2114_v25  ;;  %v2900_v45 = vsel %vm2833_vm3, %v7584_v56, 0.0  ;;  %vm3226_vm6 = vcmp.eq.s32.totalorder %v12347_v34, 13  ;;  %vm3357_vm0 = vcmp.eq.s32.totalorder %v12347_v34, 17 }
 0x474   : > { %v2376_v20 = vsel %vm2309_vm8, %v7558_v46, %v2245_v7  ;;  %v3031_v44 = vsel %vm2964_vm4, %v7589_v60, %v2900_v45  ;;  %vm3488_vm14 = vcmp.eq.s32.totalorder %v12347_v34, 21  ;;  %v6948_v62 = vcvt.f32.s32 %v6947_v37  ;;  %v12382_v39 = vpop.eup %7176 }
 0x475   : > { %v2507_v29 = vsel %vm2440_vm5, %v7561_v47, %v2376_v20  ;;  %v3162_v28 = vsel %vm3095_vm12, %v7592_v61, %v3031_v44  ;;  %vm3619_vm11 = vcmp.eq.s32.totalorder %v12347_v34, 25  ;;  %vm3750_vm13 = vcmp.eq.s32.totalorder %v12347_v34, 29 }
 0x476   : > { %v2638_v25 = vsel %vm2571_vm2, %v7572_v51, %v2507_v29  ;;  %v3293_v7 = vsel %vm3226_vm6, %v7599_v3, %v3162_v28  ;;  %vm3881_vm1 = vcmp.eq.s32.totalorder %v12347_v34, 2  ;;  %v1466_v37 = vadd.s32 8, %v6948_v62  ;;  %v12395_v2 = vpop.eup %7178 }
 0x477   : > { %v2769_v45 = vsel %vm2702_vm15, %v7581_v55, %v2638_v25  ;;  %v3424_v20 = vsel %vm3357_vm0, %v7605_v6, %v3293_v7  ;;  %v3948_v44 = vsel %vm3881_vm1, %v7631_v21, 0.0  ;;  %vm4012_vm9 = vcmp.eq.s32.totalorder %v12347_v34, 6 }
 0x478   : > { %v3555_v50 = vsel %vm3488_vm14, %v7616_v12, %v3424_v20  ;;  %vm4143_vm7 = vcmp.eq.s32.totalorder %v12347_v34, 10  ;;  %vm4274_vm8 = vcmp.eq.s32.totalorder %v12347_v34, 14  ;;  %vm1577_vm5 = vcmp.lt.s32.totalorder %v1466_v37, 15 }
 0x479   : > { %v3686_v62 = vsel %vm3619_vm11, %v7622_v15, %v3555_v50  ;;  %v4079_v29 = vsel %vm4012_vm9, %v7640_v24, %v3948_v44  ;;  %vm4405_vm2 = vcmp.eq.s32.totalorder %v12347_v34, 18  ;;  %v1578_v28 = vsel %vm1577_vm5, %v1466_v37, 15 }
 0x47a   : > { %v3817_v25 = vsel %vm3750_vm13, %v7625_v16, %v3686_v62  ;;  %v4210_v7 = vsel %vm4143_vm7, %v7650_v32, %v4079_v29  ;;  %vm4536_vm15 = vcmp.eq.s32.totalorder %v12347_v34, 22  ;;  %v1658_v20 = vsel %vm760_vm10, %v11964_v41, %v1578_v28 }
 0x47b   : > { %v4341_v31 = vsel %vm4274_vm8, %v7656_v40, %v4210_v7  ;;  %vm4667_vm3 = vcmp.eq.s32.totalorder %v12347_v34, 26  ;;  %vm4798_vm4 = vcmp.eq.s32.totalorder %v12347_v34, 30  ;;  %v14388_v50 = vmul.u32 16, %v12319_v8 }
 0x47c   : > { %v4472_v44 = vsel %vm4405_vm2, %v7663_v52, %v4341_v31  ;;  %vm4929_vm12 = vcmp.eq.s32.totalorder %v12347_v34, 3  ;;  %vm5060_vm6 = vcmp.eq.s32.totalorder %v12347_v34, 7  ;;  %vm5191_vm10 = vcmp.eq.s32.totalorder %v12347_v34, 11 }
 0x47d   : > { %v12419_v37 = vadd.s32 %v1658_v20, %v14388_v50  ;;  %v4603_v62 = vsel %vm4536_vm15, %v7666_v53, %v4472_v44  ;;  %v4996_v41 = vsel %vm4929_vm12, %v7679_v14, 0.0  ;;  %vm5322_vm0 = vcmp.eq.s32.totalorder %v12347_v34, 15 }
 0x47e   : > { %v4734_v29 = vsel %vm4667_vm3, %v7671_v59, %v4603_v62  ;;  %v5127_v8 = vsel %vm5060_vm6, %v7684_v23, %v4996_v41  ;;  %vm5453_vm14 = vcmp.eq.s32.totalorder %v12347_v34, 19  ;;  %vm5584_vm11 = vcmp.eq.s32.totalorder %v12347_v34, 23 }
 0x47f   : > { %v4865_v31 = vsel %vm4798_vm4, %v7674_v63, %v4734_v29  ;;  %v5258_v28 = vsel %vm5191_vm10, %v7688_v26, %v5127_v8  ;;  %vm5715_vm13 = vcmp.eq.s32.totalorder %v12347_v34, 27  ;;  %vm5846_vm1 = vcmp.eq.s32.totalorder %v12347_v34, 31 }
 0x480   : > { %v5389_v7 = vsel %vm5322_vm0, %v7693_v57, %v5258_v28  ;;  %v5977_v20 = vadd.f32 %v3817_v25, %v2769_v45  ;;  %vm1786_vm9 = vcmp.eq.s32.totalorder %v12419_v37, 0  ;;  %vm1917_vm7 = vcmp.eq.s32.totalorder %v12419_v37, 4  ;;  %v6233_v28 = vld [vmem:[%s7432_s28 + $0x170] sm:$0xff] }
 0x481   : > { %v5520_v50 = vsel %vm5453_vm14, %v7696_v58, %v5389_v7  ;;  %v1853_v44 = vsel %vm1786_vm9, %v7527_v35, 0.0  ;;  %vm2048_vm8 = vcmp.eq.s32.totalorder %v12419_v37, 8  ;;  %vm2179_vm5 = vcmp.eq.s32.totalorder %v12419_v37, 12 }
 0x482   : > { %v5651_v62 = vsel %vm5584_vm11, %v7699_v0, %v5520_v50  ;;  %v6041_v41 = vadd.f32 %v5977_v20, %v4865_v31  ;;  %v1984_v29 = vsel %vm1917_vm7, %v7539_v38, %v1853_v44  ;;  %vm2310_vm2 = vcmp.eq.s32.totalorder %v12419_v37, 16 }
 0x483   : > { %v5782_v45 = vsel %vm5715_vm13, %v7705_v9, %v5651_v62  ;;  %v2115_v25 = vsel %vm2048_vm8, %v7548_v42, %v1984_v29  ;;  %vm2441_vm15 = vcmp.eq.s32.totalorder %v12419_v37, 20  ;;  %vm2572_vm3 = vcmp.eq.s32.totalorder %v12419_v37, 24 }
 0x484   : > { %v5913_v8 = vsel %vm5846_vm1, %v7714_v11, %v5782_v45  ;;  %v2246_v7 = vsel %vm2179_vm5, %v7551_v43, %v2115_v25  ;;  %vm2703_vm4 = vcmp.eq.s32.totalorder %v12419_v37, 28  ;;  %vm2834_vm12 = vcmp.eq.s32.totalorder %v12419_v37, 1 }
 0x485   : > { %v12457_v31 = vadd.f32 %v6041_v41, %v5913_v8  ;;  %v2377_v20 = vsel %vm2310_vm2, %v7558_v46, %v2246_v7  ;;  %v2901_v50 = vsel %vm2834_vm12, %v7584_v56, 0.0  ;;  %vm2965_vm6 = vcmp.eq.s32.totalorder %v12419_v37, 5 }
 0x486   : > { %v2508_v44 = vsel %vm2441_vm15, %v7561_v47, %v2377_v20  ;;  %v3032_v34 = vsel %vm2965_vm6, %v7589_v60, %v2901_v50  ;;  %vm3096_vm10 = vcmp.eq.s32.totalorder %v12419_v37, 9  ;;  %vm3227_vm0 = vcmp.eq.s32.totalorder %v12419_v37, 13 }
 0x487   : > { %14389 = vst [vmem:[#allocation68_spill] sm:$0xff] %v12457_v31  ;;  %v6425_v62 = vadd.f32 %v6233_v28, %v12457_v31  ;;  %v2639_v41 = vsel %vm2572_vm3, %v7572_v51, %v2508_v44  ;;  %v3163_v29 = vsel %vm3096_vm10, %v7592_v61, %v3032_v34  ;;  %vm3358_vm14 = vcmp.eq.s32.totalorder %v12419_v37, 17 }
 0x488   : > { %v2770_v45 = vsel %vm2703_vm4, %v7581_v55, %v2639_v41  ;;  %v3294_v25 = vsel %vm3227_vm0, %v7599_v3, %v3163_v29  ;;  %vm3489_vm11 = vcmp.eq.s32.totalorder %v12419_v37, 21  ;;  %vm3620_vm13 = vcmp.eq.s32.totalorder %v12419_v37, 25 }
 0x489   : > { %vm883_vm1 = vcmp.gt.s32.totalorder %v12341_v54, 1  ;;  %6553 = vst [vmem:[%s7867_s27 + $0x170] sm:$0xff] %v6425_v62  ;;  %v3425_v8 = vsel %vm3358_vm14, %v7605_v6, %v3294_v25  ;;  %vm3751_vm9 = vcmp.eq.s32.totalorder %v12419_v37, 29  ;;  %vm3882_vm7 = vcmp.eq.s32.totalorder %v12419_v37, 2 }
 0x48a   : > { %vm4013_vm8 = vcmp.eq.s32.totalorder %v12419_v37, 6  ;;  %v3556_v28 = vsel %vm3489_vm11, %v7616_v12, %v3425_v8  ;;  %v3949_v7 = vsel %vm3882_vm7, %v7631_v21, 0.0  ;;  %vm4144_vm5 = vcmp.eq.s32.totalorder %v12419_v37, 10 }
 0x48b   : > { %vm4275_vm2 = vcmp.eq.s32.totalorder %v12419_v37, 14  ;;  %v3687_v20 = vsel %vm3620_vm13, %v7622_v15, %v3556_v28  ;;  %v4080_v50 = vsel %vm4013_vm8, %v7640_v24, %v3949_v7  ;;  %vm4406_vm15 = vcmp.eq.s32.totalorder %v12419_v37, 18 }
 0x48c   : > { %vm4537_vm3 = vcmp.eq.s32.totalorder %v12419_v37, 22  ;;  %v3818_v44 = vsel %vm3751_vm9, %v7625_v16, %v3687_v20  ;;  %v4211_v34 = vsel %vm4144_vm5, %v7650_v32, %v4080_v50  ;;  %vm4668_vm4 = vcmp.eq.s32.totalorder %v12419_v37, 26 }
 0x48d   : > { %vm4799_vm12 = vcmp.eq.s32.totalorder %v12419_v37, 30  ;;  %v4342_v62 = vsel %vm4275_vm2, %v7656_v40, %v4211_v34  ;;  %vm4930_vm6 = vcmp.eq.s32.totalorder %v12419_v37, 3  ;;  %vm5061_vm10 = vcmp.eq.s32.totalorder %v12419_v37, 7 }
 0x48e   : > { %vm5192_vm0 = vcmp.eq.s32.totalorder %v12419_v37, 11  ;;  %v4473_v41 = vsel %vm4406_vm15, %v7663_v52, %v4342_v62  ;;  %v4997_v29 = vsel %vm4930_vm6, %v7679_v14, 0.0  ;;  %vm5323_vm14 = vcmp.eq.s32.totalorder %v12419_v37, 15 }
 0x48f   : > { %vm5454_vm11 = vcmp.eq.s32.totalorder %v12419_v37, 19  ;;  %v4604_v25 = vsel %vm4537_vm3, %v7666_v53, %v4473_v41  ;;  %v5128_v8 = vsel %vm5061_vm10, %v7684_v23, %v4997_v29  ;;  %vm5585_vm13 = vcmp.eq.s32.totalorder %v12419_v37, 23 }
 0x490   : > { %vm5716_vm9 = vcmp.eq.s32.totalorder %v12419_v37, 27  ;;  %v4735_v28 = vsel %vm4668_vm4, %v7671_v59, %v4604_v25  ;;  %v5259_v7 = vsel %vm5192_vm0, %v7688_v26, %v5128_v8  ;;  %vm5847_vm7 = vcmp.eq.s32.totalorder %v12419_v37, 31 }
 0x491   : > { %v5978_v20 = vadd.f32 %v3818_v44, %v2770_v45  ;;  %v4866_v50 = vsel %vm4799_vm12, %v7674_v63, %v4735_v28  ;;  %v5390_v34 = vsel %vm5323_vm14, %v7693_v57, %v5259_v7  ;;  %v1133_v62 = vmul.f32 0.6931472, %v12371_v10 }
 0x492   : > { %v1211_v41 = vmul.f32 0.36067376, %v12349_v13  ;;  %v5521_v29 = vsel %vm5454_vm11, %v7696_v58, %v5390_v34  ;;  %v1135_v25 = vmul.f32 0.6931472, %v12382_v39  ;;  %7180 = vlog2.f32 %v12351_v36  ;;  %v6234_v39 = vld [vmem:[%s7432_s28 + $0x178] sm:$0xff] }
 0x493   : > { %v6042_v31 = vadd.f32 %v5978_v20, %v4866_v50  ;;  %v5652_v45 = vsel %vm5585_vm13, %v7699_v0, %v5521_v29  ;;  %v1212_v44 = vmul.f32 0.36067376, %v1133_v62  ;;  %v884_v28 = vsel %vm883_vm1, %v12341_v54, 1 }
 0x494   : > { %v1275_v8 = vmul.f32 8.0, %v1211_v41  ;;  %v5783_v10 = vsel %vm5716_vm9, %v7705_v9, %v5652_v45  ;;  %v1213_v13 = vmul.f32 0.36067376, %v1135_v25  ;;  %v958_v7 = vcvt.s32.f32 %v884_v28 }
 0x495   : > { %v1139_v20 = vmul.f32 0.6931472, %v12395_v2  ;;  %v5914_v36 = vsel %vm5847_vm7, %v7714_v11, %v5783_v10  ;;  %v1276_v50 = vmul.f32 8.0, %v1212_v44  ;;  %v383_v62 = vsub.s32 %v12327_v27, %v14367_v30 }
 0x496   : > { %v1339_v34 = vadd.f32 0.0001, %v1275_v8  ;;  %v12530_v41 = vadd.f32 %v6042_v31, %v5914_v36  ;;  %v1277_v29 = vmul.f32 8.0, %v1213_v13  ;;  %v1023_v18 = vmul.f32 0.125, %v958_v7 }
 0x497   : > { %v1215_v45 = vmul.f32 0.36067376, %v1139_v20  ;;  %vm762_vm1 = vcmp.lt.s32.totalorder %v11990_v5, 8  ;;  %v1340_v25 = vadd.f32 0.0001, %v1276_v50  ;;  %v695_v28 = vsub.s32 0, %v12345_v22 }
 0x498   : > { %14390 = vst [vmem:[#allocation69_spill] sm:$0xff] %v12530_v41  ;;  %v6949_v2 = vtrunc.f32 %v1339_v34  ;;  %v6426_v37 = vadd.f32 %v6234_v39, %v12530_v41  ;;  %v572_v44 = vmul.u32 16, %v12335_v19  ;;  %v1341_v8 = vadd.f32 0.0001, %v1277_v29 }
 0x499   : > { %v1279_v10 = vmul.f32 8.0, %v1215_v45  ;;  %v6951_v27 = vtrunc.f32 %v1340_v25  ;;  %v12538_v13 = vmin.u32 %v695_v28, %v12345_v22  ;;  %7182 = vlog2.f32 %v1023_v18 }
 0x49a   : > { %v6950_v48 = vcvt.f32.s32 %v6949_v2  ;;  %6554 = vst [vmem:[%s7867_s27 + $0x178] sm:$0xff] %v6426_v37  ;;  %v6953_v7 = vtrunc.f32 %v1341_v8  ;;  %v959_v36 = vcvt.s32.f32 %v383_v62  ;;  %v12543_v39 = vadd.s32 224, %v7441_v1 }
 0x49b   : > { %v1343_v20 = vadd.f32 0.0001, %v1279_v10  ;;  %v6952_v50 = vcvt.f32.s32 %v6951_v27  ;;  %vm887_vm8 = vcmp.gt.s32.totalorder %v12538_v13, 1 }
 0x49c   : > { %v1467_v34 = vadd.s32 8, %v6950_v48  ;;  %v7181_v29 = vpop.eup %7180  ;;  %v6954_v45 = vcvt.f32.s32 %v6953_v7  ;;  %v12546_v2 = vsel %vm887_vm8, %v12538_v13, 1  ;;  %v1024_v28 = vmul.f32 0.125, %v959_v36 }
 0x49d   : > { %v6957_v25 = vtrunc.f32 %v1343_v20  ;;  %v1468_v31 = vadd.s32 8, %v6952_v50  ;;  %v12548_v37 = vmul.f32 0.6931472, %v7181_v29  ;;  %v14391_v36 = vmul.u32 16, %v12322_v17 }
 0x49e   : > { %vm1579_vm5 = vcmp.lt.s32.totalorder %v1467_v34, 15  ;;  %v12553_v48 = vadd.s32 8, %v6954_v45  ;;  %7184 = vlog2.f32 %v1024_v28 }
 0x49f   : > { %v12551_v62 = vsel %vm1579_vm5, %v1467_v34, 15  ;;  %v12555_v8 = vcvt.f32.s32 %v6957_v25  ;;  %vm1581_vm2 = vcmp.lt.s32.totalorder %v1468_v31, 15 }
 0x4a0   : > { %vm1787_vm15 = vcmp.eq.s32.totalorder %v12551_v62, 0  ;;  %vm1918_vm3 = vcmp.eq.s32.totalorder %v12551_v62, 4  ;;  %vm2049_vm4 = vcmp.eq.s32.totalorder %v12551_v62, 8  ;;  %v1582_v10 = vsel %vm1581_vm2, %v1468_v31, 15 }
 0x4a1   : > { %v1854_v27 = vsel %vm1787_vm15, %v7527_v35, 0.0  ;;  %vm2180_vm12 = vcmp.eq.s32.totalorder %v12551_v62, 12  ;;  %vm2311_vm6 = vcmp.eq.s32.totalorder %v12551_v62, 16  ;;  %v1660_v7 = vsel %vm762_vm1, %v11990_v5, %v1582_v10 }
 0x4a2   : > { %v1985_v20 = vsel %vm1918_vm3, %v7539_v38, %v1854_v27  ;;  %vm2442_vm10 = vcmp.eq.s32.totalorder %v12551_v62, 20  ;;  %vm2573_vm0 = vcmp.eq.s32.totalorder %v12551_v62, 24  ;;  %v12571_v50 = vadd.s32 %v1660_v7, %v14391_v36 }
 0x4a3   : > { %v2116_v31 = vsel %vm2049_vm4, %v7548_v42, %v1985_v20  ;;  %vm2704_vm14 = vcmp.eq.s32.totalorder %v12551_v62, 28  ;;  %vm2835_vm11 = vcmp.eq.s32.totalorder %v12551_v62, 1  ;;  %vm2966_vm13 = vcmp.eq.s32.totalorder %v12551_v62, 5  ;;  %v12580_v29 = vpop.eup %7182 }
 0x4a4   : > { %v2247_v34 = vsel %vm2180_vm12, %v7551_v43, %v2116_v31  ;;  %v2902_v5 = vsel %vm2835_vm11, %v7584_v56, 0.0  ;;  %vm3097_vm9 = vcmp.eq.s32.totalorder %v12551_v62, 9  ;;  %vm3228_vm7 = vcmp.eq.s32.totalorder %v12551_v62, 13 }
 0x4a5   : > { %v2378_v17 = vsel %vm2311_vm6, %v7558_v46, %v2247_v34  ;;  %v3033_v45 = vsel %vm2966_vm13, %v7589_v60, %v2902_v5  ;;  %vm3359_vm1 = vcmp.eq.s32.totalorder %v12551_v62, 17  ;;  %vm3490_vm8 = vcmp.eq.s32.totalorder %v12551_v62, 21 }
 0x4a6   : > { %v2509_v25 = vsel %vm2442_vm10, %v7561_v47, %v2378_v17  ;;  %v3164_v28 = vsel %vm3097_vm9, %v7592_v61, %v3033_v45  ;;  %vm3621_vm5 = vcmp.eq.s32.totalorder %v12551_v62, 25  ;;  %vm3752_vm2 = vcmp.eq.s32.totalorder %v12551_v62, 29 }
 0x4a7   : > { %v2640_v10 = vsel %vm2573_vm0, %v7572_v51, %v2509_v25  ;;  %v3295_v27 = vsel %vm3228_vm7, %v7599_v3, %v3164_v28  ;;  %vm3883_vm15 = vcmp.eq.s32.totalorder %v12551_v62, 2  ;;  %vm4014_vm3 = vcmp.eq.s32.totalorder %v12551_v62, 6 }
 0x4a8   : > { %v2771_v7 = vsel %vm2704_vm14, %v7581_v55, %v2640_v10  ;;  %v3426_v20 = vsel %vm3359_vm1, %v7605_v6, %v3295_v27  ;;  %v3950_v36 = vsel %vm3883_vm15, %v7631_v21, 0.0  ;;  %v12602_v31 = vpop.eup %7184  ;;  %vm4145_vm4 = vcmp.eq.s32.totalorder %v12551_v62, 10 }
 0x4a9   : > { %v3557_v34 = vsel %vm3490_vm8, %v7616_v12, %v3426_v20  ;;  %v4081_v5 = vsel %vm4014_vm3, %v7640_v24, %v3950_v36  ;;  %vm4276_vm12 = vcmp.eq.s32.totalorder %v12551_v62, 14  ;;  %vm4407_vm6 = vcmp.eq.s32.totalorder %v12551_v62, 18 }
 0x4aa   : > { %v3688_v17 = vsel %vm3621_vm5, %v7622_v15, %v3557_v34  ;;  %v4212_v45 = vsel %vm4145_vm4, %v7650_v32, %v4081_v5  ;;  %vm4538_vm10 = vcmp.eq.s32.totalorder %v12551_v62, 22  ;;  %vm4669_vm0 = vcmp.eq.s32.totalorder %v12551_v62, 26 }
 0x4ab   : > { %v3819_v25 = vsel %vm3752_vm2, %v7625_v16, %v3688_v17  ;;  %v4343_v28 = vsel %vm4276_vm12, %v7656_v40, %v4212_v45  ;;  %vm4800_vm14 = vcmp.eq.s32.totalorder %v12551_v62, 30  ;;  %vm4931_vm11 = vcmp.eq.s32.totalorder %v12551_v62, 3 }
 0x4ac   : > { %v4474_v10 = vsel %vm4407_vm6, %v7663_v52, %v4343_v28  ;;  %vm5062_vm13 = vcmp.eq.s32.totalorder %v12551_v62, 7  ;;  %vm5193_vm9 = vcmp.eq.s32.totalorder %v12551_v62, 11  ;;  %v4998_v20 = vsel %vm4931_vm11, %v7679_v14, 0.0 }
 0x4ad   : > { %v4605_v27 = vsel %vm4538_vm10, %v7666_v53, %v4474_v10  ;;  %vm5324_vm7 = vcmp.eq.s32.totalorder %v12551_v62, 15  ;;  %vm5455_vm1 = vcmp.eq.s32.totalorder %v12551_v62, 19  ;;  %v5129_v34 = vsel %vm5062_vm13, %v7684_v23, %v4998_v20 }
 0x4ae   : > { %v4736_v36 = vsel %vm4669_vm0, %v7671_v59, %v4605_v27  ;;  %vm5586_vm8 = vcmp.eq.s32.totalorder %v12551_v62, 23  ;;  %vm5717_vm5 = vcmp.eq.s32.totalorder %v12551_v62, 27  ;;  %v5260_v17 = vsel %vm5193_vm9, %v7688_v26, %v5129_v34 }
 0x4af   : > { %v4867_v5 = vsel %vm4800_vm14, %v7674_v63, %v4736_v36  ;;  %vm5848_vm2 = vcmp.eq.s32.totalorder %v12551_v62, 31  ;;  %v5979_v45 = vadd.f32 %v3819_v25, %v2771_v7  ;;  %v5391_v28 = vsel %vm5324_vm7, %v7693_v57, %v5260_v17  ;;  %v6235_v17 = vld [vmem:[%s7432_s28 + $0x180] sm:$0xff] }
 0x4b0   : > { %vm1788_vm15 = vcmp.eq.s32.totalorder %v12571_v50, 0  ;;  %vm1919_vm3 = vcmp.eq.s32.totalorder %v12571_v50, 4  ;;  %vm2050_vm4 = vcmp.eq.s32.totalorder %v12571_v50, 8  ;;  %v5522_v10 = vsel %vm5455_vm1, %v7696_v58, %v5391_v28 }
 0x4b1   : > { %v6043_v27 = vadd.f32 %v5979_v45, %v4867_v5  ;;  %v1855_v20 = vsel %vm1788_vm15, %v7527_v35, 0.0  ;;  %vm2181_vm12 = vcmp.eq.s32.totalorder %v12571_v50, 12  ;;  %v5653_v36 = vsel %vm5586_vm8, %v7699_v0, %v5522_v10 }
 0x4b2   : > { %v1986_v7 = vsel %vm1919_vm3, %v7539_v38, %v1855_v20  ;;  %vm2312_vm6 = vcmp.eq.s32.totalorder %v12571_v50, 16  ;;  %vm2443_vm10 = vcmp.eq.s32.totalorder %v12571_v50, 20  ;;  %v5784_v25 = vsel %vm5717_vm5, %v7705_v9, %v5653_v36 }
 0x4b3   : > { %v2117_v34 = vsel %vm2050_vm4, %v7548_v42, %v1986_v7  ;;  %vm2574_vm0 = vcmp.eq.s32.totalorder %v12571_v50, 24  ;;  %vm2705_vm14 = vcmp.eq.s32.totalorder %v12571_v50, 28  ;;  %v5915_v5 = vsel %vm5848_vm2, %v7714_v11, %v5784_v25 }
 0x4b4   : > { %v2248_v45 = vsel %vm2181_vm12, %v7551_v43, %v2117_v34  ;;  %vm2836_vm11 = vcmp.eq.s32.totalorder %v12571_v50, 1  ;;  %vm2967_vm13 = vcmp.eq.s32.totalorder %v12571_v50, 5  ;;  %v12655_v28 = vadd.f32 %v6043_v27, %v5915_v5 }
 0x4b5   : > { %v2379_v10 = vsel %vm2312_vm6, %v7558_v46, %v2248_v45  ;;  %v2903_v20 = vsel %vm2836_vm11, %v7584_v56, 0.0  ;;  %vm3098_vm9 = vcmp.eq.s32.totalorder %v12571_v50, 9  ;;  %vm3229_vm7 = vcmp.eq.s32.totalorder %v12571_v50, 13 }
 0x4b6   : > { %14392 = vst [vmem:[#allocation70_spill] sm:$0xff] %v12655_v28  ;;  %v2510_v36 = vsel %vm2443_vm10, %v7561_v47, %v2379_v10  ;;  %v3034_v62 = vsel %vm2967_vm13, %v7589_v60, %v2903_v20  ;;  %vm3360_vm1 = vcmp.eq.s32.totalorder %v12571_v50, 17  ;;  %v6427_v7 = vadd.f32 %v6235_v17, %v12655_v28  ;;  %v6258_v28 = vld [vmem:[%s7432_s28 + $0x238] sm:$0xff] }
 0x4b7   : > { %v2641_v27 = vsel %vm2574_vm0, %v7572_v51, %v2510_v36  ;;  %v3165_v25 = vsel %vm3098_vm9, %v7592_v61, %v3034_v62  ;;  %vm3491_vm8 = vcmp.eq.s32.totalorder %v12571_v50, 21  ;;  %vm3622_vm5 = vcmp.eq.s32.totalorder %v12571_v50, 25 }
 0x4b8   : > { %v2772_v34 = vsel %vm2705_vm14, %v7581_v55, %v2641_v27  ;;  %v3296_v5 = vsel %vm3229_vm7, %v7599_v3, %v3165_v25  ;;  %vm3753_vm2 = vcmp.eq.s32.totalorder %v12571_v50, 29  ;;  %6555 = vst [vmem:[%s7867_s27 + $0x180] sm:$0xff] %v6427_v7  ;;  %vm3884_vm15 = vcmp.eq.s32.totalorder %v12571_v50, 2 }
 0x4b9   : > { %v3427_v17 = vsel %vm3360_vm1, %v7605_v6, %v3296_v5  ;;  %vm4015_vm3 = vcmp.eq.s32.totalorder %v12571_v50, 6  ;;  %vm4146_vm4 = vcmp.eq.s32.totalorder %v12571_v50, 10  ;;  %v3951_v10 = vsel %vm3884_vm15, %v7631_v21, 0.0 }
 0x4ba   : > { %v3558_v45 = vsel %vm3491_vm8, %v7616_v12, %v3427_v17  ;;  %vm4277_vm12 = vcmp.eq.s32.totalorder %v12571_v50, 14  ;;  %vm4408_vm6 = vcmp.eq.s32.totalorder %v12571_v50, 18  ;;  %v4082_v36 = vsel %vm4015_vm3, %v7640_v24, %v3951_v10 }
 0x4bb   : > { %v3689_v20 = vsel %vm3622_vm5, %v7622_v15, %v3558_v45  ;;  %vm4539_vm10 = vcmp.eq.s32.totalorder %v12571_v50, 22  ;;  %vm4670_vm0 = vcmp.eq.s32.totalorder %v12571_v50, 26  ;;  %v4213_v7 = vsel %vm4146_vm4, %v7650_v32, %v4082_v36 }
 0x4bc   : > { %v3820_v62 = vsel %vm3753_vm2, %v7625_v16, %v3689_v20  ;;  %vm4801_vm14 = vcmp.eq.s32.totalorder %v12571_v50, 30  ;;  %vm4932_vm11 = vcmp.eq.s32.totalorder %v12571_v50, 3  ;;  %v4344_v27 = vsel %vm4277_vm12, %v7656_v40, %v4213_v7 }
 0x4bd   : > { %v4999_v25 = vsel %vm4932_vm11, %v7679_v14, 0.0  ;;  %vm5063_vm13 = vcmp.eq.s32.totalorder %v12571_v50, 7  ;;  %vm5194_vm9 = vcmp.eq.s32.totalorder %v12571_v50, 11  ;;  %v4475_v5 = vsel %vm4408_vm6, %v7663_v52, %v4344_v27 }
 0x4be   : > { %v5130_v17 = vsel %vm5063_vm13, %v7684_v23, %v4999_v25  ;;  %vm5325_vm7 = vcmp.eq.s32.totalorder %v12571_v50, 15  ;;  %vm5456_vm1 = vcmp.eq.s32.totalorder %v12571_v50, 19  ;;  %v4606_v45 = vsel %vm4539_vm10, %v7666_v53, %v4475_v5 }
 0x4bf   : > { %v5261_v10 = vsel %vm5194_vm9, %v7688_v26, %v5130_v17  ;;  %vm5587_vm8 = vcmp.eq.s32.totalorder %v12571_v50, 23  ;;  %vm5718_vm5 = vcmp.eq.s32.totalorder %v12571_v50, 27  ;;  %v4737_v20 = vsel %vm4670_vm0, %v7671_v59, %v4606_v45 }
 0x4c0   : > { %v5392_v36 = vsel %vm5325_vm7, %v7693_v57, %v5261_v10  ;;  %vm5849_vm2 = vcmp.eq.s32.totalorder %v12571_v50, 31  ;;  %v5980_v7 = vadd.f32 %v3820_v62, %v2772_v34  ;;  %v4868_v27 = vsel %vm4801_vm14, %v7674_v63, %v4737_v20  ;;  %v6236_v50 = vld [vmem:[%s7432_s28 + $0x188] sm:$0xff] }
 0x4c1   : > { %v5523_v25 = vsel %vm5456_vm1, %v7696_v58, %v5392_v36  ;;  %v1214_v5 = vmul.f32 0.36067376, %v12548_v37  ;;  %vm1583_vm15 = vcmp.lt.s32.totalorder %v12553_v48, 15  ;;  %v12721_v10 = vmul.f32 0.6931472, %v12580_v29 }
 0x4c2   : > { %v5654_v17 = vsel %vm5587_vm8, %v7699_v0, %v5523_v25  ;;  %v6044_v18 = vadd.f32 %v5980_v7, %v4868_v27  ;;  %v12718_v45 = vsel %vm1583_vm15, %v12553_v48, 15  ;;  %vm764_vm12 = vcmp.lt.s32.totalorder %v12324_v49, 8 }
 0x4c3   : > { %v5785_v34 = vsel %vm5718_vm5, %v7705_v9, %v5654_v17  ;;  %v1278_v62 = vmul.f32 8.0, %v1214_v5  ;;  %vm1789_vm3 = vcmp.eq.s32.totalorder %v12718_v45, 0  ;;  %vm1920_vm4 = vcmp.eq.s32.totalorder %v12718_v45, 4 }
 0x4c4   : > { %v5916_v37 = vsel %vm5849_vm2, %v7714_v11, %v5785_v34  ;;  %v1856_v20 = vsel %vm1789_vm3, %v7527_v35, 0.0  ;;  %vm2051_vm6 = vcmp.eq.s32.totalorder %v12718_v45, 8  ;;  %vm2182_vm10 = vcmp.eq.s32.totalorder %v12718_v45, 12 }
 0x4c5   : > { %v12732_v48 = vadd.f32 %v6044_v18, %v5916_v37  ;;  %v1342_v29 = vadd.f32 0.0001, %v1278_v62  ;;  %v1987_v36 = vsel %vm1920_vm4, %v7539_v38, %v1856_v20  ;;  %vm2313_vm0 = vcmp.eq.s32.totalorder %v12718_v45, 16 }
 0x4c6   : > { %v2118_v7 = vsel %vm2051_vm6, %v7548_v42, %v1987_v36  ;;  %vm2444_vm14 = vcmp.eq.s32.totalorder %v12718_v45, 20  ;;  %vm2575_vm11 = vcmp.eq.s32.totalorder %v12718_v45, 24  ;;  %vm2706_vm13 = vcmp.eq.s32.totalorder %v12718_v45, 28 }
 0x4c7   : > { %14393 = vst [vmem:[#allocation71_spill] sm:$0xff] %v12732_v48  ;;  %v6428_v27 = vadd.f32 %v6236_v50, %v12732_v48  ;;  %v6955_v25 = vtrunc.f32 %v1342_v29  ;;  %v2249_v18 = vsel %vm2182_vm10, %v7551_v43, %v2118_v7  ;;  %vm2837_vm9 = vcmp.eq.s32.totalorder %v12718_v45, 1 }
 0x4c8   : > { %v2380_v5 = vsel %vm2313_vm0, %v7558_v46, %v2249_v18  ;;  %v2904_v17 = vsel %vm2837_vm9, %v7584_v56, 0.0  ;;  %vm2968_vm7 = vcmp.eq.s32.totalorder %v12718_v45, 5  ;;  %vm3099_vm1 = vcmp.eq.s32.totalorder %v12718_v45, 9 }
 0x4c9   : > { %6556 = vst [vmem:[%s7867_s27 + $0x188] sm:$0xff] %v6428_v27  ;;  %v6956_v34 = vcvt.f32.s32 %v6955_v25  ;;  %v2511_v62 = vsel %vm2444_vm14, %v7561_v47, %v2380_v5  ;;  %v3035_v37 = vsel %vm2968_vm7, %v7589_v60, %v2904_v17  ;;  %vm3230_vm8 = vcmp.eq.s32.totalorder %v12718_v45, 13 }
 0x4ca   : > { %v2642_v50 = vsel %vm2575_vm11, %v7572_v51, %v2511_v62  ;;  %v3166_v20 = vsel %vm3099_vm1, %v7592_v61, %v3035_v37  ;;  %vm3361_vm5 = vcmp.eq.s32.totalorder %v12718_v45, 17  ;;  %vm3492_vm2 = vcmp.eq.s32.totalorder %v12718_v45, 21 }
 0x4cb   : > { %v1470_v29 = vadd.s32 8, %v6956_v34  ;;  %v2773_v36 = vsel %vm2706_vm13, %v7581_v55, %v2642_v50  ;;  %v3297_v7 = vsel %vm3230_vm8, %v7599_v3, %v3166_v20  ;;  %vm3623_vm15 = vcmp.eq.s32.totalorder %v12718_v45, 25 }
 0x4cc   : > { %v3428_v27 = vsel %vm3361_vm5, %v7605_v6, %v3297_v7  ;;  %vm3754_vm3 = vcmp.eq.s32.totalorder %v12718_v45, 29  ;;  %vm3885_vm4 = vcmp.eq.s32.totalorder %v12718_v45, 2  ;;  %vm4016_vm6 = vcmp.eq.s32.totalorder %v12718_v45, 6 }
 0x4cd   : > { %vm1585_vm10 = vcmp.lt.s32.totalorder %v1470_v29, 15  ;;  %v3559_v25 = vsel %vm3492_vm2, %v7616_v12, %v3428_v27  ;;  %v3952_v18 = vsel %vm3885_vm4, %v7631_v21, 0.0  ;;  %vm4147_vm0 = vcmp.eq.s32.totalorder %v12718_v45, 10 }
 0x4ce   : > { %v1586_v5 = vsel %vm1585_vm10, %v1470_v29, 15  ;;  %v3690_v17 = vsel %vm3623_vm15, %v7622_v15, %v3559_v25  ;;  %v4083_v34 = vsel %vm4016_vm6, %v7640_v24, %v3952_v18  ;;  %vm4278_vm14 = vcmp.eq.s32.totalorder %v12718_v45, 14 }
 0x4cf   : > { %v1662_v62 = vsel %vm764_vm12, %v12324_v49, %v1586_v5  ;;  %v3821_v37 = vsel %vm3754_vm3, %v7625_v16, %v3690_v17  ;;  %v4214_v50 = vsel %vm4147_vm0, %v7650_v32, %v4083_v34  ;;  %vm4409_vm11 = vcmp.eq.s32.totalorder %v12718_v45, 18 }
 0x4d0   : > { %v12778_v20 = vadd.s32 %v1662_v62, %v572_v44  ;;  %v4345_v29 = vsel %vm4278_vm14, %v7656_v40, %v4214_v50  ;;  %vm4540_vm13 = vcmp.eq.s32.totalorder %v12718_v45, 22  ;;  %vm4671_vm9 = vcmp.eq.s32.totalorder %v12718_v45, 26 }
 0x4d1   : > { %v4476_v7 = vsel %vm4409_vm11, %v7663_v52, %v4345_v29  ;;  %vm4802_vm12 = vcmp.eq.s32.totalorder %v12718_v45, 30  ;;  %vm4933_vm7 = vcmp.eq.s32.totalorder %v12718_v45, 3  ;;  %vm5064_vm1 = vcmp.eq.s32.totalorder %v12718_v45, 7 }
 0x4d2   : > { %v4607_v49 = vsel %vm4540_vm13, %v7666_v53, %v4476_v7  ;;  %v5000_v19 = vsel %vm4933_vm7, %v7679_v14, 0.0  ;;  %vm5195_vm8 = vcmp.eq.s32.totalorder %v12718_v45, 11  ;;  %vm5326_vm5 = vcmp.eq.s32.totalorder %v12718_v45, 15 }
 0x4d3   : > { %v4738_v44 = vsel %vm4671_vm9, %v7671_v59, %v4607_v49  ;;  %v5131_v27 = vsel %vm5064_vm1, %v7684_v23, %v5000_v19  ;;  %vm5457_vm2 = vcmp.eq.s32.totalorder %v12718_v45, 19  ;;  %vm5588_vm15 = vcmp.eq.s32.totalorder %v12718_v45, 23  ;;  %v6237_v19 = vld [vmem:[%s7432_s28 + $0x190] sm:$0xff] }
 0x4d4   : > { %v4869_v25 = vsel %vm4802_vm12, %v7674_v63, %v4738_v44  ;;  %v5262_v18 = vsel %vm5195_vm8, %v7688_v26, %v5131_v27  ;;  %vm5719_vm3 = vcmp.eq.s32.totalorder %v12718_v45, 27  ;;  %vm5850_vm4 = vcmp.eq.s32.totalorder %v12718_v45, 31 }
 0x4d5   : > { %v5393_v5 = vsel %vm5326_vm5, %v7693_v57, %v5262_v18  ;;  %v5981_v17 = vadd.f32 %v3821_v37, %v2773_v36  ;;  %vm1790_vm6 = vcmp.eq.s32.totalorder %v12778_v20, 0  ;;  %vm1921_vm10 = vcmp.eq.s32.totalorder %v12778_v20, 4 }
 0x4d6   : > { %v5524_v34 = vsel %vm5457_vm2, %v7696_v58, %v5393_v5  ;;  %v1857_v62 = vsel %vm1790_vm6, %v7527_v35, 0.0  ;;  %vm2052_vm0 = vcmp.eq.s32.totalorder %v12778_v20, 8  ;;  %vm2183_vm14 = vcmp.eq.s32.totalorder %v12778_v20, 12 }
 0x4d7   : > { %v5655_v50 = vsel %vm5588_vm15, %v7699_v0, %v5524_v34  ;;  %v6045_v29 = vadd.f32 %v5981_v17, %v4869_v25  ;;  %v1988_v7 = vsel %vm1921_vm10, %v7539_v38, %v1857_v62  ;;  %vm2314_vm11 = vcmp.eq.s32.totalorder %v12778_v20, 16 }
 0x4d8   : > { %v5786_v36 = vsel %vm5719_vm3, %v7705_v9, %v5655_v50  ;;  %v2119_v37 = vsel %vm2052_vm0, %v7548_v42, %v1988_v7  ;;  %vm2445_vm13 = vcmp.eq.s32.totalorder %v12778_v20, 20  ;;  %vm2576_vm9 = vcmp.eq.s32.totalorder %v12778_v20, 24 }
 0x4d9   : > { %v5917_v49 = vsel %vm5850_vm4, %v7714_v11, %v5786_v36  ;;  %v2250_v44 = vsel %vm2183_vm14, %v7551_v43, %v2119_v37  ;;  %vm2707_vm12 = vcmp.eq.s32.totalorder %v12778_v20, 28  ;;  %vm2838_vm7 = vcmp.eq.s32.totalorder %v12778_v20, 1 }
 0x4da   : > { %v12820_v27 = vadd.f32 %v6045_v29, %v5917_v49  ;;  %v2381_v25 = vsel %vm2314_vm11, %v7558_v46, %v2250_v44  ;;  %v2905_v18 = vsel %vm2838_vm7, %v7584_v56, 0.0  ;;  %vm2969_vm1 = vcmp.eq.s32.totalorder %v12778_v20, 5 }
 0x4db   : > { %v2512_v5 = vsel %vm2445_vm13, %v7561_v47, %v2381_v25  ;;  %v3036_v45 = vsel %vm2969_vm1, %v7589_v60, %v2905_v18  ;;  %vm3100_vm8 = vcmp.eq.s32.totalorder %v12778_v20, 9  ;;  %vm3231_vm5 = vcmp.eq.s32.totalorder %v12778_v20, 13 }
 0x4dc   : > { %14394 = vst [vmem:[#allocation72_spill] sm:$0xff] %v12820_v27  ;;  %v6429_v17 = vadd.f32 %v6237_v19, %v12820_v27  ;;  %v2643_v34 = vsel %vm2576_vm9, %v7572_v51, %v2512_v5  ;;  %v3167_v62 = vsel %vm3100_vm8, %v7592_v61, %v3036_v45  ;;  %vm3362_vm2 = vcmp.eq.s32.totalorder %v12778_v20, 17 }
 0x4dd   : > { %v2774_v50 = vsel %vm2707_vm12, %v7581_v55, %v2643_v34  ;;  %v3298_v29 = vsel %vm3231_vm5, %v7599_v3, %v3167_v62  ;;  %vm3493_vm15 = vcmp.eq.s32.totalorder %v12778_v20, 21  ;;  %vm3624_vm3 = vcmp.eq.s32.totalorder %v12778_v20, 25 }
 0x4de   : > { %6557 = vst [vmem:[%s7867_s27 + $0x190] sm:$0xff] %v6429_v17  ;;  %v3429_v7 = vsel %vm3362_vm2, %v7605_v6, %v3298_v29  ;;  %vm3755_vm4 = vcmp.eq.s32.totalorder %v12778_v20, 29  ;;  %vm3886_vm6 = vcmp.eq.s32.totalorder %v12778_v20, 2  ;;  %vm4017_vm10 = vcmp.eq.s32.totalorder %v12778_v20, 6 }
 0x4df   : > { %v3560_v36 = vsel %vm3493_vm15, %v7616_v12, %v3429_v7  ;;  %v3953_v37 = vsel %vm3886_vm6, %v7631_v21, 0.0  ;;  %vm4148_vm0 = vcmp.eq.s32.totalorder %v12778_v20, 10  ;;  %vm4279_vm14 = vcmp.eq.s32.totalorder %v12778_v20, 14 }
 0x4e0   : > { %v3691_v49 = vsel %vm3624_vm3, %v7622_v15, %v3560_v36  ;;  %v4084_v19 = vsel %vm4017_vm10, %v7640_v24, %v3953_v37  ;;  %vm4410_vm11 = vcmp.eq.s32.totalorder %v12778_v20, 18  ;;  %vm4541_vm13 = vcmp.eq.s32.totalorder %v12778_v20, 22 }
 0x4e1   : > { %v3822_v44 = vsel %vm3755_vm4, %v7625_v16, %v3691_v49  ;;  %v4215_v25 = vsel %vm4148_vm0, %v7650_v32, %v4084_v19  ;;  %vm4672_vm9 = vcmp.eq.s32.totalorder %v12778_v20, 26  ;;  %vm4803_vm12 = vcmp.eq.s32.totalorder %v12778_v20, 30 }
 0x4e2   : > { %v4346_v18 = vsel %vm4279_vm14, %v7656_v40, %v4215_v25  ;;  %vm4934_vm7 = vcmp.eq.s32.totalorder %v12778_v20, 3  ;;  %vm5065_vm1 = vcmp.eq.s32.totalorder %v12778_v20, 7  ;;  %vm5196_vm8 = vcmp.eq.s32.totalorder %v12778_v20, 11 }
 0x4e3   : > { %v4477_v5 = vsel %vm4410_vm11, %v7663_v52, %v4346_v18  ;;  %v5001_v45 = vsel %vm4934_vm7, %v7679_v14, 0.0  ;;  %vm5327_vm5 = vcmp.eq.s32.totalorder %v12778_v20, 15  ;;  %vm5458_vm2 = vcmp.eq.s32.totalorder %v12778_v20, 19 }
 0x4e4   : > { %v4608_v17 = vsel %vm4541_vm13, %v7666_v53, %v4477_v5  ;;  %v5132_v34 = vsel %vm5065_vm1, %v7684_v23, %v5001_v45  ;;  %vm5589_vm15 = vcmp.eq.s32.totalorder %v12778_v20, 23  ;;  %vm5720_vm3 = vcmp.eq.s32.totalorder %v12778_v20, 27 }
 0x4e5   : > { %v4739_v62 = vsel %vm4672_vm9, %v7671_v59, %v4608_v17  ;;  %v5263_v29 = vsel %vm5196_vm8, %v7688_v26, %v5132_v34  ;;  %vm5851_vm4 = vcmp.eq.s32.totalorder %v12778_v20, 31  ;;  %v5982_v7 = vadd.f32 %v3822_v44, %v2774_v50 }
 0x4e6   : > { %v4870_v36 = vsel %vm4803_vm12, %v7674_v63, %v4739_v62  ;;  %v5394_v37 = vsel %vm5327_vm5, %v7693_v57, %v5263_v29  ;;  %v1216_v49 = vmul.f32 0.36067376, %v12721_v10  ;;  %v1471_v19 = vadd.s32 8, %v12555_v8  ;;  %v6238_v62 = vld [vmem:[%s7432_s28 + $0x198] sm:$0xff] }
 0x4e7   : > { %v5525_v25 = vsel %vm5458_vm2, %v7696_v58, %v5394_v37  ;;  %v6046_v18 = vadd.f32 %v5982_v7, %v4870_v36  ;;  %v14395_v5 = vcvt.s32.f32 %v12546_v2  ;;  %v1143_v17 = vmul.f32 0.6931472, %v12602_v31 }
 0x4e8   : > { %v5656_v50 = vsel %vm5589_vm15, %v7699_v0, %v5525_v25  ;;  %v1280_v44 = vmul.f32 8.0, %v1216_v49  ;;  %vm1587_vm6 = vcmp.lt.s32.totalorder %v1471_v19, 15  ;;  %v385_v34 = vsub.s32 %v12543_v39, %v14367_v30 }
 0x4e9   : > { %v1025_v45 = vmul.f32 0.125, %v14395_v5  ;;  %v5787_v10 = vsel %vm5720_vm3, %v7705_v9, %v5656_v50  ;;  %vm766_vm10 = vcmp.lt.s32.totalorder %v12341_v54, 8  ;;  %v12886_v8 = vsel %vm1587_vm6, %v1471_v19, 15 }
 0x4ea   : > { %v12888_v2 = vmul.f32 0.36067376, %v1143_v17  ;;  %v5918_v31 = vsel %vm5851_vm4, %v7714_v11, %v5787_v10  ;;  %v1344_v29 = vadd.f32 0.0001, %v1280_v44  ;;  %vm1791_vm0 = vcmp.eq.s32.totalorder %v12886_v8, 0 }
 0x4eb   : > { %7186 = vlog2.f32 %v1025_v45  ;;  %vm1922_vm14 = vcmp.eq.s32.totalorder %v12886_v8, 4  ;;  %v12896_v7 = vadd.f32 %v6046_v18, %v5918_v31  ;;  %v1858_v36 = vsel %vm1791_vm0, %v7527_v35, 0.0 }
 0x4ec   : > { %vm2053_vm11 = vcmp.eq.s32.totalorder %v12886_v8, 8  ;;  %vm2184_vm13 = vcmp.eq.s32.totalorder %v12886_v8, 12  ;;  %v6959_v37 = vtrunc.f32 %v1344_v29  ;;  %v1989_v49 = vsel %vm1922_vm14, %v7539_v38, %v1858_v36 }
 0x4ed   : > { %14396 = vst [vmem:[#allocation73_spill] sm:$0xff] %v12896_v7  ;;  %vm2315_vm9 = vcmp.eq.s32.totalorder %v12886_v8, 16  ;;  %vm2446_vm12 = vcmp.eq.s32.totalorder %v12886_v8, 20  ;;  %v6430_v20 = vadd.f32 %v6238_v62, %v12896_v7  ;;  %v2120_v19 = vsel %vm2053_vm11, %v7548_v42, %v1989_v49 }
 0x4ee   : > { %vm2577_vm7 = vcmp.eq.s32.totalorder %v12886_v8, 24  ;;  %vm2708_vm1 = vcmp.eq.s32.totalorder %v12886_v8, 28  ;;  %v6960_v25 = vcvt.f32.s32 %v6959_v37  ;;  %v2251_v18 = vsel %vm2184_vm13, %v7551_v43, %v2120_v19 }
 0x4ef   : > { %vm2839_vm8 = vcmp.eq.s32.totalorder %v12886_v8, 1  ;;  %vm2970_vm5 = vcmp.eq.s32.totalorder %v12886_v8, 5  ;;  %6558 = vst [vmem:[%s7867_s27 + $0x198] sm:$0xff] %v6430_v20  ;;  %v2382_v5 = vsel %vm2315_vm9, %v7558_v46, %v2251_v18  ;;  %vm3101_vm2 = vcmp.eq.s32.totalorder %v12886_v8, 9 }
 0x4f0   : > { %v2906_v45 = vsel %vm2839_vm8, %v7584_v56, 0.0  ;;  %vm3232_vm15 = vcmp.eq.s32.totalorder %v12886_v8, 13  ;;  %v1472_v17 = vadd.s32 8, %v6960_v25  ;;  %v2513_v50 = vsel %vm2446_vm12, %v7561_v47, %v2382_v5 }
 0x4f1   : > { %v3037_v44 = vsel %vm2970_vm5, %v7589_v60, %v2906_v45  ;;  %vm3363_vm3 = vcmp.eq.s32.totalorder %v12886_v8, 17  ;;  %v2644_v10 = vsel %vm2577_vm7, %v7572_v51, %v2513_v50  ;;  %vm3494_vm4 = vcmp.eq.s32.totalorder %v12886_v8, 21 }
 0x4f2   : > { %v3168_v31 = vsel %vm3101_vm2, %v7592_v61, %v3037_v44  ;;  %vm3625_vm6 = vcmp.eq.s32.totalorder %v12886_v8, 25  ;;  %vm1589_vm0 = vcmp.lt.s32.totalorder %v1472_v17, 15  ;;  %v2775_v62 = vsel %vm2708_vm1, %v7581_v55, %v2644_v10 }
 0x4f3   : > { %v3299_v29 = vsel %vm3232_vm15, %v7599_v3, %v3168_v31  ;;  %vm3756_vm14 = vcmp.eq.s32.totalorder %v12886_v8, 29  ;;  %v1590_v37 = vsel %vm1589_vm0, %v1472_v17, 15  ;;  %vm3887_vm11 = vcmp.eq.s32.totalorder %v12886_v8, 2 }
 0x4f4   : > { %v3430_v49 = vsel %vm3363_vm3, %v7605_v6, %v3299_v29  ;;  %vm4018_vm13 = vcmp.eq.s32.totalorder %v12886_v8, 6  ;;  %v1664_v20 = vsel %vm766_vm10, %v12341_v54, %v1590_v37  ;;  %v3954_v25 = vsel %vm3887_vm11, %v7631_v21, 0.0 }
 0x4f5   : > { %v12928_v36 = vpop.eup %7186  ;;  %v3561_v19 = vsel %vm3494_vm4, %v7616_v12, %v3430_v49  ;;  %vm4149_vm9 = vcmp.eq.s32.totalorder %v12886_v8, 10  ;;  %v14397_v18 = vmul.u32 16, %v12339_v33  ;;  %v4085_v17 = vsel %vm4018_vm13, %v7640_v24, %v3954_v25 }
 0x4f6   : > { %v3692_v45 = vsel %vm3625_vm6, %v7622_v15, %v3561_v19  ;;  %vm4280_vm12 = vcmp.eq.s32.totalorder %v12886_v8, 14  ;;  %v4216_v54 = vsel %vm4149_vm9, %v7650_v32, %v4085_v17  ;;  %vm4411_vm10 = vcmp.eq.s32.totalorder %v12886_v8, 18 }
 0x4f7   : > { %v12941_v5 = vadd.s32 %v1664_v20, %v14397_v18  ;;  %v3823_v50 = vsel %vm3756_vm14, %v7625_v16, %v3692_v45  ;;  %vm4542_vm7 = vcmp.eq.s32.totalorder %v12886_v8, 22  ;;  %v4347_v44 = vsel %vm4280_vm12, %v7656_v40, %v4216_v54 }
 0x4f8   : > { %vm4673_vm1 = vcmp.eq.s32.totalorder %v12886_v8, 26  ;;  %vm4804_vm8 = vcmp.eq.s32.totalorder %v12886_v8, 30  ;;  %vm4935_vm5 = vcmp.eq.s32.totalorder %v12886_v8, 3  ;;  %v4478_v33 = vsel %vm4411_vm10, %v7663_v52, %v4347_v44 }
 0x4f9   : > { %v5002_v10 = vsel %vm4935_vm5, %v7679_v14, 0.0  ;;  %vm5066_vm2 = vcmp.eq.s32.totalorder %v12886_v8, 7  ;;  %vm5197_vm15 = vcmp.eq.s32.totalorder %v12886_v8, 11  ;;  %v4609_v31 = vsel %vm4542_vm7, %v7666_v53, %v4478_v33 }
 0x4fa   : > { %v5133_v29 = vsel %vm5066_vm2, %v7684_v23, %v5002_v10  ;;  %vm5328_vm3 = vcmp.eq.s32.totalorder %v12886_v8, 15  ;;  %vm5459_vm4 = vcmp.eq.s32.totalorder %v12886_v8, 19  ;;  %v4740_v37 = vsel %vm4673_vm1, %v7671_v59, %v4609_v31 }
 0x4fb   : > { %v5264_v49 = vsel %vm5197_vm15, %v7688_v26, %v5133_v29  ;;  %vm5590_vm6 = vcmp.eq.s32.totalorder %v12886_v8, 23  ;;  %vm5721_vm0 = vcmp.eq.s32.totalorder %v12886_v8, 27  ;;  %v4871_v20 = vsel %vm4804_vm8, %v7674_v63, %v4740_v37 }
 0x4fc   : > { %v5395_v19 = vsel %vm5328_vm3, %v7693_v57, %v5264_v49  ;;  %vm5852_vm14 = vcmp.eq.s32.totalorder %v12886_v8, 31  ;;  %v5983_v25 = vadd.f32 %v3823_v50, %v2775_v62  ;;  %vm1792_vm11 = vcmp.eq.s32.totalorder %v12941_v5, 0  ;;  %v6239_v50 = vld [vmem:[%s7432_s28 + $0x1a0] sm:$0xff] }
 0x4fd   : > { %v5526_v18 = vsel %vm5459_vm4, %v7696_v58, %v5395_v19  ;;  %vm1923_vm13 = vcmp.eq.s32.totalorder %v12941_v5, 4  ;;  %vm2054_vm9 = vcmp.eq.s32.totalorder %v12941_v5, 8  ;;  %v1859_v54 = vsel %vm1792_vm11, %v7527_v35, 0.0 }
 0x4fe   : > { %v5657_v45 = vsel %vm5590_vm6, %v7699_v0, %v5526_v18  ;;  %v6047_v17 = vadd.f32 %v5983_v25, %v4871_v20  ;;  %vm2185_vm12 = vcmp.eq.s32.totalorder %v12941_v5, 12  ;;  %v1990_v8 = vsel %vm1923_vm13, %v7539_v38, %v1859_v54 }
 0x4ff   : > { %v5788_v44 = vsel %vm5721_vm0, %v7705_v9, %v5657_v45  ;;  %vm2316_vm10 = vcmp.eq.s32.totalorder %v12941_v5, 16  ;;  %vm2447_vm7 = vcmp.eq.s32.totalorder %v12941_v5, 20  ;;  %v2121_v33 = vsel %vm2054_vm9, %v7548_v42, %v1990_v8 }
 0x500   : > { %v5919_v62 = vsel %vm5852_vm14, %v7714_v11, %v5788_v44  ;;  %vm2578_vm1 = vcmp.eq.s32.totalorder %v12941_v5, 24  ;;  %vm2709_vm8 = vcmp.eq.s32.totalorder %v12941_v5, 28  ;;  %v2252_v31 = vsel %vm2185_vm12, %v7551_v43, %v2121_v33 }
 0x501   : > { %v12985_v10 = vadd.f32 %v6047_v17, %v5919_v62  ;;  %vm2840_vm5 = vcmp.eq.s32.totalorder %v12941_v5, 1  ;;  %vm2971_vm2 = vcmp.eq.s32.totalorder %v12941_v5, 5  ;;  %v2383_v29 = vsel %vm2316_vm10, %v7558_v46, %v2252_v31 }
 0x502   : > { %v2907_v37 = vsel %vm2840_vm5, %v7584_v56, 0.0  ;;  %vm3102_vm15 = vcmp.eq.s32.totalorder %v12941_v5, 9  ;;  %vm3233_vm3 = vcmp.eq.s32.totalorder %v12941_v5, 13  ;;  %v2514_v20 = vsel %vm2447_vm7, %v7561_v47, %v2383_v29 }
 0x503   : > { %14398 = vst [vmem:[#allocation74_spill] sm:$0xff] %v12985_v10  ;;  %v6431_v49 = vadd.f32 %v6239_v50, %v12985_v10  ;;  %v3038_v19 = vsel %vm2971_vm2, %v7589_v60, %v2907_v37  ;;  %vm3364_vm4 = vcmp.eq.s32.totalorder %v12941_v5, 17  ;;  %v2645_v25 = vsel %vm2578_vm1, %v7572_v51, %v2514_v20 }
 0x504   : > { %v3169_v18 = vsel %vm3102_vm15, %v7592_v61, %v3038_v19  ;;  %vm3495_vm6 = vcmp.eq.s32.totalorder %v12941_v5, 21  ;;  %vm3626_vm0 = vcmp.eq.s32.totalorder %v12941_v5, 25  ;;  %v2776_v45 = vsel %vm2709_vm8, %v7581_v55, %v2645_v25 }
 0x505   : > { %6559 = vst [vmem:[%s7867_s27 + $0x1a0] sm:$0xff] %v6431_v49  ;;  %v3300_v17 = vsel %vm3233_vm3, %v7599_v3, %v3169_v18  ;;  %vm3757_vm14 = vcmp.eq.s32.totalorder %v12941_v5, 29  ;;  %vm3888_vm11 = vcmp.eq.s32.totalorder %v12941_v5, 2  ;;  %vm4019_vm13 = vcmp.eq.s32.totalorder %v12941_v5, 6 }
 0x506   : > { %v3431_v54 = vsel %vm3364_vm4, %v7605_v6, %v3300_v17  ;;  %v3955_v44 = vsel %vm3888_vm11, %v7631_v21, 0.0  ;;  %vm4150_vm9 = vcmp.eq.s32.totalorder %v12941_v5, 10  ;;  %vm4281_vm12 = vcmp.eq.s32.totalorder %v12941_v5, 14 }
 0x507   : > { %v3562_v8 = vsel %vm3495_vm6, %v7616_v12, %v3431_v54  ;;  %v4086_v62 = vsel %vm4019_vm13, %v7640_v24, %v3955_v44  ;;  %vm4412_vm10 = vcmp.eq.s32.totalorder %v12941_v5, 18  ;;  %vm4543_vm7 = vcmp.eq.s32.totalorder %v12941_v5, 22 }
 0x508   : > { %v3693_v50 = vsel %vm3626_vm0, %v7622_v15, %v3562_v8  ;;  %v4217_v33 = vsel %vm4150_vm9, %v7650_v32, %v4086_v62  ;;  %vm4674_vm1 = vcmp.eq.s32.totalorder %v12941_v5, 26  ;;  %vm4805_vm8 = vcmp.eq.s32.totalorder %v12941_v5, 30 }
 0x509   : > { %v3824_v31 = vsel %vm3757_vm14, %v7625_v16, %v3693_v50  ;;  %v4348_v29 = vsel %vm4281_vm12, %v7656_v40, %v4217_v33  ;;  %vm4936_vm5 = vcmp.eq.s32.totalorder %v12941_v5, 3  ;;  %vm5067_vm2 = vcmp.eq.s32.totalorder %v12941_v5, 7 }
 0x50a   : > { %v4479_v37 = vsel %vm4412_vm10, %v7663_v52, %v4348_v29  ;;  %v5003_v49 = vsel %vm4936_vm5, %v7679_v14, 0.0  ;;  %vm5198_vm15 = vcmp.eq.s32.totalorder %v12941_v5, 11  ;;  %vm5329_vm3 = vcmp.eq.s32.totalorder %v12941_v5, 15 }
 0x50b   : > { %v4610_v20 = vsel %vm4543_vm7, %v7666_v53, %v4479_v37  ;;  %v5134_v19 = vsel %vm5067_vm2, %v7684_v23, %v5003_v49  ;;  %vm5460_vm4 = vcmp.eq.s32.totalorder %v12941_v5, 19  ;;  %vm5591_vm6 = vcmp.eq.s32.totalorder %v12941_v5, 23 }
 0x50c   : > { %v4741_v25 = vsel %vm4674_vm1, %v7671_v59, %v4610_v20  ;;  %v5265_v18 = vsel %vm5198_vm15, %v7688_v26, %v5134_v19  ;;  %vm5722_vm0 = vcmp.eq.s32.totalorder %v12941_v5, 27  ;;  %vm5853_vm14 = vcmp.eq.s32.totalorder %v12941_v5, 31  ;;  %v6240_v20 = vld [vmem:[%s7432_s28 + $0x1a8] sm:$0xff] }
 0x50d   : > { %v4872_v17 = vsel %vm4805_vm8, %v7674_v63, %v4741_v25  ;;  %v5396_v54 = vsel %vm5329_vm3, %v7693_v57, %v5265_v18  ;;  %v5984_v44 = vadd.f32 %v3824_v31, %v2776_v45  ;;  %v1145_v62 = vmul.f32 0.6931472, %v12928_v36 }
 0x50e   : > { %v5527_v8 = vsel %vm5460_vm4, %v7696_v58, %v5396_v54  ;;  %v1281_v50 = vmul.f32 8.0, %v12888_v2  ;;  %v13045_v33 = vsub.s32 %v12543_v39, %v7449_v4  ;;  %v961_v49 = vcvt.s32.f32 %v385_v34 }
 0x50f   : > { %v5658_v29 = vsel %vm5591_vm6, %v7699_v0, %v5527_v8  ;;  %v6048_v37 = vadd.f32 %v5984_v44, %v4872_v17  ;;  %v286_v5 = vadd.s32 232, %v7441_v1  ;;  %vm448_vm11 = vcmp.lt.s32.totalorder %v12345_v22, 0 }
 0x510   : > { %v5789_v45 = vsel %vm5722_vm0, %v7705_v9, %v5658_v29  ;;  %v1218_v36 = vmul.f32 0.36067376, %v1145_v62  ;;  %v1345_v31 = vadd.f32 0.0001, %v1281_v50  ;;  %v699_v19 = vsub.s32 0, %v13045_v33 }
 0x511   : > { %v5920_v2 = vsel %vm5853_vm14, %v7714_v11, %v5789_v45  ;;  %v14400_v39 = vmov 0   ;;  %v1026_v44 = vmul.f32 0.125, %v961_v49  ;;  %v13064_v22 = vsub.s32 %v286_v5, %v7449_v4 }
 0x512   : > { %v13057_v25 = vadd.f32 %v6048_v37, %v5920_v2  ;;  %v1282_v18 = vmul.f32 8.0, %v1218_v36  ;;  %v6961_v17 = vtrunc.f32 %v1345_v31  ;;  %v512_v34 = vsel %vm448_vm11, 1, %v14400_v39 }
 0x513   : > { %v13061_v54 = vmin.u32 %v699_v19, %v13045_v33  ;;  %v387_v29 = vsub.s32 %v286_v5, %v14367_v30  ;;  %v703_v37 = vsub.s32 0, %v13064_v22  ;;  %v13071_v45 = vadd.s32 240, %v7441_v1 }
 0x514   : > { %14399 = vst [vmem:[#allocation75_spill] sm:$0xff] %v13057_v25  ;;  %v6432_v8 = vadd.f32 %v6240_v20, %v13057_v25  ;;  %v1346_v62 = vadd.f32 0.0001, %v1282_v18  ;;  %v6962_v50 = vcvt.f32.s32 %v6961_v17  ;;  %v576_v2 = vmul.u32 16, %v512_v34 }
 0x515   : > { %vm891_vm13 = vcmp.gt.s32.totalorder %v13061_v54, 1  ;;  %vm768_vm9 = vcmp.lt.s32.totalorder %v12538_v13, 8  ;;  %7188 = vlog2.f32 %v1026_v44  ;;  %v13077_v5 = vmin.u32 %v703_v37, %v13064_v22 }
 0x516   : > { %6560 = vst [vmem:[%s7867_s27 + $0x1a8] sm:$0xff] %v6432_v8  ;;  %v6963_v36 = vtrunc.f32 %v1346_v62  ;;  %v1473_v31 = vadd.s32 8, %v6962_v50  ;;  %v892_v49 = vsel %vm891_vm13, %v13061_v54, 1  ;;  %v13079_v18 = vcvt.s32.f32 %v387_v29 }
 0x517   : > { %v962_v20 = vcvt.s32.f32 %v892_v49  ;;  %v13089_v34 = vsub.s32 %v13071_v45, %v7449_v4 }
 0x518   : > { %v6964_v19 = vcvt.f32.s32 %v6963_v36  ;;  %vm1591_vm12 = vcmp.lt.s32.totalorder %v1473_v31, 15 }
 0x519   : > { %v13081_v17 = vsel %vm1591_vm12, %v1473_v31, 15  ;;  %v13083_v25 = vmul.f32 0.125, %v962_v20 }
 0x51a   : > { %v1474_v62 = vadd.s32 8, %v6964_v19  ;;  %vm1793_vm10 = vcmp.eq.s32.totalorder %v13081_v17, 0  ;;  %vm1924_vm7 = vcmp.eq.s32.totalorder %v13081_v17, 4  ;;  %vm2055_vm1 = vcmp.eq.s32.totalorder %v13081_v17, 8 }
 0x51b   : > { %v1860_v44 = vsel %vm1793_vm10, %v7527_v35, 0.0  ;;  %vm2186_vm8 = vcmp.eq.s32.totalorder %v13081_v17, 12  ;;  %vm2317_vm5 = vcmp.eq.s32.totalorder %v13081_v17, 16  ;;  %vm2448_vm2 = vcmp.eq.s32.totalorder %v13081_v17, 20 }
 0x51c   : > { %vm1593_vm15 = vcmp.lt.s32.totalorder %v1474_v62, 15  ;;  %v1991_v50 = vsel %vm1924_vm7, %v7539_v38, %v1860_v44  ;;  %vm2579_vm3 = vcmp.eq.s32.totalorder %v13081_v17, 24  ;;  %vm2710_vm4 = vcmp.eq.s32.totalorder %v13081_v17, 28 }
 0x51d   : > { %v1594_v29 = vsel %vm1593_vm15, %v1474_v62, 15  ;;  %v2122_v37 = vsel %vm2055_vm1, %v7548_v42, %v1991_v50  ;;  %vm2841_vm6 = vcmp.eq.s32.totalorder %v13081_v17, 1  ;;  %vm2972_vm0 = vcmp.eq.s32.totalorder %v13081_v17, 5 }
 0x51e   : > { %v1666_v36 = vsel %vm768_vm9, %v12538_v13, %v1594_v29  ;;  %v2253_v31 = vsel %vm2186_vm8, %v7551_v43, %v2122_v37  ;;  %v2908_v49 = vsel %vm2841_vm6, %v7584_v56, 0.0  ;;  %vm3103_vm14 = vcmp.eq.s32.totalorder %v13081_v17, 9 }
 0x51f   : > { %v13110_v20 = vadd.s32 %v1666_v36, %v576_v2  ;;  %v2384_v19 = vsel %vm2317_vm5, %v7558_v46, %v2253_v31  ;;  %v3039_v62 = vsel %vm2972_vm0, %v7589_v60, %v2908_v49  ;;  %vm3234_vm11 = vcmp.eq.s32.totalorder %v13081_v17, 13  ;;  %v13121_v50 = vpop.eup %7188 }
 0x520   : > { %v2515_v44 = vsel %vm2448_vm2, %v7561_v47, %v2384_v19  ;;  %v3170_v13 = vsel %vm3103_vm14, %v7592_v61, %v3039_v62  ;;  %vm3365_vm13 = vcmp.eq.s32.totalorder %v13081_v17, 17  ;;  %vm3496_vm9 = vcmp.eq.s32.totalorder %v13081_v17, 21 }
 0x521   : > { %v2646_v2 = vsel %vm2579_vm3, %v7572_v51, %v2515_v44  ;;  %v3301_v29 = vsel %vm3234_vm11, %v7599_v3, %v3170_v13  ;;  %vm3627_vm12 = vcmp.eq.s32.totalorder %v13081_v17, 25  ;;  %vm3758_vm10 = vcmp.eq.s32.totalorder %v13081_v17, 29 }
 0x522   : > { %v2777_v37 = vsel %vm2710_vm4, %v7581_v55, %v2646_v2  ;;  %v3432_v36 = vsel %vm3365_vm13, %v7605_v6, %v3301_v29  ;;  %vm3889_vm7 = vcmp.eq.s32.totalorder %v13081_v17, 2  ;;  %vm4020_vm1 = vcmp.eq.s32.totalorder %v13081_v17, 6 }
 0x523   : > { %v3563_v31 = vsel %vm3496_vm9, %v7616_v12, %v3432_v36  ;;  %v3956_v49 = vsel %vm3889_vm7, %v7631_v21, 0.0  ;;  %vm4151_vm8 = vcmp.eq.s32.totalorder %v13081_v17, 10  ;;  %vm4282_vm5 = vcmp.eq.s32.totalorder %v13081_v17, 14 }
 0x524   : > { %v3694_v19 = vsel %vm3627_vm12, %v7622_v15, %v3563_v31  ;;  %v4087_v62 = vsel %vm4020_vm1, %v7640_v24, %v3956_v49  ;;  %vm4413_vm2 = vcmp.eq.s32.totalorder %v13081_v17, 18  ;;  %vm4544_vm15 = vcmp.eq.s32.totalorder %v13081_v17, 22 }
 0x525   : > { %v3825_v44 = vsel %vm3758_vm10, %v7625_v16, %v3694_v19  ;;  %v4218_v13 = vsel %vm4151_vm8, %v7650_v32, %v4087_v62  ;;  %vm4675_vm3 = vcmp.eq.s32.totalorder %v13081_v17, 26  ;;  %vm4806_vm4 = vcmp.eq.s32.totalorder %v13081_v17, 30 }
 0x526   : > { %v4349_v2 = vsel %vm4282_vm5, %v7656_v40, %v4218_v13  ;;  %vm4937_vm6 = vcmp.eq.s32.totalorder %v13081_v17, 3  ;;  %vm5068_vm0 = vcmp.eq.s32.totalorder %v13081_v17, 7  ;;  %vm5199_vm14 = vcmp.eq.s32.totalorder %v13081_v17, 11 }
 0x527   : > { %v4480_v29 = vsel %vm4413_vm2, %v7663_v52, %v4349_v2  ;;  %v5004_v36 = vsel %vm4937_vm6, %v7679_v14, 0.0  ;;  %vm5330_vm11 = vcmp.eq.s32.totalorder %v13081_v17, 15  ;;  %vm5461_vm13 = vcmp.eq.s32.totalorder %v13081_v17, 19 }
 0x528   : > { %v4611_v31 = vsel %vm4544_vm15, %v7666_v53, %v4480_v29  ;;  %v5135_v49 = vsel %vm5068_vm0, %v7684_v23, %v5004_v36  ;;  %vm5592_vm9 = vcmp.eq.s32.totalorder %v13081_v17, 23  ;;  %vm5723_vm12 = vcmp.eq.s32.totalorder %v13081_v17, 27 }
 0x529   : > { %v4742_v19 = vsel %vm4675_vm3, %v7671_v59, %v4611_v31  ;;  %v5266_v62 = vsel %vm5199_vm14, %v7688_v26, %v5135_v49  ;;  %vm5854_vm10 = vcmp.eq.s32.totalorder %v13081_v17, 31  ;;  %v5985_v13 = vadd.f32 %v3825_v44, %v2777_v37 }
 0x52a   : > { %v4873_v2 = vsel %vm4806_vm4, %v7674_v63, %v4742_v19  ;;  %v5397_v8 = vsel %vm5330_vm11, %v7693_v57, %v5266_v62  ;;  %vm1794_vm7 = vcmp.eq.s32.totalorder %v13110_v20, 0  ;;  %vm1925_vm1 = vcmp.eq.s32.totalorder %v13110_v20, 4  ;;  %v6241_v62 = vld [vmem:[%s7432_s28 + $0x1b0] sm:$0xff] }
 0x52b   : > { %v5528_v29 = vsel %vm5461_vm13, %v7696_v58, %v5397_v8  ;;  %v6049_v36 = vadd.f32 %v5985_v13, %v4873_v2  ;;  %v1861_v31 = vsel %vm1794_vm7, %v7527_v35, 0.0  ;;  %vm2056_vm8 = vcmp.eq.s32.totalorder %v13110_v20, 8 }
 0x52c   : > { %v5659_v37 = vsel %vm5592_vm9, %v7699_v0, %v5528_v29  ;;  %v1992_v44 = vsel %vm1925_vm1, %v7539_v38, %v1861_v31  ;;  %vm2187_vm5 = vcmp.eq.s32.totalorder %v13110_v20, 12  ;;  %vm2318_vm2 = vcmp.eq.s32.totalorder %v13110_v20, 16 }
 0x52d   : > { %v5790_v49 = vsel %vm5723_vm12, %v7705_v9, %v5659_v37  ;;  %v2123_v19 = vsel %vm2056_vm8, %v7548_v42, %v1992_v44  ;;  %vm2449_vm15 = vcmp.eq.s32.totalorder %v13110_v20, 20  ;;  %vm2580_vm3 = vcmp.eq.s32.totalorder %v13110_v20, 24 }
 0x52e   : > { %v5921_v8 = vsel %vm5854_vm10, %v7714_v11, %v5790_v49  ;;  %v2254_v13 = vsel %vm2187_vm5, %v7551_v43, %v2123_v19  ;;  %vm2711_vm4 = vcmp.eq.s32.totalorder %v13110_v20, 28  ;;  %vm2842_vm6 = vcmp.eq.s32.totalorder %v13110_v20, 1 }
 0x52f   : > { %v13188_v2 = vadd.f32 %v6049_v36, %v5921_v8  ;;  %v2385_v29 = vsel %vm2318_vm2, %v7558_v46, %v2254_v13  ;;  %v2909_v31 = vsel %vm2842_vm6, %v7584_v56, 0.0  ;;  %vm2973_vm0 = vcmp.eq.s32.totalorder %v13110_v20, 5 }
 0x530   : > { %v2516_v37 = vsel %vm2449_vm15, %v7561_v47, %v2385_v29  ;;  %v3040_v17 = vsel %vm2973_vm0, %v7589_v60, %v2909_v31  ;;  %vm3104_vm14 = vcmp.eq.s32.totalorder %v13110_v20, 9  ;;  %vm3235_vm11 = vcmp.eq.s32.totalorder %v13110_v20, 13 }
 0x531   : > { %14401 = vst [vmem:[#allocation76_spill] sm:$0xff] %v13188_v2  ;;  %v6433_v44 = vadd.f32 %v6241_v62, %v13188_v2  ;;  %v2647_v36 = vsel %vm2580_vm3, %v7572_v51, %v2516_v37  ;;  %v3171_v49 = vsel %vm3104_vm14, %v7592_v61, %v3040_v17  ;;  %vm3366_vm13 = vcmp.eq.s32.totalorder %v13110_v20, 17 }
 0x532   : > { %vm895_vm9 = vcmp.gt.s32.totalorder %v13077_v5, 1  ;;  %v2778_v19 = vsel %vm2711_vm4, %v7581_v55, %v2647_v36  ;;  %v3302_v8 = vsel %vm3235_vm11, %v7599_v3, %v3171_v49  ;;  %vm3497_vm12 = vcmp.eq.s32.totalorder %v13110_v20, 21 }
 0x533   : > { %vm3628_vm10 = vcmp.eq.s32.totalorder %v13110_v20, 25  ;;  %6561 = vst [vmem:[%s7867_s27 + $0x1b0] sm:$0xff] %v6433_v44  ;;  %v3433_v13 = vsel %vm3366_vm13, %v7605_v6, %v3302_v8  ;;  %vm3759_vm7 = vcmp.eq.s32.totalorder %v13110_v20, 29  ;;  %vm3890_vm1 = vcmp.eq.s32.totalorder %v13110_v20, 2 }
 0x534   : > { %vm4021_vm8 = vcmp.eq.s32.totalorder %v13110_v20, 6  ;;  %v3564_v62 = vsel %vm3497_vm12, %v7616_v12, %v3433_v13  ;;  %v3957_v29 = vsel %vm3890_vm1, %v7631_v21, 0.0  ;;  %vm4152_vm5 = vcmp.eq.s32.totalorder %v13110_v20, 10 }
 0x535   : > { %vm4283_vm2 = vcmp.eq.s32.totalorder %v13110_v20, 14  ;;  %v3695_v31 = vsel %vm3628_vm10, %v7622_v15, %v3564_v62  ;;  %v4088_v37 = vsel %vm4021_vm8, %v7640_v24, %v3957_v29  ;;  %vm4414_vm15 = vcmp.eq.s32.totalorder %v13110_v20, 18 }
 0x536   : > { %vm4545_vm3 = vcmp.eq.s32.totalorder %v13110_v20, 22  ;;  %v3826_v17 = vsel %vm3759_vm7, %v7625_v16, %v3695_v31  ;;  %v4219_v44 = vsel %vm4152_vm5, %v7650_v32, %v4088_v37  ;;  %vm4676_vm4 = vcmp.eq.s32.totalorder %v13110_v20, 26 }
 0x537   : > { %vm4807_vm6 = vcmp.eq.s32.totalorder %v13110_v20, 30  ;;  %v4350_v36 = vsel %vm4283_vm2, %v7656_v40, %v4219_v44  ;;  %vm4938_vm0 = vcmp.eq.s32.totalorder %v13110_v20, 3  ;;  %vm5069_vm14 = vcmp.eq.s32.totalorder %v13110_v20, 7 }
 0x538   : > { %vm5200_vm11 = vcmp.eq.s32.totalorder %v13110_v20, 11  ;;  %v4481_v49 = vsel %vm4414_vm15, %v7663_v52, %v4350_v36  ;;  %v5005_v8 = vsel %vm4938_vm0, %v7679_v14, 0.0  ;;  %vm5331_vm13 = vcmp.eq.s32.totalorder %v13110_v20, 15 }
 0x539   : > { %vm5462_vm12 = vcmp.eq.s32.totalorder %v13110_v20, 19  ;;  %v4612_v13 = vsel %vm4545_vm3, %v7666_v53, %v4481_v49  ;;  %v5136_v62 = vsel %vm5069_vm14, %v7684_v23, %v5005_v8  ;;  %vm5593_vm10 = vcmp.eq.s32.totalorder %v13110_v20, 23 }
 0x53a   : > { %vm5724_vm7 = vcmp.eq.s32.totalorder %v13110_v20, 27  ;;  %v4743_v29 = vsel %vm4676_vm4, %v7671_v59, %v4612_v13  ;;  %v5267_v31 = vsel %vm5200_vm11, %v7688_v26, %v5136_v62  ;;  %vm5855_vm1 = vcmp.eq.s32.totalorder %v13110_v20, 31 }
 0x53b   : > { %v5986_v37 = vadd.f32 %v3826_v17, %v2778_v19  ;;  %v4874_v44 = vsel %vm4807_vm6, %v7674_v63, %v4743_v29  ;;  %v5398_v36 = vsel %vm5331_vm13, %v7693_v57, %v5267_v31  ;;  %v1147_v49 = vmul.f32 0.6931472, %v13121_v50 }
 0x53c   : > { %7190 = vlog2.f32 %v13083_v25  ;;  %v5529_v8 = vsel %vm5462_vm12, %v7696_v58, %v5398_v36  ;;  %v896_v13 = vsel %vm895_vm9, %v13077_v5, 1  ;;  %v1028_v19 = vmul.f32 0.125, %v13079_v18 }
 0x53d   : > { %v6050_v2 = vadd.f32 %v5986_v37, %v4874_v44  ;;  %v5660_v17 = vsel %vm5593_vm10, %v7699_v0, %v5529_v8  ;;  %vm450_vm8 = vcmp.lt.s32.totalorder %v13045_v33, 0  ;;  %v1219_v62 = vmul.f32 0.36067376, %v1147_v49  ;;  %v6242_v37 = vld [vmem:[%s7432_s28 + $0x1b8] sm:$0xff] }
 0x53e   : > { %v5791_v50 = vsel %vm5724_vm7, %v7705_v9, %v5660_v17  ;;  %v964_v29 = vcvt.s32.f32 %v896_v13  ;;  %7192 = vlog2.f32 %v1028_v19  ;;  %v707_v25 = vsub.s32 0, %v13089_v34 }
 0x53f   : > { %v5922_v31 = vsel %vm5855_vm1, %v7714_v11, %v5791_v50  ;;  %v1283_v44 = vmul.f32 8.0, %v1219_v62  ;;  %vm452_vm9 = vcmp.lt.s32.totalorder %v13064_v22, 0  ;;  %v14403_v36 = vsub.s32 %v13071_v45, %v14367_v30 }
 0x540   : > { %v13260_v18 = vadd.f32 %v6050_v2, %v5922_v31  ;;  %v13263_v33 = vmin.u32 %v707_v25, %v13089_v34  ;;  %v288_v8 = vadd.s32 248, %v7441_v1  ;;  %v13270_v13 = vsel %vm450_vm8, 1, %v14400_v39 }
 0x541   : > { %v965_v49 = vcvt.s32.f32 %v14403_v36  ;;  %v1347_v20 = vadd.f32 0.0001, %v1283_v44  ;;  %vm454_vm5 = vcmp.lt.s32.totalorder %v13089_v34, 0  ;;  %v13275_v2 = vsel %vm452_vm9, 1, %v14400_v39 }
 0x542   : > { %14402 = vst [vmem:[#allocation77_spill] sm:$0xff] %v13260_v18  ;;  %v6434_v22 = vadd.f32 %v6242_v37, %v13260_v18  ;;  %v1029_v19 = vmul.f32 0.125, %v964_v29  ;;  %vm899_vm2 = vcmp.gt.s32.totalorder %v13263_v33, 1  ;;  %v391_v62 = vsub.s32 %v288_v8, %v14367_v30 }
 0x543   : > { %v6965_v17 = vtrunc.f32 %v1347_v20  ;;  %v900_v45 = vsel %vm899_vm2, %v13263_v33, 1  ;;  %v392_v1 = vsub.s32 %v288_v8, %v7449_v4  ;;  %v13284_v34 = vsel %vm454_vm5, 1, %v14400_v39 }
 0x544   : > { %6562 = vst [vmem:[%s7867_s27 + $0x1b8] sm:$0xff] %v6434_v22  ;;  %v966_v25 = vcvt.s32.f32 %v900_v45  ;;  %v1030_v31 = vmul.f32 0.125, %v965_v49  ;;  %v967_v36 = vcvt.s32.f32 %v391_v62  ;;  %7194 = vlog2.f32 %v1029_v19 }
 0x545   : > { %v6966_v44 = vcvt.f32.s32 %v6965_v17  ;;  %vm456_vm15 = vcmp.lt.s32.totalorder %v392_v1, 0  ;;  %v711_v29 = vsub.s32 0, %v392_v1  ;;  %vm770_vm6 = vcmp.lt.s32.totalorder %v13061_v54, 8 }
 0x546   : > { %v7191_v37 = vpop.eup %7190  ;;  %v1031_v10 = vmul.f32 0.125, %v966_v25  ;;  %v13288_v30 = vsel %vm456_vm15, 1, %v14400_v39  ;;  %v1032_v22 = vmul.f32 0.125, %v967_v36  ;;  %7196 = vlog2.f32 %v1030_v31 }
 0x547   : > { %v1149_v20 = vmul.f32 0.6931472, %v7191_v37  ;;  %14404 = vst [vmem:[#allocation78_spill] sm:$0xff] %v13288_v30  ;;  %v1475_v4 = vadd.s32 8, %v6966_v44  ;;  %v13290_v8 = vmin.u32 %v711_v29, %v392_v1 }
 0x548   : > { %v7193_v50 = vpop.eup %7192  ;;  %7198 = vlog2.f32 %v1031_v10 }
 0x549   : > { %v1220_v45 = vmul.f32 0.36067376, %v1149_v20  ;;  %vm1595_vm3 = vcmp.lt.s32.totalorder %v1475_v4, 15  ;;  %v13294_v62 = vmul.f32 0.6931472, %v7193_v50  ;;  %vm903_vm4 = vcmp.gt.s32.totalorder %v13290_v8, 1 }
 0x54a   : > { %v13297_v25 = vsel %vm1595_vm3, %v1475_v4, 15  ;;  %v13300_v19 = vsel %vm903_vm4, %v13290_v8, 1  ;;  %7200 = vlog2.f32 %v1032_v22 }
 0x54b   : > { %v1284_v39 = vmul.f32 8.0, %v1220_v45  ;;  %vm1795_vm0 = vcmp.eq.s32.totalorder %v13297_v25, 0  ;;  %vm1926_vm14 = vcmp.eq.s32.totalorder %v13297_v25, 4  ;;  %vm2057_vm11 = vcmp.eq.s32.totalorder %v13297_v25, 8 }
 0x54c   : > { %vm2188_vm13 = vcmp.eq.s32.totalorder %v13297_v25, 12  ;;  %v1862_v1 = vsel %vm1795_vm0, %v7527_v35, 0.0  ;;  %vm2319_vm12 = vcmp.eq.s32.totalorder %v13297_v25, 16  ;;  %vm2450_vm10 = vcmp.eq.s32.totalorder %v13297_v25, 20 }
 0x54d   : > { %v1348_v10 = vadd.f32 0.0001, %v1284_v39  ;;  %v1993_v50 = vsel %vm1926_vm14, %v7539_v38, %v1862_v1  ;;  %vm2581_vm7 = vcmp.eq.s32.totalorder %v13297_v25, 24  ;;  %vm2712_vm1 = vcmp.eq.s32.totalorder %v13297_v25, 28 }
 0x54e   : > { %vm2843_vm8 = vcmp.eq.s32.totalorder %v13297_v25, 1  ;;  %v2124_v37 = vsel %vm2057_vm11, %v7548_v42, %v1993_v50  ;;  %vm2974_vm9 = vcmp.eq.s32.totalorder %v13297_v25, 5  ;;  %vm3105_vm5 = vcmp.eq.s32.totalorder %v13297_v25, 9  ;;  %v13324_v45 = vpop.eup %7194 }
 0x54f   : > { %v6967_v31 = vtrunc.f32 %v1348_v10  ;;  %v2910_v44 = vsel %vm2843_vm8, %v7584_v56, 0.0  ;;  %v2255_v29 = vsel %vm2188_vm13, %v7551_v43, %v2124_v37  ;;  %vm3236_vm2 = vcmp.eq.s32.totalorder %v13297_v25, 13 }
 0x550   : > { %v3041_v36 = vsel %vm2974_vm9, %v7589_v60, %v2910_v44  ;;  %v2386_v4 = vsel %vm2319_vm12, %v7558_v46, %v2255_v29  ;;  %vm3367_vm15 = vcmp.eq.s32.totalorder %v13297_v25, 17  ;;  %vm3498_vm3 = vcmp.eq.s32.totalorder %v13297_v25, 21  ;;  %v13332_v1 = vpop.eup %7196 }
 0x551   : > { %v6968_v20 = vcvt.f32.s32 %v6967_v31  ;;  %v3172_v22 = vsel %vm3105_vm5, %v7592_v61, %v3041_v36  ;;  %v2517_v39 = vsel %vm2450_vm10, %v7561_v47, %v2386_v4  ;;  %vm3629_vm4 = vcmp.eq.s32.totalorder %v13297_v25, 25 }
 0x552   : > { %v3303_v10 = vsel %vm3236_vm2, %v7599_v3, %v3172_v22  ;;  %v2648_v31 = vsel %vm2581_vm7, %v7572_v51, %v2517_v39  ;;  %vm3760_vm0 = vcmp.eq.s32.totalorder %v13297_v25, 29  ;;  %v13339_v44 = vpop.eup %7198  ;;  %vm3891_vm14 = vcmp.eq.s32.totalorder %v13297_v25, 2 }
 0x553   : > { %v1476_v50 = vadd.s32 8, %v6968_v20  ;;  %v3434_v37 = vsel %vm3367_vm15, %v7605_v6, %v3303_v10  ;;  %v2779_v29 = vsel %vm2712_vm1, %v7581_v55, %v2648_v31  ;;  %vm4022_vm11 = vcmp.eq.s32.totalorder %v13297_v25, 6 }
 0x554   : > { %v3565_v36 = vsel %vm3498_vm3, %v7616_v12, %v3434_v37  ;;  %v13347_v20 = vpop.eup %7200  ;;  %v3958_v22 = vsel %vm3891_vm14, %v7631_v21, 0.0  ;;  %vm4153_vm12 = vcmp.eq.s32.totalorder %v13297_v25, 10  ;;  %vm4284_vm10 = vcmp.eq.s32.totalorder %v13297_v25, 14 }
 0x555   : > { %vm1597_vm13 = vcmp.lt.s32.totalorder %v1476_v50, 15  ;;  %v3696_v4 = vsel %vm3629_vm4, %v7622_v15, %v3565_v36  ;;  %v4089_v31 = vsel %vm4022_vm11, %v7640_v24, %v3958_v22  ;;  %vm4415_vm7 = vcmp.eq.s32.totalorder %v13297_v25, 18 }
 0x556   : > { %v1598_v39 = vsel %vm1597_vm13, %v1476_v50, 15  ;;  %v3827_v10 = vsel %vm3760_vm0, %v7625_v16, %v3696_v4  ;;  %v4220_v17 = vsel %vm4153_vm12, %v7650_v32, %v4089_v31  ;;  %vm4546_vm1 = vcmp.eq.s32.totalorder %v13297_v25, 22 }
 0x557   : > { %v1668_v37 = vsel %vm770_vm6, %v13061_v54, %v1598_v39  ;;  %v14405_v36 = vmul.u32 16, %v13270_v13  ;;  %v4351_v50 = vsel %vm4284_vm10, %v7656_v40, %v4220_v17  ;;  %vm4677_vm8 = vcmp.eq.s32.totalorder %v13297_v25, 26 }
 0x558   : > { %vm4808_vm9 = vcmp.eq.s32.totalorder %v13297_v25, 30  ;;  %v4482_v4 = vsel %vm4415_vm7, %v7663_v52, %v4351_v50  ;;  %vm4939_vm6 = vcmp.eq.s32.totalorder %v13297_v25, 3  ;;  %vm5070_vm5 = vcmp.eq.s32.totalorder %v13297_v25, 7 }
 0x559   : > { %v13363_v49 = vadd.s32 %v1668_v37, %v14405_v36  ;;  %vm5201_vm2 = vcmp.eq.s32.totalorder %v13297_v25, 11  ;;  %v4613_v54 = vsel %vm4546_vm1, %v7666_v53, %v4482_v4  ;;  %v5006_v13 = vsel %vm4939_vm6, %v7679_v14, 0.0 }
 0x55a   : > { %vm5332_vm15 = vcmp.eq.s32.totalorder %v13297_v25, 15  ;;  %vm5463_vm3 = vcmp.eq.s32.totalorder %v13297_v25, 19  ;;  %v4744_v17 = vsel %vm4677_vm8, %v7671_v59, %v4613_v54  ;;  %v5137_v22 = vsel %vm5070_vm5, %v7684_v23, %v5006_v13 }
 0x55b   : > { %vm5594_vm4 = vcmp.eq.s32.totalorder %v13297_v25, 23  ;;  %vm5725_vm0 = vcmp.eq.s32.totalorder %v13297_v25, 27  ;;  %v4875_v39 = vsel %vm4808_vm9, %v7674_v63, %v4744_v17  ;;  %v5268_v31 = vsel %vm5201_vm2, %v7688_v26, %v5137_v22 }
 0x55c   : > { %vm5856_vm14 = vcmp.eq.s32.totalorder %v13297_v25, 31  ;;  %v5987_v37 = vadd.f32 %v3827_v10, %v2779_v29  ;;  %v5399_v36 = vsel %vm5332_vm15, %v7693_v57, %v5268_v31  ;;  %vm1796_vm11 = vcmp.eq.s32.totalorder %v13363_v49, 0 }
 0x55d   : > { %vm1927_vm13 = vcmp.eq.s32.totalorder %v13363_v49, 4  ;;  %vm2058_vm12 = vcmp.eq.s32.totalorder %v13363_v49, 8  ;;  %v5530_v50 = vsel %vm5463_vm3, %v7696_v58, %v5399_v36  ;;  %v1863_v54 = vsel %vm1796_vm11, %v7527_v35, 0.0 }
 0x55e   : > { %v6051_v4 = vadd.f32 %v5987_v37, %v4875_v39  ;;  %vm2189_vm10 = vcmp.eq.s32.totalorder %v13363_v49, 12  ;;  %v5661_v13 = vsel %vm5594_vm4, %v7699_v0, %v5530_v50  ;;  %v1994_v29 = vsel %vm1927_vm13, %v7539_v38, %v1863_v54  ;;  %v6243_v39 = vld [vmem:[%s7432_s28 + $0x1c0] sm:$0xff] }
 0x55f   : > { %vm2320_vm7 = vcmp.eq.s32.totalorder %v13363_v49, 16  ;;  %vm2451_vm1 = vcmp.eq.s32.totalorder %v13363_v49, 20  ;;  %v5792_v10 = vsel %vm5725_vm0, %v7705_v9, %v5661_v13  ;;  %v2125_v17 = vsel %vm2058_vm12, %v7548_v42, %v1994_v29 }
 0x560   : > { %vm2582_vm8 = vcmp.eq.s32.totalorder %v13363_v49, 24  ;;  %vm2713_vm9 = vcmp.eq.s32.totalorder %v13363_v49, 28  ;;  %v5923_v22 = vsel %vm5856_vm14, %v7714_v11, %v5792_v10  ;;  %v2256_v31 = vsel %vm2189_vm10, %v7551_v43, %v2125_v17 }
 0x561   : > { %vm2844_vm6 = vcmp.eq.s32.totalorder %v13363_v49, 1  ;;  %vm2975_vm5 = vcmp.eq.s32.totalorder %v13363_v49, 5  ;;  %v13407_v37 = vadd.f32 %v6051_v4, %v5923_v22  ;;  %v2387_v36 = vsel %vm2320_vm7, %v7558_v46, %v2256_v31 }
 0x562   : > { %v2911_v50 = vsel %vm2844_vm6, %v7584_v56, 0.0  ;;  %vm3106_vm2 = vcmp.eq.s32.totalorder %v13363_v49, 9  ;;  %v2518_v54 = vsel %vm2451_vm1, %v7561_v47, %v2387_v36  ;;  %vm3237_vm15 = vcmp.eq.s32.totalorder %v13363_v49, 13 }
 0x563   : > { %14406 = vst [vmem:[#allocation79_spill] sm:$0xff] %v13407_v37  ;;  %v3042_v25 = vsel %vm2975_vm5, %v7589_v60, %v2911_v50  ;;  %vm3368_vm3 = vcmp.eq.s32.totalorder %v13363_v49, 17  ;;  %v6435_v13 = vadd.f32 %v6243_v39, %v13407_v37  ;;  %v2649_v4 = vsel %vm2582_vm8, %v7572_v51, %v2518_v54 }
 0x564   : > { %v3173_v29 = vsel %vm3106_vm2, %v7592_v61, %v3042_v25  ;;  %vm3499_vm4 = vcmp.eq.s32.totalorder %v13363_v49, 21  ;;  %v2780_v10 = vsel %vm2713_vm9, %v7581_v55, %v2649_v4  ;;  %vm3630_vm0 = vcmp.eq.s32.totalorder %v13363_v49, 25 }
 0x565   : > { %v3304_v17 = vsel %vm3237_vm15, %v7599_v3, %v3173_v29  ;;  %vm3761_vm14 = vcmp.eq.s32.totalorder %v13363_v49, 29  ;;  %6563 = vst [vmem:[%s7867_s27 + $0x1c0] sm:$0xff] %v6435_v13  ;;  %vm3892_vm11 = vcmp.eq.s32.totalorder %v13363_v49, 2  ;;  %vm4023_vm13 = vcmp.eq.s32.totalorder %v13363_v49, 6 }
 0x566   : > { %v3435_v22 = vsel %vm3368_vm3, %v7605_v6, %v3304_v17  ;;  %vm4154_vm12 = vcmp.eq.s32.totalorder %v13363_v49, 10  ;;  %v3959_v31 = vsel %vm3892_vm11, %v7631_v21, 0.0  ;;  %vm4285_vm10 = vcmp.eq.s32.totalorder %v13363_v49, 14 }
 0x567   : > { %v3566_v39 = vsel %vm3499_vm4, %v7616_v12, %v3435_v22  ;;  %vm4416_vm7 = vcmp.eq.s32.totalorder %v13363_v49, 18  ;;  %v4090_v50 = vsel %vm4023_vm13, %v7640_v24, %v3959_v31  ;;  %vm4547_vm1 = vcmp.eq.s32.totalorder %v13363_v49, 22 }
 0x568   : > { %v3697_v36 = vsel %vm3630_vm0, %v7622_v15, %v3566_v39  ;;  %vm4678_vm8 = vcmp.eq.s32.totalorder %v13363_v49, 26  ;;  %v4221_v25 = vsel %vm4154_vm12, %v7650_v32, %v4090_v50  ;;  %vm4809_vm9 = vcmp.eq.s32.totalorder %v13363_v49, 30 }
 0x569   : > { %v3828_v54 = vsel %vm3761_vm14, %v7625_v16, %v3697_v36  ;;  %vm4940_vm6 = vcmp.eq.s32.totalorder %v13363_v49, 3  ;;  %v4352_v13 = vsel %vm4285_vm10, %v7656_v40, %v4221_v25  ;;  %vm5071_vm5 = vcmp.eq.s32.totalorder %v13363_v49, 7 }
 0x56a   : > { %v5007_v4 = vsel %vm4940_vm6, %v7679_v14, 0.0  ;;  %vm5202_vm2 = vcmp.eq.s32.totalorder %v13363_v49, 11  ;;  %v4483_v29 = vsel %vm4416_vm7, %v7663_v52, %v4352_v13  ;;  %vm5333_vm15 = vcmp.eq.s32.totalorder %v13363_v49, 15 }
 0x56b   : > { %v5138_v17 = vsel %vm5071_vm5, %v7684_v23, %v5007_v4  ;;  %vm5464_vm3 = vcmp.eq.s32.totalorder %v13363_v49, 19  ;;  %v4614_v22 = vsel %vm4547_vm1, %v7666_v53, %v4483_v29  ;;  %vm5595_vm4 = vcmp.eq.s32.totalorder %v13363_v49, 23 }
 0x56c   : > { %v5269_v39 = vsel %vm5202_vm2, %v7688_v26, %v5138_v17  ;;  %vm5726_vm0 = vcmp.eq.s32.totalorder %v13363_v49, 27  ;;  %v4745_v31 = vsel %vm4678_vm8, %v7671_v59, %v4614_v22  ;;  %vm5857_vm14 = vcmp.eq.s32.totalorder %v13363_v49, 31 }
 0x56d   : > { %v5400_v36 = vsel %vm5333_vm15, %v7693_v57, %v5269_v39  ;;  %v5988_v50 = vadd.f32 %v3828_v54, %v2780_v10  ;;  %v4876_v25 = vsel %vm4809_vm9, %v7674_v63, %v4745_v31  ;;  %v1153_v4 = vmul.f32 0.6931472, %v13324_v45  ;;  %v6244_v54 = vld [vmem:[%s7432_s28 + $0x1c8] sm:$0xff] }
 0x56e   : > { %v5531_v13 = vsel %vm5464_vm3, %v7696_v58, %v5400_v36  ;;  %v1221_v29 = vmul.f32 0.36067376, %v13294_v62  ;;  %v1155_v22 = vmul.f32 0.6931472, %v13332_v1  ;;  %v1157_v39 = vmul.f32 0.6931472, %v13339_v44 }
 0x56f   : > { %v5662_v17 = vsel %vm5595_vm4, %v7699_v0, %v5531_v13  ;;  %v6052_v18 = vadd.f32 %v5988_v50, %v4876_v25  ;;  %v1222_v37 = vmul.f32 0.36067376, %v1153_v4  ;;  %v968_v31 = vcvt.s32.f32 %v13300_v19  ;;  %v6251_v36 = vld [vmem:[%s7432_s28 + $0x200] sm:$0xff] }
 0x570   : > { %v5793_v10 = vsel %vm5726_vm0, %v7705_v9, %v5662_v17  ;;  %v1285_v7 = vmul.f32 8.0, %v1221_v29  ;;  %v1223_v45 = vmul.f32 0.36067376, %v1155_v22  ;;  %v1224_v50 = vmul.f32 0.36067376, %v1157_v39  ;;  %v6252_v29 = vld [vmem:[%s7432_s28 + $0x208] sm:$0xff] }
 0x571   : > { %v5924_v62 = vsel %vm5857_vm14, %v7714_v11, %v5793_v10  ;;  %v1159_v1 = vmul.f32 0.6931472, %v13347_v20  ;;  %v1286_v44 = vmul.f32 8.0, %v1222_v37  ;;  %v1033_v4 = vmul.f32 0.125, %v968_v31  ;;  %v14408_v10 = vld [vmem:[#allocation23_spill] sm:$0xff]  ;;  %v6253_v39 = vld [vmem:[%s7432_s28 + $0x210] sm:$0xff] }
 0x572   : > { %v13479_v25 = vadd.f32 %v6052_v18, %v5924_v62  ;;  %v1349_v13 = vadd.f32 0.0001, %v1285_v7  ;;  %vm772_vm11 = vcmp.lt.s32.totalorder %v13077_v5, 8  ;;  %v1287_v19 = vmul.f32 8.0, %v1223_v45  ;;  %v6254_v20 = vld [vmem:[%s7432_s28 + $0x218] sm:$0xff]  ;;  %v6255_v7 = vld [vmem:[%s7432_s28 + $0x220] sm:$0xff] }
 0x573   : > { %v1288_v17 = vmul.f32 8.0, %v1224_v50  ;;  %v1225_v49 = vmul.f32 0.36067376, %v1159_v1  ;;  %v6443_v22 = vadd.f32 %v6251_v36, %v14408_v10  ;;  %v1350_v62 = vadd.f32 0.0001, %v1286_v44  ;;  %v6256_v31 = vld [vmem:[%s7432_s28 + $0x228] sm:$0xff] }
 0x574   : > { %14407 = vst [vmem:[#allocation80_spill] sm:$0xff] %v13479_v25  ;;  %v6436_v18 = vadd.f32 %v6244_v54, %v13479_v25  ;;  %v6969_v37 = vtrunc.f32 %v1349_v13  ;;  %7202 = vlog2.f32 %v1033_v4  ;;  %v1351_v27 = vadd.f32 0.0001, %v1287_v19  ;;  %v14409_v50 = vld [vmem:[#allocation24_spill] sm:$0xff]  ;;  %v14410_v10 = vld [vmem:[#allocation25_spill] sm:$0xff]  ;;  %v14411_v4 = vld [vmem:[#allocation26_spill] sm:$0xff] }
 0x575   : > { %v1352_v48 = vadd.f32 0.0001, %v1288_v17  ;;  %v1289_v45 = vmul.f32 8.0, %v1225_v49  ;;  %6571 = vst [vmem:[%s7867_s27 + $0x200] sm:$0xff] %v6443_v22  ;;  %v6444_v1 = vadd.f32 %v6252_v29, %v14409_v50  ;;  %v6257_v36 = vld [vmem:[%s7432_s28 + $0x230] sm:$0xff]  ;;  %v6971_v44 = vtrunc.f32 %v1350_v62  ;;  %v14412_v49 = vld [vmem:[#allocation27_spill] sm:$0xff] }
 0x576   : > { %6564 = vst [vmem:[%s7867_s27 + $0x1c8] sm:$0xff] %v6436_v18  ;;  %v6970_v54 = vcvt.f32.s32 %v6969_v37  ;;  %v6445_v13 = vadd.f32 %v6253_v39, %v14410_v10  ;;  %v6446_v25 = vadd.f32 %v6254_v20, %v14411_v4  ;;  %v6973_v41 = vtrunc.f32 %v1351_v27  ;;  %v6259_v29 = vld [vmem:[%s7432_s28 + $0x240] sm:$0xff]  ;;  %v6260_v50 = vld [vmem:[%s7432_s28 + $0x248] sm:$0xff]  ;;  %v14413_v62 = vld [vmem:[#allocation28_spill] sm:$0xff] }
 0x577   : > { %v6975_v19 = vtrunc.f32 %v1352_v48  ;;  %v1353_v17 = vadd.f32 0.0001, %v1289_v45  ;;  %6572 = vst [vmem:[%s7867_s27 + $0x208] sm:$0xff] %v6444_v1  ;;  %v6447_v22 = vadd.f32 %v6255_v7, %v14412_v49  ;;  %v6972_v18 = vcvt.f32.s32 %v6971_v44  ;;  %v14414_v37 = vld [vmem:[#allocation29_spill] sm:$0xff]  ;;  %v14415_v45 = vld [vmem:[#allocation30_spill] sm:$0xff] }
 0x578   : > { %v1477_v30 = vadd.s32 8, %v6970_v54  ;;  %6573 = vst [vmem:[%s7867_s27 + $0x210] sm:$0xff] %v6445_v13  ;;  %6574 = vst [vmem:[%s7867_s27 + $0x218] sm:$0xff] %v6446_v25  ;;  %v6448_v39 = vadd.f32 %v6256_v31, %v14413_v62  ;;  %v6449_v20 = vadd.f32 %v6257_v36, %v14414_v37  ;;  %v6974_v27 = vcvt.f32.s32 %v6973_v41  ;;  %v14416_v54 = vld [vmem:[#allocation31_spill] sm:$0xff]  ;;  %v14417_v25 = vld [vmem:[#allocation32_spill] sm:$0xff] }
 0x579   : > { %v6976_v10 = vcvt.f32.s32 %v6975_v19  ;;  %v6977_v48 = vtrunc.f32 %v1353_v17  ;;  %6575 = vst [vmem:[%s7867_s27 + $0x220] sm:$0xff] %v6447_v22  ;;  %v6450_v1 = vadd.f32 %v6258_v28, %v14415_v45  ;;  %v1478_v7 = vadd.s32 8, %v6972_v18 }
 0x57a   : > { %vm1599_vm13 = vcmp.lt.s32.totalorder %v1477_v30, 15  ;;  %6576 = vst [vmem:[%s7867_s27 + $0x228] sm:$0xff] %v6448_v39  ;;  %6577 = vst [vmem:[%s7867_s27 + $0x230] sm:$0xff] %v6449_v20  ;;  %v6451_v44 = vadd.f32 %v6259_v29, %v14416_v54  ;;  %v6452_v13 = vadd.f32 %v6260_v50, %v14417_v25  ;;  %v13512_v36 = vadd.s32 8, %v6974_v27 }
 0x57b   : > { %v13510_v31 = vsel %vm1599_vm13, %v1477_v30, 15  ;;  %v13514_v41 = vadd.s32 8, %v6976_v10  ;;  %v13516_v4 = vcvt.f32.s32 %v6977_v48  ;;  %6578 = vst [vmem:[%s7867_s27 + $0x238] sm:$0xff] %v6450_v1  ;;  %vm1601_vm12 = vcmp.lt.s32.totalorder %v1478_v7, 15 }
 0x57c   : > { %vm1797_vm10 = vcmp.eq.s32.totalorder %v13510_v31, 0  ;;  %vm1928_vm7 = vcmp.eq.s32.totalorder %v13510_v31, 4  ;;  %vm2059_vm1 = vcmp.eq.s32.totalorder %v13510_v31, 8  ;;  %6579 = vst [vmem:[%s7867_s27 + $0x240] sm:$0xff] %v6451_v44  ;;  %6580 = vst [vmem:[%s7867_s27 + $0x248] sm:$0xff] %v6452_v13  ;;  %v1602_v28 = vsel %vm1601_vm12, %v1478_v7, 15 }
 0x57d   : > { %v1864_v30 = vsel %vm1797_vm10, %v7527_v35, 0.0  ;;  %vm2190_vm8 = vcmp.eq.s32.totalorder %v13510_v31, 12  ;;  %vm2321_vm9 = vcmp.eq.s32.totalorder %v13510_v31, 16  ;;  %v1670_v17 = vsel %vm772_vm11, %v13077_v5, %v1602_v28 }
 0x57e   : > { %v13527_v19 = vpop.eup %7202  ;;  %v1995_v49 = vsel %vm1928_vm7, %v7539_v38, %v1864_v30  ;;  %vm2452_vm6 = vcmp.eq.s32.totalorder %v13510_v31, 20  ;;  %vm2583_vm5 = vcmp.eq.s32.totalorder %v13510_v31, 24  ;;  %v14418_v22 = vmul.u32 16, %v13275_v2 }
 0x57f   : > { %v2126_v50 = vsel %vm2059_vm1, %v7548_v42, %v1995_v49  ;;  %vm2714_vm2 = vcmp.eq.s32.totalorder %v13510_v31, 28  ;;  %vm2845_vm15 = vcmp.eq.s32.totalorder %v13510_v31, 1  ;;  %vm2976_vm3 = vcmp.eq.s32.totalorder %v13510_v31, 5 }
 0x580   : > { %v13537_v29 = vadd.s32 %v1670_v17, %v14418_v22  ;;  %v2257_v18 = vsel %vm2190_vm8, %v7551_v43, %v2126_v50  ;;  %v2912_v5 = vsel %vm2845_vm15, %v7584_v56, 0.0  ;;  %vm3107_vm4 = vcmp.eq.s32.totalorder %v13510_v31, 9 }
 0x581   : > { %v2388_v62 = vsel %vm2321_vm9, %v7558_v46, %v2257_v18  ;;  %v3043_v2 = vsel %vm2976_vm3, %v7589_v60, %v2912_v5  ;;  %vm3238_vm0 = vcmp.eq.s32.totalorder %v13510_v31, 13  ;;  %vm3369_vm14 = vcmp.eq.s32.totalorder %v13510_v31, 17 }
 0x582   : > { %v2519_v39 = vsel %vm2452_vm6, %v7561_v47, %v2388_v62  ;;  %v3174_v37 = vsel %vm3107_vm4, %v7592_v61, %v3043_v2  ;;  %vm3500_vm11 = vcmp.eq.s32.totalorder %v13510_v31, 21  ;;  %vm3631_vm13 = vcmp.eq.s32.totalorder %v13510_v31, 25 }
 0x583   : > { %v2650_v20 = vsel %vm2583_vm5, %v7572_v51, %v2519_v39  ;;  %v3305_v27 = vsel %vm3238_vm0, %v7599_v3, %v3174_v37  ;;  %vm3762_vm12 = vcmp.eq.s32.totalorder %v13510_v31, 29  ;;  %vm3893_vm10 = vcmp.eq.s32.totalorder %v13510_v31, 2 }
 0x584   : > { %v2781_v10 = vsel %vm2714_vm2, %v7581_v55, %v2650_v20  ;;  %v3436_v48 = vsel %vm3369_vm14, %v7605_v6, %v3305_v27  ;;  %v3960_v45 = vsel %vm3893_vm10, %v7631_v21, 0.0  ;;  %vm4024_vm7 = vcmp.eq.s32.totalorder %v13510_v31, 6 }
 0x585   : > { %v3567_v1 = vsel %vm3500_vm11, %v7616_v12, %v3436_v48  ;;  %v4091_v7 = vsel %vm4024_vm7, %v7640_v24, %v3960_v45  ;;  %vm4155_vm1 = vcmp.eq.s32.totalorder %v13510_v31, 10  ;;  %vm4286_vm8 = vcmp.eq.s32.totalorder %v13510_v31, 14 }
 0x586   : > { %v3698_v54 = vsel %vm3631_vm13, %v7622_v15, %v3567_v1  ;;  %v4222_v44 = vsel %vm4155_vm1, %v7650_v32, %v4091_v7  ;;  %vm4417_vm9 = vcmp.eq.s32.totalorder %v13510_v31, 18  ;;  %vm4548_vm6 = vcmp.eq.s32.totalorder %v13510_v31, 22  ;;  %v6245_v1 = vld [vmem:[%s7432_s28 + $0x1d0] sm:$0xff] }
 0x587   : > { %v3829_v25 = vsel %vm3762_vm12, %v7625_v16, %v3698_v54  ;;  %v4353_v13 = vsel %vm4286_vm8, %v7656_v40, %v4222_v44  ;;  %vm4679_vm5 = vcmp.eq.s32.totalorder %v13510_v31, 26  ;;  %vm4810_vm2 = vcmp.eq.s32.totalorder %v13510_v31, 30 }
 0x588   : > { %v4484_v28 = vsel %vm4417_vm9, %v7663_v52, %v4353_v13  ;;  %vm4941_vm15 = vcmp.eq.s32.totalorder %v13510_v31, 3  ;;  %vm5072_vm3 = vcmp.eq.s32.totalorder %v13510_v31, 7  ;;  %vm5203_vm4 = vcmp.eq.s32.totalorder %v13510_v31, 11 }
 0x589   : > { %v4615_v30 = vsel %vm4548_vm6, %v7666_v53, %v4484_v28  ;;  %v5008_v17 = vsel %vm4941_vm15, %v7679_v14, 0.0  ;;  %vm5334_vm0 = vcmp.eq.s32.totalorder %v13510_v31, 15  ;;  %vm5465_vm14 = vcmp.eq.s32.totalorder %v13510_v31, 19 }
 0x58a   : > { %v4746_v49 = vsel %vm4679_vm5, %v7671_v59, %v4615_v30  ;;  %v5139_v22 = vsel %vm5072_vm3, %v7684_v23, %v5008_v17  ;;  %vm5596_vm11 = vcmp.eq.s32.totalorder %v13510_v31, 23  ;;  %vm5727_vm13 = vcmp.eq.s32.totalorder %v13510_v31, 27 }
 0x58b   : > { %v4877_v50 = vsel %vm4810_vm2, %v7674_v63, %v4746_v49  ;;  %v5270_v18 = vsel %vm5203_vm4, %v7688_v26, %v5139_v22  ;;  %vm5858_vm12 = vcmp.eq.s32.totalorder %v13510_v31, 31  ;;  %v5989_v5 = vadd.f32 %v3829_v25, %v2781_v10 }
 0x58c   : > { %v5401_v62 = vsel %vm5334_vm0, %v7693_v57, %v5270_v18  ;;  %vm1798_vm10 = vcmp.eq.s32.totalorder %v13537_v29, 0  ;;  %vm1929_vm7 = vcmp.eq.s32.totalorder %v13537_v29, 4  ;;  %vm2060_vm1 = vcmp.eq.s32.totalorder %v13537_v29, 8 }
 0x58d   : > { %v5532_v2 = vsel %vm5465_vm14, %v7696_v58, %v5401_v62  ;;  %v6053_v39 = vadd.f32 %v5989_v5, %v4877_v50  ;;  %v1865_v37 = vsel %vm1798_vm10, %v7527_v35, 0.0  ;;  %vm2191_vm8 = vcmp.eq.s32.totalorder %v13537_v29, 12 }
 0x58e   : > { %v5663_v20 = vsel %vm5596_vm11, %v7699_v0, %v5532_v2  ;;  %v1996_v27 = vsel %vm1929_vm7, %v7539_v38, %v1865_v37  ;;  %vm2322_vm9 = vcmp.eq.s32.totalorder %v13537_v29, 16  ;;  %vm2453_vm6 = vcmp.eq.s32.totalorder %v13537_v29, 20 }
 0x58f   : > { %v5794_v10 = vsel %vm5727_vm13, %v7705_v9, %v5663_v20  ;;  %v2127_v48 = vsel %vm2060_vm1, %v7548_v42, %v1996_v27  ;;  %vm2584_vm5 = vcmp.eq.s32.totalorder %v13537_v29, 24  ;;  %vm2715_vm2 = vcmp.eq.s32.totalorder %v13537_v29, 28 }
 0x590   : > { %v5925_v45 = vsel %vm5858_vm12, %v7714_v11, %v5794_v10  ;;  %v2258_v7 = vsel %vm2191_vm8, %v7551_v43, %v2127_v48  ;;  %vm2846_vm15 = vcmp.eq.s32.totalorder %v13537_v29, 1  ;;  %vm2977_vm3 = vcmp.eq.s32.totalorder %v13537_v29, 5 }
 0x591   : > { %v13617_v54 = vadd.f32 %v6053_v39, %v5925_v45  ;;  %v2389_v44 = vsel %vm2322_vm9, %v7558_v46, %v2258_v7  ;;  %v2913_v25 = vsel %vm2846_vm15, %v7584_v56, 0.0  ;;  %vm3108_vm4 = vcmp.eq.s32.totalorder %v13537_v29, 9 }
 0x592   : > { %v2520_v13 = vsel %vm2453_vm6, %v7561_v47, %v2389_v44  ;;  %v3044_v31 = vsel %vm2977_vm3, %v7589_v60, %v2913_v25  ;;  %vm3239_vm0 = vcmp.eq.s32.totalorder %v13537_v29, 13  ;;  %vm3370_vm14 = vcmp.eq.s32.totalorder %v13537_v29, 17 }
 0x593   : > { %v6437_v28 = vadd.f32 %v6245_v1, %v13617_v54  ;;  %v2651_v30 = vsel %vm2584_vm5, %v7572_v51, %v2520_v13  ;;  %v3175_v17 = vsel %vm3108_vm4, %v7592_v61, %v3044_v31  ;;  %vm3501_vm11 = vcmp.eq.s32.totalorder %v13537_v29, 21 }
 0x594   : > { %v2782_v49 = vsel %vm2715_vm2, %v7581_v55, %v2651_v30  ;;  %v3306_v22 = vsel %vm3239_vm0, %v7599_v3, %v3175_v17  ;;  %vm3632_vm13 = vcmp.eq.s32.totalorder %v13537_v29, 25  ;;  %vm3763_vm12 = vcmp.eq.s32.totalorder %v13537_v29, 29 }
 0x595   : > { %vm774_vm10 = vcmp.lt.s32.totalorder %v13263_v33, 8  ;;  %6565 = vst [vmem:[%s7867_s27 + $0x1d0] sm:$0xff] %v6437_v28  ;;  %v3437_v50 = vsel %vm3370_vm14, %v7605_v6, %v3306_v22  ;;  %vm3894_vm7 = vcmp.eq.s32.totalorder %v13537_v29, 2  ;;  %vm4025_vm1 = vcmp.eq.s32.totalorder %v13537_v29, 6 }
 0x596   : > { %vm4156_vm8 = vcmp.eq.s32.totalorder %v13537_v29, 10  ;;  %v3568_v18 = vsel %vm3501_vm11, %v7616_v12, %v3437_v50  ;;  %v3961_v5 = vsel %vm3894_vm7, %v7631_v21, 0.0  ;;  %vm4287_vm9 = vcmp.eq.s32.totalorder %v13537_v29, 14 }
 0x597   : > { %vm4418_vm6 = vcmp.eq.s32.totalorder %v13537_v29, 18  ;;  %v3699_v62 = vsel %vm3632_vm13, %v7622_v15, %v3568_v18  ;;  %v4092_v2 = vsel %vm4025_vm1, %v7640_v24, %v3961_v5  ;;  %vm4549_vm5 = vcmp.eq.s32.totalorder %v13537_v29, 22  ;;  %v6246_v18 = vld [vmem:[%s7432_s28 + $0x1d8] sm:$0xff] }
 0x598   : > { %vm4680_vm2 = vcmp.eq.s32.totalorder %v13537_v29, 26  ;;  %v3830_v39 = vsel %vm3763_vm12, %v7625_v16, %v3699_v62  ;;  %v4223_v37 = vsel %vm4156_vm8, %v7650_v32, %v4092_v2  ;;  %vm4811_vm15 = vcmp.eq.s32.totalorder %v13537_v29, 30 }
 0x599   : > { %vm4942_vm3 = vcmp.eq.s32.totalorder %v13537_v29, 3  ;;  %v4354_v20 = vsel %vm4287_vm9, %v7656_v40, %v4223_v37  ;;  %vm5073_vm4 = vcmp.eq.s32.totalorder %v13537_v29, 7  ;;  %vm5204_vm0 = vcmp.eq.s32.totalorder %v13537_v29, 11 }
 0x59a   : > { %v5009_v27 = vsel %vm4942_vm3, %v7679_v14, 0.0  ;;  %v4485_v10 = vsel %vm4418_vm6, %v7663_v52, %v4354_v20  ;;  %vm5335_vm14 = vcmp.eq.s32.totalorder %v13537_v29, 15  ;;  %vm5466_vm11 = vcmp.eq.s32.totalorder %v13537_v29, 19 }
 0x59b   : > { %v5140_v48 = vsel %vm5073_vm4, %v7684_v23, %v5009_v27  ;;  %v4616_v45 = vsel %vm4549_vm5, %v7666_v53, %v4485_v10  ;;  %vm5597_vm13 = vcmp.eq.s32.totalorder %v13537_v29, 23  ;;  %vm5728_vm12 = vcmp.eq.s32.totalorder %v13537_v29, 27 }
 0x59c   : > { %v5271_v1 = vsel %vm5204_vm0, %v7688_v26, %v5140_v48  ;;  %v4747_v7 = vsel %vm4680_vm2, %v7671_v59, %v4616_v45  ;;  %vm5859_vm7 = vcmp.eq.s32.totalorder %v13537_v29, 31  ;;  %v5990_v25 = vadd.f32 %v3830_v39, %v2782_v49 }
 0x59d   : > { %v5402_v44 = vsel %vm5335_vm14, %v7693_v57, %v5271_v1  ;;  %v4878_v13 = vsel %vm4811_vm15, %v7674_v63, %v4747_v7  ;;  %vm1603_vm1 = vcmp.lt.s32.totalorder %v13512_v36, 15  ;;  %vm1605_vm8 = vcmp.lt.s32.totalorder %v13514_v41, 15 }
 0x59e   : > { %v5533_v31 = vsel %vm5466_vm11, %v7696_v58, %v5402_v44  ;;  %v6054_v30 = vadd.f32 %v5990_v25, %v4878_v13  ;;  %v13681_v17 = vsel %vm1603_vm1, %v13512_v36, 15  ;;  %v1606_v22 = vsel %vm1605_vm8, %v13514_v41, 15 }
 0x59f   : > { %v5664_v28 = vsel %vm5597_vm13, %v7699_v0, %v5533_v31  ;;  %v1672_v29 = vsel %vm774_vm10, %v13263_v33, %v1606_v22  ;;  %vm1799_vm9 = vcmp.eq.s32.totalorder %v13681_v17, 0  ;;  %vm1930_vm6 = vcmp.eq.s32.totalorder %v13681_v17, 4 }
 0x5a0   : > { %v5795_v49 = vsel %vm5728_vm12, %v7705_v9, %v5664_v28  ;;  %v14419_v5 = vmul.u32 16, %v13284_v34  ;;  %v1866_v36 = vsel %vm1799_vm9, %v7527_v35, 0.0  ;;  %vm2061_vm5 = vcmp.eq.s32.totalorder %v13681_v17, 8 }
 0x5a1   : > { %v5926_v50 = vsel %vm5859_vm7, %v7714_v11, %v5795_v49  ;;  %v1997_v33 = vsel %vm1930_vm6, %v7539_v38, %v1866_v36  ;;  %vm2192_vm10 = vcmp.eq.s32.totalorder %v13681_v17, 12  ;;  %vm2323_vm2 = vcmp.eq.s32.totalorder %v13681_v17, 16 }
 0x5a2   : > { %v13694_v62 = vadd.s32 %v1672_v29, %v14419_v5  ;;  %v13698_v41 = vadd.f32 %v6054_v30, %v5926_v50  ;;  %v2128_v2 = vsel %vm2061_vm5, %v7548_v42, %v1997_v33  ;;  %vm2454_vm15 = vcmp.eq.s32.totalorder %v13681_v17, 20 }
 0x5a3   : > { %vm2585_vm3 = vcmp.eq.s32.totalorder %v13681_v17, 24  ;;  %vm2716_vm4 = vcmp.eq.s32.totalorder %v13681_v17, 28  ;;  %v2259_v39 = vsel %vm2192_vm10, %v7551_v43, %v2128_v2  ;;  %vm2847_vm0 = vcmp.eq.s32.totalorder %v13681_v17, 1 }
 0x5a4   : > { %v6438_v34 = vadd.f32 %v6246_v18, %v13698_v41  ;;  %vm2978_vm14 = vcmp.eq.s32.totalorder %v13681_v17, 5  ;;  %v2390_v37 = vsel %vm2323_vm2, %v7558_v46, %v2259_v39  ;;  %v2914_v20 = vsel %vm2847_vm0, %v7584_v56, 0.0 }
 0x5a5   : > { %vm3109_vm11 = vcmp.eq.s32.totalorder %v13681_v17, 9  ;;  %vm3240_vm13 = vcmp.eq.s32.totalorder %v13681_v17, 13  ;;  %v2521_v27 = vsel %vm2454_vm15, %v7561_v47, %v2390_v37  ;;  %v3045_v10 = vsel %vm2978_vm14, %v7589_v60, %v2914_v20 }
 0x5a6   : > { %6566 = vst [vmem:[%s7867_s27 + $0x1d8] sm:$0xff] %v6438_v34  ;;  %vm3371_vm12 = vcmp.eq.s32.totalorder %v13681_v17, 17  ;;  %vm3502_vm7 = vcmp.eq.s32.totalorder %v13681_v17, 21  ;;  %v2652_v48 = vsel %vm2585_vm3, %v7572_v51, %v2521_v27  ;;  %v3176_v45 = vsel %vm3109_vm11, %v7592_v61, %v3045_v10 }
 0x5a7   : > { %vm3633_vm1 = vcmp.eq.s32.totalorder %v13681_v17, 25  ;;  %vm3764_vm8 = vcmp.eq.s32.totalorder %v13681_v17, 29  ;;  %v2783_v1 = vsel %vm2716_vm4, %v7581_v55, %v2652_v48  ;;  %v3307_v7 = vsel %vm3240_vm13, %v7599_v3, %v3176_v45 }
 0x5a8   : > { %vm3895_vm9 = vcmp.eq.s32.totalorder %v13681_v17, 2  ;;  %vm4026_vm6 = vcmp.eq.s32.totalorder %v13681_v17, 6  ;;  %v3438_v44 = vsel %vm3371_vm12, %v7605_v6, %v3307_v7  ;;  %vm4157_vm5 = vcmp.eq.s32.totalorder %v13681_v17, 10 }
 0x5a9   : > { %v3962_v25 = vsel %vm3895_vm9, %v7631_v21, 0.0  ;;  %vm4288_vm10 = vcmp.eq.s32.totalorder %v13681_v17, 14  ;;  %v3569_v13 = vsel %vm3502_vm7, %v7616_v12, %v3438_v44  ;;  %vm4419_vm2 = vcmp.eq.s32.totalorder %v13681_v17, 18  ;;  %v6247_v44 = vld [vmem:[%s7432_s28 + $0x1e0] sm:$0xff] }
 0x5aa   : > { %v4093_v31 = vsel %vm4026_vm6, %v7640_v24, %v3962_v25  ;;  %vm4550_vm15 = vcmp.eq.s32.totalorder %v13681_v17, 22  ;;  %v3700_v28 = vsel %vm3633_vm1, %v7622_v15, %v3569_v13  ;;  %vm4681_vm3 = vcmp.eq.s32.totalorder %v13681_v17, 26 }
 0x5ab   : > { %v4224_v30 = vsel %vm4157_vm5, %v7650_v32, %v4093_v31  ;;  %vm4812_vm4 = vcmp.eq.s32.totalorder %v13681_v17, 30  ;;  %v3831_v22 = vsel %vm3764_vm8, %v7625_v16, %v3700_v28  ;;  %vm4943_vm0 = vcmp.eq.s32.totalorder %v13681_v17, 3 }
 0x5ac   : > { %v4355_v49 = vsel %vm4288_vm10, %v7656_v40, %v4224_v30  ;;  %vm5074_vm14 = vcmp.eq.s32.totalorder %v13681_v17, 7  ;;  %v5010_v50 = vsel %vm4943_vm0, %v7679_v14, 0.0  ;;  %vm5205_vm11 = vcmp.eq.s32.totalorder %v13681_v17, 11 }
 0x5ad   : > { %v4486_v29 = vsel %vm4419_vm2, %v7663_v52, %v4355_v49  ;;  %vm5336_vm13 = vcmp.eq.s32.totalorder %v13681_v17, 15  ;;  %v5141_v5 = vsel %vm5074_vm14, %v7684_v23, %v5010_v50  ;;  %vm5467_vm12 = vcmp.eq.s32.totalorder %v13681_v17, 19 }
 0x5ae   : > { %v4617_v18 = vsel %vm4550_vm15, %v7666_v53, %v4486_v29  ;;  %vm5598_vm7 = vcmp.eq.s32.totalorder %v13681_v17, 23  ;;  %v5272_v33 = vsel %vm5205_vm11, %v7688_v26, %v5141_v5  ;;  %vm5729_vm1 = vcmp.eq.s32.totalorder %v13681_v17, 27 }
 0x5af   : > { %v4748_v36 = vsel %vm4681_vm3, %v7671_v59, %v4617_v18  ;;  %vm5860_vm8 = vcmp.eq.s32.totalorder %v13681_v17, 31  ;;  %v5403_v34 = vsel %vm5336_vm13, %v7693_v57, %v5272_v33  ;;  %v5991_v39 = vadd.f32 %v3831_v22, %v2783_v1 }
 0x5b0   : > { %v4879_v2 = vsel %vm4812_vm4, %v7674_v63, %v4748_v36  ;;  %vm1800_vm9 = vcmp.eq.s32.totalorder %v13694_v62, 0  ;;  %v5534_v37 = vsel %vm5467_vm12, %v7696_v58, %v5403_v34  ;;  %vm1931_vm6 = vcmp.eq.s32.totalorder %v13694_v62, 4 }
 0x5b1   : > { %v1867_v20 = vsel %vm1800_vm9, %v7527_v35, 0.0  ;;  %vm2062_vm5 = vcmp.eq.s32.totalorder %v13694_v62, 8  ;;  %v5665_v27 = vsel %vm5598_vm7, %v7699_v0, %v5534_v37  ;;  %v6055_v10 = vadd.f32 %v5991_v39, %v4879_v2 }
 0x5b2   : > { %v1998_v48 = vsel %vm1931_vm6, %v7539_v38, %v1867_v20  ;;  %vm2193_vm10 = vcmp.eq.s32.totalorder %v13694_v62, 12  ;;  %v5796_v45 = vsel %vm5729_vm1, %v7705_v9, %v5665_v27  ;;  %vm2324_vm2 = vcmp.eq.s32.totalorder %v13694_v62, 16 }
 0x5b3   : > { %v2129_v1 = vsel %vm2062_vm5, %v7548_v42, %v1998_v48  ;;  %vm2455_vm15 = vcmp.eq.s32.totalorder %v13694_v62, 20  ;;  %v5927_v7 = vsel %vm5860_vm8, %v7714_v11, %v5796_v45  ;;  %vm2586_vm3 = vcmp.eq.s32.totalorder %v13694_v62, 24 }
 0x5b4   : > { %v2260_v25 = vsel %vm2193_vm10, %v7551_v43, %v2129_v1  ;;  %vm2717_vm4 = vcmp.eq.s32.totalorder %v13694_v62, 28  ;;  %v13783_v13 = vadd.f32 %v6055_v10, %v5927_v7  ;;  %vm2848_vm0 = vcmp.eq.s32.totalorder %v13694_v62, 1  ;;  %v6261_v1 = vld [vmem:[%s7432_s28 + $0x250] sm:$0xff]  ;;  %v6262_v7 = vld [vmem:[%s7432_s28 + $0x258] sm:$0xff] }
 0x5b5   : > { %v2391_v31 = vsel %vm2324_vm2, %v7558_v46, %v2260_v25  ;;  %vm2979_vm14 = vcmp.eq.s32.totalorder %v13694_v62, 5  ;;  %v2915_v17 = vsel %vm2848_vm0, %v7584_v56, 0.0  ;;  %vm3110_vm11 = vcmp.eq.s32.totalorder %v13694_v62, 9 }
 0x5b6   : > { %v2522_v28 = vsel %vm2455_vm15, %v7561_v47, %v2391_v31  ;;  %vm3241_vm13 = vcmp.eq.s32.totalorder %v13694_v62, 13  ;;  %v6439_v30 = vadd.f32 %v6247_v44, %v13783_v13  ;;  %v3046_v49 = vsel %vm2979_vm14, %v7589_v60, %v2915_v17  ;;  %v6263_v31 = vld [vmem:[%s7432_s28 + $0x260] sm:$0xff] }
 0x5b7   : > { %v2653_v22 = vsel %vm2586_vm3, %v7572_v51, %v2522_v28  ;;  %vm3372_vm12 = vcmp.eq.s32.totalorder %v13694_v62, 17  ;;  %v3177_v50 = vsel %vm3110_vm11, %v7592_v61, %v3046_v49  ;;  %vm3503_vm7 = vcmp.eq.s32.totalorder %v13694_v62, 21  ;;  %v6264_v49 = vld [vmem:[%s7432_s28 + $0x268] sm:$0xff] }
 0x5b8   : > { %v2784_v29 = vsel %vm2717_vm4, %v7581_v55, %v2653_v22  ;;  %vm3634_vm1 = vcmp.eq.s32.totalorder %v13694_v62, 25  ;;  %6567 = vst [vmem:[%s7867_s27 + $0x1e0] sm:$0xff] %v6439_v30  ;;  %v3308_v18 = vsel %vm3241_vm13, %v7599_v3, %v3177_v50  ;;  %vm3765_vm8 = vcmp.eq.s32.totalorder %v13694_v62, 29  ;;  %v6265_v50 = vld [vmem:[%s7432_s28 + $0x270] sm:$0xff] }
 0x5b9   : > { %vm3896_vm9 = vcmp.eq.s32.totalorder %v13694_v62, 2  ;;  %vm4027_vm6 = vcmp.eq.s32.totalorder %v13694_v62, 6  ;;  %v3439_v5 = vsel %vm3372_vm12, %v7605_v6, %v3308_v18  ;;  %vm4158_vm5 = vcmp.eq.s32.totalorder %v13694_v62, 10 }
 0x5ba   : > { %v3963_v36 = vsel %vm3896_vm9, %v7631_v21, 0.0  ;;  %vm4289_vm10 = vcmp.eq.s32.totalorder %v13694_v62, 14  ;;  %v3570_v33 = vsel %vm3503_vm7, %v7616_v12, %v3439_v5  ;;  %vm4420_vm2 = vcmp.eq.s32.totalorder %v13694_v62, 18 }
 0x5bb   : > { %v4094_v2 = vsel %vm4027_vm6, %v7640_v24, %v3963_v36  ;;  %vm4551_vm15 = vcmp.eq.s32.totalorder %v13694_v62, 22  ;;  %v3701_v34 = vsel %vm3634_vm1, %v7622_v15, %v3570_v33  ;;  %vm4682_vm3 = vcmp.eq.s32.totalorder %v13694_v62, 26  ;;  %v14420_v36 = vld [vmem:[#allocation33_spill] sm:$0xff] }
 0x5bc   : > { %v4225_v39 = vsel %vm4158_vm5, %v7650_v32, %v4094_v2  ;;  %vm4813_vm4 = vcmp.eq.s32.totalorder %v13694_v62, 30  ;;  %v3832_v37 = vsel %vm3765_vm8, %v7625_v16, %v3701_v34  ;;  %vm4944_vm0 = vcmp.eq.s32.totalorder %v13694_v62, 3  ;;  %v14421_v2 = vld [vmem:[#allocation34_spill] sm:$0xff] }
 0x5bd   : > { %v4356_v20 = vsel %vm4289_vm10, %v7656_v40, %v4225_v39  ;;  %vm5075_vm14 = vcmp.eq.s32.totalorder %v13694_v62, 7  ;;  %v5011_v10 = vsel %vm4944_vm0, %v7679_v14, 0.0  ;;  %vm5206_vm11 = vcmp.eq.s32.totalorder %v13694_v62, 11  ;;  %v6266_v39 = vld [vmem:[%s7432_s28 + $0x278] sm:$0xff] }
 0x5be   : > { %v4487_v27 = vsel %vm4420_vm2, %v7663_v52, %v4356_v20  ;;  %vm5337_vm13 = vcmp.eq.s32.totalorder %v13694_v62, 15  ;;  %v5142_v45 = vsel %vm5075_vm14, %v7684_v23, %v5011_v10  ;;  %vm5468_vm12 = vcmp.eq.s32.totalorder %v13694_v62, 19 }
 0x5bf   : > { %v4618_v48 = vsel %vm4551_vm15, %v7666_v53, %v4487_v27  ;;  %vm5599_vm7 = vcmp.eq.s32.totalorder %v13694_v62, 23  ;;  %v5273_v25 = vsel %vm5206_vm11, %v7688_v26, %v5142_v45  ;;  %vm5730_vm1 = vcmp.eq.s32.totalorder %v13694_v62, 27  ;;  %v14424_v45 = vld [vmem:[#allocation37_spill] sm:$0xff] }
 0x5c0   : > { %v4749_v44 = vsel %vm4682_vm3, %v7671_v59, %v4618_v48  ;;  %vm5861_vm8 = vcmp.eq.s32.totalorder %v13694_v62, 31  ;;  %v5404_v17 = vsel %vm5337_vm13, %v7693_v57, %v5273_v25  ;;  %v5992_v30 = vadd.f32 %v3832_v37, %v2784_v29 }
 0x5c1   : > { %v4880_v28 = vsel %vm4813_vm4, %v7674_v63, %v4749_v44  ;;  %v1161_v22 = vmul.f32 0.6931472, %v13527_v19  ;;  %v5535_v18 = vsel %vm5468_vm12, %v7696_v58, %v5404_v17  ;;  %v1481_v5 = vadd.s32 8, %v13516_v4  ;;  %v14422_v19 = vld [vmem:[#allocation35_spill] sm:$0xff]  ;;  %v14423_v4 = vld [vmem:[#allocation36_spill] sm:$0xff] }
 0x5c2   : > { %v6453_v33 = vadd.f32 %v6261_v1, %v14420_v36  ;;  %v6454_v34 = vadd.f32 %v6262_v7, %v14421_v2  ;;  %v5666_v29 = vsel %vm5599_vm7, %v7699_v0, %v5535_v18  ;;  %v6056_v37 = vadd.f32 %v5992_v30, %v4880_v28  ;;  %v6248_v44 = vld [vmem:[%s7432_s28 + $0x1e8] sm:$0xff]  ;;  %v14425_v28 = vld [vmem:[#allocation38_spill] sm:$0xff] }
 0x5c3   : > { %v1226_v20 = vmul.f32 0.36067376, %v1161_v22  ;;  %v6455_v27 = vadd.f32 %v6263_v31, %v14422_v19  ;;  %v5797_v10 = vsel %vm5730_vm1, %v7705_v9, %v5666_v29  ;;  %vm1607_vm9 = vcmp.lt.s32.totalorder %v1481_v5, 15 }
 0x5c4   : > { %6581 = vst [vmem:[%s7867_s27 + $0x250] sm:$0xff] %v6453_v33  ;;  %6582 = vst [vmem:[%s7867_s27 + $0x258] sm:$0xff] %v6454_v34  ;;  %v6456_v48 = vadd.f32 %v6264_v49, %v14423_v4  ;;  %v6457_v1 = vadd.f32 %v6265_v50, %v14424_v45  ;;  %v5928_v7 = vsel %vm5861_vm8, %v7714_v11, %v5797_v10  ;;  %v13865_v31 = vsel %vm1607_vm9, %v1481_v5, 15 }
 0x5c5   : > { %v1290_v25 = vmul.f32 8.0, %v1226_v20  ;;  %6583 = vst [vmem:[%s7867_s27 + $0x260] sm:$0xff] %v6455_v27  ;;  %v6458_v17 = vadd.f32 %v6266_v39, %v14425_v28  ;;  %v13869_v30 = vadd.f32 %v6056_v37, %v5928_v7  ;;  %vm776_vm6 = vcmp.lt.s32.totalorder %v13290_v8, 8 }
 0x5c6   : > { %vm1801_vm5 = vcmp.eq.s32.totalorder %v13865_v31, 0  ;;  %vm1932_vm10 = vcmp.eq.s32.totalorder %v13865_v31, 4  ;;  %vm2063_vm2 = vcmp.eq.s32.totalorder %v13865_v31, 8  ;;  %6584 = vst [vmem:[%s7867_s27 + $0x268] sm:$0xff] %v6456_v48  ;;  %6585 = vst [vmem:[%s7867_s27 + $0x270] sm:$0xff] %v6457_v1  ;;  %vm2194_vm15 = vcmp.eq.s32.totalorder %v13865_v31, 12 }
 0x5c7   : > { %v1354_v62 = vadd.f32 0.0001, %v1290_v25  ;;  %v1868_v22 = vsel %vm1801_vm5, %v7527_v35, 0.0  ;;  %vm2325_vm3 = vcmp.eq.s32.totalorder %v13865_v31, 16  ;;  %6586 = vst [vmem:[%s7867_s27 + $0x278] sm:$0xff] %v6458_v17  ;;  %v6440_v49 = vadd.f32 %v6248_v44, %v13869_v30 }
 0x5c8   : > { %v1999_v50 = vsel %vm1932_vm10, %v7539_v38, %v1868_v22  ;;  %vm2456_vm4 = vcmp.eq.s32.totalorder %v13865_v31, 20  ;;  %vm2587_vm0 = vcmp.eq.s32.totalorder %v13865_v31, 24  ;;  %vm2718_vm14 = vcmp.eq.s32.totalorder %v13865_v31, 28 }
 0x5c9   : > { %v6979_v18 = vtrunc.f32 %v1354_v62  ;;  %v2130_v5 = vsel %vm2063_vm2, %v7548_v42, %v1999_v50  ;;  %vm2849_vm11 = vcmp.eq.s32.totalorder %v13865_v31, 1  ;;  %6568 = vst [vmem:[%s7867_s27 + $0x1e8] sm:$0xff] %v6440_v49  ;;  %vm2980_vm13 = vcmp.eq.s32.totalorder %v13865_v31, 5  ;;  %v14426_v62 = vld [vmem:[#allocation78_spill] sm:$0xff] }
 0x5ca   : > { %v2261_v36 = vsel %vm2194_vm15, %v7551_v43, %v2130_v5  ;;  %v2916_v33 = vsel %vm2849_vm11, %v7584_v56, 0.0  ;;  %vm3111_vm12 = vcmp.eq.s32.totalorder %v13865_v31, 9  ;;  %vm3242_vm7 = vcmp.eq.s32.totalorder %v13865_v31, 13 }
 0x5cb   : > { %v6980_v2 = vcvt.f32.s32 %v6979_v18  ;;  %v2392_v34 = vsel %vm2325_vm3, %v7558_v46, %v2261_v36  ;;  %v3047_v39 = vsel %vm2980_vm13, %v7589_v60, %v2916_v33  ;;  %vm3373_vm1 = vcmp.eq.s32.totalorder %v13865_v31, 17 }
 0x5cc   : > { %v2523_v29 = vsel %vm2456_vm4, %v7561_v47, %v2392_v34  ;;  %v3178_v37 = vsel %vm3111_vm12, %v7592_v61, %v3047_v39  ;;  %vm3504_vm8 = vcmp.eq.s32.totalorder %v13865_v31, 21  ;;  %vm3635_vm9 = vcmp.eq.s32.totalorder %v13865_v31, 25 }
 0x5cd   : > { %v1482_v20 = vadd.s32 8, %v6980_v2  ;;  %v2654_v19 = vsel %vm2587_vm0, %v7572_v51, %v2523_v29  ;;  %v3309_v27 = vsel %vm3242_vm7, %v7599_v3, %v3178_v37  ;;  %vm3766_vm5 = vcmp.eq.s32.totalorder %v13865_v31, 29 }
 0x5ce   : > { %v2785_v10 = vsel %vm2718_vm14, %v7581_v55, %v2654_v19  ;;  %v3440_v4 = vsel %vm3373_vm1, %v7605_v6, %v3309_v27  ;;  %vm3897_vm10 = vcmp.eq.s32.totalorder %v13865_v31, 2  ;;  %vm4028_vm15 = vcmp.eq.s32.totalorder %v13865_v31, 6 }
 0x5cf   : > { %vm1609_vm2 = vcmp.lt.s32.totalorder %v1482_v20, 15  ;;  %v3571_v48 = vsel %vm3504_vm8, %v7616_v12, %v3440_v4  ;;  %v3964_v45 = vsel %vm3897_vm10, %v7631_v21, 0.0  ;;  %vm4159_vm3 = vcmp.eq.s32.totalorder %v13865_v31, 10 }
 0x5d0   : > { %v1610_v1 = vsel %vm1609_vm2, %v1482_v20, 15  ;;  %v3702_v7 = vsel %vm3635_vm9, %v7622_v15, %v3571_v48  ;;  %v4095_v44 = vsel %vm4028_vm15, %v7640_v24, %v3964_v45  ;;  %vm4290_vm4 = vcmp.eq.s32.totalorder %v13865_v31, 14  ;;  %v6249_v48 = vld [vmem:[%s7432_s28 + $0x1f0] sm:$0xff] }
 0x5d1   : > { %v1674_v25 = vsel %vm776_vm6, %v13290_v8, %v1610_v1  ;;  %v3833_v28 = vsel %vm3766_vm5, %v7625_v16, %v3702_v7  ;;  %v4226_v17 = vsel %vm4159_vm3, %v7650_v32, %v4095_v44  ;;  %v14427_v22 = vmul.u32 16, %v14426_v62  ;;  %v6272_v62 = vld [vmem:[%s7432_s28 + $0x2a8] sm:$0xff] }
 0x5d2   : > { %v4357_v50 = vsel %vm4290_vm4, %v7656_v40, %v4226_v17  ;;  %vm4421_vm0 = vcmp.eq.s32.totalorder %v13865_v31, 18  ;;  %vm4552_vm14 = vcmp.eq.s32.totalorder %v13865_v31, 22  ;;  %vm4683_vm6 = vcmp.eq.s32.totalorder %v13865_v31, 26 }
 0x5d3   : > { %v13927_v49 = vadd.s32 %v1674_v25, %v14427_v22  ;;  %v4488_v18 = vsel %vm4421_vm0, %v7663_v52, %v4357_v50  ;;  %vm4814_vm11 = vcmp.eq.s32.totalorder %v13865_v31, 30  ;;  %vm4945_vm13 = vcmp.eq.s32.totalorder %v13865_v31, 3 }
 0x5d4   : > { %v4619_v8 = vsel %vm4552_vm14, %v7666_v53, %v4488_v18  ;;  %v5012_v5 = vsel %vm4945_vm13, %v7679_v14, 0.0  ;;  %vm5076_vm12 = vcmp.eq.s32.totalorder %v13865_v31, 7  ;;  %vm5207_vm7 = vcmp.eq.s32.totalorder %v13865_v31, 11  ;;  %v6275_v18 = vld [vmem:[%s7432_s28 + $0x2c0] sm:$0xff] }
 0x5d5   : > { %v4750_v36 = vsel %vm4683_vm6, %v7671_v59, %v4619_v8  ;;  %v5143_v33 = vsel %vm5076_vm12, %v7684_v23, %v5012_v5  ;;  %vm5338_vm1 = vcmp.eq.s32.totalorder %v13865_v31, 15  ;;  %vm5469_vm8 = vcmp.eq.s32.totalorder %v13865_v31, 19 }
 0x5d6   : > { %v4881_v2 = vsel %vm4814_vm11, %v7674_v63, %v4750_v36  ;;  %v5274_v34 = vsel %vm5207_vm7, %v7688_v26, %v5143_v33  ;;  %vm5600_vm9 = vcmp.eq.s32.totalorder %v13865_v31, 23  ;;  %vm5731_vm5 = vcmp.eq.s32.totalorder %v13865_v31, 27  ;;  %v6278_v36 = vld [vmem:[%s7432_s28 + $0x2d8] sm:$0xff] }
 0x5d7   : > { %v5405_v39 = vsel %vm5338_vm1, %v7693_v57, %v5274_v34  ;;  %vm5862_vm10 = vcmp.eq.s32.totalorder %v13865_v31, 31  ;;  %v5993_v29 = vadd.f32 %v3833_v28, %v2785_v10  ;;  %vm1802_vm2 = vcmp.eq.s32.totalorder %v13927_v49, 0 }
 0x5d8   : > { %v5536_v37 = vsel %vm5469_vm8, %v7696_v58, %v5405_v39  ;;  %v1869_v20 = vsel %vm1802_vm2, %v7527_v35, 0.0  ;;  %vm1933_vm15 = vcmp.eq.s32.totalorder %v13927_v49, 4  ;;  %vm2064_vm3 = vcmp.eq.s32.totalorder %v13927_v49, 8  ;;  %v6279_v39 = vld [vmem:[%s7432_s28 + $0x2e0] sm:$0xff] }
 0x5d9   : > { %v5667_v19 = vsel %vm5600_vm9, %v7699_v0, %v5536_v37  ;;  %v6057_v27 = vadd.f32 %v5993_v29, %v4881_v2  ;;  %v2000_v4 = vsel %vm1933_vm15, %v7539_v38, %v1869_v20  ;;  %vm2195_vm4 = vcmp.eq.s32.totalorder %v13927_v49, 12  ;;  %v14428_v2 = vld [vmem:[#allocation39_spill] sm:$0xff]  ;;  %v6281_v37 = vld [vmem:[%s7432_s28 + $0x2f0] sm:$0xff] }
 0x5da   : > { %v5798_v31 = vsel %vm5731_vm5, %v7705_v9, %v5667_v19  ;;  %v2131_v10 = vsel %vm2064_vm3, %v7548_v42, %v2000_v4  ;;  %vm2326_vm0 = vcmp.eq.s32.totalorder %v13927_v49, 16  ;;  %vm2457_vm14 = vcmp.eq.s32.totalorder %v13927_v49, 20  ;;  %v6280_v29 = vld [vmem:[%s7432_s28 + $0x2e8] sm:$0xff]  ;;  %v14429_v19 = vld [vmem:[#allocation40_spill] sm:$0xff] }
 0x5db   : > { %v5929_v35 = vsel %vm5862_vm10, %v7714_v11, %v5798_v31  ;;  %v2262_v45 = vsel %vm2195_vm4, %v7551_v43, %v2131_v10  ;;  %vm2588_vm6 = vcmp.eq.s32.totalorder %v13927_v49, 24  ;;  %vm2719_vm11 = vcmp.eq.s32.totalorder %v13927_v49, 28  ;;  %v6282_v10 = vld [vmem:[%s7432_s28 + $0x2f8] sm:$0xff] }
 0x5dc   : > { %v13967_v38 = vadd.f32 %v6057_v27, %v5929_v35  ;;  %v2393_v1 = vsel %vm2326_vm0, %v7558_v46, %v2262_v45  ;;  %vm2850_vm13 = vcmp.eq.s32.totalorder %v13927_v49, 1  ;;  %vm2981_vm12 = vcmp.eq.s32.totalorder %v13927_v49, 5  ;;  %v14430_v27 = vld [vmem:[#allocation41_spill] sm:$0xff]  ;;  %v6283_v35 = vld [vmem:[%s7432_s28 + $0x300] sm:$0xff]  ;;  %v6285_v45 = vld [vmem:[%s7432_s28 + $0x310] sm:$0xff] }
 0x5dd   : > { %v2524_v42 = vsel %vm2457_vm14, %v7561_v47, %v2393_v1  ;;  %v2917_v7 = vsel %vm2850_vm13, %v7584_v56, 0.0  ;;  %vm3112_vm7 = vcmp.eq.s32.totalorder %v13927_v49, 9  ;;  %vm3243_vm1 = vcmp.eq.s32.totalorder %v13927_v49, 13 }
 0x5de   : > { %v6441_v43 = vadd.f32 %v6249_v48, %v13967_v38  ;;  %v2655_v44 = vsel %vm2588_vm6, %v7572_v51, %v2524_v42  ;;  %v3048_v25 = vsel %vm2981_vm12, %v7589_v60, %v2917_v7  ;;  %vm3374_vm8 = vcmp.eq.s32.totalorder %v13927_v49, 17  ;;  %v6284_v48 = vld [vmem:[%s7432_s28 + $0x308] sm:$0xff]  ;;  %v6250_v42 = vld [vmem:[%s7432_s28 + $0x1f8] sm:$0xff] }
 0x5df   : > { %v2786_v46 = vsel %vm2719_vm11, %v7581_v55, %v2655_v44  ;;  %v3179_v28 = vsel %vm3112_vm7, %v7592_v61, %v3048_v25  ;;  %vm3505_vm9 = vcmp.eq.s32.totalorder %v13927_v49, 21  ;;  %vm3636_vm5 = vcmp.eq.s32.totalorder %v13927_v49, 25  ;;  %v14432_v7 = vld [vmem:[#allocation43_spill] sm:$0xff]  ;;  %v14433_v44 = vld [vmem:[#allocation44_spill] sm:$0xff] }
 0x5e0   : > { %6569 = vst [vmem:[%s7867_s27 + $0x1f0] sm:$0xff] %v6441_v43  ;;  %v3310_v47 = vsel %vm3243_vm1, %v7599_v3, %v3179_v28  ;;  %vm3767_vm10 = vcmp.eq.s32.totalorder %v13927_v49, 29  ;;  %vm3898_vm2 = vcmp.eq.s32.totalorder %v13927_v49, 2  ;;  %vm4029_vm15 = vcmp.eq.s32.totalorder %v13927_v49, 6  ;;  %v6287_v28 = vld [vmem:[%s7432_s28 + $0x320] sm:$0xff] }
 0x5e1   : > { %v3441_v51 = vsel %vm3374_vm8, %v7605_v6, %v3310_v47  ;;  %v3965_v55 = vsel %vm3898_vm2, %v7631_v21, 0.0  ;;  %vm4160_vm3 = vcmp.eq.s32.totalorder %v13927_v49, 10  ;;  %vm4291_vm4 = vcmp.eq.s32.totalorder %v13927_v49, 14  ;;  %v6267_v21 = vld [vmem:[%s7432_s28 + $0x280] sm:$0xff]  ;;  %v6288_v47 = vld [vmem:[%s7432_s28 + $0x328] sm:$0xff] }
 0x5e2   : > { %v3572_v56 = vsel %vm3505_vm9, %v7616_v12, %v3441_v51  ;;  %v4096_v60 = vsel %vm4029_vm15, %v7640_v24, %v3965_v55  ;;  %vm4422_vm0 = vcmp.eq.s32.totalorder %v13927_v49, 18  ;;  %vm4553_vm14 = vcmp.eq.s32.totalorder %v13927_v49, 22  ;;  %v6269_v24 = vld [vmem:[%s7432_s28 + $0x290] sm:$0xff] }
 0x5e3   : > { %v3703_v61 = vsel %vm3636_vm5, %v7622_v15, %v3572_v56  ;;  %v4227_v3 = vsel %vm4160_vm3, %v7650_v32, %v4096_v60  ;;  %vm4684_vm6 = vcmp.eq.s32.totalorder %v13927_v49, 26  ;;  %vm4815_vm11 = vcmp.eq.s32.totalorder %v13927_v49, 30  ;;  %v6268_v15 = vld [vmem:[%s7432_s28 + $0x288] sm:$0xff]  ;;  %v14435_v56 = vld [vmem:[#allocation46_spill] sm:$0xff] }
 0x5e4   : > { %v3834_v6 = vsel %vm3767_vm10, %v7625_v16, %v3703_v61  ;;  %v4358_v12 = vsel %vm4291_vm4, %v7656_v40, %v4227_v3  ;;  %vm4946_vm13 = vcmp.eq.s32.totalorder %v13927_v49, 3  ;;  %vm5077_vm12 = vcmp.eq.s32.totalorder %v13927_v49, 7  ;;  %v6270_v16 = vld [vmem:[%s7432_s28 + $0x298] sm:$0xff]  ;;  %v6271_v40 = vld [vmem:[%s7432_s28 + $0x2a0] sm:$0xff]  ;;  %v14436_v61 = vld [vmem:[#allocation47_spill] sm:$0xff] }
 0x5e5   : > { %v4489_v32 = vsel %vm4422_vm0, %v7663_v52, %v4358_v12  ;;  %v5013_v17 = vsel %vm4946_vm13, %v7679_v14, 0.0  ;;  %vm5208_vm7 = vcmp.eq.s32.totalorder %v13927_v49, 11  ;;  %vm5339_vm1 = vcmp.eq.s32.totalorder %v13927_v49, 15  ;;  %v6273_v52 = vld [vmem:[%s7432_s28 + $0x2b0] sm:$0xff]  ;;  %v6274_v14 = vld [vmem:[%s7432_s28 + $0x2b8] sm:$0xff] }
 0x5e6   : > { %v4620_v22 = vsel %vm4553_vm14, %v7666_v53, %v4489_v32  ;;  %v5144_v50 = vsel %vm5077_vm12, %v7684_v23, %v5013_v17  ;;  %vm5470_vm8 = vcmp.eq.s32.totalorder %v13927_v49, 19  ;;  %vm5601_vm9 = vcmp.eq.s32.totalorder %v13927_v49, 23  ;;  %v6276_v53 = vld [vmem:[%s7432_s28 + $0x2c8] sm:$0xff]  ;;  %v6277_v23 = vld [vmem:[%s7432_s28 + $0x2d0] sm:$0xff]  ;;  %v6290_v12 = vld [vmem:[%s7432_s28 + $0x338] sm:$0xff] }
 0x5e7   : > { %v4751_v8 = vsel %vm4684_vm6, %v7671_v59, %v4620_v22  ;;  %v5275_v5 = vsel %vm5208_vm7, %v7688_v26, %v5144_v50  ;;  %vm5732_vm5 = vcmp.eq.s32.totalorder %v13927_v49, 27  ;;  %vm5863_vm10 = vcmp.eq.s32.totalorder %v13927_v49, 31  ;;  %v14438_v32 = vld [vmem:[#allocation49_spill] sm:$0xff]  ;;  %v6293_v22 = vld [vmem:[%s7432_s28 + $0x350] sm:$0xff] }
 0x5e8   : > { %v4882_v33 = vsel %vm4815_vm11, %v7674_v63, %v4751_v8  ;;  %v5406_v59 = vsel %vm5339_vm1, %v7693_v57, %v5275_v5  ;;  %v5994_v26 = vadd.f32 %v3834_v6, %v2786_v46  ;;  %v6459_v34 = vadd.f32 %v6267_v21, %v14428_v2  ;;  %v14431_v57 = vld [vmem:[#allocation42_spill] sm:$0xff]  ;;  %v6286_v46 = vld [vmem:[%s7432_s28 + $0x318] sm:$0xff]  ;;  %v6289_v6 = vld [vmem:[%s7432_s28 + $0x330] sm:$0xff] }
 0x5e9   : > { %v5537_v20 = vsel %vm5470_vm8, %v7696_v58, %v5406_v59  ;;  %v6460_v63 = vadd.f32 %v6268_v15, %v14429_v19  ;;  %v6461_v4 = vadd.f32 %v6269_v24, %v14430_v27  ;;  %v6462_v31 = vadd.f32 %v6270_v16, %v14431_v57  ;;  %v6291_v21 = vld [vmem:[%s7432_s28 + $0x340] sm:$0xff]  ;;  %v14437_v15 = vld [vmem:[#allocation48_spill] sm:$0xff]  ;;  %v6294_v50 = vld [vmem:[%s7432_s28 + $0x358] sm:$0xff] }
 0x5ea   : > { %v5668_v1 = vsel %vm5601_vm9, %v7699_v0, %v5537_v20  ;;  %v6058_v58 = vadd.f32 %v5994_v26, %v4882_v33  ;;  %6587 = vst [vmem:[%s7867_s27 + $0x280] sm:$0xff] %v6459_v34  ;;  %v6463_v43 = vadd.f32 %v6271_v40, %v14432_v7  ;;  %v6464_v25 = vadd.f32 %v6272_v62, %v14433_v44  ;;  %v14434_v0 = vld [vmem:[#allocation45_spill] sm:$0xff]  ;;  %v14439_v16 = vld [vmem:[#allocation50_spill] sm:$0xff]  ;;  %v6292_v62 = vld [vmem:[%s7432_s28 + $0x348] sm:$0xff] }
 0x5eb   : > { %v5799_v51 = vsel %vm5732_vm5, %v7705_v9, %v5668_v1  ;;  %6588 = vst [vmem:[%s7867_s27 + $0x288] sm:$0xff] %v6460_v63  ;;  %6589 = vst [vmem:[%s7867_s27 + $0x290] sm:$0xff] %v6461_v4  ;;  %v6465_v55 = vadd.f32 %v6273_v52, %v14434_v0  ;;  %v6466_v60 = vadd.f32 %v6274_v14, %v14435_v56  ;;  %v14441_v14 = vld [vmem:[#allocation52_spill] sm:$0xff]  ;;  %v14442_v8 = vld [vmem:[#allocation53_spill] sm:$0xff] }
 0x5ec   : > { %6590 = vst [vmem:[%s7867_s27 + $0x298] sm:$0xff] %v6462_v31  ;;  %v6467_v3 = vadd.f32 %v6275_v18, %v14436_v61  ;;  %v5930_v9 = vsel %vm5863_vm10, %v7714_v11, %v5799_v51  ;;  %6591 = vst [vmem:[%s7867_s27 + $0x2a0] sm:$0xff] %v6463_v43  ;;  %v6468_v24 = vadd.f32 %v6276_v53, %v14437_v15  ;;  %v14440_v11 = vld [vmem:[#allocation51_spill] sm:$0xff]  ;;  %v6295_v53 = vld [vmem:[%s7432_s28 + $0x360] sm:$0xff] }
 0x5ed   : > { %6592 = vst [vmem:[%s7867_s27 + $0x2a8] sm:$0xff] %v6464_v25  ;;  %v6469_v17 = vadd.f32 %v6277_v23, %v14438_v32  ;;  %v6470_v40 = vadd.f32 %v6278_v36, %v14439_v16  ;;  %v14086_v52 = vadd.f32 %v6058_v58, %v5930_v9  ;;  %6593 = vst [vmem:[%s7867_s27 + $0x2b0] sm:$0xff] %v6465_v55  ;;  %v6296_v23 = vld [vmem:[%s7432_s28 + $0x368] sm:$0xff]  ;;  %v6297_v36 = vld [vmem:[%s7432_s28 + $0x370] sm:$0xff] }
 0x5ee   : > { %6594 = vst [vmem:[%s7867_s27 + $0x2b8] sm:$0xff] %v6466_v60  ;;  %6595 = vst [vmem:[%s7867_s27 + $0x2c0] sm:$0xff] %v6467_v3  ;;  %v6471_v49 = vadd.f32 %v6279_v39, %v14440_v11  ;;  %v6472_v18 = vadd.f32 %v6280_v29, %v14441_v14  ;;  %v6473_v5 = vadd.f32 %v6281_v37, %v14442_v8  ;;  %v14443_v33 = vld [vmem:[#allocation54_spill] sm:$0xff]  ;;  %v14445_v34 = vld [vmem:[#allocation55_spill] sm:$0xff] }
 0x5ef   : > { %6596 = vst [vmem:[%s7867_s27 + $0x2c8] sm:$0xff] %v6468_v24  ;;  %6597 = vst [vmem:[%s7867_s27 + $0x2d0] sm:$0xff] %v6469_v17  ;;  %v6474_v59 = vadd.f32 %v6282_v10, %v14443_v33  ;;  %v14444_v26 = vld [vmem:[#allocation22_spill] sm:$0xff]  ;;  %v6476_v39 = vadd.f32 %v6284_v48, %v14445_v34  ;;  %v14446_v29 = vld [vmem:[#allocation56_spill] sm:$0xff]  ;;  %v6442_v27 = vadd.f32 %v6250_v42, %v14086_v52 }
 0x5f0   : > { %6598 = vst [vmem:[%s7867_s27 + $0x2d8] sm:$0xff] %v6470_v40  ;;  %v6475_v2 = vadd.f32 %v6283_v35, %v14444_v26  ;;  %v6477_v37 = vadd.f32 %v6285_v45, %v14446_v29  ;;  %v6298_v20 = vld [vmem:[%s7432_s28 + $0x378] sm:$0xff]  ;;  %v6299_v19 = vld [vmem:[%s7432_s28 + $0x380] sm:$0xff]  ;;  %v6300_v63 = vld [vmem:[%s7432_s28 + $0x388] sm:$0xff] }
 0x5f1   : > { %6599 = vst [vmem:[%s7867_s27 + $0x2e0] sm:$0xff] %v6471_v49  ;;  %6600 = vst [vmem:[%s7867_s27 + $0x2e8] sm:$0xff] %v6472_v18  ;;  %v14447_v4 = vld [vmem:[#allocation57_spill] sm:$0xff]  ;;  %v14448_v31 = vld [vmem:[#allocation59_spill] sm:$0xff] }
 0x5f2   : > { %6601 = vst [vmem:[%s7867_s27 + $0x2f0] sm:$0xff] %v6473_v5  ;;  %v6478_v57 = vadd.f32 %v6286_v46, %v14447_v4  ;;  %v6479_v10 = vadd.f32 %v6287_v28, %v14448_v31  ;;  %v14449_v35 = vld [vmem:[#allocation60_spill] sm:$0xff]  ;;  %v6302_v1 = vld [vmem:[%s7432_s28 + $0x398] sm:$0xff]  ;;  %v6303_v58 = vld [vmem:[%s7432_s28 + $0x3a0] sm:$0xff] }
 0x5f3   : > { %v6480_v48 = vadd.f32 %v6288_v47, %v14449_v35  ;;  %v6301_v45 = vld [vmem:[%s7432_s28 + $0x390] sm:$0xff]  ;;  %6602 = vst [vmem:[%s7867_s27 + $0x2f8] sm:$0xff] %v6474_v59  ;;  %6603 = vst [vmem:[%s7867_s27 + $0x300] sm:$0xff] %v6475_v2  ;;  %v14450_v42 = vld [vmem:[#allocation61_spill] sm:$0xff] }
 0x5f4   : > { %6604 = vst [vmem:[%s7867_s27 + $0x308] sm:$0xff] %v6476_v39  ;;  %6605 = vst [vmem:[%s7867_s27 + $0x310] sm:$0xff] %v6477_v37  ;;  %v6481_v7 = vadd.f32 %v6289_v6, %v14450_v42  ;;  %v14451_v43 = vld [vmem:[#allocation62_spill] sm:$0xff]  ;;  %v14452_v25 = vld [vmem:[#allocation63_spill] sm:$0xff] }
 0x5f5   : > { %v6482_v44 = vadd.f32 %v6290_v12, %v14451_v43  ;;  %v6483_v46 = vadd.f32 %v6291_v21, %v14452_v25  ;;  %v14453_v28 = vld [vmem:[#allocation64_spill] sm:$0xff]  ;;  %v6304_v51 = vld [vmem:[%s7432_s28 + $0x3a8] sm:$0xff]  ;;  %v6306_v55 = vld [vmem:[%s7432_s28 + $0x3b8] sm:$0xff]  ;;  %6570 = vst [vmem:[%s7867_s27 + $0x1f8] sm:$0xff] %v6442_v27 }
 0x5f6   : > { %v6484_v47 = vadd.f32 %v6292_v62, %v14453_v28  ;;  %v6305_v0 = vld [vmem:[%s7432_s28 + $0x3b0] sm:$0xff]  ;;  %6606 = vst [vmem:[%s7867_s27 + $0x318] sm:$0xff] %v6478_v57  ;;  %6607 = vst [vmem:[%s7867_s27 + $0x320] sm:$0xff] %v6479_v10  ;;  %v14454_v56 = vld [vmem:[#allocation58_spill] sm:$0xff] }
 0x5f7   : > { %6608 = vst [vmem:[%s7867_s27 + $0x328] sm:$0xff] %v6480_v48  ;;  %v6485_v60 = vadd.f32 %v6293_v22, %v14454_v56  ;;  %v14455_v61 = vld [vmem:[#allocation65_spill] sm:$0xff]  ;;  %v14456_v6 = vld [vmem:[#allocation66_spill] sm:$0xff]  ;;  %v14457_v21 = vld [vmem:[#allocation67_spill] sm:$0xff] }
 0x5f8   : > { %v6486_v3 = vadd.f32 %v6294_v50, %v14455_v61  ;;  %v6487_v12 = vadd.f32 %v6295_v53, %v14456_v6  ;;  %v6488_v9 = vadd.f32 %v6296_v23, %v14457_v21  ;;  %v6307_v15 = vld [vmem:[%s7432_s28 + $0x3c0] sm:$0xff]  ;;  %v6308_v24 = vld [vmem:[%s7432_s28 + $0x3c8] sm:$0xff]  ;;  %v6309_v32 = vld [vmem:[%s7432_s28 + $0x3d0] sm:$0xff]  ;;  %6609 = vst [vmem:[%s7867_s27 + $0x330] sm:$0xff] %v6481_v7 }
 0x5f9   : > { %6610 = vst [vmem:[%s7867_s27 + $0x338] sm:$0xff] %v6482_v44  ;;  %6611 = vst [vmem:[%s7867_s27 + $0x340] sm:$0xff] %v6483_v46  ;;  %v14458_v17 = vld [vmem:[#allocation68_spill] sm:$0xff]  ;;  %v14459_v40 = vld [vmem:[#allocation69_spill] sm:$0xff]  ;;  %v6501_v31 = vadd.f32 %v6309_v32, %v13617_v54 }
 0x5fa   : > { %6612 = vst [vmem:[%s7867_s27 + $0x348] sm:$0xff] %v6484_v47  ;;  %v6489_v16 = vadd.f32 %v6297_v36, %v14458_v17  ;;  %v6490_v62 = vadd.f32 %v6298_v20, %v14459_v40  ;;  %v14460_v22 = vld [vmem:[#allocation70_spill] sm:$0xff]  ;;  %v14461_v11 = vld [vmem:[#allocation71_spill] sm:$0xff]  ;;  %v6310_v14 = vld [vmem:[%s7432_s28 + $0x3d8] sm:$0xff] }
 0x5fb   : > { %v6491_v50 = vadd.f32 %v6299_v19, %v14460_v22  ;;  %v6492_v49 = vadd.f32 %v6300_v63, %v14461_v11  ;;  %v6311_v18 = vld [vmem:[%s7432_s28 + $0x3e0] sm:$0xff]  ;;  %v6312_v8 = vld [vmem:[%s7432_s28 + $0x3e8] sm:$0xff]  ;;  %6613 = vst [vmem:[%s7867_s27 + $0x350] sm:$0xff] %v6485_v60  ;;  %6614 = vst [vmem:[%s7867_s27 + $0x358] sm:$0xff] %v6486_v3  ;;  %v6502_v10 = vadd.f32 %v6310_v14, %v13698_v41 }
 0x5fc   : > { %6615 = vst [vmem:[%s7867_s27 + $0x360] sm:$0xff] %v6487_v12  ;;  %6616 = vst [vmem:[%s7867_s27 + $0x368] sm:$0xff] %v6488_v9  ;;  %v14462_v5 = vld [vmem:[#allocation72_spill] sm:$0xff]  ;;  %v14463_v23 = vld [vmem:[#allocation73_spill] sm:$0xff]  ;;  %v6503_v35 = vadd.f32 %v6311_v18, %v13783_v13  ;;  %v6504_v48 = vadd.f32 %v6312_v8, %v13869_v30 }
 0x5fd   : > { %v6493_v53 = vadd.f32 %v6301_v45, %v14462_v5  ;;  %v6494_v36 = vadd.f32 %v6302_v1, %v14463_v23  ;;  %v14464_v33 = vld [vmem:[#allocation74_spill] sm:$0xff]  ;;  %v14465_v26 = vld [vmem:[#allocation75_spill] sm:$0xff]  ;;  %v6313_v34 = vld [vmem:[%s7432_s28 + $0x3f0] sm:$0xff]  ;;  %6617 = vst [vmem:[%s7867_s27 + $0x370] sm:$0xff] %v6489_v16 }
 0x5fe   : > { %v6495_v59 = vadd.f32 %v6303_v58, %v14464_v33  ;;  %v6496_v2 = vadd.f32 %v6304_v51, %v14465_v26  ;;  %v6314_v39 = vld [vmem:[%s7432_s28 + $0x3f8] sm:$0xff]  ;;  %6618 = vst [vmem:[%s7867_s27 + $0x378] sm:$0xff] %v6490_v62  ;;  %6619 = vst [vmem:[%s7867_s27 + $0x380] sm:$0xff] %v6491_v50  ;;  %v14466_v29 = vld [vmem:[#allocation76_spill] sm:$0xff]  ;;  %v6505_v45 = vadd.f32 %v6313_v34, %v13967_v38  ;;  %s6636_s28 = scalar_lea.sflag [#allocation5], %s7426_s30 }
 0x5ff   : > { %6620 = vst [vmem:[%s7867_s27 + $0x388] sm:$0xff] %v6492_v49  ;;  %v6497_v37 = vadd.f32 %v6305_v0, %v14466_v29  ;;  %v14467_v20 = vld [vmem:[#allocation77_spill] sm:$0xff]  ;;  %v14468_v63 = vld [vmem:[#allocation79_spill] sm:$0xff]  ;;  %v14469_v4 = vld [vmem:[#allocation80_spill] sm:$0xff]  ;;  %v6506_v1 = vadd.f32 %v6314_v39, %v14086_v52 }
 0x600   : > { %v6498_v19 = vadd.f32 %v6306_v55, %v14467_v20  ;;  %v6499_v27 = vadd.f32 %v6307_v15, %v14468_v63  ;;  %v6500_v57 = vadd.f32 %v6308_v24, %v14469_v4  ;;  %6621 = vst [vmem:[%s7867_s27 + $0x390] sm:$0xff] %v6493_v53  ;;  %6622 = vst [vmem:[%s7867_s27 + $0x398] sm:$0xff] %v6494_v36 }
 0x601   : > { %6623 = vst [vmem:[%s7867_s27 + $0x3a0] sm:$0xff] %v6495_v59  ;;  %6624 = vst [vmem:[%s7867_s27 + $0x3a8] sm:$0xff] %v6496_v2 }
 0x602   : > { %6625 = vst [vmem:[%s7867_s27 + $0x3b0] sm:$0xff] %v6497_v37  ;;  %6626 = vst [vmem:[%s7867_s27 + $0x3b8] sm:$0xff] %v6498_v19 }
 0x603   : > { %6627 = vst [vmem:[%s7867_s27 + $0x3c0] sm:$0xff] %v6499_v27  ;;  %6628 = vst [vmem:[%s7867_s27 + $0x3c8] sm:$0xff] %v6500_v57 }
 0x604   : > { %6629 = vst [vmem:[%s7867_s27 + $0x3d0] sm:$0xff] %v6501_v31  ;;  %6630 = vst [vmem:[%s7867_s27 + $0x3d8] sm:$0xff] %v6502_v10 }
 0x605   : > { %6631 = vst [vmem:[%s7867_s27 + $0x3e0] sm:$0xff] %v6503_v35  ;;  %6632 = vst [vmem:[%s7867_s27 + $0x3e8] sm:$0xff] %v6504_v48 }
 0x606   : > { %6633 = vst [vmem:[%s7867_s27 + $0x3f0] sm:$0xff] %v6505_v45  ;;  %6634 = vst [vmem:[%s7867_s27 + $0x3f8] sm:$0xff] %v6506_v1 }
 0x607   : > { %s6852_s29 = sshll.u32 %s7267_s12, 13  ;;  %s6673_s11 = sshll.u32 %s7867_s27, 4  ;;  %s6674_s11 = int_to_ptr.vmem [resolvable:$true] %s6673_s11 }
 0x608   : > { %s6656_s16 = scalar_lea.hbm %s14232_s2, %s6852_s29  ;;  %s7285_s21 = smov 8192  }
 0x609   : > { %6994 = sst [smem:[#allocation12]] (%p7364_p9), %s7285_s21  ;;  %s7286_s30 = smov 65536  }
 0x60a   : > { %6995 = sst [smem:[#allocation12 + $0x1]] (%p7364_p9), %s7286_s30  ;;  %s7287_s26 = smov 32  }
 0x60b   : > { %6996 = sst [smem:[#allocation12 + $0x2]] (%p7364_p9), %s7287_s26  ;;  %s7288_s1 = smov 256  }
 0x60c   : > { %6997 = sst [smem:[#allocation12 + $0x3]] (%p7364_p9), %s7288_s1  ;;  %s7289_s12 = smov 16  }
 0x60d   : > { %6998 = sst [smem:[#allocation12 + $0x4]] (%p7364_p9), %s7288_s1  ;;  %s7290_s5 = smov [#allocation11]  }
 0x60e   : > { %6999 = sst [smem:[#allocation12 + $0x5]] (%p7364_p9), %s7289_s12  ;;  %s7291_s15 = smov 0  }
 0x60f   : > { %7000 = dma.general (%p7364_p9), %s6674_s11, 16384, %s6656_s16, %s6636_s28, %s7290_s5, [#allocation12], %s7291_s15, 0  }
 0x610 PF: > { %p7012_p4 = scmp.ge.s32.totalorder %s7275_s14, 2  ;;  %s6701_s6 = sand.u32 1, %s7255_s9  }
 0x611   : > { %s6702_s13 = scalar_lea.sflag [#allocation5], %s6701_s6 }
 0x612   : > { %p7007_p5 = pnand %p7012_p4, %p7371_p11 }
 0x614   : > { %7250 = dma.done.wait (!%p7007_p5), %s6702_s13, 16384  }
 0x615   : > { %7252 = vsyncadd (!%p7007_p5), %s6702_s13, 4294950912  ;;  %s19_s14 = sadd.s32 1, %s7275_s14   ;;  %s14470_s9 = sld [smem:[#allocation17_spill]] }
 0x616   : > { %p16_p8 = scmp.ge.s32.totalorder %s19_s14, 10   ;;  %s14471_s10 = sld [smem:[#allocation18_spill]] }
 0x617   : > { %s14472_s11 = sld [smem:[#allocation21_spill]]  ;;  %s14473_s12 = sld [smem:[#allocation19_spill]] }
 0x618   : > { %s14474_s13 = sld [smem:[#allocation20_spill]]  ;;  %18 = sbr.rel (!%p16_p8) target bundleno = 10 (0xa), region = 92 }
 0x61f   :  { %6707 = vsyncpa [#allocation4], 1 }
 0x620   :  { %6709 = vsyncpa [#allocation4 + $0x1], 1 }
 0x621   :  { %6710 = vsyncpa [#allocation5], 1 }
 0x622   :  { %6712 = vsyncpa [#allocation5 + $0x1], 1 }
 0x623   :  { %6713 = vsyncpa [#allocation6], 1 }
 0x624   :  { %6715 = vsyncpa [#allocation6 + $0x1], 1 }

</bundles_post_ra>
